<compile_context>
chip_gen: v6e
topology: v6e:2x2x1
jax: 0.10.0
libtpu: 0.0.40
codegen_flags: <defaults>
</compile_context>

<pallas_src>
import functools

import jax
import jax.numpy as jnp
from jax.experimental import pallas as pl
from jax.experimental.pallas import tpu as pltpu


# -----------------------------------------------------------------------------
# Pallas kernels
# -----------------------------------------------------------------------------
def bilstm_layer_kernel(x_ref, wih_ref, whh_f_ref, whh_b_ref, b_ref, out_ref,
                        gf_sc, gb_sc, h_sc, c_sc):
    """One fused bidirectional LSTM layer over the whole sequence.

    x_ref     : (S, Bt, Dp)    bf16  time-major, lane-padded input
    wih_ref   : (Dp, 8*Hp)     bf16  [W_ih_fwd^T | W_ih_bwd^T], gate-padded
    whh_f_ref : (Hp, 4*Hp)     bf16  W_hh_fwd^T
    whh_b_ref : (Hp, 4*Hp)     bf16  W_hh_bwd^T
    b_ref     : (1, 8*Hp)      f32   [b_fwd | b_bwd] (b_ih + b_hh), gate-padded
    out_ref   : (S, Bt, 2*Hp)  f32   [h_fwd | h_bwd] per timestep
    gf_sc/gb_sc : (S, Bt, 4*Hp) f32  precomputed input-gate contributions
    h_sc/c_sc   : (2, Bt, Hp)   f32  recurrent state ([0]=fwd, [1]=bwd)
    """
    S, Bt, Dp = x_ref.shape
    Hp = h_sc.shape[2]
    G = 4 * Hp

    # ---- Pre-pass: hoisted input projection for BOTH directions (one matmul).
    x_flat = x_ref[...].reshape(S * Bt, Dp)                       # bf16
    gx = jnp.dot(x_flat, wih_ref[...],
                 preferred_element_type=jnp.float32)              # (S*Bt, 8Hp)
    gx = (gx + b_ref[...]).reshape(S, Bt, 2 * G)                  # bias once
    gf_sc[...] = gx[:, :, :G]
    gb_sc[...] = gx[:, :, G:]

    h_sc[...] = jnp.zeros_like(h_sc)
    c_sc[...] = jnp.zeros_like(c_sc)

    # Hoist weight loads out of the recurrent loop.
    whh_f = whh_f_ref[...]
    whh_b = whh_b_ref[...]

    def cell(g_x, h, c, whh):
        g = g_x + jnp.dot(h.astype(whh.dtype), whh,
                          preferred_element_type=jnp.float32)     # (Bt, 4Hp)
        # PyTorch gate order: i, f, g, o — each gate block is 128-lane aligned.
        i_g = jax.nn.sigmoid(g[:, 0 * Hp:1 * Hp])
        f_g = jax.nn.sigmoid(g[:, 1 * Hp:2 * Hp])
        g_g = jnp.tanh(g[:, 2 * Hp:3 * Hp])
        o_g = jax.nn.sigmoid(g[:, 3 * Hp:4 * Hp])
        c_new = f_g * c + i_g * g_g
        h_new = o_g * jnp.tanh(c_new)
        return h_new, c_new

    def step(t, carry):
        rt = S - 1 - t
        h_f, c_f = cell(gf_sc[t], h_sc[0], c_sc[0], whh_f)
        h_b, c_b = cell(gb_sc[rt], h_sc[1], c_sc[1], whh_b)
        h_sc[0] = h_f
        c_sc[0] = c_f
        h_sc[1] = h_b
        c_sc[1] = c_b
        out_ref[t, :, :Hp] = h_f        # fwd half  (lanes   0:Hp, aligned)
        out_ref[rt, :, Hp:] = h_b       # bwd half  (lanes Hp:2Hp, aligned)
        return carry

    jax.lax.fori_loop(0, S, step, 0, unroll=True)


def head_kernel(x_ref, w1_ref, b1_ref, w2_ref, b2_ref, out_ref):
    """fc1 -> ReLU -> fc2 -> softmax(dim=1). Dropout is identity at eval."""
    x = x_ref[...].astype(jnp.bfloat16)
    h1 = jnp.dot(x, w1_ref[...], preferred_element_type=jnp.float32) + b1_ref[...]
    h1 = jnp.maximum(h1, 0.0)
    logits = jnp.dot(h1.astype(jnp.bfloat16), w2_ref[...],
                     preferred_element_type=jnp.float32) + b2_ref[...]
    m = jnp.max(logits, axis=1, keepdims=True)
    e = jnp.exp(logits - m)
    out_ref[...] = e / jnp.sum(e, axis=1, keepdims=True)


# -----------------------------------------------------------------------------
# Weight padding helpers (zero-padding is exact: padded gates are 0 -> padded
# c, h stay exactly 0 forever, so padded lanes never pollute real values).
# -----------------------------------------------------------------------------
def _round_up(n, m):
    return ((n + m - 1) // m) * m


def _pad_wih_t(w_ih, in_map, Dp, H, Hp):
    """w_ih: (4H, D_real) -> (Dp, 4Hp); real input dims scattered per `in_map`."""
    wt = w_ih.T.astype(jnp.float32)                      # (D_real, 4H)
    out = jnp.zeros((Dp, 4 * Hp), jnp.float32)
    for k in range(4):
        out = out.at[in_map, k * Hp:k * Hp + H].set(wt[:, k * H:(k + 1) * H])
    return out


def _pad_whh_t(w_hh, H, Hp):
    """w_hh: (4H, H) -> (Hp, 4Hp)."""
    wt = w_hh.T.astype(jnp.float32)                      # (H, 4H)
    out = jnp.zeros((Hp, 4 * Hp), jnp.float32)
    for k in range(4):
        out = out.at[:H, k * Hp:k * Hp + H].set(wt[:, k * H:(k + 1) * H])
    return out


def _pad_bias(b, H, Hp):
    out = jnp.zeros((4 * Hp,), jnp.float32)
    for k in range(4):
        out = out.at[k * Hp:k * Hp + H].set(b[k * H:(k + 1) * H].astype(jnp.float32))
    return out


def _pad_fc1_t(fc1_w, H, Hp):
    """fc1_w: (256, 2H) -> (2Hp, 256); rows map to [h_fwd 0:H, h_bwd Hp:Hp+H]."""
    wt = fc1_w.T.astype(jnp.float32)                     # (2H, 256)
    out = jnp.zeros((2 * Hp, fc1_w.shape[0]), jnp.float32)
    out = out.at[0:H, :].set(wt[0:H, :])
    out = out.at[Hp:Hp + H, :].set(wt[H:2 * H, :])
    return out


# -----------------------------------------------------------------------------
# pallas_call wrappers
# -----------------------------------------------------------------------------
def bilstm_layer(x, wih_cat, whh_f, whh_b, b_cat, Hp):
    """x: (S, Bp, Dp) bf16. Returns (S, Bp, 2*Hp) f32."""
    S, Bp, Dp = x.shape
    # Batch tile: full batch for small problems; 16-row tiles (parallel across
    # TensorCores on v7x megacore) when the padded batch allows it.
    Bt = 16 if (Bp % 16 == 0 and Bp > 16) else Bp
    grid = (Bp // Bt,)

    return pl.pallas_call(
        bilstm_layer_kernel,
        out_shape=jax.ShapeDtypeStruct((S, Bp, 2 * Hp), jnp.float32),
        grid=grid,
        in_specs=[
            pl.BlockSpec((S, Bt, Dp), lambda b: (0, b, 0)),
            pl.BlockSpec((Dp, 8 * Hp), lambda b: (0, 0)),
            pl.BlockSpec((Hp, 4 * Hp), lambda b: (0, 0)),
            pl.BlockSpec((Hp, 4 * Hp), lambda b: (0, 0)),
            pl.BlockSpec((1, 8 * Hp), lambda b: (0, 0)),
        ],
        out_specs=pl.BlockSpec((S, Bt, 2 * Hp), lambda b: (0, b, 0)),
        scratch_shapes=[
            pltpu.VMEM((S, Bt, 4 * Hp), jnp.float32),   # precomputed fwd gates
            pltpu.VMEM((S, Bt, 4 * Hp), jnp.float32),   # precomputed bwd gates
            pltpu.VMEM((2, Bt, Hp), jnp.float32),       # h (fwd, bwd)
            pltpu.VMEM((2, Bt, Hp), jnp.float32),       # c (fwd, bwd)
        ],
        compiler_params=pltpu.CompilerParams(
            dimension_semantics=("parallel",),
            vmem_limit_bytes=32 * 1024 * 1024,
        ),
    )(x, wih_cat, whh_f, whh_b, b_cat)


def fc_head(x, w1t, b1, w2t, b2):
    """x: (Bp, 2Hp) f32 -> softmax probs (Bp, C)."""
    Bp, Din = x.shape
    F1 = w1t.shape[1]
    C = w2t.shape[1]
    return pl.pallas_call(
        head_kernel,
        out_shape=jax.ShapeDtypeStruct((Bp, C), jnp.float32),
        grid=(1,),
        in_specs=[
            pl.BlockSpec((Bp, Din), lambda i: (0, 0)),
            pl.BlockSpec((Din, F1), lambda i: (0, 0)),
            pl.BlockSpec((1, F1), lambda i: (0, 0)),
            pl.BlockSpec((F1, C), lambda i: (0, 0)),
            pl.BlockSpec((1, C), lambda i: (0, 0)),
        ],
        out_specs=pl.BlockSpec((Bp, C), lambda i: (0, 0)),
        compiler_params=pltpu.CompilerParams(vmem_limit_bytes=32 * 1024 * 1024),
    )(x, w1t, b1, w2t, b2)


def phobert_lstm_forward(hidden_states, params, num_layers, hidden_size):
    """hidden_states: (B, S, bert_hidden) — the frozen-BERT features."""
    B, S, D = hidden_states.shape
    H = hidden_size
    Hp = _round_up(H, 128)       # lane-pad hidden size (gate blocks 128-aligned)
    Bp = _round_up(B, 8)         # sublane-pad batch
    Dp = _round_up(D, 128)       # lane-pad input feature dim

    # (B, S, D) -> time-major, padded, bf16 for the MXU.
    x = jnp.transpose(hidden_states, (1, 0, 2)).astype(jnp.float32)
    x = jnp.pad(x, ((0, 0), (0, Bp - B), (0, Dp - D))).astype(jnp.bfloat16)

    in_map = jnp.arange(D)       # layer-0 real input dims occupy rows 0..D-1
    layer_out = None
    for l in range(num_layers):
        pf = params["lstm"][l]["fwd"]
        pb = params["lstm"][l]["bwd"]
        wih_cat = jnp.concatenate(
            [_pad_wih_t(pf["w_ih"], in_map, Dp, H, Hp),
             _pad_wih_t(pb["w_ih"], in_map, Dp, H, Hp)], axis=1
        ).astype(jnp.bfloat16)                                     # (Dp, 8Hp)
        whh_f = _pad_whh_t(pf["w_hh"], H, Hp).astype(jnp.bfloat16)  # (Hp, 4Hp)
        whh_b = _pad_whh_t(pb["w_hh"], H, Hp).astype(jnp.bfloat16)
        b_cat = jnp.concatenate(
            [_pad_bias(pf["b_ih"] + pf["b_hh"], H, Hp),
             _pad_bias(pb["b_ih"] + pb["b_hh"], H, Hp)]
        ).reshape(1, 8 * Hp)

        layer_out = bilstm_layer(x, wih_cat, whh_f, whh_b, b_cat, Hp)
        x = layer_out.astype(jnp.bfloat16)      # next layer's (bf16) input
        # Layers > 0 consume [h_fwd (lanes 0:H) | h_bwd (lanes Hp:Hp+H)].
        in_map = jnp.concatenate([jnp.arange(H), Hp + jnp.arange(H)])
        Dp = 2 * Hp

    # lstm_out[:, -1, :] in batch_first terms == layer_out[S-1]  (Bp, 2Hp)
    last = layer_out[S - 1]
    # Dropout(p=0.5): identity at inference.
    w1t = _pad_fc1_t(params["fc1_w"], H, Hp).astype(jnp.bfloat16)   # (2Hp, 256)
    b1 = params["fc1_b"].reshape(1, -1).astype(jnp.float32)
    w2t = jnp.transpose(params["fc2_w"]).astype(jnp.bfloat16)       # (256, C)
    b2 = params["fc2_b"].reshape(1, -1).astype(jnp.float32)
    probs = fc_head(last, w1t, b1, w2t, b2)
    return probs[:B]             # drop padded batch rows


# -----------------------------------------------------------------------------
# Pure-JAX reference mirroring the kernel numerics (bf16 matmul operands,
# f32 accumulation / state / gate math) for a tight sanity check.
# -----------------------------------------------------------------------------
def _forward_ref(hidden_states, params, num_layers, hidden_size):
    H = hidden_size
    B, S, D = hidden_states.shape
    x = jnp.transpose(hidden_states, (1, 0, 2)).astype(jnp.bfloat16)

    def dir_ref(x_sbd, w_ih, w_hh, b_ih, b_hh):
        S_, B_, D_ = x_sbd.shape
        wih_t = w_ih.T.astype(jnp.bfloat16)
        whh_t = w_hh.T.astype(jnp.bfloat16)
        b = (b_ih + b_hh).astype(jnp.float32)
        gx = (jnp.dot(x_sbd.reshape(S_ * B_, D_), wih_t,
                      preferred_element_type=jnp.float32)
              .reshape(S_, B_, 4 * H) + b)
        h = jnp.zeros((B_, H), jnp.float32)
        c = jnp.zeros((B_, H), jnp.float32)
        outs = []
        for t in range(S_):
            g = gx[t] + jnp.dot(h.astype(jnp.bfloat16), whh_t,
                                preferred_element_type=jnp.float32)
            i = jax.nn.sigmoid(g[:, 0 * H:1 * H])
            f = jax.nn.sigmoid(g[:, 1 * H:2 * H])
            gg = jnp.tanh(g[:, 2 * H:3 * H])
            o = jax.nn.sigmoid(g[:, 3 * H:4 * H])
            c = f * c + i * gg
            h = o * jnp.tanh(c)
            outs.append(h)
        return jnp.stack(outs, 0)

    out = None
    for l in range(num_layers):
        pf, pb = params["lstm"][l]["fwd"], params["lstm"][l]["bwd"]
        of = dir_ref(x, pf["w_ih"], pf["w_hh"], pf["b_ih"], pf["b_hh"])
        ob = jnp.flip(dir_ref(jnp.flip(x, 0), pb["w_ih"], pb["w_hh"],
                              pb["b_ih"], pb["b_hh"]), 0)
        out = jnp.concatenate([of, ob], axis=-1)
        x = out.astype(jnp.bfloat16)
    last = out[S - 1].astype(jnp.bfloat16)
    h1 = (jnp.dot(last, params["fc1_w"].T.astype(jnp.bfloat16),
                  preferred_element_type=jnp.float32) + params["fc1_b"])
    h1 = jnp.maximum(h1, 0.0)
    logits = (jnp.dot(h1.astype(jnp.bfloat16),
                      params["fc2_w"].T.astype(jnp.bfloat16),
                      preferred_element_type=jnp.float32) + params["fc2_b"])
    return jax.nn.softmax(logits, axis=1)


# -----------------------------------------------------------------------------
# Deterministic parameter init (PyTorch-style uniform bounds)
# -----------------------------------------------------------------------------
def init_params(key, bert_hidden, hidden_size, num_layers, num_classes):
    H = hidden_size
    params = {"lstm": []}
    k = 1.0 / jnp.sqrt(H)
    for l in range(num_layers):
        d_in = bert_hidden if l == 0 else 2 * H
        layer = {}
        for dname in ("fwd", "bwd"):
            key, k1, k2, k3, k4 = jax.random.split(key, 5)
            layer[dname] = {
                "w_ih": jax.random.uniform(k1, (4 * H, d_in), jnp.float32, -k, k),
                "w_hh": jax.random.uniform(k2, (4 * H, H), jnp.float32, -k, k),
                "b_ih": jax.random.uniform(k3, (4 * H,), jnp.float32, -k, k),
                "b_hh": jax.random.uniform(k4, (4 * H,), jnp.float32, -k, k),
            }
        params["lstm"].append(layer)

    key, k1, k2, k3, k4 = jax.random.split(key, 5)
    k_fc1 = 1.0 / jnp.sqrt(2 * H)
    k_fc2 = 1.0 / jnp.sqrt(256)
    params["fc1_w"] = jax.random.uniform(k1, (256, 2 * H), jnp.float32, -k_fc1, k_fc1)
    params["fc1_b"] = jax.random.uniform(k2, (256,), jnp.float32, -k_fc1, k_fc1)
    params["fc2_w"] = jax.random.uniform(k3, (num_classes, 256), jnp.float32, -k_fc2, k_fc2)
    params["fc2_b"] = jax.random.uniform(k4, (num_classes,), jnp.float32, -k_fc2, k_fc2)
    return params


# -----------------------------------------------------------------------------
if __name__ == "__main__":
    B, S = 2, 8                 # batch, sequence length (post-tokenizer)
    BERT_HIDDEN = 32            # stand-in for bert_model.config.hidden_size
    HIDDEN_SIZE = 16
    NUM_LAYERS = 2
    NUM_CLASSES = 4

    root = jax.random.PRNGKey(0)
    k_feat, k_param = jax.random.split(root)

    # Stand-in for `bert_model(...).last_hidden_state` (frozen feature extractor).
    hidden_states = jax.random.normal(k_feat, (B, S, BERT_HIDDEN), jnp.float32)
    params = init_params(k_param, BERT_HIDDEN, HIDDEN_SIZE, NUM_LAYERS, NUM_CLASSES)

    fwd = jax.jit(functools.partial(phobert_lstm_forward,
                                    num_layers=NUM_LAYERS,
                                    hidden_size=HIDDEN_SIZE))
    probs = jax.block_until_ready(fwd(hidden_states, params))

    ref = _forward_ref(hidden_states, params, NUM_LAYERS, HIDDEN_SIZE)
    assert probs.shape == (B, NUM_CLASSES)
    assert jnp.allclose(probs, ref, atol=2e-3, rtol=2e-3), "mismatch vs reference"
    assert jnp.allclose(jnp.sum(probs, axis=1), 1.0, atol=1e-4)

    print("KERNEL_OK")
</pallas_src>

<mosaic_0001>
module attributes {stable_mosaic.version = 11 : i64} {
  func.func @bilstm_layer_kernel(%arg0: i32, %arg1: memref<8x8x128xbf16, #tpu.memory_space<vmem>>, %arg2: memref<128x1024xbf16, #tpu.memory_space<vmem>>, %arg3: memref<128x512xbf16, #tpu.memory_space<vmem>>, %arg4: memref<128x512xbf16, #tpu.memory_space<vmem>>, %arg5: memref<1x1024xf32, #tpu.memory_space<vmem>>, %arg6: memref<8x8x256xf32, #tpu.memory_space<vmem>>, %arg7: memref<8x8x512xf32, #tpu.memory_space<vmem>>, %arg8: memref<8x8x512xf32, #tpu.memory_space<vmem>>, %arg9: memref<2x8x128xf32, #tpu.memory_space<vmem>>, %arg10: memref<2x8x128xf32, #tpu.memory_space<vmem>>) attributes {dimension_semantics = [#tpu.dimension_semantics<parallel>], iteration_bounds = array<i64: 1>, scalar_prefetch = 0 : i64, scratch_operands = 4 : i64, tpu.core_type = #tpu.core_type<tc>, window_params = [{transform_indices = @transform_0, window_bounds = array<i64: 8, 8, 128>}, {pipeline_mode = #tpu.pipeline_mode<synchronous>, transform_indices = @transform_1, window_bounds = array<i64: 128, 1024>}, {pipeline_mode = #tpu.pipeline_mode<synchronous>, transform_indices = @transform_2, window_bounds = array<i64: 128, 512>}, {pipeline_mode = #tpu.pipeline_mode<synchronous>, transform_indices = @transform_3, window_bounds = array<i64: 128, 512>}, {pipeline_mode = #tpu.pipeline_mode<synchronous>, transform_indices = @transform_4, window_bounds = array<i64: 1, 1024>}, {transform_indices = @transform_5, window_bounds = array<i64: 8, 8, 256>}]} {
    %c0 = arith.constant 0 : index
    %c0_0 = arith.constant 0 : index
    %c0_1 = arith.constant 0 : index
    %0 = vector.load %arg1[%c0, %c0_0, %c0_1] : memref<8x8x128xbf16, #tpu.memory_space<vmem>>, vector<8x8x128xbf16>
    %1 = vector.shape_cast %0 : vector<8x8x128xbf16> to vector<64x128xbf16>
    %c0_2 = arith.constant 0 : index
    %c0_3 = arith.constant 0 : index
    %2 = vector.load %arg2[%c0_2, %c0_3] : memref<128x1024xbf16, #tpu.memory_space<vmem>>, vector<128x1024xbf16>
    %cst = arith.constant dense<0.000000e+00> : vector<64x1024xf32>
    %3 = tpu.matmul %1, %2, %cst {dimension_numbers = #tpu.dot_dimension_numbers<[1], [0], [0], [1], [0, 0, 1, 1], [], []>} : vector<64x128xbf16>, vector<128x1024xbf16>, vector<64x1024xf32> -> vector<64x1024xf32>
    %c0_4 = arith.constant 0 : index
    %c0_5 = arith.constant 0 : index
    %4 = vector.load %arg5[%c0_4, %c0_5] : memref<1x1024xf32, #tpu.memory_space<vmem>>, vector<1x1024xf32>
    %5 = vector.broadcast %4 : vector<1x1024xf32> to vector<64x1024xf32>
    %6 = arith.addf %3, %5 : vector<64x1024xf32>
    %7 = vector.shape_cast %6 : vector<64x1024xf32> to vector<8x8x1024xf32>
    %8 = vector.extract_strided_slice %7 {offsets = [0, 0, 0], sizes = [8, 8, 512], strides = [1, 1, 1]} : vector<8x8x1024xf32> to vector<8x8x512xf32>
    %c0_6 = arith.constant 0 : index
    %c0_7 = arith.constant 0 : index
    %c0_8 = arith.constant 0 : index
    %9 = vector.load %arg7[%c0_6, %c0_7, %c0_8] : memref<8x8x512xf32, #tpu.memory_space<vmem>>, vector<8x8x512xf32>
    tpu.vector_store %arg7[%c0_6, %c0_7, %c0_8], %8 {strides = array<i32>} : memref<8x8x512xf32, #tpu.memory_space<vmem>>, vector<8x8x512xf32>,
    %10 = vector.extract_strided_slice %7 {offsets = [0, 0, 512], sizes = [8, 8, 512], strides = [1, 1, 1]} : vector<8x8x1024xf32> to vector<8x8x512xf32>
    %c0_9 = arith.constant 0 : index
    %c0_10 = arith.constant 0 : index
    %c0_11 = arith.constant 0 : index
    %11 = vector.load %arg8[%c0_9, %c0_10, %c0_11] : memref<8x8x512xf32, #tpu.memory_space<vmem>>, vector<8x8x512xf32>
    tpu.vector_store %arg8[%c0_9, %c0_10, %c0_11], %10 {strides = array<i32>} : memref<8x8x512xf32, #tpu.memory_space<vmem>>, vector<8x8x512xf32>,
    %cst_12 = arith.constant 0.000000e+00 : f32
    %12 = vector.broadcast %cst_12 : f32 to vector<2x8x128xf32>
    %c0_13 = arith.constant 0 : index
    %c0_14 = arith.constant 0 : index
    %c0_15 = arith.constant 0 : index
    %13 = vector.load %arg9[%c0_13, %c0_14, %c0_15] : memref<2x8x128xf32, #tpu.memory_space<vmem>>, vector<2x8x128xf32>
    tpu.vector_store %arg9[%c0_13, %c0_14, %c0_15], %12 {strides = array<i32>} : memref<2x8x128xf32, #tpu.memory_space<vmem>>, vector<2x8x128xf32>,
    %cst_16 = arith.constant 0.000000e+00 : f32
    %14 = vector.broadcast %cst_16 : f32 to vector<2x8x128xf32>
    %c0_17 = arith.constant 0 : index
    %c0_18 = arith.constant 0 : index
    %c0_19 = arith.constant 0 : index
    %15 = vector.load %arg10[%c0_17, %c0_18, %c0_19] : memref<2x8x128xf32, #tpu.memory_space<vmem>>, vector<2x8x128xf32>
    tpu.vector_store %arg10[%c0_17, %c0_18, %c0_19], %14 {strides = array<i32>} : memref<2x8x128xf32, #tpu.memory_space<vmem>>, vector<2x8x128xf32>,
    %c0_20 = arith.constant 0 : index
    %c0_21 = arith.constant 0 : index
    %16 = vector.load %arg3[%c0_20, %c0_21] : memref<128x512xbf16, #tpu.memory_space<vmem>>, vector<128x512xbf16>
    %c0_22 = arith.constant 0 : index
    %c0_23 = arith.constant 0 : index
    %17 = vector.load %arg4[%c0_22, %c0_23] : memref<128x512xbf16, #tpu.memory_space<vmem>>, vector<128x512xbf16>
    %c0_i32 = arith.constant 0 : i32
    %c7_i32 = arith.constant 7 : i32
    %18 = arith.subi %c7_i32, %c0_i32 : i32
    %19 = arith.index_cast %c0_i32 : i32 to index
    %c0_24 = arith.constant 0 : index
    %c0_25 = arith.constant 0 : index
    %20 = vector.load %arg7[%19, %c0_24, %c0_25] : memref<8x8x512xf32, #tpu.memory_space<vmem>>, vector<1x8x512xf32>
    %21 = vector.shape_cast %20 : vector<1x8x512xf32> to vector<8x512xf32>
    %c0_26 = arith.constant 0 : index
    %c0_27 = arith.constant 0 : index
    %c0_28 = arith.constant 0 : index
    %22 = vector.load %arg9[%c0_26, %c0_27, %c0_28] : memref<2x8x128xf32, #tpu.memory_space<vmem>>, vector<1x8x128xf32>
    %23 = vector.shape_cast %22 : vector<1x8x128xf32> to vector<8x128xf32>
    %c0_29 = arith.constant 0 : index
    %c0_30 = arith.constant 0 : index
    %c0_31 = arith.constant 0 : index
    %24 = vector.load %arg10[%c0_29, %c0_30, %c0_31] : memref<2x8x128xf32, #tpu.memory_space<vmem>>, vector<1x8x128xf32>
    %25 = vector.shape_cast %24 : vector<1x8x128xf32> to vector<8x128xf32>
    %26 = arith.truncf %23 : vector<8x128xf32> to vector<8x128xbf16>
    %cst_32 = arith.constant dense<0.000000e+00> : vector<8x512xf32>
    %27 = tpu.matmul %26, %16, %cst_32 {dimension_numbers = #tpu.dot_dimension_numbers<[1], [0], [0], [1], [0, 0, 1, 1], [], []>} : vector<8x128xbf16>, vector<128x512xbf16>, vector<8x512xf32> -> vector<8x512xf32>
    %28 = arith.addf %21, %27 : vector<8x512xf32>
    %29 = vector.extract_strided_slice %28 {offsets = [0, 0], sizes = [8, 128], strides = [1, 1]} : vector<8x512xf32> to vector<8x128xf32>
    %30 = arith.negf %29 : vector<8x128xf32>
    %31 = math.exp %30 : vector<8x128xf32>
    %cst_33 = arith.constant 1.000000e+00 : f32
    %32 = vector.broadcast %cst_33 : f32 to vector<8x128xf32>
    %33 = arith.addf %32, %31 : vector<8x128xf32>
    %34 = arith.divf %32, %33 : vector<8x128xf32>
    %35 = vector.extract_strided_slice %28 {offsets = [0, 128], sizes = [8, 128], strides = [1, 1]} : vector<8x512xf32> to vector<8x128xf32>
    %36 = arith.negf %35 : vector<8x128xf32>
    %37 = math.exp %36 : vector<8x128xf32>
    %cst_34 = arith.constant 1.000000e+00 : f32
    %38 = vector.broadcast %cst_34 : f32 to vector<8x128xf32>
    %39 = arith.addf %38, %37 : vector<8x128xf32>
    %40 = arith.divf %38, %39 : vector<8x128xf32>
    %41 = vector.extract_strided_slice %28 {offsets = [0, 256], sizes = [8, 128], strides = [1, 1]} : vector<8x512xf32> to vector<8x128xf32>
    %42 = math.tanh %41 : vector<8x128xf32>
    %43 = vector.extract_strided_slice %28 {offsets = [0, 384], sizes = [8, 128], strides = [1, 1]} : vector<8x512xf32> to vector<8x128xf32>
    %44 = arith.negf %43 : vector<8x128xf32>
    %45 = math.exp %44 : vector<8x128xf32>
    %cst_35 = arith.constant 1.000000e+00 : f32
    %46 = vector.broadcast %cst_35 : f32 to vector<8x128xf32>
    %47 = arith.addf %46, %45 : vector<8x128xf32>
    %48 = arith.divf %46, %47 : vector<8x128xf32>
    %49 = arith.mulf %40, %25 : vector<8x128xf32>
    %50 = arith.mulf %34, %42 : vector<8x128xf32>
    %51 = arith.addf %49, %50 : vector<8x128xf32>
    %52 = math.tanh %51 : vector<8x128xf32>
    %53 = arith.mulf %48, %52 : vector<8x128xf32>
    %54 = arith.index_cast %18 : i32 to index
    %c0_36 = arith.constant 0 : index
    %c0_37 = arith.constant 0 : index
    %55 = vector.load %arg8[%54, %c0_36, %c0_37] : memref<8x8x512xf32, #tpu.memory_space<vmem>>, vector<1x8x512xf32>
    %56 = vector.shape_cast %55 : vector<1x8x512xf32> to vector<8x512xf32>
    %c1 = arith.constant 1 : index
    %c0_38 = arith.constant 0 : index
    %c0_39 = arith.constant 0 : index
    %57 = vector.load %arg9[%c1, %c0_38, %c0_39] : memref<2x8x128xf32, #tpu.memory_space<vmem>>, vector<1x8x128xf32>
    %58 = vector.shape_cast %57 : vector<1x8x128xf32> to vector<8x128xf32>
    %c1_40 = arith.constant 1 : index
    %c0_41 = arith.constant 0 : index
    %c0_42 = arith.constant 0 : index
    %59 = vector.load %arg10[%c1_40, %c0_41, %c0_42] : memref<2x8x128xf32, #tpu.memory_space<vmem>>, vector<1x8x128xf32>
    %60 = vector.shape_cast %59 : vector<1x8x128xf32> to vector<8x128xf32>
    %61 = arith.truncf %58 : vector<8x128xf32> to vector<8x128xbf16>
    %cst_43 = arith.constant dense<0.000000e+00> : vector<8x512xf32>
    %62 = tpu.matmul %61, %17, %cst_43 {dimension_numbers = #tpu.dot_dimension_numbers<[1], [0], [0], [1], [0, 0, 1, 1], [], []>} : vector<8x128xbf16>, vector<128x512xbf16>, vector<8x512xf32> -> vector<8x512xf32>
    %63 = arith.addf %56, %62 : vector<8x512xf32>
    %64 = vector.extract_strided_slice %63 {offsets = [0, 0], sizes = [8, 128], strides = [1, 1]} : vector<8x512xf32> to vector<8x128xf32>
    %65 = arith.negf %64 : vector<8x128xf32>
    %66 = math.exp %65 : vector<8x128xf32>
    %cst_44 = arith.constant 1.000000e+00 : f32
    %67 = vector.broadcast %cst_44 : f32 to vector<8x128xf32>
    %68 = arith.addf %67, %66 : vector<8x128xf32>
    %69 = arith.divf %67, %68 : vector<8x128xf32>
    %70 = vector.extract_strided_slice %63 {offsets = [0, 128], sizes = [8, 128], strides = [1, 1]} : vector<8x512xf32> to vector<8x128xf32>
    %71 = arith.negf %70 : vector<8x128xf32>
    %72 = math.exp %71 : vector<8x128xf32>
    %cst_45 = arith.constant 1.000000e+00 : f32
    %73 = vector.broadcast %cst_45 : f32 to vector<8x128xf32>
    %74 = arith.addf %73, %72 : vector<8x128xf32>
    %75 = arith.divf %73, %74 : vector<8x128xf32>
    %76 = vector.extract_strided_slice %63 {offsets = [0, 256], sizes = [8, 128], strides = [1, 1]} : vector<8x512xf32> to vector<8x128xf32>
    %77 = math.tanh %76 : vector<8x128xf32>
    %78 = vector.extract_strided_slice %63 {offsets = [0, 384], sizes = [8, 128], strides = [1, 1]} : vector<8x512xf32> to vector<8x128xf32>
    %79 = arith.negf %78 : vector<8x128xf32>
    %80 = math.exp %79 : vector<8x128xf32>
    %cst_46 = arith.constant 1.000000e+00 : f32
    %81 = vector.broadcast %cst_46 : f32 to vector<8x128xf32>
    %82 = arith.addf %81, %80 : vector<8x128xf32>
    %83 = arith.divf %81, %82 : vector<8x128xf32>
    %84 = arith.mulf %75, %60 : vector<8x128xf32>
    %85 = arith.mulf %69, %77 : vector<8x128xf32>
    %86 = arith.addf %84, %85 : vector<8x128xf32>
    %87 = math.tanh %86 : vector<8x128xf32>
    %88 = arith.mulf %83, %87 : vector<8x128xf32>
    %c0_47 = arith.constant 0 : index
    %c0_48 = arith.constant 0 : index
    %c0_49 = arith.constant 0 : index
    %89 = vector.load %arg9[%c0_47, %c0_48, %c0_49] : memref<2x8x128xf32, #tpu.memory_space<vmem>>, vector<1x8x128xf32>
    %90 = vector.shape_cast %89 : vector<1x8x128xf32> to vector<8x128xf32>
    %91 = vector.shape_cast %53 : vector<8x128xf32> to vector<1x8x128xf32>
    tpu.vector_store %arg9[%c0_47, %c0_48, %c0_49], %91 {strides = array<i32>} : memref<2x8x128xf32, #tpu.memory_space<vmem>>, vector<1x8x128xf32>,
    %c0_50 = arith.constant 0 : index
    %c0_51 = arith.constant 0 : index
    %c0_52 = arith.constant 0 : index
    %92 = vector.load %arg10[%c0_50, %c0_51, %c0_52] : memref<2x8x128xf32, #tpu.memory_space<vmem>>, vector<1x8x128xf32>
    %93 = vector.shape_cast %92 : vector<1x8x128xf32> to vector<8x128xf32>
    %94 = vector.shape_cast %51 : vector<8x128xf32> to vector<1x8x128xf32>
    tpu.vector_store %arg10[%c0_50, %c0_51, %c0_52], %94 {strides = array<i32>} : memref<2x8x128xf32, #tpu.memory_space<vmem>>, vector<1x8x128xf32>,
    %c1_53 = arith.constant 1 : index
    %c0_54 = arith.constant 0 : index
    %c0_55 = arith.constant 0 : index
    %95 = vector.load %arg9[%c1_53, %c0_54, %c0_55] : memref<2x8x128xf32, #tpu.memory_space<vmem>>, vector<1x8x128xf32>
    %96 = vector.shape_cast %95 : vector<1x8x128xf32> to vector<8x128xf32>
    %97 = vector.shape_cast %88 : vector<8x128xf32> to vector<1x8x128xf32>
    tpu.vector_store %arg9[%c1_53, %c0_54, %c0_55], %97 {strides = array<i32>} : memref<2x8x128xf32, #tpu.memory_space<vmem>>, vector<1x8x128xf32>,
    %c1_56 = arith.constant 1 : index
    %c0_57 = arith.constant 0 : index
    %c0_58 = arith.constant 0 : index
    %98 = vector.load %arg10[%c1_56, %c0_57, %c0_58] : memref<2x8x128xf32, #tpu.memory_space<vmem>>, vector<1x8x128xf32>
    %99 = vector.shape_cast %98 : vector<1x8x128xf32> to vector<8x128xf32>
    %100 = vector.shape_cast %86 : vector<8x128xf32> to vector<1x8x128xf32>
    tpu.vector_store %arg10[%c1_56, %c0_57, %c0_58], %100 {strides = array<i32>} : memref<2x8x128xf32, #tpu.memory_space<vmem>>, vector<1x8x128xf32>,
    %101 = arith.index_cast %c0_i32 : i32 to index
    %c0_59 = arith.constant 0 : index
    %c0_60 = arith.constant 0 : index
    %102 = vector.load %arg6[%101, %c0_59, %c0_60] : memref<8x8x256xf32, #tpu.memory_space<vmem>>, vector<1x8x128xf32>
    %103 = vector.shape_cast %102 : vector<1x8x128xf32> to vector<8x128xf32>
    %104 = vector.shape_cast %53 : vector<8x128xf32> to vector<1x8x128xf32>
    tpu.vector_store %arg6[%101, %c0_59, %c0_60], %104 {strides = array<i32>} : memref<8x8x256xf32, #tpu.memory_space<vmem>>, vector<1x8x128xf32>,
    %105 = arith.index_cast %18 : i32 to index
    %c0_61 = arith.constant 0 : index
    %c128 = arith.constant 128 : index
    %106 = vector.load %arg6[%105, %c0_61, %c128] : memref<8x8x256xf32, #tpu.memory_space<vmem>>, vector<1x8x128xf32>
    %107 = vector.shape_cast %106 : vector<1x8x128xf32> to vector<8x128xf32>
    %108 = vector.shape_cast %88 : vector<8x128xf32> to vector<1x8x128xf32>
    tpu.vector_store %arg6[%105, %c0_61, %c128], %108 {strides = array<i32>} : memref<8x8x256xf32, #tpu.memory_space<vmem>>, vector<1x8x128xf32>,
    %c1_i32 = arith.constant 1 : i32
    %c7_i32_62 = arith.constant 7 : i32
    %109 = arith.subi %c7_i32_62, %c1_i32 : i32
    %110 = arith.index_cast %c1_i32 : i32 to index
    %c0_63 = arith.constant 0 : index
    %c0_64 = arith.constant 0 : index
    %111 = vector.load %arg7[%110, %c0_63, %c0_64] : memref<8x8x512xf32, #tpu.memory_space<vmem>>, vector<1x8x512xf32>
    %112 = vector.shape_cast %111 : vector<1x8x512xf32> to vector<8x512xf32>
    %c0_65 = arith.constant 0 : index
    %c0_66 = arith.constant 0 : index
    %c0_67 = arith.constant 0 : index
    %113 = vector.load %arg9[%c0_65, %c0_66, %c0_67] : memref<2x8x128xf32, #tpu.memory_space<vmem>>, vector<1x8x128xf32>
    %114 = vector.shape_cast %113 : vector<1x8x128xf32> to vector<8x128xf32>
    %c0_68 = arith.constant 0 : index
    %c0_69 = arith.constant 0 : index
    %c0_70 = arith.constant 0 : index
    %115 = vector.load %arg10[%c0_68, %c0_69, %c0_70] : memref<2x8x128xf32, #tpu.memory_space<vmem>>, vector<1x8x128xf32>
    %116 = vector.shape_cast %115 : vector<1x8x128xf32> to vector<8x128xf32>
    %117 = arith.truncf %114 : vector<8x128xf32> to vector<8x128xbf16>
    %cst_71 = arith.constant dense<0.000000e+00> : vector<8x512xf32>
    %118 = tpu.matmul %117, %16, %cst_71 {dimension_numbers = #tpu.dot_dimension_numbers<[1], [0], [0], [1], [0, 0, 1, 1], [], []>} : vector<8x128xbf16>, vector<128x512xbf16>, vector<8x512xf32> -> vector<8x512xf32>
    %119 = arith.addf %112, %118 : vector<8x512xf32>
    %120 = vector.extract_strided_slice %119 {offsets = [0, 0], sizes = [8, 128], strides = [1, 1]} : vector<8x512xf32> to vector<8x128xf32>
    %121 = arith.negf %120 : vector<8x128xf32>
    %122 = math.exp %121 : vector<8x128xf32>
    %cst_72 = arith.constant 1.000000e+00 : f32
    %123 = vector.broadcast %cst_72 : f32 to vector<8x128xf32>
    %124 = arith.addf %123, %122 : vector<8x128xf32>
    %125 = arith.divf %123, %124 : vector<8x128xf32>
    %126 = vector.extract_strided_slice %119 {offsets = [0, 128], sizes = [8, 128], strides = [1, 1]} : vector<8x512xf32> to vector<8x128xf32>
    %127 = arith.negf %126 : vector<8x128xf32>
    %128 = math.exp %127 : vector<8x128xf32>
    %cst_73 = arith.constant 1.000000e+00 : f32
    %129 = vector.broadcast %cst_73 : f32 to vector<8x128xf32>
    %130 = arith.addf %129, %128 : vector<8x128xf32>
    %131 = arith.divf %129, %130 : vector<8x128xf32>
    %132 = vector.extract_strided_slice %119 {offsets = [0, 256], sizes = [8, 128], strides = [1, 1]} : vector<8x512xf32> to vector<8x128xf32>
    %133 = math.tanh %132 : vector<8x128xf32>
    %134 = vector.extract_strided_slice %119 {offsets = [0, 384], sizes = [8, 128], strides = [1, 1]} : vector<8x512xf32> to vector<8x128xf32>
    %135 = arith.negf %134 : vector<8x128xf32>
    %136 = math.exp %135 : vector<8x128xf32>
    %cst_74 = arith.constant 1.000000e+00 : f32
    %137 = vector.broadcast %cst_74 : f32 to vector<8x128xf32>
    %138 = arith.addf %137, %136 : vector<8x128xf32>
    %139 = arith.divf %137, %138 : vector<8x128xf32>
    %140 = arith.mulf %131, %116 : vector<8x128xf32>
    %141 = arith.mulf %125, %133 : vector<8x128xf32>
    %142 = arith.addf %140, %141 : vector<8x128xf32>
    %143 = math.tanh %142 : vector<8x128xf32>
    %144 = arith.mulf %139, %143 : vector<8x128xf32>
    %145 = arith.index_cast %109 : i32 to index
    %c0_75 = arith.constant 0 : index
    %c0_76 = arith.constant 0 : index
    %146 = vector.load %arg8[%145, %c0_75, %c0_76] : memref<8x8x512xf32, #tpu.memory_space<vmem>>, vector<1x8x512xf32>
    %147 = vector.shape_cast %146 : vector<1x8x512xf32> to vector<8x512xf32>
    %c1_77 = arith.constant 1 : index
    %c0_78 = arith.constant 0 : index
    %c0_79 = arith.constant 0 : index
    %148 = vector.load %arg9[%c1_77, %c0_78, %c0_79] : memref<2x8x128xf32, #tpu.memory_space<vmem>>, vector<1x8x128xf32>
    %149 = vector.shape_cast %148 : vector<1x8x128xf32> to vector<8x128xf32>
    %c1_80 = arith.constant 1 : index
    %c0_81 = arith.constant 0 : index
    %c0_82 = arith.constant 0 : index
    %150 = vector.load %arg10[%c1_80, %c0_81, %c0_82] : memref<2x8x128xf32, #tpu.memory_space<vmem>>, vector<1x8x128xf32>
    %151 = vector.shape_cast %150 : vector<1x8x128xf32> to vector<8x128xf32>
    %152 = arith.truncf %149 : vector<8x128xf32> to vector<8x128xbf16>
    %cst_83 = arith.constant dense<0.000000e+00> : vector<8x512xf32>
    %153 = tpu.matmul %152, %17, %cst_83 {dimension_numbers = #tpu.dot_dimension_numbers<[1], [0], [0], [1], [0, 0, 1, 1], [], []>} : vector<8x128xbf16>, vector<128x512xbf16>, vector<8x512xf32> -> vector<8x512xf32>
    %154 = arith.addf %147, %153 : vector<8x512xf32>
    %155 = vector.extract_strided_slice %154 {offsets = [0, 0], sizes = [8, 128], strides = [1, 1]} : vector<8x512xf32> to vector<8x128xf32>
    %156 = arith.negf %155 : vector<8x128xf32>
    %157 = math.exp %156 : vector<8x128xf32>
    %cst_84 = arith.constant 1.000000e+00 : f32
    %158 = vector.broadcast %cst_84 : f32 to vector<8x128xf32>
    %159 = arith.addf %158, %157 : vector<8x128xf32>
    %160 = arith.divf %158, %159 : vector<8x128xf32>
    %161 = vector.extract_strided_slice %154 {offsets = [0, 128], sizes = [8, 128], strides = [1, 1]} : vector<8x512xf32> to vector<8x128xf32>
    %162 = arith.negf %161 : vector<8x128xf32>
    %163 = math.exp %162 : vector<8x128xf32>
    %cst_85 = arith.constant 1.000000e+00 : f32
    %164 = vector.broadcast %cst_85 : f32 to vector<8x128xf32>
    %165 = arith.addf %164, %163 : vector<8x128xf32>
    %166 = arith.divf %164, %165 : vector<8x128xf32>
    %167 = vector.extract_strided_slice %154 {offsets = [0, 256], sizes = [8, 128], strides = [1, 1]} : vector<8x512xf32> to vector<8x128xf32>
    %168 = math.tanh %167 : vector<8x128xf32>
    %169 = vector.extract_strided_slice %154 {offsets = [0, 384], sizes = [8, 128], strides = [1, 1]} : vector<8x512xf32> to vector<8x128xf32>
    %170 = arith.negf %169 : vector<8x128xf32>
    %171 = math.exp %170 : vector<8x128xf32>
    %cst_86 = arith.constant 1.000000e+00 : f32
    %172 = vector.broadcast %cst_86 : f32 to vector<8x128xf32>
    %173 = arith.addf %172, %171 : vector<8x128xf32>
    %174 = arith.divf %172, %173 : vector<8x128xf32>
    %175 = arith.mulf %166, %151 : vector<8x128xf32>
    %176 = arith.mulf %160, %168 : vector<8x128xf32>
    %177 = arith.addf %175, %176 : vector<8x128xf32>
    %178 = math.tanh %177 : vector<8x128xf32>
    %179 = arith.mulf %174, %178 : vector<8x128xf32>
    %c0_87 = arith.constant 0 : index
    %c0_88 = arith.constant 0 : index
    %c0_89 = arith.constant 0 : index
    %180 = vector.load %arg9[%c0_87, %c0_88, %c0_89] : memref<2x8x128xf32, #tpu.memory_space<vmem>>, vector<1x8x128xf32>
    %181 = vector.shape_cast %180 : vector<1x8x128xf32> to vector<8x128xf32>
    %182 = vector.shape_cast %144 : vector<8x128xf32> to vector<1x8x128xf32>
    tpu.vector_store %arg9[%c0_87, %c0_88, %c0_89], %182 {strides = array<i32>} : memref<2x8x128xf32, #tpu.memory_space<vmem>>, vector<1x8x128xf32>,
    %c0_90 = arith.constant 0 : index
    %c0_91 = arith.constant 0 : index
    %c0_92 = arith.constant 0 : index
    %183 = vector.load %arg10[%c0_90, %c0_91, %c0_92] : memref<2x8x128xf32, #tpu.memory_space<vmem>>, vector<1x8x128xf32>
    %184 = vector.shape_cast %183 : vector<1x8x128xf32> to vector<8x128xf32>
    %185 = vector.shape_cast %142 : vector<8x128xf32> to vector<1x8x128xf32>
    tpu.vector_store %arg10[%c0_90, %c0_91, %c0_92], %185 {strides = array<i32>} : memref<2x8x128xf32, #tpu.memory_space<vmem>>, vector<1x8x128xf32>,
    %c1_93 = arith.constant 1 : index
    %c0_94 = arith.constant 0 : index
    %c0_95 = arith.constant 0 : index
    %186 = vector.load %arg9[%c1_93, %c0_94, %c0_95] : memref<2x8x128xf32, #tpu.memory_space<vmem>>, vector<1x8x128xf32>
    %187 = vector.shape_cast %186 : vector<1x8x128xf32> to vector<8x128xf32>
    %188 = vector.shape_cast %179 : vector<8x128xf32> to vector<1x8x128xf32>
    tpu.vector_store %arg9[%c1_93, %c0_94, %c0_95], %188 {strides = array<i32>} : memref<2x8x128xf32, #tpu.memory_space<vmem>>, vector<1x8x128xf32>,
    %c1_96 = arith.constant 1 : index
    %c0_97 = arith.constant 0 : index
    %c0_98 = arith.constant 0 : index
    %189 = vector.load %arg10[%c1_96, %c0_97, %c0_98] : memref<2x8x128xf32, #tpu.memory_space<vmem>>, vector<1x8x128xf32>
    %190 = vector.shape_cast %189 : vector<1x8x128xf32> to vector<8x128xf32>
    %191 = vector.shape_cast %177 : vector<8x128xf32> to vector<1x8x128xf32>
    tpu.vector_store %arg10[%c1_96, %c0_97, %c0_98], %191 {strides = array<i32>} : memref<2x8x128xf32, #tpu.memory_space<vmem>>, vector<1x8x128xf32>,
    %192 = arith.index_cast %c1_i32 : i32 to index
    %c0_99 = arith.constant 0 : index
    %c0_100 = arith.constant 0 : index
    %193 = vector.load %arg6[%192, %c0_99, %c0_100] : memref<8x8x256xf32, #tpu.memory_space<vmem>>, vector<1x8x128xf32>
    %194 = vector.shape_cast %193 : vector<1x8x128xf32> to vector<8x128xf32>
    %195 = vector.shape_cast %144 : vector<8x128xf32> to vector<1x8x128xf32>
    tpu.vector_store %arg6[%192, %c0_99, %c0_100], %195 {strides = array<i32>} : memref<8x8x256xf32, #tpu.memory_space<vmem>>, vector<1x8x128xf32>,
    %196 = arith.index_cast %109 : i32 to index
    %c0_101 = arith.constant 0 : index
    %c128_102 = arith.constant 128 : index
    %197 = vector.load %arg6[%196, %c0_101, %c128_102] : memref<8x8x256xf32, #tpu.memory_space<vmem>>, vector<1x8x128xf32>
    %198 = vector.shape_cast %197 : vector<1x8x128xf32> to vector<8x128xf32>
    %199 = vector.shape_cast %179 : vector<8x128xf32> to vector<1x8x128xf32>
    tpu.vector_store %arg6[%196, %c0_101, %c128_102], %199 {strides = array<i32>} : memref<8x8x256xf32, #tpu.memory_space<vmem>>, vector<1x8x128xf32>,
    %c2_i32 = arith.constant 2 : i32
    %c7_i32_103 = arith.constant 7 : i32
    %200 = arith.subi %c7_i32_103, %c2_i32 : i32
    %201 = arith.index_cast %c2_i32 : i32 to index
    %c0_104 = arith.constant 0 : index
    %c0_105 = arith.constant 0 : index
    %202 = vector.load %arg7[%201, %c0_104, %c0_105] : memref<8x8x512xf32, #tpu.memory_space<vmem>>, vector<1x8x512xf32>
    %203 = vector.shape_cast %202 : vector<1x8x512xf32> to vector<8x512xf32>
    %c0_106 = arith.constant 0 : index
    %c0_107 = arith.constant 0 : index
    %c0_108 = arith.constant 0 : index
    %204 = vector.load %arg9[%c0_106, %c0_107, %c0_108] : memref<2x8x128xf32, #tpu.memory_space<vmem>>, vector<1x8x128xf32>
    %205 = vector.shape_cast %204 : vector<1x8x128xf32> to vector<8x128xf32>
    %c0_109 = arith.constant 0 : index
    %c0_110 = arith.constant 0 : index
    %c0_111 = arith.constant 0 : index
    %206 = vector.load %arg10[%c0_109, %c0_110, %c0_111] : memref<2x8x128xf32, #tpu.memory_space<vmem>>, vector<1x8x128xf32>
    %207 = vector.shape_cast %206 : vector<1x8x128xf32> to vector<8x128xf32>
    %208 = arith.truncf %205 : vector<8x128xf32> to vector<8x128xbf16>
    %cst_112 = arith.constant dense<0.000000e+00> : vector<8x512xf32>
    %209 = tpu.matmul %208, %16, %cst_112 {dimension_numbers = #tpu.dot_dimension_numbers<[1], [0], [0], [1], [0, 0, 1, 1], [], []>} : vector<8x128xbf16>, vector<128x512xbf16>, vector<8x512xf32> -> vector<8x512xf32>
    %210 = arith.addf %203, %209 : vector<8x512xf32>
    %211 = vector.extract_strided_slice %210 {offsets = [0, 0], sizes = [8, 128], strides = [1, 1]} : vector<8x512xf32> to vector<8x128xf32>
    %212 = arith.negf %211 : vector<8x128xf32>
    %213 = math.exp %212 : vector<8x128xf32>
    %cst_113 = arith.constant 1.000000e+00 : f32
    %214 = vector.broadcast %cst_113 : f32 to vector<8x128xf32>
    %215 = arith.addf %214, %213 : vector<8x128xf32>
    %216 = arith.divf %214, %215 : vector<8x128xf32>
    %217 = vector.extract_strided_slice %210 {offsets = [0, 128], sizes = [8, 128], strides = [1, 1]} : vector<8x512xf32> to vector<8x128xf32>
    %218 = arith.negf %217 : vector<8x128xf32>
    %219 = math.exp %218 : vector<8x128xf32>
    %cst_114 = arith.constant 1.000000e+00 : f32
    %220 = vector.broadcast %cst_114 : f32 to vector<8x128xf32>
    %221 = arith.addf %220, %219 : vector<8x128xf32>
    %222 = arith.divf %220, %221 : vector<8x128xf32>
    %223 = vector.extract_strided_slice %210 {offsets = [0, 256], sizes = [8, 128], strides = [1, 1]} : vector<8x512xf32> to vector<8x128xf32>
    %224 = math.tanh %223 : vector<8x128xf32>
    %225 = vector.extract_strided_slice %210 {offsets = [0, 384], sizes = [8, 128], strides = [1, 1]} : vector<8x512xf32> to vector<8x128xf32>
    %226 = arith.negf %225 : vector<8x128xf32>
    %227 = math.exp %226 : vector<8x128xf32>
    %cst_115 = arith.constant 1.000000e+00 : f32
    %228 = vector.broadcast %cst_115 : f32 to vector<8x128xf32>
    %229 = arith.addf %228, %227 : vector<8x128xf32>
    %230 = arith.divf %228, %229 : vector<8x128xf32>
    %231 = arith.mulf %222, %207 : vector<8x128xf32>
    %232 = arith.mulf %216, %224 : vector<8x128xf32>
    %233 = arith.addf %231, %232 : vector<8x128xf32>
    %234 = math.tanh %233 : vector<8x128xf32>
    %235 = arith.mulf %230, %234 : vector<8x128xf32>
    %236 = arith.index_cast %200 : i32 to index
    %c0_116 = arith.constant 0 : index
    %c0_117 = arith.constant 0 : index
    %237 = vector.load %arg8[%236, %c0_116, %c0_117] : memref<8x8x512xf32, #tpu.memory_space<vmem>>, vector<1x8x512xf32>
    %238 = vector.shape_cast %237 : vector<1x8x512xf32> to vector<8x512xf32>
    %c1_118 = arith.constant 1 : index
    %c0_119 = arith.constant 0 : index
    %c0_120 = arith.constant 0 : index
    %239 = vector.load %arg9[%c1_118, %c0_119, %c0_120] : memref<2x8x128xf32, #tpu.memory_space<vmem>>, vector<1x8x128xf32>
    %240 = vector.shape_cast %239 : vector<1x8x128xf32> to vector<8x128xf32>
    %c1_121 = arith.constant 1 : index
    %c0_122 = arith.constant 0 : index
    %c0_123 = arith.constant 0 : index
    %241 = vector.load %arg10[%c1_121, %c0_122, %c0_123] : memref<2x8x128xf32, #tpu.memory_space<vmem>>, vector<1x8x128xf32>
    %242 = vector.shape_cast %241 : vector<1x8x128xf32> to vector<8x128xf32>
    %243 = arith.truncf %240 : vector<8x128xf32> to vector<8x128xbf16>
    %cst_124 = arith.constant dense<0.000000e+00> : vector<8x512xf32>
    %244 = tpu.matmul %243, %17, %cst_124 {dimension_numbers = #tpu.dot_dimension_numbers<[1], [0], [0], [1], [0, 0, 1, 1], [], []>} : vector<8x128xbf16>, vector<128x512xbf16>, vector<8x512xf32> -> vector<8x512xf32>
    %245 = arith.addf %238, %244 : vector<8x512xf32>
    %246 = vector.extract_strided_slice %245 {offsets = [0, 0], sizes = [8, 128], strides = [1, 1]} : vector<8x512xf32> to vector<8x128xf32>
    %247 = arith.negf %246 : vector<8x128xf32>
    %248 = math.exp %247 : vector<8x128xf32>
    %cst_125 = arith.constant 1.000000e+00 : f32
    %249 = vector.broadcast %cst_125 : f32 to vector<8x128xf32>
    %250 = arith.addf %249, %248 : vector<8x128xf32>
    %251 = arith.divf %249, %250 : vector<8x128xf32>
    %252 = vector.extract_strided_slice %245 {offsets = [0, 128], sizes = [8, 128], strides = [1, 1]} : vector<8x512xf32> to vector<8x128xf32>
    %253 = arith.negf %252 : vector<8x128xf32>
    %254 = math.exp %253 : vector<8x128xf32>
    %cst_126 = arith.constant 1.000000e+00 : f32
    %255 = vector.broadcast %cst_126 : f32 to vector<8x128xf32>
    %256 = arith.addf %255, %254 : vector<8x128xf32>
    %257 = arith.divf %255, %256 : vector<8x128xf32>
    %258 = vector.extract_strided_slice %245 {offsets = [0, 256], sizes = [8, 128], strides = [1, 1]} : vector<8x512xf32> to vector<8x128xf32>
    %259 = math.tanh %258 : vector<8x128xf32>
    %260 = vector.extract_strided_slice %245 {offsets = [0, 384], sizes = [8, 128], strides = [1, 1]} : vector<8x512xf32> to vector<8x128xf32>
    %261 = arith.negf %260 : vector<8x128xf32>
    %262 = math.exp %261 : vector<8x128xf32>
    %cst_127 = arith.constant 1.000000e+00 : f32
    %263 = vector.broadcast %cst_127 : f32 to vector<8x128xf32>
    %264 = arith.addf %263, %262 : vector<8x128xf32>
    %265 = arith.divf %263, %264 : vector<8x128xf32>
    %266 = arith.mulf %257, %242 : vector<8x128xf32>
    %267 = arith.mulf %251, %259 : vector<8x128xf32>
    %268 = arith.addf %266, %267 : vector<8x128xf32>
    %269 = math.tanh %268 : vector<8x128xf32>
    %270 = arith.mulf %265, %269 : vector<8x128xf32>
    %c0_128 = arith.constant 0 : index
    %c0_129 = arith.constant 0 : index
    %c0_130 = arith.constant 0 : index
    %271 = vector.load %arg9[%c0_128, %c0_129, %c0_130] : memref<2x8x128xf32, #tpu.memory_space<vmem>>, vector<1x8x128xf32>
    %272 = vector.shape_cast %271 : vector<1x8x128xf32> to vector<8x128xf32>
    %273 = vector.shape_cast %235 : vector<8x128xf32> to vector<1x8x128xf32>
    tpu.vector_store %arg9[%c0_128, %c0_129, %c0_130], %273 {strides = array<i32>} : memref<2x8x128xf32, #tpu.memory_space<vmem>>, vector<1x8x128xf32>,
    %c0_131 = arith.constant 0 : index
    %c0_132 = arith.constant 0 : index
    %c0_133 = arith.constant 0 : index
    %274 = vector.load %arg10[%c0_131, %c0_132, %c0_133] : memref<2x8x128xf32, #tpu.memory_space<vmem>>, vector<1x8x128xf32>
    %275 = vector.shape_cast %274 : vector<1x8x128xf32> to vector<8x128xf32>
    %276 = vector.shape_cast %233 : vector<8x128xf32> to vector<1x8x128xf32>
    tpu.vector_store %arg10[%c0_131, %c0_132, %c0_133], %276 {strides = array<i32>} : memref<2x8x128xf32, #tpu.memory_space<vmem>>, vector<1x8x128xf32>,
    %c1_134 = arith.constant 1 : index
    %c0_135 = arith.constant 0 : index
    %c0_136 = arith.constant 0 : index
    %277 = vector.load %arg9[%c1_134, %c0_135, %c0_136] : memref<2x8x128xf32, #tpu.memory_space<vmem>>, vector<1x8x128xf32>
    %278 = vector.shape_cast %277 : vector<1x8x128xf32> to vector<8x128xf32>
    %279 = vector.shape_cast %270 : vector<8x128xf32> to vector<1x8x128xf32>
    tpu.vector_store %arg9[%c1_134, %c0_135, %c0_136], %279 {strides = array<i32>} : memref<2x8x128xf32, #tpu.memory_space<vmem>>, vector<1x8x128xf32>,
    %c1_137 = arith.constant 1 : index
    %c0_138 = arith.constant 0 : index
    %c0_139 = arith.constant 0 : index
    %280 = vector.load %arg10[%c1_137, %c0_138, %c0_139] : memref<2x8x128xf32, #tpu.memory_space<vmem>>, vector<1x8x128xf32>
    %281 = vector.shape_cast %280 : vector<1x8x128xf32> to vector<8x128xf32>
    %282 = vector.shape_cast %268 : vector<8x128xf32> to vector<1x8x128xf32>
    tpu.vector_store %arg10[%c1_137, %c0_138, %c0_139], %282 {strides = array<i32>} : memref<2x8x128xf32, #tpu.memory_space<vmem>>, vector<1x8x128xf32>,
    %283 = arith.index_cast %c2_i32 : i32 to index
    %c0_140 = arith.constant 0 : index
    %c0_141 = arith.constant 0 : index
    %284 = vector.load %arg6[%283, %c0_140, %c0_141] : memref<8x8x256xf32, #tpu.memory_space<vmem>>, vector<1x8x128xf32>
    %285 = vector.shape_cast %284 : vector<1x8x128xf32> to vector<8x128xf32>
    %286 = vector.shape_cast %235 : vector<8x128xf32> to vector<1x8x128xf32>
    tpu.vector_store %arg6[%283, %c0_140, %c0_141], %286 {strides = array<i32>} : memref<8x8x256xf32, #tpu.memory_space<vmem>>, vector<1x8x128xf32>,
    %287 = arith.index_cast %200 : i32 to index
    %c0_142 = arith.constant 0 : index
    %c128_143 = arith.constant 128 : index
    %288 = vector.load %arg6[%287, %c0_142, %c128_143] : memref<8x8x256xf32, #tpu.memory_space<vmem>>, vector<1x8x128xf32>
    %289 = vector.shape_cast %288 : vector<1x8x128xf32> to vector<8x128xf32>
    %290 = vector.shape_cast %270 : vector<8x128xf32> to vector<1x8x128xf32>
    tpu.vector_store %arg6[%287, %c0_142, %c128_143], %290 {strides = array<i32>} : memref<8x8x256xf32, #tpu.memory_space<vmem>>, vector<1x8x128xf32>,
    %c3_i32 = arith.constant 3 : i32
    %c7_i32_144 = arith.constant 7 : i32
    %291 = arith.subi %c7_i32_144, %c3_i32 : i32
    %292 = arith.index_cast %c3_i32 : i32 to index
    %c0_145 = arith.constant 0 : index
    %c0_146 = arith.constant 0 : index
    %293 = vector.load %arg7[%292, %c0_145, %c0_146] : memref<8x8x512xf32, #tpu.memory_space<vmem>>, vector<1x8x512xf32>
    %294 = vector.shape_cast %293 : vector<1x8x512xf32> to vector<8x512xf32>
    %c0_147 = arith.constant 0 : index
    %c0_148 = arith.constant 0 : index
    %c0_149 = arith.constant 0 : index
    %295 = vector.load %arg9[%c0_147, %c0_148, %c0_149] : memref<2x8x128xf32, #tpu.memory_space<vmem>>, vector<1x8x128xf32>
    %296 = vector.shape_cast %295 : vector<1x8x128xf32> to vector<8x128xf32>
    %c0_150 = arith.constant 0 : index
    %c0_151 = arith.constant 0 : index
    %c0_152 = arith.constant 0 : index
    %297 = vector.load %arg10[%c0_150, %c0_151, %c0_152] : memref<2x8x128xf32, #tpu.memory_space<vmem>>, vector<1x8x128xf32>
    %298 = vector.shape_cast %297 : vector<1x8x128xf32> to vector<8x128xf32>
    %299 = arith.truncf %296 : vector<8x128xf32> to vector<8x128xbf16>
    %cst_153 = arith.constant dense<0.000000e+00> : vector<8x512xf32>
    %300 = tpu.matmul %299, %16, %cst_153 {dimension_numbers = #tpu.dot_dimension_numbers<[1], [0], [0], [1], [0, 0, 1, 1], [], []>} : vector<8x128xbf16>, vector<128x512xbf16>, vector<8x512xf32> -> vector<8x512xf32>
    %301 = arith.addf %294, %300 : vector<8x512xf32>
    %302 = vector.extract_strided_slice %301 {offsets = [0, 0], sizes = [8, 128], strides = [1, 1]} : vector<8x512xf32> to vector<8x128xf32>
    %303 = arith.negf %302 : vector<8x128xf32>
    %304 = math.exp %303 : vector<8x128xf32>
    %cst_154 = arith.constant 1.000000e+00 : f32
    %305 = vector.broadcast %cst_154 : f32 to vector<8x128xf32>
    %306 = arith.addf %305, %304 : vector<8x128xf32>
    %307 = arith.divf %305, %306 : vector<8x128xf32>
    %308 = vector.extract_strided_slice %301 {offsets = [0, 128], sizes = [8, 128], strides = [1, 1]} : vector<8x512xf32> to vector<8x128xf32>
    %309 = arith.negf %308 : vector<8x128xf32>
    %310 = math.exp %309 : vector<8x128xf32>
    %cst_155 = arith.constant 1.000000e+00 : f32
    %311 = vector.broadcast %cst_155 : f32 to vector<8x128xf32>
    %312 = arith.addf %311, %310 : vector<8x128xf32>
    %313 = arith.divf %311, %312 : vector<8x128xf32>
    %314 = vector.extract_strided_slice %301 {offsets = [0, 256], sizes = [8, 128], strides = [1, 1]} : vector<8x512xf32> to vector<8x128xf32>
    %315 = math.tanh %314 : vector<8x128xf32>
    %316 = vector.extract_strided_slice %301 {offsets = [0, 384], sizes = [8, 128], strides = [1, 1]} : vector<8x512xf32> to vector<8x128xf32>
    %317 = arith.negf %316 : vector<8x128xf32>
    %318 = math.exp %317 : vector<8x128xf32>
    %cst_156 = arith.constant 1.000000e+00 : f32
    %319 = vector.broadcast %cst_156 : f32 to vector<8x128xf32>
    %320 = arith.addf %319, %318 : vector<8x128xf32>
    %321 = arith.divf %319, %320 : vector<8x128xf32>
    %322 = arith.mulf %313, %298 : vector<8x128xf32>
    %323 = arith.mulf %307, %315 : vector<8x128xf32>
    %324 = arith.addf %322, %323 : vector<8x128xf32>
    %325 = math.tanh %324 : vector<8x128xf32>
    %326 = arith.mulf %321, %325 : vector<8x128xf32>
    %327 = arith.index_cast %291 : i32 to index
    %c0_157 = arith.constant 0 : index
    %c0_158 = arith.constant 0 : index
    %328 = vector.load %arg8[%327, %c0_157, %c0_158] : memref<8x8x512xf32, #tpu.memory_space<vmem>>, vector<1x8x512xf32>
    %329 = vector.shape_cast %328 : vector<1x8x512xf32> to vector<8x512xf32>
    %c1_159 = arith.constant 1 : index
    %c0_160 = arith.constant 0 : index
    %c0_161 = arith.constant 0 : index
    %330 = vector.load %arg9[%c1_159, %c0_160, %c0_161] : memref<2x8x128xf32, #tpu.memory_space<vmem>>, vector<1x8x128xf32>
    %331 = vector.shape_cast %330 : vector<1x8x128xf32> to vector<8x128xf32>
    %c1_162 = arith.constant 1 : index
    %c0_163 = arith.constant 0 : index
    %c0_164 = arith.constant 0 : index
    %332 = vector.load %arg10[%c1_162, %c0_163, %c0_164] : memref<2x8x128xf32, #tpu.memory_space<vmem>>, vector<1x8x128xf32>
    %333 = vector.shape_cast %332 : vector<1x8x128xf32> to vector<8x128xf32>
    %334 = arith.truncf %331 : vector<8x128xf32> to vector<8x128xbf16>
    %cst_165 = arith.constant dense<0.000000e+00> : vector<8x512xf32>
    %335 = tpu.matmul %334, %17, %cst_165 {dimension_numbers = #tpu.dot_dimension_numbers<[1], [0], [0], [1], [0, 0, 1, 1], [], []>} : vector<8x128xbf16>, vector<128x512xbf16>, vector<8x512xf32> -> vector<8x512xf32>
    %336 = arith.addf %329, %335 : vector<8x512xf32>
    %337 = vector.extract_strided_slice %336 {offsets = [0, 0], sizes = [8, 128], strides = [1, 1]} : vector<8x512xf32> to vector<8x128xf32>
    %338 = arith.negf %337 : vector<8x128xf32>
    %339 = math.exp %338 : vector<8x128xf32>
    %cst_166 = arith.constant 1.000000e+00 : f32
    %340 = vector.broadcast %cst_166 : f32 to vector<8x128xf32>
    %341 = arith.addf %340, %339 : vector<8x128xf32>
    %342 = arith.divf %340, %341 : vector<8x128xf32>
    %343 = vector.extract_strided_slice %336 {offsets = [0, 128], sizes = [8, 128], strides = [1, 1]} : vector<8x512xf32> to vector<8x128xf32>
    %344 = arith.negf %343 : vector<8x128xf32>
    %345 = math.exp %344 : vector<8x128xf32>
    %cst_167 = arith.constant 1.000000e+00 : f32
    %346 = vector.broadcast %cst_167 : f32 to vector<8x128xf32>
    %347 = arith.addf %346, %345 : vector<8x128xf32>
    %348 = arith.divf %346, %347 : vector<8x128xf32>
    %349 = vector.extract_strided_slice %336 {offsets = [0, 256], sizes = [8, 128], strides = [1, 1]} : vector<8x512xf32> to vector<8x128xf32>
    %350 = math.tanh %349 : vector<8x128xf32>
    %351 = vector.extract_strided_slice %336 {offsets = [0, 384], sizes = [8, 128], strides = [1, 1]} : vector<8x512xf32> to vector<8x128xf32>
    %352 = arith.negf %351 : vector<8x128xf32>
    %353 = math.exp %352 : vector<8x128xf32>
    %cst_168 = arith.constant 1.000000e+00 : f32
    %354 = vector.broadcast %cst_168 : f32 to vector<8x128xf32>
    %355 = arith.addf %354, %353 : vector<8x128xf32>
    %356 = arith.divf %354, %355 : vector<8x128xf32>
    %357 = arith.mulf %348, %333 : vector<8x128xf32>
    %358 = arith.mulf %342, %350 : vector<8x128xf32>
    %359 = arith.addf %357, %358 : vector<8x128xf32>
    %360 = math.tanh %359 : vector<8x128xf32>
    %361 = arith.mulf %356, %360 : vector<8x128xf32>
    %c0_169 = arith.constant 0 : index
    %c0_170 = arith.constant 0 : index
    %c0_171 = arith.constant 0 : index
    %362 = vector.load %arg9[%c0_169, %c0_170, %c0_171] : memref<2x8x128xf32, #tpu.memory_space<vmem>>, vector<1x8x128xf32>
    %363 = vector.shape_cast %362 : vector<1x8x128xf32> to vector<8x128xf32>
    %364 = vector.shape_cast %326 : vector<8x128xf32> to vector<1x8x128xf32>
    tpu.vector_store %arg9[%c0_169, %c0_170, %c0_171], %364 {strides = array<i32>} : memref<2x8x128xf32, #tpu.memory_space<vmem>>, vector<1x8x128xf32>,
    %c0_172 = arith.constant 0 : index
    %c0_173 = arith.constant 0 : index
    %c0_174 = arith.constant 0 : index
    %365 = vector.load %arg10[%c0_172, %c0_173, %c0_174] : memref<2x8x128xf32, #tpu.memory_space<vmem>>, vector<1x8x128xf32>
    %366 = vector.shape_cast %365 : vector<1x8x128xf32> to vector<8x128xf32>
    %367 = vector.shape_cast %324 : vector<8x128xf32> to vector<1x8x128xf32>
    tpu.vector_store %arg10[%c0_172, %c0_173, %c0_174], %367 {strides = array<i32>} : memref<2x8x128xf32, #tpu.memory_space<vmem>>, vector<1x8x128xf32>,
    %c1_175 = arith.constant 1 : index
    %c0_176 = arith.constant 0 : index
    %c0_177 = arith.constant 0 : index
    %368 = vector.load %arg9[%c1_175, %c0_176, %c0_177] : memref<2x8x128xf32, #tpu.memory_space<vmem>>, vector<1x8x128xf32>
    %369 = vector.shape_cast %368 : vector<1x8x128xf32> to vector<8x128xf32>
    %370 = vector.shape_cast %361 : vector<8x128xf32> to vector<1x8x128xf32>
    tpu.vector_store %arg9[%c1_175, %c0_176, %c0_177], %370 {strides = array<i32>} : memref<2x8x128xf32, #tpu.memory_space<vmem>>, vector<1x8x128xf32>,
    %c1_178 = arith.constant 1 : index
    %c0_179 = arith.constant 0 : index
    %c0_180 = arith.constant 0 : index
    %371 = vector.load %arg10[%c1_178, %c0_179, %c0_180] : memref<2x8x128xf32, #tpu.memory_space<vmem>>, vector<1x8x128xf32>
    %372 = vector.shape_cast %371 : vector<1x8x128xf32> to vector<8x128xf32>
    %373 = vector.shape_cast %359 : vector<8x128xf32> to vector<1x8x128xf32>
    tpu.vector_store %arg10[%c1_178, %c0_179, %c0_180], %373 {strides = array<i32>} : memref<2x8x128xf32, #tpu.memory_space<vmem>>, vector<1x8x128xf32>,
    %374 = arith.index_cast %c3_i32 : i32 to index
    %c0_181 = arith.constant 0 : index
    %c0_182 = arith.constant 0 : index
    %375 = vector.load %arg6[%374, %c0_181, %c0_182] : memref<8x8x256xf32, #tpu.memory_space<vmem>>, vector<1x8x128xf32>
    %376 = vector.shape_cast %375 : vector<1x8x128xf32> to vector<8x128xf32>
    %377 = vector.shape_cast %326 : vector<8x128xf32> to vector<1x8x128xf32>
    tpu.vector_store %arg6[%374, %c0_181, %c0_182], %377 {strides = array<i32>} : memref<8x8x256xf32, #tpu.memory_space<vmem>>, vector<1x8x128xf32>,
    %378 = arith.index_cast %291 : i32 to index
    %c0_183 = arith.constant 0 : index
    %c128_184 = arith.constant 128 : index
    %379 = vector.load %arg6[%378, %c0_183, %c128_184] : memref<8x8x256xf32, #tpu.memory_space<vmem>>, vector<1x8x128xf32>
    %380 = vector.shape_cast %379 : vector<1x8x128xf32> to vector<8x128xf32>
    %381 = vector.shape_cast %361 : vector<8x128xf32> to vector<1x8x128xf32>
    tpu.vector_store %arg6[%378, %c0_183, %c128_184], %381 {strides = array<i32>} : memref<8x8x256xf32, #tpu.memory_space<vmem>>, vector<1x8x128xf32>,
    %c4_i32 = arith.constant 4 : i32
    %c7_i32_185 = arith.constant 7 : i32
    %382 = arith.subi %c7_i32_185, %c4_i32 : i32
    %383 = arith.index_cast %c4_i32 : i32 to index
    %c0_186 = arith.constant 0 : index
    %c0_187 = arith.constant 0 : index
    %384 = vector.load %arg7[%383, %c0_186, %c0_187] : memref<8x8x512xf32, #tpu.memory_space<vmem>>, vector<1x8x512xf32>
    %385 = vector.shape_cast %384 : vector<1x8x512xf32> to vector<8x512xf32>
    %c0_188 = arith.constant 0 : index
    %c0_189 = arith.constant 0 : index
    %c0_190 = arith.constant 0 : index
    %386 = vector.load %arg9[%c0_188, %c0_189, %c0_190] : memref<2x8x128xf32, #tpu.memory_space<vmem>>, vector<1x8x128xf32>
    %387 = vector.shape_cast %386 : vector<1x8x128xf32> to vector<8x128xf32>
    %c0_191 = arith.constant 0 : index
    %c0_192 = arith.constant 0 : index
    %c0_193 = arith.constant 0 : index
    %388 = vector.load %arg10[%c0_191, %c0_192, %c0_193] : memref<2x8x128xf32, #tpu.memory_space<vmem>>, vector<1x8x128xf32>
    %389 = vector.shape_cast %388 : vector<1x8x128xf32> to vector<8x128xf32>
    %390 = arith.truncf %387 : vector<8x128xf32> to vector<8x128xbf16>
    %cst_194 = arith.constant dense<0.000000e+00> : vector<8x512xf32>
    %391 = tpu.matmul %390, %16, %cst_194 {dimension_numbers = #tpu.dot_dimension_numbers<[1], [0], [0], [1], [0, 0, 1, 1], [], []>} : vector<8x128xbf16>, vector<128x512xbf16>, vector<8x512xf32> -> vector<8x512xf32>
    %392 = arith.addf %385, %391 : vector<8x512xf32>
    %393 = vector.extract_strided_slice %392 {offsets = [0, 0], sizes = [8, 128], strides = [1, 1]} : vector<8x512xf32> to vector<8x128xf32>
    %394 = arith.negf %393 : vector<8x128xf32>
    %395 = math.exp %394 : vector<8x128xf32>
    %cst_195 = arith.constant 1.000000e+00 : f32
    %396 = vector.broadcast %cst_195 : f32 to vector<8x128xf32>
    %397 = arith.addf %396, %395 : vector<8x128xf32>
    %398 = arith.divf %396, %397 : vector<8x128xf32>
    %399 = vector.extract_strided_slice %392 {offsets = [0, 128], sizes = [8, 128], strides = [1, 1]} : vector<8x512xf32> to vector<8x128xf32>
    %400 = arith.negf %399 : vector<8x128xf32>
    %401 = math.exp %400 : vector<8x128xf32>
    %cst_196 = arith.constant 1.000000e+00 : f32
    %402 = vector.broadcast %cst_196 : f32 to vector<8x128xf32>
    %403 = arith.addf %402, %401 : vector<8x128xf32>
    %404 = arith.divf %402, %403 : vector<8x128xf32>
    %405 = vector.extract_strided_slice %392 {offsets = [0, 256], sizes = [8, 128], strides = [1, 1]} : vector<8x512xf32> to vector<8x128xf32>
    %406 = math.tanh %405 : vector<8x128xf32>
    %407 = vector.extract_strided_slice %392 {offsets = [0, 384], sizes = [8, 128], strides = [1, 1]} : vector<8x512xf32> to vector<8x128xf32>
    %408 = arith.negf %407 : vector<8x128xf32>
    %409 = math.exp %408 : vector<8x128xf32>
    %cst_197 = arith.constant 1.000000e+00 : f32
    %410 = vector.broadcast %cst_197 : f32 to vector<8x128xf32>
    %411 = arith.addf %410, %409 : vector<8x128xf32>
    %412 = arith.divf %410, %411 : vector<8x128xf32>
    %413 = arith.mulf %404, %389 : vector<8x128xf32>
    %414 = arith.mulf %398, %406 : vector<8x128xf32>
    %415 = arith.addf %413, %414 : vector<8x128xf32>
    %416 = math.tanh %415 : vector<8x128xf32>
    %417 = arith.mulf %412, %416 : vector<8x128xf32>
    %418 = arith.index_cast %382 : i32 to index
    %c0_198 = arith.constant 0 : index
    %c0_199 = arith.constant 0 : index
    %419 = vector.load %arg8[%418, %c0_198, %c0_199] : memref<8x8x512xf32, #tpu.memory_space<vmem>>, vector<1x8x512xf32>
    %420 = vector.shape_cast %419 : vector<1x8x512xf32> to vector<8x512xf32>
    %c1_200 = arith.constant 1 : index
    %c0_201 = arith.constant 0 : index
    %c0_202 = arith.constant 0 : index
    %421 = vector.load %arg9[%c1_200, %c0_201, %c0_202] : memref<2x8x128xf32, #tpu.memory_space<vmem>>, vector<1x8x128xf32>
    %422 = vector.shape_cast %421 : vector<1x8x128xf32> to vector<8x128xf32>
    %c1_203 = arith.constant 1 : index
    %c0_204 = arith.constant 0 : index
    %c0_205 = arith.constant 0 : index
    %423 = vector.load %arg10[%c1_203, %c0_204, %c0_205] : memref<2x8x128xf32, #tpu.memory_space<vmem>>, vector<1x8x128xf32>
    %424 = vector.shape_cast %423 : vector<1x8x128xf32> to vector<8x128xf32>
    %425 = arith.truncf %422 : vector<8x128xf32> to vector<8x128xbf16>
    %cst_206 = arith.constant dense<0.000000e+00> : vector<8x512xf32>
    %426 = tpu.matmul %425, %17, %cst_206 {dimension_numbers = #tpu.dot_dimension_numbers<[1], [0], [0], [1], [0, 0, 1, 1], [], []>} : vector<8x128xbf16>, vector<128x512xbf16>, vector<8x512xf32> -> vector<8x512xf32>
    %427 = arith.addf %420, %426 : vector<8x512xf32>
    %428 = vector.extract_strided_slice %427 {offsets = [0, 0], sizes = [8, 128], strides = [1, 1]} : vector<8x512xf32> to vector<8x128xf32>
    %429 = arith.negf %428 : vector<8x128xf32>
    %430 = math.exp %429 : vector<8x128xf32>
    %cst_207 = arith.constant 1.000000e+00 : f32
    %431 = vector.broadcast %cst_207 : f32 to vector<8x128xf32>
    %432 = arith.addf %431, %430 : vector<8x128xf32>
    %433 = arith.divf %431, %432 : vector<8x128xf32>
    %434 = vector.extract_strided_slice %427 {offsets = [0, 128], sizes = [8, 128], strides = [1, 1]} : vector<8x512xf32> to vector<8x128xf32>
    %435 = arith.negf %434 : vector<8x128xf32>
    %436 = math.exp %435 : vector<8x128xf32>
    %cst_208 = arith.constant 1.000000e+00 : f32
    %437 = vector.broadcast %cst_208 : f32 to vector<8x128xf32>
    %438 = arith.addf %437, %436 : vector<8x128xf32>
    %439 = arith.divf %437, %438 : vector<8x128xf32>
    %440 = vector.extract_strided_slice %427 {offsets = [0, 256], sizes = [8, 128], strides = [1, 1]} : vector<8x512xf32> to vector<8x128xf32>
    %441 = math.tanh %440 : vector<8x128xf32>
    %442 = vector.extract_strided_slice %427 {offsets = [0, 384], sizes = [8, 128], strides = [1, 1]} : vector<8x512xf32> to vector<8x128xf32>
    %443 = arith.negf %442 : vector<8x128xf32>
    %444 = math.exp %443 : vector<8x128xf32>
    %cst_209 = arith.constant 1.000000e+00 : f32
    %445 = vector.broadcast %cst_209 : f32 to vector<8x128xf32>
    %446 = arith.addf %445, %444 : vector<8x128xf32>
    %447 = arith.divf %445, %446 : vector<8x128xf32>
    %448 = arith.mulf %439, %424 : vector<8x128xf32>
    %449 = arith.mulf %433, %441 : vector<8x128xf32>
    %450 = arith.addf %448, %449 : vector<8x128xf32>
    %451 = math.tanh %450 : vector<8x128xf32>
    %452 = arith.mulf %447, %451 : vector<8x128xf32>
    %c0_210 = arith.constant 0 : index
    %c0_211 = arith.constant 0 : index
    %c0_212 = arith.constant 0 : index
    %453 = vector.load %arg9[%c0_210, %c0_211, %c0_212] : memref<2x8x128xf32, #tpu.memory_space<vmem>>, vector<1x8x128xf32>
    %454 = vector.shape_cast %453 : vector<1x8x128xf32> to vector<8x128xf32>
    %455 = vector.shape_cast %417 : vector<8x128xf32> to vector<1x8x128xf32>
    tpu.vector_store %arg9[%c0_210, %c0_211, %c0_212], %455 {strides = array<i32>} : memref<2x8x128xf32, #tpu.memory_space<vmem>>, vector<1x8x128xf32>,
    %c0_213 = arith.constant 0 : index
    %c0_214 = arith.constant 0 : index
    %c0_215 = arith.constant 0 : index
    %456 = vector.load %arg10[%c0_213, %c0_214, %c0_215] : memref<2x8x128xf32, #tpu.memory_space<vmem>>, vector<1x8x128xf32>
    %457 = vector.shape_cast %456 : vector<1x8x128xf32> to vector<8x128xf32>
    %458 = vector.shape_cast %415 : vector<8x128xf32> to vector<1x8x128xf32>
    tpu.vector_store %arg10[%c0_213, %c0_214, %c0_215], %458 {strides = array<i32>} : memref<2x8x128xf32, #tpu.memory_space<vmem>>, vector<1x8x128xf32>,
    %c1_216 = arith.constant 1 : index
    %c0_217 = arith.constant 0 : index
    %c0_218 = arith.constant 0 : index
    %459 = vector.load %arg9[%c1_216, %c0_217, %c0_218] : memref<2x8x128xf32, #tpu.memory_space<vmem>>, vector<1x8x128xf32>
    %460 = vector.shape_cast %459 : vector<1x8x128xf32> to vector<8x128xf32>
    %461 = vector.shape_cast %452 : vector<8x128xf32> to vector<1x8x128xf32>
    tpu.vector_store %arg9[%c1_216, %c0_217, %c0_218], %461 {strides = array<i32>} : memref<2x8x128xf32, #tpu.memory_space<vmem>>, vector<1x8x128xf32>,
    %c1_219 = arith.constant 1 : index
    %c0_220 = arith.constant 0 : index
    %c0_221 = arith.constant 0 : index
    %462 = vector.load %arg10[%c1_219, %c0_220, %c0_221] : memref<2x8x128xf32, #tpu.memory_space<vmem>>, vector<1x8x128xf32>
    %463 = vector.shape_cast %462 : vector<1x8x128xf32> to vector<8x128xf32>
    %464 = vector.shape_cast %450 : vector<8x128xf32> to vector<1x8x128xf32>
    tpu.vector_store %arg10[%c1_219, %c0_220, %c0_221], %464 {strides = array<i32>} : memref<2x8x128xf32, #tpu.memory_space<vmem>>, vector<1x8x128xf32>,
    %465 = arith.index_cast %c4_i32 : i32 to index
    %c0_222 = arith.constant 0 : index
    %c0_223 = arith.constant 0 : index
    %466 = vector.load %arg6[%465, %c0_222, %c0_223] : memref<8x8x256xf32, #tpu.memory_space<vmem>>, vector<1x8x128xf32>
    %467 = vector.shape_cast %466 : vector<1x8x128xf32> to vector<8x128xf32>
    %468 = vector.shape_cast %417 : vector<8x128xf32> to vector<1x8x128xf32>
    tpu.vector_store %arg6[%465, %c0_222, %c0_223], %468 {strides = array<i32>} : memref<8x8x256xf32, #tpu.memory_space<vmem>>, vector<1x8x128xf32>,
    %469 = arith.index_cast %382 : i32 to index
    %c0_224 = arith.constant 0 : index
    %c128_225 = arith.constant 128 : index
    %470 = vector.load %arg6[%469, %c0_224, %c128_225] : memref<8x8x256xf32, #tpu.memory_space<vmem>>, vector<1x8x128xf32>
    %471 = vector.shape_cast %470 : vector<1x8x128xf32> to vector<8x128xf32>
    %472 = vector.shape_cast %452 : vector<8x128xf32> to vector<1x8x128xf32>
    tpu.vector_store %arg6[%469, %c0_224, %c128_225], %472 {strides = array<i32>} : memref<8x8x256xf32, #tpu.memory_space<vmem>>, vector<1x8x128xf32>,
    %c5_i32 = arith.constant 5 : i32
    %c7_i32_226 = arith.constant 7 : i32
    %473 = arith.subi %c7_i32_226, %c5_i32 : i32
    %474 = arith.index_cast %c5_i32 : i32 to index
    %c0_227 = arith.constant 0 : index
    %c0_228 = arith.constant 0 : index
    %475 = vector.load %arg7[%474, %c0_227, %c0_228] : memref<8x8x512xf32, #tpu.memory_space<vmem>>, vector<1x8x512xf32>
    %476 = vector.shape_cast %475 : vector<1x8x512xf32> to vector<8x512xf32>
    %c0_229 = arith.constant 0 : index
    %c0_230 = arith.constant 0 : index
    %c0_231 = arith.constant 0 : index
    %477 = vector.load %arg9[%c0_229, %c0_230, %c0_231] : memref<2x8x128xf32, #tpu.memory_space<vmem>>, vector<1x8x128xf32>
    %478 = vector.shape_cast %477 : vector<1x8x128xf32> to vector<8x128xf32>
    %c0_232 = arith.constant 0 : index
    %c0_233 = arith.constant 0 : index
    %c0_234 = arith.constant 0 : index
    %479 = vector.load %arg10[%c0_232, %c0_233, %c0_234] : memref<2x8x128xf32, #tpu.memory_space<vmem>>, vector<1x8x128xf32>
    %480 = vector.shape_cast %479 : vector<1x8x128xf32> to vector<8x128xf32>
    %481 = arith.truncf %478 : vector<8x128xf32> to vector<8x128xbf16>
    %cst_235 = arith.constant dense<0.000000e+00> : vector<8x512xf32>
    %482 = tpu.matmul %481, %16, %cst_235 {dimension_numbers = #tpu.dot_dimension_numbers<[1], [0], [0], [1], [0, 0, 1, 1], [], []>} : vector<8x128xbf16>, vector<128x512xbf16>, vector<8x512xf32> -> vector<8x512xf32>
    %483 = arith.addf %476, %482 : vector<8x512xf32>
    %484 = vector.extract_strided_slice %483 {offsets = [0, 0], sizes = [8, 128], strides = [1, 1]} : vector<8x512xf32> to vector<8x128xf32>
    %485 = arith.negf %484 : vector<8x128xf32>
    %486 = math.exp %485 : vector<8x128xf32>
    %cst_236 = arith.constant 1.000000e+00 : f32
    %487 = vector.broadcast %cst_236 : f32 to vector<8x128xf32>
    %488 = arith.addf %487, %486 : vector<8x128xf32>
    %489 = arith.divf %487, %488 : vector<8x128xf32>
    %490 = vector.extract_strided_slice %483 {offsets = [0, 128], sizes = [8, 128], strides = [1, 1]} : vector<8x512xf32> to vector<8x128xf32>
    %491 = arith.negf %490 : vector<8x128xf32>
    %492 = math.exp %491 : vector<8x128xf32>
    %cst_237 = arith.constant 1.000000e+00 : f32
    %493 = vector.broadcast %cst_237 : f32 to vector<8x128xf32>
    %494 = arith.addf %493, %492 : vector<8x128xf32>
    %495 = arith.divf %493, %494 : vector<8x128xf32>
    %496 = vector.extract_strided_slice %483 {offsets = [0, 256], sizes = [8, 128], strides = [1, 1]} : vector<8x512xf32> to vector<8x128xf32>
    %497 = math.tanh %496 : vector<8x128xf32>
    %498 = vector.extract_strided_slice %483 {offsets = [0, 384], sizes = [8, 128], strides = [1, 1]} : vector<8x512xf32> to vector<8x128xf32>
    %499 = arith.negf %498 : vector<8x128xf32>
    %500 = math.exp %499 : vector<8x128xf32>
    %cst_238 = arith.constant 1.000000e+00 : f32
    %501 = vector.broadcast %cst_238 : f32 to vector<8x128xf32>
    %502 = arith.addf %501, %500 : vector<8x128xf32>
    %503 = arith.divf %501, %502 : vector<8x128xf32>
    %504 = arith.mulf %495, %480 : vector<8x128xf32>
    %505 = arith.mulf %489, %497 : vector<8x128xf32>
    %506 = arith.addf %504, %505 : vector<8x128xf32>
    %507 = math.tanh %506 : vector<8x128xf32>
    %508 = arith.mulf %503, %507 : vector<8x128xf32>
    %509 = arith.index_cast %473 : i32 to index
    %c0_239 = arith.constant 0 : index
    %c0_240 = arith.constant 0 : index
    %510 = vector.load %arg8[%509, %c0_239, %c0_240] : memref<8x8x512xf32, #tpu.memory_space<vmem>>, vector<1x8x512xf32>
    %511 = vector.shape_cast %510 : vector<1x8x512xf32> to vector<8x512xf32>
    %c1_241 = arith.constant 1 : index
    %c0_242 = arith.constant 0 : index
    %c0_243 = arith.constant 0 : index
    %512 = vector.load %arg9[%c1_241, %c0_242, %c0_243] : memref<2x8x128xf32, #tpu.memory_space<vmem>>, vector<1x8x128xf32>
    %513 = vector.shape_cast %512 : vector<1x8x128xf32> to vector<8x128xf32>
    %c1_244 = arith.constant 1 : index
    %c0_245 = arith.constant 0 : index
    %c0_246 = arith.constant 0 : index
    %514 = vector.load %arg10[%c1_244, %c0_245, %c0_246] : memref<2x8x128xf32, #tpu.memory_space<vmem>>, vector<1x8x128xf32>
    %515 = vector.shape_cast %514 : vector<1x8x128xf32> to vector<8x128xf32>
    %516 = arith.truncf %513 : vector<8x128xf32> to vector<8x128xbf16>
    %cst_247 = arith.constant dense<0.000000e+00> : vector<8x512xf32>
    %517 = tpu.matmul %516, %17, %cst_247 {dimension_numbers = #tpu.dot_dimension_numbers<[1], [0], [0], [1], [0, 0, 1, 1], [], []>} : vector<8x128xbf16>, vector<128x512xbf16>, vector<8x512xf32> -> vector<8x512xf32>
    %518 = arith.addf %511, %517 : vector<8x512xf32>
    %519 = vector.extract_strided_slice %518 {offsets = [0, 0], sizes = [8, 128], strides = [1, 1]} : vector<8x512xf32> to vector<8x128xf32>
    %520 = arith.negf %519 : vector<8x128xf32>
    %521 = math.exp %520 : vector<8x128xf32>
    %cst_248 = arith.constant 1.000000e+00 : f32
    %522 = vector.broadcast %cst_248 : f32 to vector<8x128xf32>
    %523 = arith.addf %522, %521 : vector<8x128xf32>
    %524 = arith.divf %522, %523 : vector<8x128xf32>
    %525 = vector.extract_strided_slice %518 {offsets = [0, 128], sizes = [8, 128], strides = [1, 1]} : vector<8x512xf32> to vector<8x128xf32>
    %526 = arith.negf %525 : vector<8x128xf32>
    %527 = math.exp %526 : vector<8x128xf32>
    %cst_249 = arith.constant 1.000000e+00 : f32
    %528 = vector.broadcast %cst_249 : f32 to vector<8x128xf32>
    %529 = arith.addf %528, %527 : vector<8x128xf32>
    %530 = arith.divf %528, %529 : vector<8x128xf32>
    %531 = vector.extract_strided_slice %518 {offsets = [0, 256], sizes = [8, 128], strides = [1, 1]} : vector<8x512xf32> to vector<8x128xf32>
    %532 = math.tanh %531 : vector<8x128xf32>
    %533 = vector.extract_strided_slice %518 {offsets = [0, 384], sizes = [8, 128], strides = [1, 1]} : vector<8x512xf32> to vector<8x128xf32>
    %534 = arith.negf %533 : vector<8x128xf32>
    %535 = math.exp %534 : vector<8x128xf32>
    %cst_250 = arith.constant 1.000000e+00 : f32
    %536 = vector.broadcast %cst_250 : f32 to vector<8x128xf32>
    %537 = arith.addf %536, %535 : vector<8x128xf32>
    %538 = arith.divf %536, %537 : vector<8x128xf32>
    %539 = arith.mulf %530, %515 : vector<8x128xf32>
    %540 = arith.mulf %524, %532 : vector<8x128xf32>
    %541 = arith.addf %539, %540 : vector<8x128xf32>
    %542 = math.tanh %541 : vector<8x128xf32>
    %543 = arith.mulf %538, %542 : vector<8x128xf32>
    %c0_251 = arith.constant 0 : index
    %c0_252 = arith.constant 0 : index
    %c0_253 = arith.constant 0 : index
    %544 = vector.load %arg9[%c0_251, %c0_252, %c0_253] : memref<2x8x128xf32, #tpu.memory_space<vmem>>, vector<1x8x128xf32>
    %545 = vector.shape_cast %544 : vector<1x8x128xf32> to vector<8x128xf32>
    %546 = vector.shape_cast %508 : vector<8x128xf32> to vector<1x8x128xf32>
    tpu.vector_store %arg9[%c0_251, %c0_252, %c0_253], %546 {strides = array<i32>} : memref<2x8x128xf32, #tpu.memory_space<vmem>>, vector<1x8x128xf32>,
    %c0_254 = arith.constant 0 : index
    %c0_255 = arith.constant 0 : index
    %c0_256 = arith.constant 0 : index
    %547 = vector.load %arg10[%c0_254, %c0_255, %c0_256] : memref<2x8x128xf32, #tpu.memory_space<vmem>>, vector<1x8x128xf32>
    %548 = vector.shape_cast %547 : vector<1x8x128xf32> to vector<8x128xf32>
    %549 = vector.shape_cast %506 : vector<8x128xf32> to vector<1x8x128xf32>
    tpu.vector_store %arg10[%c0_254, %c0_255, %c0_256], %549 {strides = array<i32>} : memref<2x8x128xf32, #tpu.memory_space<vmem>>, vector<1x8x128xf32>,
    %c1_257 = arith.constant 1 : index
    %c0_258 = arith.constant 0 : index
    %c0_259 = arith.constant 0 : index
    %550 = vector.load %arg9[%c1_257, %c0_258, %c0_259] : memref<2x8x128xf32, #tpu.memory_space<vmem>>, vector<1x8x128xf32>
    %551 = vector.shape_cast %550 : vector<1x8x128xf32> to vector<8x128xf32>
    %552 = vector.shape_cast %543 : vector<8x128xf32> to vector<1x8x128xf32>
    tpu.vector_store %arg9[%c1_257, %c0_258, %c0_259], %552 {strides = array<i32>} : memref<2x8x128xf32, #tpu.memory_space<vmem>>, vector<1x8x128xf32>,
    %c1_260 = arith.constant 1 : index
    %c0_261 = arith.constant 0 : index
    %c0_262 = arith.constant 0 : index
    %553 = vector.load %arg10[%c1_260, %c0_261, %c0_262] : memref<2x8x128xf32, #tpu.memory_space<vmem>>, vector<1x8x128xf32>
    %554 = vector.shape_cast %553 : vector<1x8x128xf32> to vector<8x128xf32>
    %555 = vector.shape_cast %541 : vector<8x128xf32> to vector<1x8x128xf32>
    tpu.vector_store %arg10[%c1_260, %c0_261, %c0_262], %555 {strides = array<i32>} : memref<2x8x128xf32, #tpu.memory_space<vmem>>, vector<1x8x128xf32>,
    %556 = arith.index_cast %c5_i32 : i32 to index
    %c0_263 = arith.constant 0 : index
    %c0_264 = arith.constant 0 : index
    %557 = vector.load %arg6[%556, %c0_263, %c0_264] : memref<8x8x256xf32, #tpu.memory_space<vmem>>, vector<1x8x128xf32>
    %558 = vector.shape_cast %557 : vector<1x8x128xf32> to vector<8x128xf32>
    %559 = vector.shape_cast %508 : vector<8x128xf32> to vector<1x8x128xf32>
    tpu.vector_store %arg6[%556, %c0_263, %c0_264], %559 {strides = array<i32>} : memref<8x8x256xf32, #tpu.memory_space<vmem>>, vector<1x8x128xf32>,
    %560 = arith.index_cast %473 : i32 to index
    %c0_265 = arith.constant 0 : index
    %c128_266 = arith.constant 128 : index
    %561 = vector.load %arg6[%560, %c0_265, %c128_266] : memref<8x8x256xf32, #tpu.memory_space<vmem>>, vector<1x8x128xf32>
    %562 = vector.shape_cast %561 : vector<1x8x128xf32> to vector<8x128xf32>
    %563 = vector.shape_cast %543 : vector<8x128xf32> to vector<1x8x128xf32>
    tpu.vector_store %arg6[%560, %c0_265, %c128_266], %563 {strides = array<i32>} : memref<8x8x256xf32, #tpu.memory_space<vmem>>, vector<1x8x128xf32>,
    %c6_i32 = arith.constant 6 : i32
    %c7_i32_267 = arith.constant 7 : i32
    %564 = arith.subi %c7_i32_267, %c6_i32 : i32
    %565 = arith.index_cast %c6_i32 : i32 to index
    %c0_268 = arith.constant 0 : index
    %c0_269 = arith.constant 0 : index
    %566 = vector.load %arg7[%565, %c0_268, %c0_269] : memref<8x8x512xf32, #tpu.memory_space<vmem>>, vector<1x8x512xf32>
    %567 = vector.shape_cast %566 : vector<1x8x512xf32> to vector<8x512xf32>
    %c0_270 = arith.constant 0 : index
    %c0_271 = arith.constant 0 : index
    %c0_272 = arith.constant 0 : index
    %568 = vector.load %arg9[%c0_270, %c0_271, %c0_272] : memref<2x8x128xf32, #tpu.memory_space<vmem>>, vector<1x8x128xf32>
    %569 = vector.shape_cast %568 : vector<1x8x128xf32> to vector<8x128xf32>
    %c0_273 = arith.constant 0 : index
    %c0_274 = arith.constant 0 : index
    %c0_275 = arith.constant 0 : index
    %570 = vector.load %arg10[%c0_273, %c0_274, %c0_275] : memref<2x8x128xf32, #tpu.memory_space<vmem>>, vector<1x8x128xf32>
    %571 = vector.shape_cast %570 : vector<1x8x128xf32> to vector<8x128xf32>
    %572 = arith.truncf %569 : vector<8x128xf32> to vector<8x128xbf16>
    %cst_276 = arith.constant dense<0.000000e+00> : vector<8x512xf32>
    %573 = tpu.matmul %572, %16, %cst_276 {dimension_numbers = #tpu.dot_dimension_numbers<[1], [0], [0], [1], [0, 0, 1, 1], [], []>} : vector<8x128xbf16>, vector<128x512xbf16>, vector<8x512xf32> -> vector<8x512xf32>
    %574 = arith.addf %567, %573 : vector<8x512xf32>
    %575 = vector.extract_strided_slice %574 {offsets = [0, 0], sizes = [8, 128], strides = [1, 1]} : vector<8x512xf32> to vector<8x128xf32>
    %576 = arith.negf %575 : vector<8x128xf32>
    %577 = math.exp %576 : vector<8x128xf32>
    %cst_277 = arith.constant 1.000000e+00 : f32
    %578 = vector.broadcast %cst_277 : f32 to vector<8x128xf32>
    %579 = arith.addf %578, %577 : vector<8x128xf32>
    %580 = arith.divf %578, %579 : vector<8x128xf32>
    %581 = vector.extract_strided_slice %574 {offsets = [0, 128], sizes = [8, 128], strides = [1, 1]} : vector<8x512xf32> to vector<8x128xf32>
    %582 = arith.negf %581 : vector<8x128xf32>
    %583 = math.exp %582 : vector<8x128xf32>
    %cst_278 = arith.constant 1.000000e+00 : f32
    %584 = vector.broadcast %cst_278 : f32 to vector<8x128xf32>
    %585 = arith.addf %584, %583 : vector<8x128xf32>
    %586 = arith.divf %584, %585 : vector<8x128xf32>
    %587 = vector.extract_strided_slice %574 {offsets = [0, 256], sizes = [8, 128], strides = [1, 1]} : vector<8x512xf32> to vector<8x128xf32>
    %588 = math.tanh %587 : vector<8x128xf32>
    %589 = vector.extract_strided_slice %574 {offsets = [0, 384], sizes = [8, 128], strides = [1, 1]} : vector<8x512xf32> to vector<8x128xf32>
    %590 = arith.negf %589 : vector<8x128xf32>
    %591 = math.exp %590 : vector<8x128xf32>
    %cst_279 = arith.constant 1.000000e+00 : f32
    %592 = vector.broadcast %cst_279 : f32 to vector<8x128xf32>
    %593 = arith.addf %592, %591 : vector<8x128xf32>
    %594 = arith.divf %592, %593 : vector<8x128xf32>
    %595 = arith.mulf %586, %571 : vector<8x128xf32>
    %596 = arith.mulf %580, %588 : vector<8x128xf32>
    %597 = arith.addf %595, %596 : vector<8x128xf32>
    %598 = math.tanh %597 : vector<8x128xf32>
    %599 = arith.mulf %594, %598 : vector<8x128xf32>
    %600 = arith.index_cast %564 : i32 to index
    %c0_280 = arith.constant 0 : index
    %c0_281 = arith.constant 0 : index
    %601 = vector.load %arg8[%600, %c0_280, %c0_281] : memref<8x8x512xf32, #tpu.memory_space<vmem>>, vector<1x8x512xf32>
    %602 = vector.shape_cast %601 : vector<1x8x512xf32> to vector<8x512xf32>
    %c1_282 = arith.constant 1 : index
    %c0_283 = arith.constant 0 : index
    %c0_284 = arith.constant 0 : index
    %603 = vector.load %arg9[%c1_282, %c0_283, %c0_284] : memref<2x8x128xf32, #tpu.memory_space<vmem>>, vector<1x8x128xf32>
    %604 = vector.shape_cast %603 : vector<1x8x128xf32> to vector<8x128xf32>
    %c1_285 = arith.constant 1 : index
    %c0_286 = arith.constant 0 : index
    %c0_287 = arith.constant 0 : index
    %605 = vector.load %arg10[%c1_285, %c0_286, %c0_287] : memref<2x8x128xf32, #tpu.memory_space<vmem>>, vector<1x8x128xf32>
    %606 = vector.shape_cast %605 : vector<1x8x128xf32> to vector<8x128xf32>
    %607 = arith.truncf %604 : vector<8x128xf32> to vector<8x128xbf16>
    %cst_288 = arith.constant dense<0.000000e+00> : vector<8x512xf32>
    %608 = tpu.matmul %607, %17, %cst_288 {dimension_numbers = #tpu.dot_dimension_numbers<[1], [0], [0], [1], [0, 0, 1, 1], [], []>} : vector<8x128xbf16>, vector<128x512xbf16>, vector<8x512xf32> -> vector<8x512xf32>
    %609 = arith.addf %602, %608 : vector<8x512xf32>
    %610 = vector.extract_strided_slice %609 {offsets = [0, 0], sizes = [8, 128], strides = [1, 1]} : vector<8x512xf32> to vector<8x128xf32>
    %611 = arith.negf %610 : vector<8x128xf32>
    %612 = math.exp %611 : vector<8x128xf32>
    %cst_289 = arith.constant 1.000000e+00 : f32
    %613 = vector.broadcast %cst_289 : f32 to vector<8x128xf32>
    %614 = arith.addf %613, %612 : vector<8x128xf32>
    %615 = arith.divf %613, %614 : vector<8x128xf32>
    %616 = vector.extract_strided_slice %609 {offsets = [0, 128], sizes = [8, 128], strides = [1, 1]} : vector<8x512xf32> to vector<8x128xf32>
    %617 = arith.negf %616 : vector<8x128xf32>
    %618 = math.exp %617 : vector<8x128xf32>
    %cst_290 = arith.constant 1.000000e+00 : f32
    %619 = vector.broadcast %cst_290 : f32 to vector<8x128xf32>
    %620 = arith.addf %619, %618 : vector<8x128xf32>
    %621 = arith.divf %619, %620 : vector<8x128xf32>
    %622 = vector.extract_strided_slice %609 {offsets = [0, 256], sizes = [8, 128], strides = [1, 1]} : vector<8x512xf32> to vector<8x128xf32>
    %623 = math.tanh %622 : vector<8x128xf32>
    %624 = vector.extract_strided_slice %609 {offsets = [0, 384], sizes = [8, 128], strides = [1, 1]} : vector<8x512xf32> to vector<8x128xf32>
    %625 = arith.negf %624 : vector<8x128xf32>
    %626 = math.exp %625 : vector<8x128xf32>
    %cst_291 = arith.constant 1.000000e+00 : f32
    %627 = vector.broadcast %cst_291 : f32 to vector<8x128xf32>
    %628 = arith.addf %627, %626 : vector<8x128xf32>
    %629 = arith.divf %627, %628 : vector<8x128xf32>
    %630 = arith.mulf %621, %606 : vector<8x128xf32>
    %631 = arith.mulf %615, %623 : vector<8x128xf32>
    %632 = arith.addf %630, %631 : vector<8x128xf32>
    %633 = math.tanh %632 : vector<8x128xf32>
    %634 = arith.mulf %629, %633 : vector<8x128xf32>
    %c0_292 = arith.constant 0 : index
    %c0_293 = arith.constant 0 : index
    %c0_294 = arith.constant 0 : index
    %635 = vector.load %arg9[%c0_292, %c0_293, %c0_294] : memref<2x8x128xf32, #tpu.memory_space<vmem>>, vector<1x8x128xf32>
    %636 = vector.shape_cast %635 : vector<1x8x128xf32> to vector<8x128xf32>
    %637 = vector.shape_cast %599 : vector<8x128xf32> to vector<1x8x128xf32>
    tpu.vector_store %arg9[%c0_292, %c0_293, %c0_294], %637 {strides = array<i32>} : memref<2x8x128xf32, #tpu.memory_space<vmem>>, vector<1x8x128xf32>,
    %c0_295 = arith.constant 0 : index
    %c0_296 = arith.constant 0 : index
    %c0_297 = arith.constant 0 : index
    %638 = vector.load %arg10[%c0_295, %c0_296, %c0_297] : memref<2x8x128xf32, #tpu.memory_space<vmem>>, vector<1x8x128xf32>
    %639 = vector.shape_cast %638 : vector<1x8x128xf32> to vector<8x128xf32>
    %640 = vector.shape_cast %597 : vector<8x128xf32> to vector<1x8x128xf32>
    tpu.vector_store %arg10[%c0_295, %c0_296, %c0_297], %640 {strides = array<i32>} : memref<2x8x128xf32, #tpu.memory_space<vmem>>, vector<1x8x128xf32>,
    %c1_298 = arith.constant 1 : index
    %c0_299 = arith.constant 0 : index
    %c0_300 = arith.constant 0 : index
    %641 = vector.load %arg9[%c1_298, %c0_299, %c0_300] : memref<2x8x128xf32, #tpu.memory_space<vmem>>, vector<1x8x128xf32>
    %642 = vector.shape_cast %641 : vector<1x8x128xf32> to vector<8x128xf32>
    %643 = vector.shape_cast %634 : vector<8x128xf32> to vector<1x8x128xf32>
    tpu.vector_store %arg9[%c1_298, %c0_299, %c0_300], %643 {strides = array<i32>} : memref<2x8x128xf32, #tpu.memory_space<vmem>>, vector<1x8x128xf32>,
    %c1_301 = arith.constant 1 : index
    %c0_302 = arith.constant 0 : index
    %c0_303 = arith.constant 0 : index
    %644 = vector.load %arg10[%c1_301, %c0_302, %c0_303] : memref<2x8x128xf32, #tpu.memory_space<vmem>>, vector<1x8x128xf32>
    %645 = vector.shape_cast %644 : vector<1x8x128xf32> to vector<8x128xf32>
    %646 = vector.shape_cast %632 : vector<8x128xf32> to vector<1x8x128xf32>
    tpu.vector_store %arg10[%c1_301, %c0_302, %c0_303], %646 {strides = array<i32>} : memref<2x8x128xf32, #tpu.memory_space<vmem>>, vector<1x8x128xf32>,
    %647 = arith.index_cast %c6_i32 : i32 to index
    %c0_304 = arith.constant 0 : index
    %c0_305 = arith.constant 0 : index
    %648 = vector.load %arg6[%647, %c0_304, %c0_305] : memref<8x8x256xf32, #tpu.memory_space<vmem>>, vector<1x8x128xf32>
    %649 = vector.shape_cast %648 : vector<1x8x128xf32> to vector<8x128xf32>
    %650 = vector.shape_cast %599 : vector<8x128xf32> to vector<1x8x128xf32>
    tpu.vector_store %arg6[%647, %c0_304, %c0_305], %650 {strides = array<i32>} : memref<8x8x256xf32, #tpu.memory_space<vmem>>, vector<1x8x128xf32>,
    %651 = arith.index_cast %564 : i32 to index
    %c0_306 = arith.constant 0 : index
    %c128_307 = arith.constant 128 : index
    %652 = vector.load %arg6[%651, %c0_306, %c128_307] : memref<8x8x256xf32, #tpu.memory_space<vmem>>, vector<1x8x128xf32>
    %653 = vector.shape_cast %652 : vector<1x8x128xf32> to vector<8x128xf32>
    %654 = vector.shape_cast %634 : vector<8x128xf32> to vector<1x8x128xf32>
    tpu.vector_store %arg6[%651, %c0_306, %c128_307], %654 {strides = array<i32>} : memref<8x8x256xf32, #tpu.memory_space<vmem>>, vector<1x8x128xf32>,
    %c7_i32_308 = arith.constant 7 : i32
    %c7_i32_309 = arith.constant 7 : i32
    %655 = arith.subi %c7_i32_309, %c7_i32_308 : i32
    %656 = arith.index_cast %c7_i32_308 : i32 to index
    %c0_310 = arith.constant 0 : index
    %c0_311 = arith.constant 0 : index
    %657 = vector.load %arg7[%656, %c0_310, %c0_311] : memref<8x8x512xf32, #tpu.memory_space<vmem>>, vector<1x8x512xf32>
    %658 = vector.shape_cast %657 : vector<1x8x512xf32> to vector<8x512xf32>
    %c0_312 = arith.constant 0 : index
    %c0_313 = arith.constant 0 : index
    %c0_314 = arith.constant 0 : index
    %659 = vector.load %arg9[%c0_312, %c0_313, %c0_314] : memref<2x8x128xf32, #tpu.memory_space<vmem>>, vector<1x8x128xf32>
    %660 = vector.shape_cast %659 : vector<1x8x128xf32> to vector<8x128xf32>
    %c0_315 = arith.constant 0 : index
    %c0_316 = arith.constant 0 : index
    %c0_317 = arith.constant 0 : index
    %661 = vector.load %arg10[%c0_315, %c0_316, %c0_317] : memref<2x8x128xf32, #tpu.memory_space<vmem>>, vector<1x8x128xf32>
    %662 = vector.shape_cast %661 : vector<1x8x128xf32> to vector<8x128xf32>
    %663 = arith.truncf %660 : vector<8x128xf32> to vector<8x128xbf16>
    %cst_318 = arith.constant dense<0.000000e+00> : vector<8x512xf32>
    %664 = tpu.matmul %663, %16, %cst_318 {dimension_numbers = #tpu.dot_dimension_numbers<[1], [0], [0], [1], [0, 0, 1, 1], [], []>} : vector<8x128xbf16>, vector<128x512xbf16>, vector<8x512xf32> -> vector<8x512xf32>
    %665 = arith.addf %658, %664 : vector<8x512xf32>
    %666 = vector.extract_strided_slice %665 {offsets = [0, 0], sizes = [8, 128], strides = [1, 1]} : vector<8x512xf32> to vector<8x128xf32>
    %667 = arith.negf %666 : vector<8x128xf32>
    %668 = math.exp %667 : vector<8x128xf32>
    %cst_319 = arith.constant 1.000000e+00 : f32
    %669 = vector.broadcast %cst_319 : f32 to vector<8x128xf32>
    %670 = arith.addf %669, %668 : vector<8x128xf32>
    %671 = arith.divf %669, %670 : vector<8x128xf32>
    %672 = vector.extract_strided_slice %665 {offsets = [0, 128], sizes = [8, 128], strides = [1, 1]} : vector<8x512xf32> to vector<8x128xf32>
    %673 = arith.negf %672 : vector<8x128xf32>
    %674 = math.exp %673 : vector<8x128xf32>
    %cst_320 = arith.constant 1.000000e+00 : f32
    %675 = vector.broadcast %cst_320 : f32 to vector<8x128xf32>
    %676 = arith.addf %675, %674 : vector<8x128xf32>
    %677 = arith.divf %675, %676 : vector<8x128xf32>
    %678 = vector.extract_strided_slice %665 {offsets = [0, 256], sizes = [8, 128], strides = [1, 1]} : vector<8x512xf32> to vector<8x128xf32>
    %679 = math.tanh %678 : vector<8x128xf32>
    %680 = vector.extract_strided_slice %665 {offsets = [0, 384], sizes = [8, 128], strides = [1, 1]} : vector<8x512xf32> to vector<8x128xf32>
    %681 = arith.negf %680 : vector<8x128xf32>
    %682 = math.exp %681 : vector<8x128xf32>
    %cst_321 = arith.constant 1.000000e+00 : f32
    %683 = vector.broadcast %cst_321 : f32 to vector<8x128xf32>
    %684 = arith.addf %683, %682 : vector<8x128xf32>
    %685 = arith.divf %683, %684 : vector<8x128xf32>
    %686 = arith.mulf %677, %662 : vector<8x128xf32>
    %687 = arith.mulf %671, %679 : vector<8x128xf32>
    %688 = arith.addf %686, %687 : vector<8x128xf32>
    %689 = math.tanh %688 : vector<8x128xf32>
    %690 = arith.mulf %685, %689 : vector<8x128xf32>
    %691 = arith.index_cast %655 : i32 to index
    %c0_322 = arith.constant 0 : index
    %c0_323 = arith.constant 0 : index
    %692 = vector.load %arg8[%691, %c0_322, %c0_323] : memref<8x8x512xf32, #tpu.memory_space<vmem>>, vector<1x8x512xf32>
    %693 = vector.shape_cast %692 : vector<1x8x512xf32> to vector<8x512xf32>
    %c1_324 = arith.constant 1 : index
    %c0_325 = arith.constant 0 : index
    %c0_326 = arith.constant 0 : index
    %694 = vector.load %arg9[%c1_324, %c0_325, %c0_326] : memref<2x8x128xf32, #tpu.memory_space<vmem>>, vector<1x8x128xf32>
    %695 = vector.shape_cast %694 : vector<1x8x128xf32> to vector<8x128xf32>
    %c1_327 = arith.constant 1 : index
    %c0_328 = arith.constant 0 : index
    %c0_329 = arith.constant 0 : index
    %696 = vector.load %arg10[%c1_327, %c0_328, %c0_329] : memref<2x8x128xf32, #tpu.memory_space<vmem>>, vector<1x8x128xf32>
    %697 = vector.shape_cast %696 : vector<1x8x128xf32> to vector<8x128xf32>
    %698 = arith.truncf %695 : vector<8x128xf32> to vector<8x128xbf16>
    %cst_330 = arith.constant dense<0.000000e+00> : vector<8x512xf32>
    %699 = tpu.matmul %698, %17, %cst_330 {dimension_numbers = #tpu.dot_dimension_numbers<[1], [0], [0], [1], [0, 0, 1, 1], [], []>} : vector<8x128xbf16>, vector<128x512xbf16>, vector<8x512xf32> -> vector<8x512xf32>
    %700 = arith.addf %693, %699 : vector<8x512xf32>
    %701 = vector.extract_strided_slice %700 {offsets = [0, 0], sizes = [8, 128], strides = [1, 1]} : vector<8x512xf32> to vector<8x128xf32>
    %702 = arith.negf %701 : vector<8x128xf32>
    %703 = math.exp %702 : vector<8x128xf32>
    %cst_331 = arith.constant 1.000000e+00 : f32
    %704 = vector.broadcast %cst_331 : f32 to vector<8x128xf32>
    %705 = arith.addf %704, %703 : vector<8x128xf32>
    %706 = arith.divf %704, %705 : vector<8x128xf32>
    %707 = vector.extract_strided_slice %700 {offsets = [0, 128], sizes = [8, 128], strides = [1, 1]} : vector<8x512xf32> to vector<8x128xf32>
    %708 = arith.negf %707 : vector<8x128xf32>
    %709 = math.exp %708 : vector<8x128xf32>
    %cst_332 = arith.constant 1.000000e+00 : f32
    %710 = vector.broadcast %cst_332 : f32 to vector<8x128xf32>
    %711 = arith.addf %710, %709 : vector<8x128xf32>
    %712 = arith.divf %710, %711 : vector<8x128xf32>
    %713 = vector.extract_strided_slice %700 {offsets = [0, 256], sizes = [8, 128], strides = [1, 1]} : vector<8x512xf32> to vector<8x128xf32>
    %714 = math.tanh %713 : vector<8x128xf32>
    %715 = vector.extract_strided_slice %700 {offsets = [0, 384], sizes = [8, 128], strides = [1, 1]} : vector<8x512xf32> to vector<8x128xf32>
    %716 = arith.negf %715 : vector<8x128xf32>
    %717 = math.exp %716 : vector<8x128xf32>
    %cst_333 = arith.constant 1.000000e+00 : f32
    %718 = vector.broadcast %cst_333 : f32 to vector<8x128xf32>
    %719 = arith.addf %718, %717 : vector<8x128xf32>
    %720 = arith.divf %718, %719 : vector<8x128xf32>
    %721 = arith.mulf %712, %697 : vector<8x128xf32>
    %722 = arith.mulf %706, %714 : vector<8x128xf32>
    %723 = arith.addf %721, %722 : vector<8x128xf32>
    %724 = math.tanh %723 : vector<8x128xf32>
    %725 = arith.mulf %720, %724 : vector<8x128xf32>
    %c0_334 = arith.constant 0 : index
    %c0_335 = arith.constant 0 : index
    %c0_336 = arith.constant 0 : index
    %726 = vector.load %arg9[%c0_334, %c0_335, %c0_336] : memref<2x8x128xf32, #tpu.memory_space<vmem>>, vector<1x8x128xf32>
    %727 = vector.shape_cast %726 : vector<1x8x128xf32> to vector<8x128xf32>
    %728 = vector.shape_cast %690 : vector<8x128xf32> to vector<1x8x128xf32>
    tpu.vector_store %arg9[%c0_334, %c0_335, %c0_336], %728 {strides = array<i32>} : memref<2x8x128xf32, #tpu.memory_space<vmem>>, vector<1x8x128xf32>,
    %c0_337 = arith.constant 0 : index
    %c0_338 = arith.constant 0 : index
    %c0_339 = arith.constant 0 : index
    %729 = vector.load %arg10[%c0_337, %c0_338, %c0_339] : memref<2x8x128xf32, #tpu.memory_space<vmem>>, vector<1x8x128xf32>
    %730 = vector.shape_cast %729 : vector<1x8x128xf32> to vector<8x128xf32>
    %731 = vector.shape_cast %688 : vector<8x128xf32> to vector<1x8x128xf32>
    tpu.vector_store %arg10[%c0_337, %c0_338, %c0_339], %731 {strides = array<i32>} : memref<2x8x128xf32, #tpu.memory_space<vmem>>, vector<1x8x128xf32>,
    %c1_340 = arith.constant 1 : index
    %c0_341 = arith.constant 0 : index
    %c0_342 = arith.constant 0 : index
    %732 = vector.load %arg9[%c1_340, %c0_341, %c0_342] : memref<2x8x128xf32, #tpu.memory_space<vmem>>, vector<1x8x128xf32>
    %733 = vector.shape_cast %732 : vector<1x8x128xf32> to vector<8x128xf32>
    %734 = vector.shape_cast %725 : vector<8x128xf32> to vector<1x8x128xf32>
    tpu.vector_store %arg9[%c1_340, %c0_341, %c0_342], %734 {strides = array<i32>} : memref<2x8x128xf32, #tpu.memory_space<vmem>>, vector<1x8x128xf32>,
    %c1_343 = arith.constant 1 : index
    %c0_344 = arith.constant 0 : index
    %c0_345 = arith.constant 0 : index
    %735 = vector.load %arg10[%c1_343, %c0_344, %c0_345] : memref<2x8x128xf32, #tpu.memory_space<vmem>>, vector<1x8x128xf32>
    %736 = vector.shape_cast %735 : vector<1x8x128xf32> to vector<8x128xf32>
    %737 = vector.shape_cast %723 : vector<8x128xf32> to vector<1x8x128xf32>
    tpu.vector_store %arg10[%c1_343, %c0_344, %c0_345], %737 {strides = array<i32>} : memref<2x8x128xf32, #tpu.memory_space<vmem>>, vector<1x8x128xf32>,
    %738 = arith.index_cast %c7_i32_308 : i32 to index
    %c0_346 = arith.constant 0 : index
    %c0_347 = arith.constant 0 : index
    %739 = vector.load %arg6[%738, %c0_346, %c0_347] : memref<8x8x256xf32, #tpu.memory_space<vmem>>, vector<1x8x128xf32>
    %740 = vector.shape_cast %739 : vector<1x8x128xf32> to vector<8x128xf32>
    %741 = vector.shape_cast %690 : vector<8x128xf32> to vector<1x8x128xf32>
    tpu.vector_store %arg6[%738, %c0_346, %c0_347], %741 {strides = array<i32>} : memref<8x8x256xf32, #tpu.memory_space<vmem>>, vector<1x8x128xf32>,
    %742 = arith.index_cast %655 : i32 to index
    %c0_348 = arith.constant 0 : index
    %c128_349 = arith.constant 128 : index
    %743 = vector.load %arg6[%742, %c0_348, %c128_349] : memref<8x8x256xf32, #tpu.memory_space<vmem>>, vector<1x8x128xf32>
    %744 = vector.shape_cast %743 : vector<1x8x128xf32> to vector<8x128xf32>
    %745 = vector.shape_cast %725 : vector<8x128xf32> to vector<1x8x128xf32>
    tpu.vector_store %arg6[%742, %c0_348, %c128_349], %745 {strides = array<i32>} : memref<8x8x256xf32, #tpu.memory_space<vmem>>, vector<1x8x128xf32>,
    %c8_i32 = arith.constant 8 : i32
    return
  }
  func.func @transform_0(%arg0: i32) -> (i32, i32, i32) {
    %c0_i32 = arith.constant 0 : i32
    %c0_i32_0 = arith.constant 0 : i32
    %c0_i32_1 = arith.constant 0 : i32
    return %c0_i32, %arg0, %c0_i32_0 : i32, i32, i32
  }
  func.func @transform_1(%arg0: i32) -> (i32, i32) {
    %c0_i32 = arith.constant 0 : i32
    %c0_i32_0 = arith.constant 0 : i32
    %c0_i32_1 = arith.constant 0 : i32
    return %c0_i32, %c0_i32_0 : i32, i32
  }
  func.func @transform_2(%arg0: i32) -> (i32, i32) {
    %c0_i32 = arith.constant 0 : i32
    %c0_i32_0 = arith.constant 0 : i32
    %c0_i32_1 = arith.constant 0 : i32
    return %c0_i32, %c0_i32_0 : i32, i32
  }
  func.func @transform_3(%arg0: i32) -> (i32, i32) {
    %c0_i32 = arith.constant 0 : i32
    %c0_i32_0 = arith.constant 0 : i32
    %c0_i32_1 = arith.constant 0 : i32
    return %c0_i32, %c0_i32_0 : i32, i32
  }
  func.func @transform_4(%arg0: i32) -> (i32, i32) {
    %c0_i32 = arith.constant 0 : i32
    %c0_i32_0 = arith.constant 0 : i32
    %c0_i32_1 = arith.constant 0 : i32
    return %c0_i32, %c0_i32_0 : i32, i32
  }
  func.func @transform_5(%arg0: i32) -> (i32, i32, i32) {
    %c0_i32 = arith.constant 0 : i32
    %c0_i32_0 = arith.constant 0 : i32
    %c0_i32_1 = arith.constant 0 : i32
    return %c0_i32, %arg0, %c0_i32_0 : i32, i32, i32
  }
}

module attributes {stable_mosaic.version = 11 : i64} {
  func.func @bilstm_layer_kernel(%arg0: i32, %arg1: memref<8x8x256xbf16, #tpu.memory_space<vmem>>, %arg2: memref<256x1024xbf16, #tpu.memory_space<vmem>>, %arg3: memref<128x512xbf16, #tpu.memory_space<vmem>>, %arg4: memref<128x512xbf16, #tpu.memory_space<vmem>>, %arg5: memref<1x1024xf32, #tpu.memory_space<vmem>>, %arg6: memref<8x8x256xf32, #tpu.memory_space<vmem>>, %arg7: memref<8x8x512xf32, #tpu.memory_space<vmem>>, %arg8: memref<8x8x512xf32, #tpu.memory_space<vmem>>, %arg9: memref<2x8x128xf32, #tpu.memory_space<vmem>>, %arg10: memref<2x8x128xf32, #tpu.memory_space<vmem>>) attributes {dimension_semantics = [#tpu.dimension_semantics<parallel>], iteration_bounds = array<i64: 1>, scalar_prefetch = 0 : i64, scratch_operands = 4 : i64, tpu.core_type = #tpu.core_type<tc>, window_params = [{transform_indices = @transform_0, window_bounds = array<i64: 8, 8, 256>}, {pipeline_mode = #tpu.pipeline_mode<synchronous>, transform_indices = @transform_1, window_bounds = array<i64: 256, 1024>}, {pipeline_mode = #tpu.pipeline_mode<synchronous>, transform_indices = @transform_2, window_bounds = array<i64: 128, 512>}, {pipeline_mode = #tpu.pipeline_mode<synchronous>, transform_indices = @transform_3, window_bounds = array<i64: 128, 512>}, {pipeline_mode = #tpu.pipeline_mode<synchronous>, transform_indices = @transform_4, window_bounds = array<i64: 1, 1024>}, {transform_indices = @transform_5, window_bounds = array<i64: 8, 8, 256>}]} {
    %c0 = arith.constant 0 : index
    %c0_0 = arith.constant 0 : index
    %c0_1 = arith.constant 0 : index
    %0 = vector.load %arg1[%c0, %c0_0, %c0_1] : memref<8x8x256xbf16, #tpu.memory_space<vmem>>, vector<8x8x256xbf16>
    %1 = vector.shape_cast %0 : vector<8x8x256xbf16> to vector<64x256xbf16>
    %c0_2 = arith.constant 0 : index
    %c0_3 = arith.constant 0 : index
    %2 = vector.load %arg2[%c0_2, %c0_3] : memref<256x1024xbf16, #tpu.memory_space<vmem>>, vector<256x1024xbf16>
    %cst = arith.constant dense<0.000000e+00> : vector<64x1024xf32>
    %3 = tpu.matmul %1, %2, %cst {dimension_numbers = #tpu.dot_dimension_numbers<[1], [0], [0], [1], [0, 0, 1, 1], [], []>} : vector<64x256xbf16>, vector<256x1024xbf16>, vector<64x1024xf32> -> vector<64x1024xf32>
    %c0_4 = arith.constant 0 : index
    %c0_5 = arith.constant 0 : index
    %4 = vector.load %arg5[%c0_4, %c0_5] : memref<1x1024xf32, #tpu.memory_space<vmem>>, vector<1x1024xf32>
    %5 = vector.broadcast %4 : vector<1x1024xf32> to vector<64x1024xf32>
    %6 = arith.addf %3, %5 : vector<64x1024xf32>
    %7 = vector.shape_cast %6 : vector<64x1024xf32> to vector<8x8x1024xf32>
    %8 = vector.extract_strided_slice %7 {offsets = [0, 0, 0], sizes = [8, 8, 512], strides = [1, 1, 1]} : vector<8x8x1024xf32> to vector<8x8x512xf32>
    %c0_6 = arith.constant 0 : index
    %c0_7 = arith.constant 0 : index
    %c0_8 = arith.constant 0 : index
    %9 = vector.load %arg7[%c0_6, %c0_7, %c0_8] : memref<8x8x512xf32, #tpu.memory_space<vmem>>, vector<8x8x512xf32>
    tpu.vector_store %arg7[%c0_6, %c0_7, %c0_8], %8 {strides = array<i32>} : memref<8x8x512xf32, #tpu.memory_space<vmem>>, vector<8x8x512xf32>,
    %10 = vector.extract_strided_slice %7 {offsets = [0, 0, 512], sizes = [8, 8, 512], strides = [1, 1, 1]} : vector<8x8x1024xf32> to vector<8x8x512xf32>
    %c0_9 = arith.constant 0 : index
    %c0_10 = arith.constant 0 : index
    %c0_11 = arith.constant 0 : index
    %11 = vector.load %arg8[%c0_9, %c0_10, %c0_11] : memref<8x8x512xf32, #tpu.memory_space<vmem>>, vector<8x8x512xf32>
    tpu.vector_store %arg8[%c0_9, %c0_10, %c0_11], %10 {strides = array<i32>} : memref<8x8x512xf32, #tpu.memory_space<vmem>>, vector<8x8x512xf32>,
    %cst_12 = arith.constant 0.000000e+00 : f32
    %12 = vector.broadcast %cst_12 : f32 to vector<2x8x128xf32>
    %c0_13 = arith.constant 0 : index
    %c0_14 = arith.constant 0 : index
    %c0_15 = arith.constant 0 : index
    %13 = vector.load %arg9[%c0_13, %c0_14, %c0_15] : memref<2x8x128xf32, #tpu.memory_space<vmem>>, vector<2x8x128xf32>
    tpu.vector_store %arg9[%c0_13, %c0_14, %c0_15], %12 {strides = array<i32>} : memref<2x8x128xf32, #tpu.memory_space<vmem>>, vector<2x8x128xf32>,
    %cst_16 = arith.constant 0.000000e+00 : f32
    %14 = vector.broadcast %cst_16 : f32 to vector<2x8x128xf32>
    %c0_17 = arith.constant 0 : index
    %c0_18 = arith.constant 0 : index
    %c0_19 = arith.constant 0 : index
    %15 = vector.load %arg10[%c0_17, %c0_18, %c0_19] : memref<2x8x128xf32, #tpu.memory_space<vmem>>, vector<2x8x128xf32>
    tpu.vector_store %arg10[%c0_17, %c0_18, %c0_19], %14 {strides = array<i32>} : memref<2x8x128xf32, #tpu.memory_space<vmem>>, vector<2x8x128xf32>,
    %c0_20 = arith.constant 0 : index
    %c0_21 = arith.constant 0 : index
    %16 = vector.load %arg3[%c0_20, %c0_21] : memref<128x512xbf16, #tpu.memory_space<vmem>>, vector<128x512xbf16>
    %c0_22 = arith.constant 0 : index
    %c0_23 = arith.constant 0 : index
    %17 = vector.load %arg4[%c0_22, %c0_23] : memref<128x512xbf16, #tpu.memory_space<vmem>>, vector<128x512xbf16>
    %c0_i32 = arith.constant 0 : i32
    %c7_i32 = arith.constant 7 : i32
    %18 = arith.subi %c7_i32, %c0_i32 : i32
    %19 = arith.index_cast %c0_i32 : i32 to index
    %c0_24 = arith.constant 0 : index
    %c0_25 = arith.constant 0 : index
    %20 = vector.load %arg7[%19, %c0_24, %c0_25] : memref<8x8x512xf32, #tpu.memory_space<vmem>>, vector<1x8x512xf32>
    %21 = vector.shape_cast %20 : vector<1x8x512xf32> to vector<8x512xf32>
    %c0_26 = arith.constant 0 : index
    %c0_27 = arith.constant 0 : index
    %c0_28 = arith.constant 0 : index
    %22 = vector.load %arg9[%c0_26, %c0_27, %c0_28] : memref<2x8x128xf32, #tpu.memory_space<vmem>>, vector<1x8x128xf32>
    %23 = vector.shape_cast %22 : vector<1x8x128xf32> to vector<8x128xf32>
    %c0_29 = arith.constant 0 : index
    %c0_30 = arith.constant 0 : index
    %c0_31 = arith.constant 0 : index
    %24 = vector.load %arg10[%c0_29, %c0_30, %c0_31] : memref<2x8x128xf32, #tpu.memory_space<vmem>>, vector<1x8x128xf32>
    %25 = vector.shape_cast %24 : vector<1x8x128xf32> to vector<8x128xf32>
    %26 = arith.truncf %23 : vector<8x128xf32> to vector<8x128xbf16>
    %cst_32 = arith.constant dense<0.000000e+00> : vector<8x512xf32>
    %27 = tpu.matmul %26, %16, %cst_32 {dimension_numbers = #tpu.dot_dimension_numbers<[1], [0], [0], [1], [0, 0, 1, 1], [], []>} : vector<8x128xbf16>, vector<128x512xbf16>, vector<8x512xf32> -> vector<8x512xf32>
    %28 = arith.addf %21, %27 : vector<8x512xf32>
    %29 = vector.extract_strided_slice %28 {offsets = [0, 0], sizes = [8, 128], strides = [1, 1]} : vector<8x512xf32> to vector<8x128xf32>
    %30 = arith.negf %29 : vector<8x128xf32>
    %31 = math.exp %30 : vector<8x128xf32>
    %cst_33 = arith.constant 1.000000e+00 : f32
    %32 = vector.broadcast %cst_33 : f32 to vector<8x128xf32>
    %33 = arith.addf %32, %31 : vector<8x128xf32>
    %34 = arith.divf %32, %33 : vector<8x128xf32>
    %35 = vector.extract_strided_slice %28 {offsets = [0, 128], sizes = [8, 128], strides = [1, 1]} : vector<8x512xf32> to vector<8x128xf32>
    %36 = arith.negf %35 : vector<8x128xf32>
    %37 = math.exp %36 : vector<8x128xf32>
    %cst_34 = arith.constant 1.000000e+00 : f32
    %38 = vector.broadcast %cst_34 : f32 to vector<8x128xf32>
    %39 = arith.addf %38, %37 : vector<8x128xf32>
    %40 = arith.divf %38, %39 : vector<8x128xf32>
    %41 = vector.extract_strided_slice %28 {offsets = [0, 256], sizes = [8, 128], strides = [1, 1]} : vector<8x512xf32> to vector<8x128xf32>
    %42 = math.tanh %41 : vector<8x128xf32>
    %43 = vector.extract_strided_slice %28 {offsets = [0, 384], sizes = [8, 128], strides = [1, 1]} : vector<8x512xf32> to vector<8x128xf32>
    %44 = arith.negf %43 : vector<8x128xf32>
    %45 = math.exp %44 : vector<8x128xf32>
    %cst_35 = arith.constant 1.000000e+00 : f32
    %46 = vector.broadcast %cst_35 : f32 to vector<8x128xf32>
    %47 = arith.addf %46, %45 : vector<8x128xf32>
    %48 = arith.divf %46, %47 : vector<8x128xf32>
    %49 = arith.mulf %40, %25 : vector<8x128xf32>
    %50 = arith.mulf %34, %42 : vector<8x128xf32>
    %51 = arith.addf %49, %50 : vector<8x128xf32>
    %52 = math.tanh %51 : vector<8x128xf32>
    %53 = arith.mulf %48, %52 : vector<8x128xf32>
    %54 = arith.index_cast %18 : i32 to index
    %c0_36 = arith.constant 0 : index
    %c0_37 = arith.constant 0 : index
    %55 = vector.load %arg8[%54, %c0_36, %c0_37] : memref<8x8x512xf32, #tpu.memory_space<vmem>>, vector<1x8x512xf32>
    %56 = vector.shape_cast %55 : vector<1x8x512xf32> to vector<8x512xf32>
    %c1 = arith.constant 1 : index
    %c0_38 = arith.constant 0 : index
    %c0_39 = arith.constant 0 : index
    %57 = vector.load %arg9[%c1, %c0_38, %c0_39] : memref<2x8x128xf32, #tpu.memory_space<vmem>>, vector<1x8x128xf32>
    %58 = vector.shape_cast %57 : vector<1x8x128xf32> to vector<8x128xf32>
    %c1_40 = arith.constant 1 : index
    %c0_41 = arith.constant 0 : index
    %c0_42 = arith.constant 0 : index
    %59 = vector.load %arg10[%c1_40, %c0_41, %c0_42] : memref<2x8x128xf32, #tpu.memory_space<vmem>>, vector<1x8x128xf32>
    %60 = vector.shape_cast %59 : vector<1x8x128xf32> to vector<8x128xf32>
    %61 = arith.truncf %58 : vector<8x128xf32> to vector<8x128xbf16>
    %cst_43 = arith.constant dense<0.000000e+00> : vector<8x512xf32>
    %62 = tpu.matmul %61, %17, %cst_43 {dimension_numbers = #tpu.dot_dimension_numbers<[1], [0], [0], [1], [0, 0, 1, 1], [], []>} : vector<8x128xbf16>, vector<128x512xbf16>, vector<8x512xf32> -> vector<8x512xf32>
    %63 = arith.addf %56, %62 : vector<8x512xf32>
    %64 = vector.extract_strided_slice %63 {offsets = [0, 0], sizes = [8, 128], strides = [1, 1]} : vector<8x512xf32> to vector<8x128xf32>
    %65 = arith.negf %64 : vector<8x128xf32>
    %66 = math.exp %65 : vector<8x128xf32>
    %cst_44 = arith.constant 1.000000e+00 : f32
    %67 = vector.broadcast %cst_44 : f32 to vector<8x128xf32>
    %68 = arith.addf %67, %66 : vector<8x128xf32>
    %69 = arith.divf %67, %68 : vector<8x128xf32>
    %70 = vector.extract_strided_slice %63 {offsets = [0, 128], sizes = [8, 128], strides = [1, 1]} : vector<8x512xf32> to vector<8x128xf32>
    %71 = arith.negf %70 : vector<8x128xf32>
    %72 = math.exp %71 : vector<8x128xf32>
    %cst_45 = arith.constant 1.000000e+00 : f32
    %73 = vector.broadcast %cst_45 : f32 to vector<8x128xf32>
    %74 = arith.addf %73, %72 : vector<8x128xf32>
    %75 = arith.divf %73, %74 : vector<8x128xf32>
    %76 = vector.extract_strided_slice %63 {offsets = [0, 256], sizes = [8, 128], strides = [1, 1]} : vector<8x512xf32> to vector<8x128xf32>
    %77 = math.tanh %76 : vector<8x128xf32>
    %78 = vector.extract_strided_slice %63 {offsets = [0, 384], sizes = [8, 128], strides = [1, 1]} : vector<8x512xf32> to vector<8x128xf32>
    %79 = arith.negf %78 : vector<8x128xf32>
    %80 = math.exp %79 : vector<8x128xf32>
    %cst_46 = arith.constant 1.000000e+00 : f32
    %81 = vector.broadcast %cst_46 : f32 to vector<8x128xf32>
    %82 = arith.addf %81, %80 : vector<8x128xf32>
    %83 = arith.divf %81, %82 : vector<8x128xf32>
    %84 = arith.mulf %75, %60 : vector<8x128xf32>
    %85 = arith.mulf %69, %77 : vector<8x128xf32>
    %86 = arith.addf %84, %85 : vector<8x128xf32>
    %87 = math.tanh %86 : vector<8x128xf32>
    %88 = arith.mulf %83, %87 : vector<8x128xf32>
    %c0_47 = arith.constant 0 : index
    %c0_48 = arith.constant 0 : index
    %c0_49 = arith.constant 0 : index
    %89 = vector.load %arg9[%c0_47, %c0_48, %c0_49] : memref<2x8x128xf32, #tpu.memory_space<vmem>>, vector<1x8x128xf32>
    %90 = vector.shape_cast %89 : vector<1x8x128xf32> to vector<8x128xf32>
    %91 = vector.shape_cast %53 : vector<8x128xf32> to vector<1x8x128xf32>
    tpu.vector_store %arg9[%c0_47, %c0_48, %c0_49], %91 {strides = array<i32>} : memref<2x8x128xf32, #tpu.memory_space<vmem>>, vector<1x8x128xf32>,
    %c0_50 = arith.constant 0 : index
    %c0_51 = arith.constant 0 : index
    %c0_52 = arith.constant 0 : index
    %92 = vector.load %arg10[%c0_50, %c0_51, %c0_52] : memref<2x8x128xf32, #tpu.memory_space<vmem>>, vector<1x8x128xf32>
    %93 = vector.shape_cast %92 : vector<1x8x128xf32> to vector<8x128xf32>
    %94 = vector.shape_cast %51 : vector<8x128xf32> to vector<1x8x128xf32>
    tpu.vector_store %arg10[%c0_50, %c0_51, %c0_52], %94 {strides = array<i32>} : memref<2x8x128xf32, #tpu.memory_space<vmem>>, vector<1x8x128xf32>,
    %c1_53 = arith.constant 1 : index
    %c0_54 = arith.constant 0 : index
    %c0_55 = arith.constant 0 : index
    %95 = vector.load %arg9[%c1_53, %c0_54, %c0_55] : memref<2x8x128xf32, #tpu.memory_space<vmem>>, vector<1x8x128xf32>
    %96 = vector.shape_cast %95 : vector<1x8x128xf32> to vector<8x128xf32>
    %97 = vector.shape_cast %88 : vector<8x128xf32> to vector<1x8x128xf32>
    tpu.vector_store %arg9[%c1_53, %c0_54, %c0_55], %97 {strides = array<i32>} : memref<2x8x128xf32, #tpu.memory_space<vmem>>, vector<1x8x128xf32>,
    %c1_56 = arith.constant 1 : index
    %c0_57 = arith.constant 0 : index
    %c0_58 = arith.constant 0 : index
    %98 = vector.load %arg10[%c1_56, %c0_57, %c0_58] : memref<2x8x128xf32, #tpu.memory_space<vmem>>, vector<1x8x128xf32>
    %99 = vector.shape_cast %98 : vector<1x8x128xf32> to vector<8x128xf32>
    %100 = vector.shape_cast %86 : vector<8x128xf32> to vector<1x8x128xf32>
    tpu.vector_store %arg10[%c1_56, %c0_57, %c0_58], %100 {strides = array<i32>} : memref<2x8x128xf32, #tpu.memory_space<vmem>>, vector<1x8x128xf32>,
    %101 = arith.index_cast %c0_i32 : i32 to index
    %c0_59 = arith.constant 0 : index
    %c0_60 = arith.constant 0 : index
    %102 = vector.load %arg6[%101, %c0_59, %c0_60] : memref<8x8x256xf32, #tpu.memory_space<vmem>>, vector<1x8x128xf32>
    %103 = vector.shape_cast %102 : vector<1x8x128xf32> to vector<8x128xf32>
    %104 = vector.shape_cast %53 : vector<8x128xf32> to vector<1x8x128xf32>
    tpu.vector_store %arg6[%101, %c0_59, %c0_60], %104 {strides = array<i32>} : memref<8x8x256xf32, #tpu.memory_space<vmem>>, vector<1x8x128xf32>,
    %105 = arith.index_cast %18 : i32 to index
    %c0_61 = arith.constant 0 : index
    %c128 = arith.constant 128 : index
    %106 = vector.load %arg6[%105, %c0_61, %c128] : memref<8x8x256xf32, #tpu.memory_space<vmem>>, vector<1x8x128xf32>
    %107 = vector.shape_cast %106 : vector<1x8x128xf32> to vector<8x128xf32>
    %108 = vector.shape_cast %88 : vector<8x128xf32> to vector<1x8x128xf32>
    tpu.vector_store %arg6[%105, %c0_61, %c128], %108 {strides = array<i32>} : memref<8x8x256xf32, #tpu.memory_space<vmem>>, vector<1x8x128xf32>,
    %c1_i32 = arith.constant 1 : i32
    %c7_i32_62 = arith.constant 7 : i32
    %109 = arith.subi %c7_i32_62, %c1_i32 : i32
    %110 = arith.index_cast %c1_i32 : i32 to index
    %c0_63 = arith.constant 0 : index
    %c0_64 = arith.constant 0 : index
    %111 = vector.load %arg7[%110, %c0_63, %c0_64] : memref<8x8x512xf32, #tpu.memory_space<vmem>>, vector<1x8x512xf32>
    %112 = vector.shape_cast %111 : vector<1x8x512xf32> to vector<8x512xf32>
    %c0_65 = arith.constant 0 : index
    %c0_66 = arith.constant 0 : index
    %c0_67 = arith.constant 0 : index
    %113 = vector.load %arg9[%c0_65, %c0_66, %c0_67] : memref<2x8x128xf32, #tpu.memory_space<vmem>>, vector<1x8x128xf32>
    %114 = vector.shape_cast %113 : vector<1x8x128xf32> to vector<8x128xf32>
    %c0_68 = arith.constant 0 : index
    %c0_69 = arith.constant 0 : index
    %c0_70 = arith.constant 0 : index
    %115 = vector.load %arg10[%c0_68, %c0_69, %c0_70] : memref<2x8x128xf32, #tpu.memory_space<vmem>>, vector<1x8x128xf32>
    %116 = vector.shape_cast %115 : vector<1x8x128xf32> to vector<8x128xf32>
    %117 = arith.truncf %114 : vector<8x128xf32> to vector<8x128xbf16>
    %cst_71 = arith.constant dense<0.000000e+00> : vector<8x512xf32>
    %118 = tpu.matmul %117, %16, %cst_71 {dimension_numbers = #tpu.dot_dimension_numbers<[1], [0], [0], [1], [0, 0, 1, 1], [], []>} : vector<8x128xbf16>, vector<128x512xbf16>, vector<8x512xf32> -> vector<8x512xf32>
    %119 = arith.addf %112, %118 : vector<8x512xf32>
    %120 = vector.extract_strided_slice %119 {offsets = [0, 0], sizes = [8, 128], strides = [1, 1]} : vector<8x512xf32> to vector<8x128xf32>
    %121 = arith.negf %120 : vector<8x128xf32>
    %122 = math.exp %121 : vector<8x128xf32>
    %cst_72 = arith.constant 1.000000e+00 : f32
    %123 = vector.broadcast %cst_72 : f32 to vector<8x128xf32>
    %124 = arith.addf %123, %122 : vector<8x128xf32>
    %125 = arith.divf %123, %124 : vector<8x128xf32>
    %126 = vector.extract_strided_slice %119 {offsets = [0, 128], sizes = [8, 128], strides = [1, 1]} : vector<8x512xf32> to vector<8x128xf32>
    %127 = arith.negf %126 : vector<8x128xf32>
    %128 = math.exp %127 : vector<8x128xf32>
    %cst_73 = arith.constant 1.000000e+00 : f32
    %129 = vector.broadcast %cst_73 : f32 to vector<8x128xf32>
    %130 = arith.addf %129, %128 : vector<8x128xf32>
    %131 = arith.divf %129, %130 : vector<8x128xf32>
    %132 = vector.extract_strided_slice %119 {offsets = [0, 256], sizes = [8, 128], strides = [1, 1]} : vector<8x512xf32> to vector<8x128xf32>
    %133 = math.tanh %132 : vector<8x128xf32>
    %134 = vector.extract_strided_slice %119 {offsets = [0, 384], sizes = [8, 128], strides = [1, 1]} : vector<8x512xf32> to vector<8x128xf32>
    %135 = arith.negf %134 : vector<8x128xf32>
    %136 = math.exp %135 : vector<8x128xf32>
    %cst_74 = arith.constant 1.000000e+00 : f32
    %137 = vector.broadcast %cst_74 : f32 to vector<8x128xf32>
    %138 = arith.addf %137, %136 : vector<8x128xf32>
    %139 = arith.divf %137, %138 : vector<8x128xf32>
    %140 = arith.mulf %131, %116 : vector<8x128xf32>
    %141 = arith.mulf %125, %133 : vector<8x128xf32>
    %142 = arith.addf %140, %141 : vector<8x128xf32>
    %143 = math.tanh %142 : vector<8x128xf32>
    %144 = arith.mulf %139, %143 : vector<8x128xf32>
    %145 = arith.index_cast %109 : i32 to index
    %c0_75 = arith.constant 0 : index
    %c0_76 = arith.constant 0 : index
    %146 = vector.load %arg8[%145, %c0_75, %c0_76] : memref<8x8x512xf32, #tpu.memory_space<vmem>>, vector<1x8x512xf32>
    %147 = vector.shape_cast %146 : vector<1x8x512xf32> to vector<8x512xf32>
    %c1_77 = arith.constant 1 : index
    %c0_78 = arith.constant 0 : index
    %c0_79 = arith.constant 0 : index
    %148 = vector.load %arg9[%c1_77, %c0_78, %c0_79] : memref<2x8x128xf32, #tpu.memory_space<vmem>>, vector<1x8x128xf32>
    %149 = vector.shape_cast %148 : vector<1x8x128xf32> to vector<8x128xf32>
    %c1_80 = arith.constant 1 : index
    %c0_81 = arith.constant 0 : index
    %c0_82 = arith.constant 0 : index
    %150 = vector.load %arg10[%c1_80, %c0_81, %c0_82] : memref<2x8x128xf32, #tpu.memory_space<vmem>>, vector<1x8x128xf32>
    %151 = vector.shape_cast %150 : vector<1x8x128xf32> to vector<8x128xf32>
    %152 = arith.truncf %149 : vector<8x128xf32> to vector<8x128xbf16>
    %cst_83 = arith.constant dense<0.000000e+00> : vector<8x512xf32>
    %153 = tpu.matmul %152, %17, %cst_83 {dimension_numbers = #tpu.dot_dimension_numbers<[1], [0], [0], [1], [0, 0, 1, 1], [], []>} : vector<8x128xbf16>, vector<128x512xbf16>, vector<8x512xf32> -> vector<8x512xf32>
    %154 = arith.addf %147, %153 : vector<8x512xf32>
    %155 = vector.extract_strided_slice %154 {offsets = [0, 0], sizes = [8, 128], strides = [1, 1]} : vector<8x512xf32> to vector<8x128xf32>
    %156 = arith.negf %155 : vector<8x128xf32>
    %157 = math.exp %156 : vector<8x128xf32>
    %cst_84 = arith.constant 1.000000e+00 : f32
    %158 = vector.broadcast %cst_84 : f32 to vector<8x128xf32>
    %159 = arith.addf %158, %157 : vector<8x128xf32>
    %160 = arith.divf %158, %159 : vector<8x128xf32>
    %161 = vector.extract_strided_slice %154 {offsets = [0, 128], sizes = [8, 128], strides = [1, 1]} : vector<8x512xf32> to vector<8x128xf32>
    %162 = arith.negf %161 : vector<8x128xf32>
    %163 = math.exp %162 : vector<8x128xf32>
    %cst_85 = arith.constant 1.000000e+00 : f32
    %164 = vector.broadcast %cst_85 : f32 to vector<8x128xf32>
    %165 = arith.addf %164, %163 : vector<8x128xf32>
    %166 = arith.divf %164, %165 : vector<8x128xf32>
    %167 = vector.extract_strided_slice %154 {offsets = [0, 256], sizes = [8, 128], strides = [1, 1]} : vector<8x512xf32> to vector<8x128xf32>
    %168 = math.tanh %167 : vector<8x128xf32>
    %169 = vector.extract_strided_slice %154 {offsets = [0, 384], sizes = [8, 128], strides = [1, 1]} : vector<8x512xf32> to vector<8x128xf32>
    %170 = arith.negf %169 : vector<8x128xf32>
    %171 = math.exp %170 : vector<8x128xf32>
    %cst_86 = arith.constant 1.000000e+00 : f32
    %172 = vector.broadcast %cst_86 : f32 to vector<8x128xf32>
    %173 = arith.addf %172, %171 : vector<8x128xf32>
    %174 = arith.divf %172, %173 : vector<8x128xf32>
    %175 = arith.mulf %166, %151 : vector<8x128xf32>
    %176 = arith.mulf %160, %168 : vector<8x128xf32>
    %177 = arith.addf %175, %176 : vector<8x128xf32>
    %178 = math.tanh %177 : vector<8x128xf32>
    %179 = arith.mulf %174, %178 : vector<8x128xf32>
    %c0_87 = arith.constant 0 : index
    %c0_88 = arith.constant 0 : index
    %c0_89 = arith.constant 0 : index
    %180 = vector.load %arg9[%c0_87, %c0_88, %c0_89] : memref<2x8x128xf32, #tpu.memory_space<vmem>>, vector<1x8x128xf32>
    %181 = vector.shape_cast %180 : vector<1x8x128xf32> to vector<8x128xf32>
    %182 = vector.shape_cast %144 : vector<8x128xf32> to vector<1x8x128xf32>
    tpu.vector_store %arg9[%c0_87, %c0_88, %c0_89], %182 {strides = array<i32>} : memref<2x8x128xf32, #tpu.memory_space<vmem>>, vector<1x8x128xf32>,
    %c0_90 = arith.constant 0 : index
    %c0_91 = arith.constant 0 : index
    %c0_92 = arith.constant 0 : index
    %183 = vector.load %arg10[%c0_90, %c0_91, %c0_92] : memref<2x8x128xf32, #tpu.memory_space<vmem>>, vector<1x8x128xf32>
    %184 = vector.shape_cast %183 : vector<1x8x128xf32> to vector<8x128xf32>
    %185 = vector.shape_cast %142 : vector<8x128xf32> to vector<1x8x128xf32>
    tpu.vector_store %arg10[%c0_90, %c0_91, %c0_92], %185 {strides = array<i32>} : memref<2x8x128xf32, #tpu.memory_space<vmem>>, vector<1x8x128xf32>,
    %c1_93 = arith.constant 1 : index
    %c0_94 = arith.constant 0 : index
    %c0_95 = arith.constant 0 : index
    %186 = vector.load %arg9[%c1_93, %c0_94, %c0_95] : memref<2x8x128xf32, #tpu.memory_space<vmem>>, vector<1x8x128xf32>
    %187 = vector.shape_cast %186 : vector<1x8x128xf32> to vector<8x128xf32>
    %188 = vector.shape_cast %179 : vector<8x128xf32> to vector<1x8x128xf32>
    tpu.vector_store %arg9[%c1_93, %c0_94, %c0_95], %188 {strides = array<i32>} : memref<2x8x128xf32, #tpu.memory_space<vmem>>, vector<1x8x128xf32>,
    %c1_96 = arith.constant 1 : index
    %c0_97 = arith.constant 0 : index
    %c0_98 = arith.constant 0 : index
    %189 = vector.load %arg10[%c1_96, %c0_97, %c0_98] : memref<2x8x128xf32, #tpu.memory_space<vmem>>, vector<1x8x128xf32>
    %190 = vector.shape_cast %189 : vector<1x8x128xf32> to vector<8x128xf32>
    %191 = vector.shape_cast %177 : vector<8x128xf32> to vector<1x8x128xf32>
    tpu.vector_store %arg10[%c1_96, %c0_97, %c0_98], %191 {strides = array<i32>} : memref<2x8x128xf32, #tpu.memory_space<vmem>>, vector<1x8x128xf32>,
    %192 = arith.index_cast %c1_i32 : i32 to index
    %c0_99 = arith.constant 0 : index
    %c0_100 = arith.constant 0 : index
    %193 = vector.load %arg6[%192, %c0_99, %c0_100] : memref<8x8x256xf32, #tpu.memory_space<vmem>>, vector<1x8x128xf32>
    %194 = vector.shape_cast %193 : vector<1x8x128xf32> to vector<8x128xf32>
    %195 = vector.shape_cast %144 : vector<8x128xf32> to vector<1x8x128xf32>
    tpu.vector_store %arg6[%192, %c0_99, %c0_100], %195 {strides = array<i32>} : memref<8x8x256xf32, #tpu.memory_space<vmem>>, vector<1x8x128xf32>,
    %196 = arith.index_cast %109 : i32 to index
    %c0_101 = arith.constant 0 : index
    %c128_102 = arith.constant 128 : index
    %197 = vector.load %arg6[%196, %c0_101, %c128_102] : memref<8x8x256xf32, #tpu.memory_space<vmem>>, vector<1x8x128xf32>
    %198 = vector.shape_cast %197 : vector<1x8x128xf32> to vector<8x128xf32>
    %199 = vector.shape_cast %179 : vector<8x128xf32> to vector<1x8x128xf32>
    tpu.vector_store %arg6[%196, %c0_101, %c128_102], %199 {strides = array<i32>} : memref<8x8x256xf32, #tpu.memory_space<vmem>>, vector<1x8x128xf32>,
    %c2_i32 = arith.constant 2 : i32
    %c7_i32_103 = arith.constant 7 : i32
    %200 = arith.subi %c7_i32_103, %c2_i32 : i32
    %201 = arith.index_cast %c2_i32 : i32 to index
    %c0_104 = arith.constant 0 : index
    %c0_105 = arith.constant 0 : index
    %202 = vector.load %arg7[%201, %c0_104, %c0_105] : memref<8x8x512xf32, #tpu.memory_space<vmem>>, vector<1x8x512xf32>
    %203 = vector.shape_cast %202 : vector<1x8x512xf32> to vector<8x512xf32>
    %c0_106 = arith.constant 0 : index
    %c0_107 = arith.constant 0 : index
    %c0_108 = arith.constant 0 : index
    %204 = vector.load %arg9[%c0_106, %c0_107, %c0_108] : memref<2x8x128xf32, #tpu.memory_space<vmem>>, vector<1x8x128xf32>
    %205 = vector.shape_cast %204 : vector<1x8x128xf32> to vector<8x128xf32>
    %c0_109 = arith.constant 0 : index
    %c0_110 = arith.constant 0 : index
    %c0_111 = arith.constant 0 : index
    %206 = vector.load %arg10[%c0_109, %c0_110, %c0_111] : memref<2x8x128xf32, #tpu.memory_space<vmem>>, vector<1x8x128xf32>
    %207 = vector.shape_cast %206 : vector<1x8x128xf32> to vector<8x128xf32>
    %208 = arith.truncf %205 : vector<8x128xf32> to vector<8x128xbf16>
    %cst_112 = arith.constant dense<0.000000e+00> : vector<8x512xf32>
    %209 = tpu.matmul %208, %16, %cst_112 {dimension_numbers = #tpu.dot_dimension_numbers<[1], [0], [0], [1], [0, 0, 1, 1], [], []>} : vector<8x128xbf16>, vector<128x512xbf16>, vector<8x512xf32> -> vector<8x512xf32>
    %210 = arith.addf %203, %209 : vector<8x512xf32>
    %211 = vector.extract_strided_slice %210 {offsets = [0, 0], sizes = [8, 128], strides = [1, 1]} : vector<8x512xf32> to vector<8x128xf32>
    %212 = arith.negf %211 : vector<8x128xf32>
    %213 = math.exp %212 : vector<8x128xf32>
    %cst_113 = arith.constant 1.000000e+00 : f32
    %214 = vector.broadcast %cst_113 : f32 to vector<8x128xf32>
    %215 = arith.addf %214, %213 : vector<8x128xf32>
    %216 = arith.divf %214, %215 : vector<8x128xf32>
    %217 = vector.extract_strided_slice %210 {offsets = [0, 128], sizes = [8, 128], strides = [1, 1]} : vector<8x512xf32> to vector<8x128xf32>
    %218 = arith.negf %217 : vector<8x128xf32>
    %219 = math.exp %218 : vector<8x128xf32>
    %cst_114 = arith.constant 1.000000e+00 : f32
    %220 = vector.broadcast %cst_114 : f32 to vector<8x128xf32>
    %221 = arith.addf %220, %219 : vector<8x128xf32>
    %222 = arith.divf %220, %221 : vector<8x128xf32>
    %223 = vector.extract_strided_slice %210 {offsets = [0, 256], sizes = [8, 128], strides = [1, 1]} : vector<8x512xf32> to vector<8x128xf32>
    %224 = math.tanh %223 : vector<8x128xf32>
    %225 = vector.extract_strided_slice %210 {offsets = [0, 384], sizes = [8, 128], strides = [1, 1]} : vector<8x512xf32> to vector<8x128xf32>
    %226 = arith.negf %225 : vector<8x128xf32>
    %227 = math.exp %226 : vector<8x128xf32>
    %cst_115 = arith.constant 1.000000e+00 : f32
    %228 = vector.broadcast %cst_115 : f32 to vector<8x128xf32>
    %229 = arith.addf %228, %227 : vector<8x128xf32>
    %230 = arith.divf %228, %229 : vector<8x128xf32>
    %231 = arith.mulf %222, %207 : vector<8x128xf32>
    %232 = arith.mulf %216, %224 : vector<8x128xf32>
    %233 = arith.addf %231, %232 : vector<8x128xf32>
    %234 = math.tanh %233 : vector<8x128xf32>
    %235 = arith.mulf %230, %234 : vector<8x128xf32>
    %236 = arith.index_cast %200 : i32 to index
    %c0_116 = arith.constant 0 : index
    %c0_117 = arith.constant 0 : index
    %237 = vector.load %arg8[%236, %c0_116, %c0_117] : memref<8x8x512xf32, #tpu.memory_space<vmem>>, vector<1x8x512xf32>
    %238 = vector.shape_cast %237 : vector<1x8x512xf32> to vector<8x512xf32>
    %c1_118 = arith.constant 1 : index
    %c0_119 = arith.constant 0 : index
    %c0_120 = arith.constant 0 : index
    %239 = vector.load %arg9[%c1_118, %c0_119, %c0_120] : memref<2x8x128xf32, #tpu.memory_space<vmem>>, vector<1x8x128xf32>
    %240 = vector.shape_cast %239 : vector<1x8x128xf32> to vector<8x128xf32>
    %c1_121 = arith.constant 1 : index
    %c0_122 = arith.constant 0 : index
    %c0_123 = arith.constant 0 : index
    %241 = vector.load %arg10[%c1_121, %c0_122, %c0_123] : memref<2x8x128xf32, #tpu.memory_space<vmem>>, vector<1x8x128xf32>
    %242 = vector.shape_cast %241 : vector<1x8x128xf32> to vector<8x128xf32>
    %243 = arith.truncf %240 : vector<8x128xf32> to vector<8x128xbf16>
    %cst_124 = arith.constant dense<0.000000e+00> : vector<8x512xf32>
    %244 = tpu.matmul %243, %17, %cst_124 {dimension_numbers = #tpu.dot_dimension_numbers<[1], [0], [0], [1], [0, 0, 1, 1], [], []>} : vector<8x128xbf16>, vector<128x512xbf16>, vector<8x512xf32> -> vector<8x512xf32>
    %245 = arith.addf %238, %244 : vector<8x512xf32>
    %246 = vector.extract_strided_slice %245 {offsets = [0, 0], sizes = [8, 128], strides = [1, 1]} : vector<8x512xf32> to vector<8x128xf32>
    %247 = arith.negf %246 : vector<8x128xf32>
    %248 = math.exp %247 : vector<8x128xf32>
    %cst_125 = arith.constant 1.000000e+00 : f32
    %249 = vector.broadcast %cst_125 : f32 to vector<8x128xf32>
    %250 = arith.addf %249, %248 : vector<8x128xf32>
    %251 = arith.divf %249, %250 : vector<8x128xf32>
    %252 = vector.extract_strided_slice %245 {offsets = [0, 128], sizes = [8, 128], strides = [1, 1]} : vector<8x512xf32> to vector<8x128xf32>
    %253 = arith.negf %252 : vector<8x128xf32>
    %254 = math.exp %253 : vector<8x128xf32>
    %cst_126 = arith.constant 1.000000e+00 : f32
    %255 = vector.broadcast %cst_126 : f32 to vector<8x128xf32>
    %256 = arith.addf %255, %254 : vector<8x128xf32>
    %257 = arith.divf %255, %256 : vector<8x128xf32>
    %258 = vector.extract_strided_slice %245 {offsets = [0, 256], sizes = [8, 128], strides = [1, 1]} : vector<8x512xf32> to vector<8x128xf32>
    %259 = math.tanh %258 : vector<8x128xf32>
    %260 = vector.extract_strided_slice %245 {offsets = [0, 384], sizes = [8, 128], strides = [1, 1]} : vector<8x512xf32> to vector<8x128xf32>
    %261 = arith.negf %260 : vector<8x128xf32>
    %262 = math.exp %261 : vector<8x128xf32>
    %cst_127 = arith.constant 1.000000e+00 : f32
    %263 = vector.broadcast %cst_127 : f32 to vector<8x128xf32>
    %264 = arith.addf %263, %262 : vector<8x128xf32>
    %265 = arith.divf %263, %264 : vector<8x128xf32>
    %266 = arith.mulf %257, %242 : vector<8x128xf32>
    %267 = arith.mulf %251, %259 : vector<8x128xf32>
    %268 = arith.addf %266, %267 : vector<8x128xf32>
    %269 = math.tanh %268 : vector<8x128xf32>
    %270 = arith.mulf %265, %269 : vector<8x128xf32>
    %c0_128 = arith.constant 0 : index
    %c0_129 = arith.constant 0 : index
    %c0_130 = arith.constant 0 : index
    %271 = vector.load %arg9[%c0_128, %c0_129, %c0_130] : memref<2x8x128xf32, #tpu.memory_space<vmem>>, vector<1x8x128xf32>
    %272 = vector.shape_cast %271 : vector<1x8x128xf32> to vector<8x128xf32>
    %273 = vector.shape_cast %235 : vector<8x128xf32> to vector<1x8x128xf32>
    tpu.vector_store %arg9[%c0_128, %c0_129, %c0_130], %273 {strides = array<i32>} : memref<2x8x128xf32, #tpu.memory_space<vmem>>, vector<1x8x128xf32>,
    %c0_131 = arith.constant 0 : index
    %c0_132 = arith.constant 0 : index
    %c0_133 = arith.constant 0 : index
    %274 = vector.load %arg10[%c0_131, %c0_132, %c0_133] : memref<2x8x128xf32, #tpu.memory_space<vmem>>, vector<1x8x128xf32>
    %275 = vector.shape_cast %274 : vector<1x8x128xf32> to vector<8x128xf32>
    %276 = vector.shape_cast %233 : vector<8x128xf32> to vector<1x8x128xf32>
    tpu.vector_store %arg10[%c0_131, %c0_132, %c0_133], %276 {strides = array<i32>} : memref<2x8x128xf32, #tpu.memory_space<vmem>>, vector<1x8x128xf32>,
    %c1_134 = arith.constant 1 : index
    %c0_135 = arith.constant 0 : index
    %c0_136 = arith.constant 0 : index
    %277 = vector.load %arg9[%c1_134, %c0_135, %c0_136] : memref<2x8x128xf32, #tpu.memory_space<vmem>>, vector<1x8x128xf32>
    %278 = vector.shape_cast %277 : vector<1x8x128xf32> to vector<8x128xf32>
    %279 = vector.shape_cast %270 : vector<8x128xf32> to vector<1x8x128xf32>
    tpu.vector_store %arg9[%c1_134, %c0_135, %c0_136], %279 {strides = array<i32>} : memref<2x8x128xf32, #tpu.memory_space<vmem>>, vector<1x8x128xf32>,
    %c1_137 = arith.constant 1 : index
    %c0_138 = arith.constant 0 : index
    %c0_139 = arith.constant 0 : index
    %280 = vector.load %arg10[%c1_137, %c0_138, %c0_139] : memref<2x8x128xf32, #tpu.memory_space<vmem>>, vector<1x8x128xf32>
    %281 = vector.shape_cast %280 : vector<1x8x128xf32> to vector<8x128xf32>
    %282 = vector.shape_cast %268 : vector<8x128xf32> to vector<1x8x128xf32>
    tpu.vector_store %arg10[%c1_137, %c0_138, %c0_139], %282 {strides = array<i32>} : memref<2x8x128xf32, #tpu.memory_space<vmem>>, vector<1x8x128xf32>,
    %283 = arith.index_cast %c2_i32 : i32 to index
    %c0_140 = arith.constant 0 : index
    %c0_141 = arith.constant 0 : index
    %284 = vector.load %arg6[%283, %c0_140, %c0_141] : memref<8x8x256xf32, #tpu.memory_space<vmem>>, vector<1x8x128xf32>
    %285 = vector.shape_cast %284 : vector<1x8x128xf32> to vector<8x128xf32>
    %286 = vector.shape_cast %235 : vector<8x128xf32> to vector<1x8x128xf32>
    tpu.vector_store %arg6[%283, %c0_140, %c0_141], %286 {strides = array<i32>} : memref<8x8x256xf32, #tpu.memory_space<vmem>>, vector<1x8x128xf32>,
    %287 = arith.index_cast %200 : i32 to index
    %c0_142 = arith.constant 0 : index
    %c128_143 = arith.constant 128 : index
    %288 = vector.load %arg6[%287, %c0_142, %c128_143] : memref<8x8x256xf32, #tpu.memory_space<vmem>>, vector<1x8x128xf32>
    %289 = vector.shape_cast %288 : vector<1x8x128xf32> to vector<8x128xf32>
    %290 = vector.shape_cast %270 : vector<8x128xf32> to vector<1x8x128xf32>
    tpu.vector_store %arg6[%287, %c0_142, %c128_143], %290 {strides = array<i32>} : memref<8x8x256xf32, #tpu.memory_space<vmem>>, vector<1x8x128xf32>,
    %c3_i32 = arith.constant 3 : i32
    %c7_i32_144 = arith.constant 7 : i32
    %291 = arith.subi %c7_i32_144, %c3_i32 : i32
    %292 = arith.index_cast %c3_i32 : i32 to index
    %c0_145 = arith.constant 0 : index
    %c0_146 = arith.constant 0 : index
    %293 = vector.load %arg7[%292, %c0_145, %c0_146] : memref<8x8x512xf32, #tpu.memory_space<vmem>>, vector<1x8x512xf32>
    %294 = vector.shape_cast %293 : vector<1x8x512xf32> to vector<8x512xf32>
    %c0_147 = arith.constant 0 : index
    %c0_148 = arith.constant 0 : index
    %c0_149 = arith.constant 0 : index
    %295 = vector.load %arg9[%c0_147, %c0_148, %c0_149] : memref<2x8x128xf32, #tpu.memory_space<vmem>>, vector<1x8x128xf32>
    %296 = vector.shape_cast %295 : vector<1x8x128xf32> to vector<8x128xf32>
    %c0_150 = arith.constant 0 : index
    %c0_151 = arith.constant 0 : index
    %c0_152 = arith.constant 0 : index
    %297 = vector.load %arg10[%c0_150, %c0_151, %c0_152] : memref<2x8x128xf32, #tpu.memory_space<vmem>>, vector<1x8x128xf32>
    %298 = vector.shape_cast %297 : vector<1x8x128xf32> to vector<8x128xf32>
    %299 = arith.truncf %296 : vector<8x128xf32> to vector<8x128xbf16>
    %cst_153 = arith.constant dense<0.000000e+00> : vector<8x512xf32>
    %300 = tpu.matmul %299, %16, %cst_153 {dimension_numbers = #tpu.dot_dimension_numbers<[1], [0], [0], [1], [0, 0, 1, 1], [], []>} : vector<8x128xbf16>, vector<128x512xbf16>, vector<8x512xf32> -> vector<8x512xf32>
    %301 = arith.addf %294, %300 : vector<8x512xf32>
    %302 = vector.extract_strided_slice %301 {offsets = [0, 0], sizes = [8, 128], strides = [1, 1]} : vector<8x512xf32> to vector<8x128xf32>
    %303 = arith.negf %302 : vector<8x128xf32>
    %304 = math.exp %303 : vector<8x128xf32>
    %cst_154 = arith.constant 1.000000e+00 : f32
    %305 = vector.broadcast %cst_154 : f32 to vector<8x128xf32>
    %306 = arith.addf %305, %304 : vector<8x128xf32>
    %307 = arith.divf %305, %306 : vector<8x128xf32>
    %308 = vector.extract_strided_slice %301 {offsets = [0, 128], sizes = [8, 128], strides = [1, 1]} : vector<8x512xf32> to vector<8x128xf32>
    %309 = arith.negf %308 : vector<8x128xf32>
    %310 = math.exp %309 : vector<8x128xf32>
    %cst_155 = arith.constant 1.000000e+00 : f32
    %311 = vector.broadcast %cst_155 : f32 to vector<8x128xf32>
    %312 = arith.addf %311, %310 : vector<8x128xf32>
    %313 = arith.divf %311, %312 : vector<8x128xf32>
    %314 = vector.extract_strided_slice %301 {offsets = [0, 256], sizes = [8, 128], strides = [1, 1]} : vector<8x512xf32> to vector<8x128xf32>
    %315 = math.tanh %314 : vector<8x128xf32>
    %316 = vector.extract_strided_slice %301 {offsets = [0, 384], sizes = [8, 128], strides = [1, 1]} : vector<8x512xf32> to vector<8x128xf32>
    %317 = arith.negf %316 : vector<8x128xf32>
    %318 = math.exp %317 : vector<8x128xf32>
    %cst_156 = arith.constant 1.000000e+00 : f32
    %319 = vector.broadcast %cst_156 : f32 to vector<8x128xf32>
    %320 = arith.addf %319, %318 : vector<8x128xf32>
    %321 = arith.divf %319, %320 : vector<8x128xf32>
    %322 = arith.mulf %313, %298 : vector<8x128xf32>
    %323 = arith.mulf %307, %315 : vector<8x128xf32>
    %324 = arith.addf %322, %323 : vector<8x128xf32>
    %325 = math.tanh %324 : vector<8x128xf32>
    %326 = arith.mulf %321, %325 : vector<8x128xf32>
    %327 = arith.index_cast %291 : i32 to index
    %c0_157 = arith.constant 0 : index
    %c0_158 = arith.constant 0 : index
    %328 = vector.load %arg8[%327, %c0_157, %c0_158] : memref<8x8x512xf32, #tpu.memory_space<vmem>>, vector<1x8x512xf32>
    %329 = vector.shape_cast %328 : vector<1x8x512xf32> to vector<8x512xf32>
    %c1_159 = arith.constant 1 : index
    %c0_160 = arith.constant 0 : index
    %c0_161 = arith.constant 0 : index
    %330 = vector.load %arg9[%c1_159, %c0_160, %c0_161] : memref<2x8x128xf32, #tpu.memory_space<vmem>>, vector<1x8x128xf32>
    %331 = vector.shape_cast %330 : vector<1x8x128xf32> to vector<8x128xf32>
    %c1_162 = arith.constant 1 : index
    %c0_163 = arith.constant 0 : index
    %c0_164 = arith.constant 0 : index
    %332 = vector.load %arg10[%c1_162, %c0_163, %c0_164] : memref<2x8x128xf32, #tpu.memory_space<vmem>>, vector<1x8x128xf32>
    %333 = vector.shape_cast %332 : vector<1x8x128xf32> to vector<8x128xf32>
    %334 = arith.truncf %331 : vector<8x128xf32> to vector<8x128xbf16>
    %cst_165 = arith.constant dense<0.000000e+00> : vector<8x512xf32>
    %335 = tpu.matmul %334, %17, %cst_165 {dimension_numbers = #tpu.dot_dimension_numbers<[1], [0], [0], [1], [0, 0, 1, 1], [], []>} : vector<8x128xbf16>, vector<128x512xbf16>, vector<8x512xf32> -> vector<8x512xf32>
    %336 = arith.addf %329, %335 : vector<8x512xf32>
    %337 = vector.extract_strided_slice %336 {offsets = [0, 0], sizes = [8, 128], strides = [1, 1]} : vector<8x512xf32> to vector<8x128xf32>
    %338 = arith.negf %337 : vector<8x128xf32>
    %339 = math.exp %338 : vector<8x128xf32>
    %cst_166 = arith.constant 1.000000e+00 : f32
    %340 = vector.broadcast %cst_166 : f32 to vector<8x128xf32>
    %341 = arith.addf %340, %339 : vector<8x128xf32>
    %342 = arith.divf %340, %341 : vector<8x128xf32>
    %343 = vector.extract_strided_slice %336 {offsets = [0, 128], sizes = [8, 128], strides = [1, 1]} : vector<8x512xf32> to vector<8x128xf32>
    %344 = arith.negf %343 : vector<8x128xf32>
    %345 = math.exp %344 : vector<8x128xf32>
    %cst_167 = arith.constant 1.000000e+00 : f32
    %346 = vector.broadcast %cst_167 : f32 to vector<8x128xf32>
    %347 = arith.addf %346, %345 : vector<8x128xf32>
    %348 = arith.divf %346, %347 : vector<8x128xf32>
    %349 = vector.extract_strided_slice %336 {offsets = [0, 256], sizes = [8, 128], strides = [1, 1]} : vector<8x512xf32> to vector<8x128xf32>
    %350 = math.tanh %349 : vector<8x128xf32>
    %351 = vector.extract_strided_slice %336 {offsets = [0, 384], sizes = [8, 128], strides = [1, 1]} : vector<8x512xf32> to vector<8x128xf32>
    %352 = arith.negf %351 : vector<8x128xf32>
    %353 = math.exp %352 : vector<8x128xf32>
    %cst_168 = arith.constant 1.000000e+00 : f32
    %354 = vector.broadcast %cst_168 : f32 to vector<8x128xf32>
    %355 = arith.addf %354, %353 : vector<8x128xf32>
    %356 = arith.divf %354, %355 : vector<8x128xf32>
    %357 = arith.mulf %348, %333 : vector<8x128xf32>
    %358 = arith.mulf %342, %350 : vector<8x128xf32>
    %359 = arith.addf %357, %358 : vector<8x128xf32>
    %360 = math.tanh %359 : vector<8x128xf32>
    %361 = arith.mulf %356, %360 : vector<8x128xf32>
    %c0_169 = arith.constant 0 : index
    %c0_170 = arith.constant 0 : index
    %c0_171 = arith.constant 0 : index
    %362 = vector.load %arg9[%c0_169, %c0_170, %c0_171] : memref<2x8x128xf32, #tpu.memory_space<vmem>>, vector<1x8x128xf32>
    %363 = vector.shape_cast %362 : vector<1x8x128xf32> to vector<8x128xf32>
    %364 = vector.shape_cast %326 : vector<8x128xf32> to vector<1x8x128xf32>
    tpu.vector_store %arg9[%c0_169, %c0_170, %c0_171], %364 {strides = array<i32>} : memref<2x8x128xf32, #tpu.memory_space<vmem>>, vector<1x8x128xf32>,
    %c0_172 = arith.constant 0 : index
    %c0_173 = arith.constant 0 : index
    %c0_174 = arith.constant 0 : index
    %365 = vector.load %arg10[%c0_172, %c0_173, %c0_174] : memref<2x8x128xf32, #tpu.memory_space<vmem>>, vector<1x8x128xf32>
    %366 = vector.shape_cast %365 : vector<1x8x128xf32> to vector<8x128xf32>
    %367 = vector.shape_cast %324 : vector<8x128xf32> to vector<1x8x128xf32>
    tpu.vector_store %arg10[%c0_172, %c0_173, %c0_174], %367 {strides = array<i32>} : memref<2x8x128xf32, #tpu.memory_space<vmem>>, vector<1x8x128xf32>,
    %c1_175 = arith.constant 1 : index
    %c0_176 = arith.constant 0 : index
    %c0_177 = arith.constant 0 : index
    %368 = vector.load %arg9[%c1_175, %c0_176, %c0_177] : memref<2x8x128xf32, #tpu.memory_space<vmem>>, vector<1x8x128xf32>
    %369 = vector.shape_cast %368 : vector<1x8x128xf32> to vector<8x128xf32>
    %370 = vector.shape_cast %361 : vector<8x128xf32> to vector<1x8x128xf32>
    tpu.vector_store %arg9[%c1_175, %c0_176, %c0_177], %370 {strides = array<i32>} : memref<2x8x128xf32, #tpu.memory_space<vmem>>, vector<1x8x128xf32>,
    %c1_178 = arith.constant 1 : index
    %c0_179 = arith.constant 0 : index
    %c0_180 = arith.constant 0 : index
    %371 = vector.load %arg10[%c1_178, %c0_179, %c0_180] : memref<2x8x128xf32, #tpu.memory_space<vmem>>, vector<1x8x128xf32>
    %372 = vector.shape_cast %371 : vector<1x8x128xf32> to vector<8x128xf32>
    %373 = vector.shape_cast %359 : vector<8x128xf32> to vector<1x8x128xf32>
    tpu.vector_store %arg10[%c1_178, %c0_179, %c0_180], %373 {strides = array<i32>} : memref<2x8x128xf32, #tpu.memory_space<vmem>>, vector<1x8x128xf32>,
    %374 = arith.index_cast %c3_i32 : i32 to index
    %c0_181 = arith.constant 0 : index
    %c0_182 = arith.constant 0 : index
    %375 = vector.load %arg6[%374, %c0_181, %c0_182] : memref<8x8x256xf32, #tpu.memory_space<vmem>>, vector<1x8x128xf32>
    %376 = vector.shape_cast %375 : vector<1x8x128xf32> to vector<8x128xf32>
    %377 = vector.shape_cast %326 : vector<8x128xf32> to vector<1x8x128xf32>
    tpu.vector_store %arg6[%374, %c0_181, %c0_182], %377 {strides = array<i32>} : memref<8x8x256xf32, #tpu.memory_space<vmem>>, vector<1x8x128xf32>,
    %378 = arith.index_cast %291 : i32 to index
    %c0_183 = arith.constant 0 : index
    %c128_184 = arith.constant 128 : index
    %379 = vector.load %arg6[%378, %c0_183, %c128_184] : memref<8x8x256xf32, #tpu.memory_space<vmem>>, vector<1x8x128xf32>
    %380 = vector.shape_cast %379 : vector<1x8x128xf32> to vector<8x128xf32>
    %381 = vector.shape_cast %361 : vector<8x128xf32> to vector<1x8x128xf32>
    tpu.vector_store %arg6[%378, %c0_183, %c128_184], %381 {strides = array<i32>} : memref<8x8x256xf32, #tpu.memory_space<vmem>>, vector<1x8x128xf32>,
    %c4_i32 = arith.constant 4 : i32
    %c7_i32_185 = arith.constant 7 : i32
    %382 = arith.subi %c7_i32_185, %c4_i32 : i32
    %383 = arith.index_cast %c4_i32 : i32 to index
    %c0_186 = arith.constant 0 : index
    %c0_187 = arith.constant 0 : index
    %384 = vector.load %arg7[%383, %c0_186, %c0_187] : memref<8x8x512xf32, #tpu.memory_space<vmem>>, vector<1x8x512xf32>
    %385 = vector.shape_cast %384 : vector<1x8x512xf32> to vector<8x512xf32>
    %c0_188 = arith.constant 0 : index
    %c0_189 = arith.constant 0 : index
    %c0_190 = arith.constant 0 : index
    %386 = vector.load %arg9[%c0_188, %c0_189, %c0_190] : memref<2x8x128xf32, #tpu.memory_space<vmem>>, vector<1x8x128xf32>
    %387 = vector.shape_cast %386 : vector<1x8x128xf32> to vector<8x128xf32>
    %c0_191 = arith.constant 0 : index
    %c0_192 = arith.constant 0 : index
    %c0_193 = arith.constant 0 : index
    %388 = vector.load %arg10[%c0_191, %c0_192, %c0_193] : memref<2x8x128xf32, #tpu.memory_space<vmem>>, vector<1x8x128xf32>
    %389 = vector.shape_cast %388 : vector<1x8x128xf32> to vector<8x128xf32>
    %390 = arith.truncf %387 : vector<8x128xf32> to vector<8x128xbf16>
    %cst_194 = arith.constant dense<0.000000e+00> : vector<8x512xf32>
    %391 = tpu.matmul %390, %16, %cst_194 {dimension_numbers = #tpu.dot_dimension_numbers<[1], [0], [0], [1], [0, 0, 1, 1], [], []>} : vector<8x128xbf16>, vector<128x512xbf16>, vector<8x512xf32> -> vector<8x512xf32>
    %392 = arith.addf %385, %391 : vector<8x512xf32>
    %393 = vector.extract_strided_slice %392 {offsets = [0, 0], sizes = [8, 128], strides = [1, 1]} : vector<8x512xf32> to vector<8x128xf32>
    %394 = arith.negf %393 : vector<8x128xf32>
    %395 = math.exp %394 : vector<8x128xf32>
    %cst_195 = arith.constant 1.000000e+00 : f32
    %396 = vector.broadcast %cst_195 : f32 to vector<8x128xf32>
    %397 = arith.addf %396, %395 : vector<8x128xf32>
    %398 = arith.divf %396, %397 : vector<8x128xf32>
    %399 = vector.extract_strided_slice %392 {offsets = [0, 128], sizes = [8, 128], strides = [1, 1]} : vector<8x512xf32> to vector<8x128xf32>
    %400 = arith.negf %399 : vector<8x128xf32>
    %401 = math.exp %400 : vector<8x128xf32>
    %cst_196 = arith.constant 1.000000e+00 : f32
    %402 = vector.broadcast %cst_196 : f32 to vector<8x128xf32>
    %403 = arith.addf %402, %401 : vector<8x128xf32>
    %404 = arith.divf %402, %403 : vector<8x128xf32>
    %405 = vector.extract_strided_slice %392 {offsets = [0, 256], sizes = [8, 128], strides = [1, 1]} : vector<8x512xf32> to vector<8x128xf32>
    %406 = math.tanh %405 : vector<8x128xf32>
    %407 = vector.extract_strided_slice %392 {offsets = [0, 384], sizes = [8, 128], strides = [1, 1]} : vector<8x512xf32> to vector<8x128xf32>
    %408 = arith.negf %407 : vector<8x128xf32>
    %409 = math.exp %408 : vector<8x128xf32>
    %cst_197 = arith.constant 1.000000e+00 : f32
    %410 = vector.broadcast %cst_197 : f32 to vector<8x128xf32>
    %411 = arith.addf %410, %409 : vector<8x128xf32>
    %412 = arith.divf %410, %411 : vector<8x128xf32>
    %413 = arith.mulf %404, %389 : vector<8x128xf32>
    %414 = arith.mulf %398, %406 : vector<8x128xf32>
    %415 = arith.addf %413, %414 : vector<8x128xf32>
    %416 = math.tanh %415 : vector<8x128xf32>
    %417 = arith.mulf %412, %416 : vector<8x128xf32>
    %418 = arith.index_cast %382 : i32 to index
    %c0_198 = arith.constant 0 : index
    %c0_199 = arith.constant 0 : index
    %419 = vector.load %arg8[%418, %c0_198, %c0_199] : memref<8x8x512xf32, #tpu.memory_space<vmem>>, vector<1x8x512xf32>
    %420 = vector.shape_cast %419 : vector<1x8x512xf32> to vector<8x512xf32>
    %c1_200 = arith.constant 1 : index
    %c0_201 = arith.constant 0 : index
    %c0_202 = arith.constant 0 : index
    %421 = vector.load %arg9[%c1_200, %c0_201, %c0_202] : memref<2x8x128xf32, #tpu.memory_space<vmem>>, vector<1x8x128xf32>
    %422 = vector.shape_cast %421 : vector<1x8x128xf32> to vector<8x128xf32>
    %c1_203 = arith.constant 1 : index
    %c0_204 = arith.constant 0 : index
    %c0_205 = arith.constant 0 : index
    %423 = vector.load %arg10[%c1_203, %c0_204, %c0_205] : memref<2x8x128xf32, #tpu.memory_space<vmem>>, vector<1x8x128xf32>
    %424 = vector.shape_cast %423 : vector<1x8x128xf32> to vector<8x128xf32>
    %425 = arith.truncf %422 : vector<8x128xf32> to vector<8x128xbf16>
    %cst_206 = arith.constant dense<0.000000e+00> : vector<8x512xf32>
    %426 = tpu.matmul %425, %17, %cst_206 {dimension_numbers = #tpu.dot_dimension_numbers<[1], [0], [0], [1], [0, 0, 1, 1], [], []>} : vector<8x128xbf16>, vector<128x512xbf16>, vector<8x512xf32> -> vector<8x512xf32>
    %427 = arith.addf %420, %426 : vector<8x512xf32>
    %428 = vector.extract_strided_slice %427 {offsets = [0, 0], sizes = [8, 128], strides = [1, 1]} : vector<8x512xf32> to vector<8x128xf32>
    %429 = arith.negf %428 : vector<8x128xf32>
    %430 = math.exp %429 : vector<8x128xf32>
    %cst_207 = arith.constant 1.000000e+00 : f32
    %431 = vector.broadcast %cst_207 : f32 to vector<8x128xf32>
    %432 = arith.addf %431, %430 : vector<8x128xf32>
    %433 = arith.divf %431, %432 : vector<8x128xf32>
    %434 = vector.extract_strided_slice %427 {offsets = [0, 128], sizes = [8, 128], strides = [1, 1]} : vector<8x512xf32> to vector<8x128xf32>
    %435 = arith.negf %434 : vector<8x128xf32>
    %436 = math.exp %435 : vector<8x128xf32>
    %cst_208 = arith.constant 1.000000e+00 : f32
    %437 = vector.broadcast %cst_208 : f32 to vector<8x128xf32>
    %438 = arith.addf %437, %436 : vector<8x128xf32>
    %439 = arith.divf %437, %438 : vector<8x128xf32>
    %440 = vector.extract_strided_slice %427 {offsets = [0, 256], sizes = [8, 128], strides = [1, 1]} : vector<8x512xf32> to vector<8x128xf32>
    %441 = math.tanh %440 : vector<8x128xf32>
    %442 = vector.extract_strided_slice %427 {offsets = [0, 384], sizes = [8, 128], strides = [1, 1]} : vector<8x512xf32> to vector<8x128xf32>
    %443 = arith.negf %442 : vector<8x128xf32>
    %444 = math.exp %443 : vector<8x128xf32>
    %cst_209 = arith.constant 1.000000e+00 : f32
    %445 = vector.broadcast %cst_209 : f32 to vector<8x128xf32>
    %446 = arith.addf %445, %444 : vector<8x128xf32>
    %447 = arith.divf %445, %446 : vector<8x128xf32>
    %448 = arith.mulf %439, %424 : vector<8x128xf32>
    %449 = arith.mulf %433, %441 : vector<8x128xf32>
    %450 = arith.addf %448, %449 : vector<8x128xf32>
    %451 = math.tanh %450 : vector<8x128xf32>
    %452 = arith.mulf %447, %451 : vector<8x128xf32>
    %c0_210 = arith.constant 0 : index
    %c0_211 = arith.constant 0 : index
    %c0_212 = arith.constant 0 : index
    %453 = vector.load %arg9[%c0_210, %c0_211, %c0_212] : memref<2x8x128xf32, #tpu.memory_space<vmem>>, vector<1x8x128xf32>
    %454 = vector.shape_cast %453 : vector<1x8x128xf32> to vector<8x128xf32>
    %455 = vector.shape_cast %417 : vector<8x128xf32> to vector<1x8x128xf32>
    tpu.vector_store %arg9[%c0_210, %c0_211, %c0_212], %455 {strides = array<i32>} : memref<2x8x128xf32, #tpu.memory_space<vmem>>, vector<1x8x128xf32>,
    %c0_213 = arith.constant 0 : index
    %c0_214 = arith.constant 0 : index
    %c0_215 = arith.constant 0 : index
    %456 = vector.load %arg10[%c0_213, %c0_214, %c0_215] : memref<2x8x128xf32, #tpu.memory_space<vmem>>, vector<1x8x128xf32>
    %457 = vector.shape_cast %456 : vector<1x8x128xf32> to vector<8x128xf32>
    %458 = vector.shape_cast %415 : vector<8x128xf32> to vector<1x8x128xf32>
    tpu.vector_store %arg10[%c0_213, %c0_214, %c0_215], %458 {strides = array<i32>} : memref<2x8x128xf32, #tpu.memory_space<vmem>>, vector<1x8x128xf32>,
    %c1_216 = arith.constant 1 : index
    %c0_217 = arith.constant 0 : index
    %c0_218 = arith.constant 0 : index
    %459 = vector.load %arg9[%c1_216, %c0_217, %c0_218] : memref<2x8x128xf32, #tpu.memory_space<vmem>>, vector<1x8x128xf32>
    %460 = vector.shape_cast %459 : vector<1x8x128xf32> to vector<8x128xf32>
    %461 = vector.shape_cast %452 : vector<8x128xf32> to vector<1x8x128xf32>
    tpu.vector_store %arg9[%c1_216, %c0_217, %c0_218], %461 {strides = array<i32>} : memref<2x8x128xf32, #tpu.memory_space<vmem>>, vector<1x8x128xf32>,
    %c1_219 = arith.constant 1 : index
    %c0_220 = arith.constant 0 : index
    %c0_221 = arith.constant 0 : index
    %462 = vector.load %arg10[%c1_219, %c0_220, %c0_221] : memref<2x8x128xf32, #tpu.memory_space<vmem>>, vector<1x8x128xf32>
    %463 = vector.shape_cast %462 : vector<1x8x128xf32> to vector<8x128xf32>
    %464 = vector.shape_cast %450 : vector<8x128xf32> to vector<1x8x128xf32>
    tpu.vector_store %arg10[%c1_219, %c0_220, %c0_221], %464 {strides = array<i32>} : memref<2x8x128xf32, #tpu.memory_space<vmem>>, vector<1x8x128xf32>,
    %465 = arith.index_cast %c4_i32 : i32 to index
    %c0_222 = arith.constant 0 : index
    %c0_223 = arith.constant 0 : index
    %466 = vector.load %arg6[%465, %c0_222, %c0_223] : memref<8x8x256xf32, #tpu.memory_space<vmem>>, vector<1x8x128xf32>
    %467 = vector.shape_cast %466 : vector<1x8x128xf32> to vector<8x128xf32>
    %468 = vector.shape_cast %417 : vector<8x128xf32> to vector<1x8x128xf32>
    tpu.vector_store %arg6[%465, %c0_222, %c0_223], %468 {strides = array<i32>} : memref<8x8x256xf32, #tpu.memory_space<vmem>>, vector<1x8x128xf32>,
    %469 = arith.index_cast %382 : i32 to index
    %c0_224 = arith.constant 0 : index
    %c128_225 = arith.constant 128 : index
    %470 = vector.load %arg6[%469, %c0_224, %c128_225] : memref<8x8x256xf32, #tpu.memory_space<vmem>>, vector<1x8x128xf32>
    %471 = vector.shape_cast %470 : vector<1x8x128xf32> to vector<8x128xf32>
    %472 = vector.shape_cast %452 : vector<8x128xf32> to vector<1x8x128xf32>
    tpu.vector_store %arg6[%469, %c0_224, %c128_225], %472 {strides = array<i32>} : memref<8x8x256xf32, #tpu.memory_space<vmem>>, vector<1x8x128xf32>,
    %c5_i32 = arith.constant 5 : i32
    %c7_i32_226 = arith.constant 7 : i32
    %473 = arith.subi %c7_i32_226, %c5_i32 : i32
    %474 = arith.index_cast %c5_i32 : i32 to index
    %c0_227 = arith.constant 0 : index
    %c0_228 = arith.constant 0 : index
    %475 = vector.load %arg7[%474, %c0_227, %c0_228] : memref<8x8x512xf32, #tpu.memory_space<vmem>>, vector<1x8x512xf32>
    %476 = vector.shape_cast %475 : vector<1x8x512xf32> to vector<8x512xf32>
    %c0_229 = arith.constant 0 : index
    %c0_230 = arith.constant 0 : index
    %c0_231 = arith.constant 0 : index
    %477 = vector.load %arg9[%c0_229, %c0_230, %c0_231] : memref<2x8x128xf32, #tpu.memory_space<vmem>>, vector<1x8x128xf32>
    %478 = vector.shape_cast %477 : vector<1x8x128xf32> to vector<8x128xf32>
    %c0_232 = arith.constant 0 : index
    %c0_233 = arith.constant 0 : index
    %c0_234 = arith.constant 0 : index
    %479 = vector.load %arg10[%c0_232, %c0_233, %c0_234] : memref<2x8x128xf32, #tpu.memory_space<vmem>>, vector<1x8x128xf32>
    %480 = vector.shape_cast %479 : vector<1x8x128xf32> to vector<8x128xf32>
    %481 = arith.truncf %478 : vector<8x128xf32> to vector<8x128xbf16>
    %cst_235 = arith.constant dense<0.000000e+00> : vector<8x512xf32>
    %482 = tpu.matmul %481, %16, %cst_235 {dimension_numbers = #tpu.dot_dimension_numbers<[1], [0], [0], [1], [0, 0, 1, 1], [], []>} : vector<8x128xbf16>, vector<128x512xbf16>, vector<8x512xf32> -> vector<8x512xf32>
    %483 = arith.addf %476, %482 : vector<8x512xf32>
    %484 = vector.extract_strided_slice %483 {offsets = [0, 0], sizes = [8, 128], strides = [1, 1]} : vector<8x512xf32> to vector<8x128xf32>
    %485 = arith.negf %484 : vector<8x128xf32>
    %486 = math.exp %485 : vector<8x128xf32>
    %cst_236 = arith.constant 1.000000e+00 : f32
    %487 = vector.broadcast %cst_236 : f32 to vector<8x128xf32>
    %488 = arith.addf %487, %486 : vector<8x128xf32>
    %489 = arith.divf %487, %488 : vector<8x128xf32>
    %490 = vector.extract_strided_slice %483 {offsets = [0, 128], sizes = [8, 128], strides = [1, 1]} : vector<8x512xf32> to vector<8x128xf32>
    %491 = arith.negf %490 : vector<8x128xf32>
    %492 = math.exp %491 : vector<8x128xf32>
    %cst_237 = arith.constant 1.000000e+00 : f32
    %493 = vector.broadcast %cst_237 : f32 to vector<8x128xf32>
    %494 = arith.addf %493, %492 : vector<8x128xf32>
    %495 = arith.divf %493, %494 : vector<8x128xf32>
    %496 = vector.extract_strided_slice %483 {offsets = [0, 256], sizes = [8, 128], strides = [1, 1]} : vector<8x512xf32> to vector<8x128xf32>
    %497 = math.tanh %496 : vector<8x128xf32>
    %498 = vector.extract_strided_slice %483 {offsets = [0, 384], sizes = [8, 128], strides = [1, 1]} : vector<8x512xf32> to vector<8x128xf32>
    %499 = arith.negf %498 : vector<8x128xf32>
    %500 = math.exp %499 : vector<8x128xf32>
    %cst_238 = arith.constant 1.000000e+00 : f32
    %501 = vector.broadcast %cst_238 : f32 to vector<8x128xf32>
    %502 = arith.addf %501, %500 : vector<8x128xf32>
    %503 = arith.divf %501, %502 : vector<8x128xf32>
    %504 = arith.mulf %495, %480 : vector<8x128xf32>
    %505 = arith.mulf %489, %497 : vector<8x128xf32>
    %506 = arith.addf %504, %505 : vector<8x128xf32>
    %507 = math.tanh %506 : vector<8x128xf32>
    %508 = arith.mulf %503, %507 : vector<8x128xf32>
    %509 = arith.index_cast %473 : i32 to index
    %c0_239 = arith.constant 0 : index
    %c0_240 = arith.constant 0 : index
    %510 = vector.load %arg8[%509, %c0_239, %c0_240] : memref<8x8x512xf32, #tpu.memory_space<vmem>>, vector<1x8x512xf32>
    %511 = vector.shape_cast %510 : vector<1x8x512xf32> to vector<8x512xf32>
    %c1_241 = arith.constant 1 : index
    %c0_242 = arith.constant 0 : index
    %c0_243 = arith.constant 0 : index
    %512 = vector.load %arg9[%c1_241, %c0_242, %c0_243] : memref<2x8x128xf32, #tpu.memory_space<vmem>>, vector<1x8x128xf32>
    %513 = vector.shape_cast %512 : vector<1x8x128xf32> to vector<8x128xf32>
    %c1_244 = arith.constant 1 : index
    %c0_245 = arith.constant 0 : index
    %c0_246 = arith.constant 0 : index
    %514 = vector.load %arg10[%c1_244, %c0_245, %c0_246] : memref<2x8x128xf32, #tpu.memory_space<vmem>>, vector<1x8x128xf32>
    %515 = vector.shape_cast %514 : vector<1x8x128xf32> to vector<8x128xf32>
    %516 = arith.truncf %513 : vector<8x128xf32> to vector<8x128xbf16>
    %cst_247 = arith.constant dense<0.000000e+00> : vector<8x512xf32>
    %517 = tpu.matmul %516, %17, %cst_247 {dimension_numbers = #tpu.dot_dimension_numbers<[1], [0], [0], [1], [0, 0, 1, 1], [], []>} : vector<8x128xbf16>, vector<128x512xbf16>, vector<8x512xf32> -> vector<8x512xf32>
    %518 = arith.addf %511, %517 : vector<8x512xf32>
    %519 = vector.extract_strided_slice %518 {offsets = [0, 0], sizes = [8, 128], strides = [1, 1]} : vector<8x512xf32> to vector<8x128xf32>
    %520 = arith.negf %519 : vector<8x128xf32>
    %521 = math.exp %520 : vector<8x128xf32>
    %cst_248 = arith.constant 1.000000e+00 : f32
    %522 = vector.broadcast %cst_248 : f32 to vector<8x128xf32>
    %523 = arith.addf %522, %521 : vector<8x128xf32>
    %524 = arith.divf %522, %523 : vector<8x128xf32>
    %525 = vector.extract_strided_slice %518 {offsets = [0, 128], sizes = [8, 128], strides = [1, 1]} : vector<8x512xf32> to vector<8x128xf32>
    %526 = arith.negf %525 : vector<8x128xf32>
    %527 = math.exp %526 : vector<8x128xf32>
    %cst_249 = arith.constant 1.000000e+00 : f32
    %528 = vector.broadcast %cst_249 : f32 to vector<8x128xf32>
    %529 = arith.addf %528, %527 : vector<8x128xf32>
    %530 = arith.divf %528, %529 : vector<8x128xf32>
    %531 = vector.extract_strided_slice %518 {offsets = [0, 256], sizes = [8, 128], strides = [1, 1]} : vector<8x512xf32> to vector<8x128xf32>
    %532 = math.tanh %531 : vector<8x128xf32>
    %533 = vector.extract_strided_slice %518 {offsets = [0, 384], sizes = [8, 128], strides = [1, 1]} : vector<8x512xf32> to vector<8x128xf32>
    %534 = arith.negf %533 : vector<8x128xf32>
    %535 = math.exp %534 : vector<8x128xf32>
    %cst_250 = arith.constant 1.000000e+00 : f32
    %536 = vector.broadcast %cst_250 : f32 to vector<8x128xf32>
    %537 = arith.addf %536, %535 : vector<8x128xf32>
    %538 = arith.divf %536, %537 : vector<8x128xf32>
    %539 = arith.mulf %530, %515 : vector<8x128xf32>
    %540 = arith.mulf %524, %532 : vector<8x128xf32>
    %541 = arith.addf %539, %540 : vector<8x128xf32>
    %542 = math.tanh %541 : vector<8x128xf32>
    %543 = arith.mulf %538, %542 : vector<8x128xf32>
    %c0_251 = arith.constant 0 : index
    %c0_252 = arith.constant 0 : index
    %c0_253 = arith.constant 0 : index
    %544 = vector.load %arg9[%c0_251, %c0_252, %c0_253] : memref<2x8x128xf32, #tpu.memory_space<vmem>>, vector<1x8x128xf32>
    %545 = vector.shape_cast %544 : vector<1x8x128xf32> to vector<8x128xf32>
    %546 = vector.shape_cast %508 : vector<8x128xf32> to vector<1x8x128xf32>
    tpu.vector_store %arg9[%c0_251, %c0_252, %c0_253], %546 {strides = array<i32>} : memref<2x8x128xf32, #tpu.memory_space<vmem>>, vector<1x8x128xf32>,
    %c0_254 = arith.constant 0 : index
    %c0_255 = arith.constant 0 : index
    %c0_256 = arith.constant 0 : index
    %547 = vector.load %arg10[%c0_254, %c0_255, %c0_256] : memref<2x8x128xf32, #tpu.memory_space<vmem>>, vector<1x8x128xf32>
    %548 = vector.shape_cast %547 : vector<1x8x128xf32> to vector<8x128xf32>
    %549 = vector.shape_cast %506 : vector<8x128xf32> to vector<1x8x128xf32>
    tpu.vector_store %arg10[%c0_254, %c0_255, %c0_256], %549 {strides = array<i32>} : memref<2x8x128xf32, #tpu.memory_space<vmem>>, vector<1x8x128xf32>,
    %c1_257 = arith.constant 1 : index
    %c0_258 = arith.constant 0 : index
    %c0_259 = arith.constant 0 : index
    %550 = vector.load %arg9[%c1_257, %c0_258, %c0_259] : memref<2x8x128xf32, #tpu.memory_space<vmem>>, vector<1x8x128xf32>
    %551 = vector.shape_cast %550 : vector<1x8x128xf32> to vector<8x128xf32>
    %552 = vector.shape_cast %543 : vector<8x128xf32> to vector<1x8x128xf32>
    tpu.vector_store %arg9[%c1_257, %c0_258, %c0_259], %552 {strides = array<i32>} : memref<2x8x128xf32, #tpu.memory_space<vmem>>, vector<1x8x128xf32>,
    %c1_260 = arith.constant 1 : index
    %c0_261 = arith.constant 0 : index
    %c0_262 = arith.constant 0 : index
    %553 = vector.load %arg10[%c1_260, %c0_261, %c0_262] : memref<2x8x128xf32, #tpu.memory_space<vmem>>, vector<1x8x128xf32>
    %554 = vector.shape_cast %553 : vector<1x8x128xf32> to vector<8x128xf32>
    %555 = vector.shape_cast %541 : vector<8x128xf32> to vector<1x8x128xf32>
    tpu.vector_store %arg10[%c1_260, %c0_261, %c0_262], %555 {strides = array<i32>} : memref<2x8x128xf32, #tpu.memory_space<vmem>>, vector<1x8x128xf32>,
    %556 = arith.index_cast %c5_i32 : i32 to index
    %c0_263 = arith.constant 0 : index
    %c0_264 = arith.constant 0 : index
    %557 = vector.load %arg6[%556, %c0_263, %c0_264] : memref<8x8x256xf32, #tpu.memory_space<vmem>>, vector<1x8x128xf32>
    %558 = vector.shape_cast %557 : vector<1x8x128xf32> to vector<8x128xf32>
    %559 = vector.shape_cast %508 : vector<8x128xf32> to vector<1x8x128xf32>
    tpu.vector_store %arg6[%556, %c0_263, %c0_264], %559 {strides = array<i32>} : memref<8x8x256xf32, #tpu.memory_space<vmem>>, vector<1x8x128xf32>,
    %560 = arith.index_cast %473 : i32 to index
    %c0_265 = arith.constant 0 : index
    %c128_266 = arith.constant 128 : index
    %561 = vector.load %arg6[%560, %c0_265, %c128_266] : memref<8x8x256xf32, #tpu.memory_space<vmem>>, vector<1x8x128xf32>
    %562 = vector.shape_cast %561 : vector<1x8x128xf32> to vector<8x128xf32>
    %563 = vector.shape_cast %543 : vector<8x128xf32> to vector<1x8x128xf32>
    tpu.vector_store %arg6[%560, %c0_265, %c128_266], %563 {strides = array<i32>} : memref<8x8x256xf32, #tpu.memory_space<vmem>>, vector<1x8x128xf32>,
    %c6_i32 = arith.constant 6 : i32
    %c7_i32_267 = arith.constant 7 : i32
    %564 = arith.subi %c7_i32_267, %c6_i32 : i32
    %565 = arith.index_cast %c6_i32 : i32 to index
    %c0_268 = arith.constant 0 : index
    %c0_269 = arith.constant 0 : index
    %566 = vector.load %arg7[%565, %c0_268, %c0_269] : memref<8x8x512xf32, #tpu.memory_space<vmem>>, vector<1x8x512xf32>
    %567 = vector.shape_cast %566 : vector<1x8x512xf32> to vector<8x512xf32>
    %c0_270 = arith.constant 0 : index
    %c0_271 = arith.constant 0 : index
    %c0_272 = arith.constant 0 : index
    %568 = vector.load %arg9[%c0_270, %c0_271, %c0_272] : memref<2x8x128xf32, #tpu.memory_space<vmem>>, vector<1x8x128xf32>
    %569 = vector.shape_cast %568 : vector<1x8x128xf32> to vector<8x128xf32>
    %c0_273 = arith.constant 0 : index
    %c0_274 = arith.constant 0 : index
    %c0_275 = arith.constant 0 : index
    %570 = vector.load %arg10[%c0_273, %c0_274, %c0_275] : memref<2x8x128xf32, #tpu.memory_space<vmem>>, vector<1x8x128xf32>
    %571 = vector.shape_cast %570 : vector<1x8x128xf32> to vector<8x128xf32>
    %572 = arith.truncf %569 : vector<8x128xf32> to vector<8x128xbf16>
    %cst_276 = arith.constant dense<0.000000e+00> : vector<8x512xf32>
    %573 = tpu.matmul %572, %16, %cst_276 {dimension_numbers = #tpu.dot_dimension_numbers<[1], [0], [0], [1], [0, 0, 1, 1], [], []>} : vector<8x128xbf16>, vector<128x512xbf16>, vector<8x512xf32> -> vector<8x512xf32>
    %574 = arith.addf %567, %573 : vector<8x512xf32>
    %575 = vector.extract_strided_slice %574 {offsets = [0, 0], sizes = [8, 128], strides = [1, 1]} : vector<8x512xf32> to vector<8x128xf32>
    %576 = arith.negf %575 : vector<8x128xf32>
    %577 = math.exp %576 : vector<8x128xf32>
    %cst_277 = arith.constant 1.000000e+00 : f32
    %578 = vector.broadcast %cst_277 : f32 to vector<8x128xf32>
    %579 = arith.addf %578, %577 : vector<8x128xf32>
    %580 = arith.divf %578, %579 : vector<8x128xf32>
    %581 = vector.extract_strided_slice %574 {offsets = [0, 128], sizes = [8, 128], strides = [1, 1]} : vector<8x512xf32> to vector<8x128xf32>
    %582 = arith.negf %581 : vector<8x128xf32>
    %583 = math.exp %582 : vector<8x128xf32>
    %cst_278 = arith.constant 1.000000e+00 : f32
    %584 = vector.broadcast %cst_278 : f32 to vector<8x128xf32>
    %585 = arith.addf %584, %583 : vector<8x128xf32>
    %586 = arith.divf %584, %585 : vector<8x128xf32>
    %587 = vector.extract_strided_slice %574 {offsets = [0, 256], sizes = [8, 128], strides = [1, 1]} : vector<8x512xf32> to vector<8x128xf32>
    %588 = math.tanh %587 : vector<8x128xf32>
    %589 = vector.extract_strided_slice %574 {offsets = [0, 384], sizes = [8, 128], strides = [1, 1]} : vector<8x512xf32> to vector<8x128xf32>
    %590 = arith.negf %589 : vector<8x128xf32>
    %591 = math.exp %590 : vector<8x128xf32>
    %cst_279 = arith.constant 1.000000e+00 : f32
    %592 = vector.broadcast %cst_279 : f32 to vector<8x128xf32>
    %593 = arith.addf %592, %591 : vector<8x128xf32>
    %594 = arith.divf %592, %593 : vector<8x128xf32>
    %595 = arith.mulf %586, %571 : vector<8x128xf32>
    %596 = arith.mulf %580, %588 : vector<8x128xf32>
    %597 = arith.addf %595, %596 : vector<8x128xf32>
    %598 = math.tanh %597 : vector<8x128xf32>
    %599 = arith.mulf %594, %598 : vector<8x128xf32>
    %600 = arith.index_cast %564 : i32 to index
    %c0_280 = arith.constant 0 : index
    %c0_281 = arith.constant 0 : index
    %601 = vector.load %arg8[%600, %c0_280, %c0_281] : memref<8x8x512xf32, #tpu.memory_space<vmem>>, vector<1x8x512xf32>
    %602 = vector.shape_cast %601 : vector<1x8x512xf32> to vector<8x512xf32>
    %c1_282 = arith.constant 1 : index
    %c0_283 = arith.constant 0 : index
    %c0_284 = arith.constant 0 : index
    %603 = vector.load %arg9[%c1_282, %c0_283, %c0_284] : memref<2x8x128xf32, #tpu.memory_space<vmem>>, vector<1x8x128xf32>
    %604 = vector.shape_cast %603 : vector<1x8x128xf32> to vector<8x128xf32>
    %c1_285 = arith.constant 1 : index
    %c0_286 = arith.constant 0 : index
    %c0_287 = arith.constant 0 : index
    %605 = vector.load %arg10[%c1_285, %c0_286, %c0_287] : memref<2x8x128xf32, #tpu.memory_space<vmem>>, vector<1x8x128xf32>
    %606 = vector.shape_cast %605 : vector<1x8x128xf32> to vector<8x128xf32>
    %607 = arith.truncf %604 : vector<8x128xf32> to vector<8x128xbf16>
    %cst_288 = arith.constant dense<0.000000e+00> : vector<8x512xf32>
    %608 = tpu.matmul %607, %17, %cst_288 {dimension_numbers = #tpu.dot_dimension_numbers<[1], [0], [0], [1], [0, 0, 1, 1], [], []>} : vector<8x128xbf16>, vector<128x512xbf16>, vector<8x512xf32> -> vector<8x512xf32>
    %609 = arith.addf %602, %608 : vector<8x512xf32>
    %610 = vector.extract_strided_slice %609 {offsets = [0, 0], sizes = [8, 128], strides = [1, 1]} : vector<8x512xf32> to vector<8x128xf32>
    %611 = arith.negf %610 : vector<8x128xf32>
    %612 = math.exp %611 : vector<8x128xf32>
    %cst_289 = arith.constant 1.000000e+00 : f32
    %613 = vector.broadcast %cst_289 : f32 to vector<8x128xf32>
    %614 = arith.addf %613, %612 : vector<8x128xf32>
    %615 = arith.divf %613, %614 : vector<8x128xf32>
    %616 = vector.extract_strided_slice %609 {offsets = [0, 128], sizes = [8, 128], strides = [1, 1]} : vector<8x512xf32> to vector<8x128xf32>
    %617 = arith.negf %616 : vector<8x128xf32>
    %618 = math.exp %617 : vector<8x128xf32>
    %cst_290 = arith.constant 1.000000e+00 : f32
    %619 = vector.broadcast %cst_290 : f32 to vector<8x128xf32>
    %620 = arith.addf %619, %618 : vector<8x128xf32>
    %621 = arith.divf %619, %620 : vector<8x128xf32>
    %622 = vector.extract_strided_slice %609 {offsets = [0, 256], sizes = [8, 128], strides = [1, 1]} : vector<8x512xf32> to vector<8x128xf32>
    %623 = math.tanh %622 : vector<8x128xf32>
    %624 = vector.extract_strided_slice %609 {offsets = [0, 384], sizes = [8, 128], strides = [1, 1]} : vector<8x512xf32> to vector<8x128xf32>
    %625 = arith.negf %624 : vector<8x128xf32>
    %626 = math.exp %625 : vector<8x128xf32>
    %cst_291 = arith.constant 1.000000e+00 : f32
    %627 = vector.broadcast %cst_291 : f32 to vector<8x128xf32>
    %628 = arith.addf %627, %626 : vector<8x128xf32>
    %629 = arith.divf %627, %628 : vector<8x128xf32>
    %630 = arith.mulf %621, %606 : vector<8x128xf32>
    %631 = arith.mulf %615, %623 : vector<8x128xf32>
    %632 = arith.addf %630, %631 : vector<8x128xf32>
    %633 = math.tanh %632 : vector<8x128xf32>
    %634 = arith.mulf %629, %633 : vector<8x128xf32>
    %c0_292 = arith.constant 0 : index
    %c0_293 = arith.constant 0 : index
    %c0_294 = arith.constant 0 : index
    %635 = vector.load %arg9[%c0_292, %c0_293, %c0_294] : memref<2x8x128xf32, #tpu.memory_space<vmem>>, vector<1x8x128xf32>
    %636 = vector.shape_cast %635 : vector<1x8x128xf32> to vector<8x128xf32>
    %637 = vector.shape_cast %599 : vector<8x128xf32> to vector<1x8x128xf32>
    tpu.vector_store %arg9[%c0_292, %c0_293, %c0_294], %637 {strides = array<i32>} : memref<2x8x128xf32, #tpu.memory_space<vmem>>, vector<1x8x128xf32>,
    %c0_295 = arith.constant 0 : index
    %c0_296 = arith.constant 0 : index
    %c0_297 = arith.constant 0 : index
    %638 = vector.load %arg10[%c0_295, %c0_296, %c0_297] : memref<2x8x128xf32, #tpu.memory_space<vmem>>, vector<1x8x128xf32>
    %639 = vector.shape_cast %638 : vector<1x8x128xf32> to vector<8x128xf32>
    %640 = vector.shape_cast %597 : vector<8x128xf32> to vector<1x8x128xf32>
    tpu.vector_store %arg10[%c0_295, %c0_296, %c0_297], %640 {strides = array<i32>} : memref<2x8x128xf32, #tpu.memory_space<vmem>>, vector<1x8x128xf32>,
    %c1_298 = arith.constant 1 : index
    %c0_299 = arith.constant 0 : index
    %c0_300 = arith.constant 0 : index
    %641 = vector.load %arg9[%c1_298, %c0_299, %c0_300] : memref<2x8x128xf32, #tpu.memory_space<vmem>>, vector<1x8x128xf32>
    %642 = vector.shape_cast %641 : vector<1x8x128xf32> to vector<8x128xf32>
    %643 = vector.shape_cast %634 : vector<8x128xf32> to vector<1x8x128xf32>
    tpu.vector_store %arg9[%c1_298, %c0_299, %c0_300], %643 {strides = array<i32>} : memref<2x8x128xf32, #tpu.memory_space<vmem>>, vector<1x8x128xf32>,
    %c1_301 = arith.constant 1 : index
    %c0_302 = arith.constant 0 : index
    %c0_303 = arith.constant 0 : index
    %644 = vector.load %arg10[%c1_301, %c0_302, %c0_303] : memref<2x8x128xf32, #tpu.memory_space<vmem>>, vector<1x8x128xf32>
    %645 = vector.shape_cast %644 : vector<1x8x128xf32> to vector<8x128xf32>
    %646 = vector.shape_cast %632 : vector<8x128xf32> to vector<1x8x128xf32>
    tpu.vector_store %arg10[%c1_301, %c0_302, %c0_303], %646 {strides = array<i32>} : memref<2x8x128xf32, #tpu.memory_space<vmem>>, vector<1x8x128xf32>,
    %647 = arith.index_cast %c6_i32 : i32 to index
    %c0_304 = arith.constant 0 : index
    %c0_305 = arith.constant 0 : index
    %648 = vector.load %arg6[%647, %c0_304, %c0_305] : memref<8x8x256xf32, #tpu.memory_space<vmem>>, vector<1x8x128xf32>
    %649 = vector.shape_cast %648 : vector<1x8x128xf32> to vector<8x128xf32>
    %650 = vector.shape_cast %599 : vector<8x128xf32> to vector<1x8x128xf32>
    tpu.vector_store %arg6[%647, %c0_304, %c0_305], %650 {strides = array<i32>} : memref<8x8x256xf32, #tpu.memory_space<vmem>>, vector<1x8x128xf32>,
    %651 = arith.index_cast %564 : i32 to index
    %c0_306 = arith.constant 0 : index
    %c128_307 = arith.constant 128 : index
    %652 = vector.load %arg6[%651, %c0_306, %c128_307] : memref<8x8x256xf32, #tpu.memory_space<vmem>>, vector<1x8x128xf32>
    %653 = vector.shape_cast %652 : vector<1x8x128xf32> to vector<8x128xf32>
    %654 = vector.shape_cast %634 : vector<8x128xf32> to vector<1x8x128xf32>
    tpu.vector_store %arg6[%651, %c0_306, %c128_307], %654 {strides = array<i32>} : memref<8x8x256xf32, #tpu.memory_space<vmem>>, vector<1x8x128xf32>,
    %c7_i32_308 = arith.constant 7 : i32
    %c7_i32_309 = arith.constant 7 : i32
    %655 = arith.subi %c7_i32_309, %c7_i32_308 : i32
    %656 = arith.index_cast %c7_i32_308 : i32 to index
    %c0_310 = arith.constant 0 : index
    %c0_311 = arith.constant 0 : index
    %657 = vector.load %arg7[%656, %c0_310, %c0_311] : memref<8x8x512xf32, #tpu.memory_space<vmem>>, vector<1x8x512xf32>
    %658 = vector.shape_cast %657 : vector<1x8x512xf32> to vector<8x512xf32>
    %c0_312 = arith.constant 0 : index
    %c0_313 = arith.constant 0 : index
    %c0_314 = arith.constant 0 : index
    %659 = vector.load %arg9[%c0_312, %c0_313, %c0_314] : memref<2x8x128xf32, #tpu.memory_space<vmem>>, vector<1x8x128xf32>
    %660 = vector.shape_cast %659 : vector<1x8x128xf32> to vector<8x128xf32>
    %c0_315 = arith.constant 0 : index
    %c0_316 = arith.constant 0 : index
    %c0_317 = arith.constant 0 : index
    %661 = vector.load %arg10[%c0_315, %c0_316, %c0_317] : memref<2x8x128xf32, #tpu.memory_space<vmem>>, vector<1x8x128xf32>
    %662 = vector.shape_cast %661 : vector<1x8x128xf32> to vector<8x128xf32>
    %663 = arith.truncf %660 : vector<8x128xf32> to vector<8x128xbf16>
    %cst_318 = arith.constant dense<0.000000e+00> : vector<8x512xf32>
    %664 = tpu.matmul %663, %16, %cst_318 {dimension_numbers = #tpu.dot_dimension_numbers<[1], [0], [0], [1], [0, 0, 1, 1], [], []>} : vector<8x128xbf16>, vector<128x512xbf16>, vector<8x512xf32> -> vector<8x512xf32>
    %665 = arith.addf %658, %664 : vector<8x512xf32>
    %666 = vector.extract_strided_slice %665 {offsets = [0, 0], sizes = [8, 128], strides = [1, 1]} : vector<8x512xf32> to vector<8x128xf32>
    %667 = arith.negf %666 : vector<8x128xf32>
    %668 = math.exp %667 : vector<8x128xf32>
    %cst_319 = arith.constant 1.000000e+00 : f32
    %669 = vector.broadcast %cst_319 : f32 to vector<8x128xf32>
    %670 = arith.addf %669, %668 : vector<8x128xf32>
    %671 = arith.divf %669, %670 : vector<8x128xf32>
    %672 = vector.extract_strided_slice %665 {offsets = [0, 128], sizes = [8, 128], strides = [1, 1]} : vector<8x512xf32> to vector<8x128xf32>
    %673 = arith.negf %672 : vector<8x128xf32>
    %674 = math.exp %673 : vector<8x128xf32>
    %cst_320 = arith.constant 1.000000e+00 : f32
    %675 = vector.broadcast %cst_320 : f32 to vector<8x128xf32>
    %676 = arith.addf %675, %674 : vector<8x128xf32>
    %677 = arith.divf %675, %676 : vector<8x128xf32>
    %678 = vector.extract_strided_slice %665 {offsets = [0, 256], sizes = [8, 128], strides = [1, 1]} : vector<8x512xf32> to vector<8x128xf32>
    %679 = math.tanh %678 : vector<8x128xf32>
    %680 = vector.extract_strided_slice %665 {offsets = [0, 384], sizes = [8, 128], strides = [1, 1]} : vector<8x512xf32> to vector<8x128xf32>
    %681 = arith.negf %680 : vector<8x128xf32>
    %682 = math.exp %681 : vector<8x128xf32>
    %cst_321 = arith.constant 1.000000e+00 : f32
    %683 = vector.broadcast %cst_321 : f32 to vector<8x128xf32>
    %684 = arith.addf %683, %682 : vector<8x128xf32>
    %685 = arith.divf %683, %684 : vector<8x128xf32>
    %686 = arith.mulf %677, %662 : vector<8x128xf32>
    %687 = arith.mulf %671, %679 : vector<8x128xf32>
    %688 = arith.addf %686, %687 : vector<8x128xf32>
    %689 = math.tanh %688 : vector<8x128xf32>
    %690 = arith.mulf %685, %689 : vector<8x128xf32>
    %691 = arith.index_cast %655 : i32 to index
    %c0_322 = arith.constant 0 : index
    %c0_323 = arith.constant 0 : index
    %692 = vector.load %arg8[%691, %c0_322, %c0_323] : memref<8x8x512xf32, #tpu.memory_space<vmem>>, vector<1x8x512xf32>
    %693 = vector.shape_cast %692 : vector<1x8x512xf32> to vector<8x512xf32>
    %c1_324 = arith.constant 1 : index
    %c0_325 = arith.constant 0 : index
    %c0_326 = arith.constant 0 : index
    %694 = vector.load %arg9[%c1_324, %c0_325, %c0_326] : memref<2x8x128xf32, #tpu.memory_space<vmem>>, vector<1x8x128xf32>
    %695 = vector.shape_cast %694 : vector<1x8x128xf32> to vector<8x128xf32>
    %c1_327 = arith.constant 1 : index
    %c0_328 = arith.constant 0 : index
    %c0_329 = arith.constant 0 : index
    %696 = vector.load %arg10[%c1_327, %c0_328, %c0_329] : memref<2x8x128xf32, #tpu.memory_space<vmem>>, vector<1x8x128xf32>
    %697 = vector.shape_cast %696 : vector<1x8x128xf32> to vector<8x128xf32>
    %698 = arith.truncf %695 : vector<8x128xf32> to vector<8x128xbf16>
    %cst_330 = arith.constant dense<0.000000e+00> : vector<8x512xf32>
    %699 = tpu.matmul %698, %17, %cst_330 {dimension_numbers = #tpu.dot_dimension_numbers<[1], [0], [0], [1], [0, 0, 1, 1], [], []>} : vector<8x128xbf16>, vector<128x512xbf16>, vector<8x512xf32> -> vector<8x512xf32>
    %700 = arith.addf %693, %699 : vector<8x512xf32>
    %701 = vector.extract_strided_slice %700 {offsets = [0, 0], sizes = [8, 128], strides = [1, 1]} : vector<8x512xf32> to vector<8x128xf32>
    %702 = arith.negf %701 : vector<8x128xf32>
    %703 = math.exp %702 : vector<8x128xf32>
    %cst_331 = arith.constant 1.000000e+00 : f32
    %704 = vector.broadcast %cst_331 : f32 to vector<8x128xf32>
    %705 = arith.addf %704, %703 : vector<8x128xf32>
    %706 = arith.divf %704, %705 : vector<8x128xf32>
    %707 = vector.extract_strided_slice %700 {offsets = [0, 128], sizes = [8, 128], strides = [1, 1]} : vector<8x512xf32> to vector<8x128xf32>
    %708 = arith.negf %707 : vector<8x128xf32>
    %709 = math.exp %708 : vector<8x128xf32>
    %cst_332 = arith.constant 1.000000e+00 : f32
    %710 = vector.broadcast %cst_332 : f32 to vector<8x128xf32>
    %711 = arith.addf %710, %709 : vector<8x128xf32>
    %712 = arith.divf %710, %711 : vector<8x128xf32>
    %713 = vector.extract_strided_slice %700 {offsets = [0, 256], sizes = [8, 128], strides = [1, 1]} : vector<8x512xf32> to vector<8x128xf32>
    %714 = math.tanh %713 : vector<8x128xf32>
    %715 = vector.extract_strided_slice %700 {offsets = [0, 384], sizes = [8, 128], strides = [1, 1]} : vector<8x512xf32> to vector<8x128xf32>
    %716 = arith.negf %715 : vector<8x128xf32>
    %717 = math.exp %716 : vector<8x128xf32>
    %cst_333 = arith.constant 1.000000e+00 : f32
    %718 = vector.broadcast %cst_333 : f32 to vector<8x128xf32>
    %719 = arith.addf %718, %717 : vector<8x128xf32>
    %720 = arith.divf %718, %719 : vector<8x128xf32>
    %721 = arith.mulf %712, %697 : vector<8x128xf32>
    %722 = arith.mulf %706, %714 : vector<8x128xf32>
    %723 = arith.addf %721, %722 : vector<8x128xf32>
    %724 = math.tanh %723 : vector<8x128xf32>
    %725 = arith.mulf %720, %724 : vector<8x128xf32>
    %c0_334 = arith.constant 0 : index
    %c0_335 = arith.constant 0 : index
    %c0_336 = arith.constant 0 : index
    %726 = vector.load %arg9[%c0_334, %c0_335, %c0_336] : memref<2x8x128xf32, #tpu.memory_space<vmem>>, vector<1x8x128xf32>
    %727 = vector.shape_cast %726 : vector<1x8x128xf32> to vector<8x128xf32>
    %728 = vector.shape_cast %690 : vector<8x128xf32> to vector<1x8x128xf32>
    tpu.vector_store %arg9[%c0_334, %c0_335, %c0_336], %728 {strides = array<i32>} : memref<2x8x128xf32, #tpu.memory_space<vmem>>, vector<1x8x128xf32>,
    %c0_337 = arith.constant 0 : index
    %c0_338 = arith.constant 0 : index
    %c0_339 = arith.constant 0 : index
    %729 = vector.load %arg10[%c0_337, %c0_338, %c0_339] : memref<2x8x128xf32, #tpu.memory_space<vmem>>, vector<1x8x128xf32>
    %730 = vector.shape_cast %729 : vector<1x8x128xf32> to vector<8x128xf32>
    %731 = vector.shape_cast %688 : vector<8x128xf32> to vector<1x8x128xf32>
    tpu.vector_store %arg10[%c0_337, %c0_338, %c0_339], %731 {strides = array<i32>} : memref<2x8x128xf32, #tpu.memory_space<vmem>>, vector<1x8x128xf32>,
    %c1_340 = arith.constant 1 : index
    %c0_341 = arith.constant 0 : index
    %c0_342 = arith.constant 0 : index
    %732 = vector.load %arg9[%c1_340, %c0_341, %c0_342] : memref<2x8x128xf32, #tpu.memory_space<vmem>>, vector<1x8x128xf32>
    %733 = vector.shape_cast %732 : vector<1x8x128xf32> to vector<8x128xf32>
    %734 = vector.shape_cast %725 : vector<8x128xf32> to vector<1x8x128xf32>
    tpu.vector_store %arg9[%c1_340, %c0_341, %c0_342], %734 {strides = array<i32>} : memref<2x8x128xf32, #tpu.memory_space<vmem>>, vector<1x8x128xf32>,
    %c1_343 = arith.constant 1 : index
    %c0_344 = arith.constant 0 : index
    %c0_345 = arith.constant 0 : index
    %735 = vector.load %arg10[%c1_343, %c0_344, %c0_345] : memref<2x8x128xf32, #tpu.memory_space<vmem>>, vector<1x8x128xf32>
    %736 = vector.shape_cast %735 : vector<1x8x128xf32> to vector<8x128xf32>
    %737 = vector.shape_cast %723 : vector<8x128xf32> to vector<1x8x128xf32>
    tpu.vector_store %arg10[%c1_343, %c0_344, %c0_345], %737 {strides = array<i32>} : memref<2x8x128xf32, #tpu.memory_space<vmem>>, vector<1x8x128xf32>,
    %738 = arith.index_cast %c7_i32_308 : i32 to index
    %c0_346 = arith.constant 0 : index
    %c0_347 = arith.constant 0 : index
    %739 = vector.load %arg6[%738, %c0_346, %c0_347] : memref<8x8x256xf32, #tpu.memory_space<vmem>>, vector<1x8x128xf32>
    %740 = vector.shape_cast %739 : vector<1x8x128xf32> to vector<8x128xf32>
    %741 = vector.shape_cast %690 : vector<8x128xf32> to vector<1x8x128xf32>
    tpu.vector_store %arg6[%738, %c0_346, %c0_347], %741 {strides = array<i32>} : memref<8x8x256xf32, #tpu.memory_space<vmem>>, vector<1x8x128xf32>,
    %742 = arith.index_cast %655 : i32 to index
    %c0_348 = arith.constant 0 : index
    %c128_349 = arith.constant 128 : index
    %743 = vector.load %arg6[%742, %c0_348, %c128_349] : memref<8x8x256xf32, #tpu.memory_space<vmem>>, vector<1x8x128xf32>
    %744 = vector.shape_cast %743 : vector<1x8x128xf32> to vector<8x128xf32>
    %745 = vector.shape_cast %725 : vector<8x128xf32> to vector<1x8x128xf32>
    tpu.vector_store %arg6[%742, %c0_348, %c128_349], %745 {strides = array<i32>} : memref<8x8x256xf32, #tpu.memory_space<vmem>>, vector<1x8x128xf32>,
    %c8_i32 = arith.constant 8 : i32
    return
  }
  func.func @transform_0(%arg0: i32) -> (i32, i32, i32) {
    %c0_i32 = arith.constant 0 : i32
    %c0_i32_0 = arith.constant 0 : i32
    %c0_i32_1 = arith.constant 0 : i32
    return %c0_i32, %arg0, %c0_i32_0 : i32, i32, i32
  }
  func.func @transform_1(%arg0: i32) -> (i32, i32) {
    %c0_i32 = arith.constant 0 : i32
    %c0_i32_0 = arith.constant 0 : i32
    %c0_i32_1 = arith.constant 0 : i32
    return %c0_i32, %c0_i32_0 : i32, i32
  }
  func.func @transform_2(%arg0: i32) -> (i32, i32) {
    %c0_i32 = arith.constant 0 : i32
    %c0_i32_0 = arith.constant 0 : i32
    %c0_i32_1 = arith.constant 0 : i32
    return %c0_i32, %c0_i32_0 : i32, i32
  }
  func.func @transform_3(%arg0: i32) -> (i32, i32) {
    %c0_i32 = arith.constant 0 : i32
    %c0_i32_0 = arith.constant 0 : i32
    %c0_i32_1 = arith.constant 0 : i32
    return %c0_i32, %c0_i32_0 : i32, i32
  }
  func.func @transform_4(%arg0: i32) -> (i32, i32) {
    %c0_i32 = arith.constant 0 : i32
    %c0_i32_0 = arith.constant 0 : i32
    %c0_i32_1 = arith.constant 0 : i32
    return %c0_i32, %c0_i32_0 : i32, i32
  }
  func.func @transform_5(%arg0: i32) -> (i32, i32, i32) {
    %c0_i32 = arith.constant 0 : i32
    %c0_i32_0 = arith.constant 0 : i32
    %c0_i32_1 = arith.constant 0 : i32
    return %c0_i32, %arg0, %c0_i32_0 : i32, i32, i32
  }
}

module attributes {stable_mosaic.version = 11 : i64} {
  func.func @head_kernel(%arg0: i32, %arg1: memref<8x256xf32, #tpu.memory_space<vmem>>, %arg2: memref<256x256xbf16, #tpu.memory_space<vmem>>, %arg3: memref<1x256xf32, #tpu.memory_space<vmem>>, %arg4: memref<256x4xbf16, #tpu.memory_space<vmem>>, %arg5: memref<1x4xf32, #tpu.memory_space<vmem>>, %arg6: memref<8x4xf32, #tpu.memory_space<vmem>>) attributes {dimension_semantics = [#tpu.dimension_semantics<arbitrary>], iteration_bounds = array<i64: 1>, scalar_prefetch = 0 : i64, scratch_operands = 0 : i64, tpu.core_type = #tpu.core_type<tc>, window_params = [{pipeline_mode = #tpu.pipeline_mode<synchronous>, transform_indices = @transform_0, window_bounds = array<i64: 8, 256>}, {pipeline_mode = #tpu.pipeline_mode<synchronous>, transform_indices = @transform_1, window_bounds = array<i64: 256, 256>}, {pipeline_mode = #tpu.pipeline_mode<synchronous>, transform_indices = @transform_2, window_bounds = array<i64: 1, 256>}, {pipeline_mode = #tpu.pipeline_mode<synchronous>, transform_indices = @transform_3, window_bounds = array<i64: 256, 4>}, {pipeline_mode = #tpu.pipeline_mode<synchronous>, transform_indices = @transform_4, window_bounds = array<i64: 1, 4>}, {pipeline_mode = #tpu.pipeline_mode<synchronous>, transform_indices = @transform_5, window_bounds = array<i64: 8, 4>}]} {
    %c0 = arith.constant 0 : index
    %c0_0 = arith.constant 0 : index
    %0 = vector.load %arg1[%c0, %c0_0] : memref<8x256xf32, #tpu.memory_space<vmem>>, vector<8x256xf32>
    %1 = arith.truncf %0 : vector<8x256xf32> to vector<8x256xbf16>
    %c0_1 = arith.constant 0 : index
    %c0_2 = arith.constant 0 : index
    %2 = vector.load %arg2[%c0_1, %c0_2] : memref<256x256xbf16, #tpu.memory_space<vmem>>, vector<256x256xbf16>
    %cst = arith.constant dense<0.000000e+00> : vector<8x256xf32>
    %3 = tpu.matmul %1, %2, %cst {dimension_numbers = #tpu.dot_dimension_numbers<[1], [0], [0], [1], [0, 0, 1, 1], [], []>} : vector<8x256xbf16>, vector<256x256xbf16>, vector<8x256xf32> -> vector<8x256xf32>
    %c0_3 = arith.constant 0 : index
    %c0_4 = arith.constant 0 : index
    %4 = vector.load %arg3[%c0_3, %c0_4] : memref<1x256xf32, #tpu.memory_space<vmem>>, vector<1x256xf32>
    %5 = vector.broadcast %4 : vector<1x256xf32> to vector<8x256xf32>
    %6 = arith.addf %3, %5 : vector<8x256xf32>
    %cst_5 = arith.constant 0.000000e+00 : f32
    %7 = vector.broadcast %cst_5 : f32 to vector<8x256xf32>
    %8 = arith.maximumf %6, %7 : vector<8x256xf32>
    %9 = arith.truncf %8 : vector<8x256xf32> to vector<8x256xbf16>
    %c0_6 = arith.constant 0 : index
    %c0_7 = arith.constant 0 : index
    %10 = vector.load %arg4[%c0_6, %c0_7] : memref<256x4xbf16, #tpu.memory_space<vmem>>, vector<256x4xbf16>
    %cst_8 = arith.constant dense<0.000000e+00> : vector<8x4xf32>
    %11 = tpu.matmul %9, %10, %cst_8 {dimension_numbers = #tpu.dot_dimension_numbers<[1], [0], [0], [1], [0, 0, 1, 1], [], []>} : vector<8x256xbf16>, vector<256x4xbf16>, vector<8x4xf32> -> vector<8x4xf32>
    %c0_9 = arith.constant 0 : index
    %c0_10 = arith.constant 0 : index
    %12 = vector.load %arg5[%c0_9, %c0_10] : memref<1x4xf32, #tpu.memory_space<vmem>>, vector<1x4xf32>
    %13 = vector.broadcast %12 : vector<1x4xf32> to vector<8x4xf32>
    %14 = arith.addf %11, %13 : vector<8x4xf32>
    %cst_11 = arith.constant dense<0xFF800000> : vector<8xf32>
    %15 = vector.multi_reduction <maximumf>, %14, %cst_11 [1] : vector<8x4xf32> to vector<8xf32>
    %16 = vector.shape_cast %15 : vector<8xf32> to vector<8x1xf32>
    %17 = vector.broadcast %16 : vector<8x1xf32> to vector<8x4xf32>
    %18 = arith.subf %14, %17 : vector<8x4xf32>
    %19 = math.exp %18 : vector<8x4xf32>
    %cst_12 = arith.constant dense<0.000000e+00> : vector<8xf32>
    %20 = vector.multi_reduction <add>, %19, %cst_12 [1] : vector<8x4xf32> to vector<8xf32>
    %21 = vector.shape_cast %20 : vector<8xf32> to vector<8x1xf32>
    %22 = vector.broadcast %21 : vector<8x1xf32> to vector<8x4xf32>
    %23 = arith.divf %19, %22 : vector<8x4xf32>
    %c0_13 = arith.constant 0 : index
    %c0_14 = arith.constant 0 : index
    %24 = vector.load %arg6[%c0_13, %c0_14] : memref<8x4xf32, #tpu.memory_space<vmem>>, vector<8x4xf32>
    tpu.vector_store %arg6[%c0_13, %c0_14], %23 {strides = array<i32>} : memref<8x4xf32, #tpu.memory_space<vmem>>, vector<8x4xf32>,
    return
  }
  func.func @transform_0(%arg0: i32) -> (i32, i32) {
    %c0_i32 = arith.constant 0 : i32
    %c0_i32_0 = arith.constant 0 : i32
    %c0_i32_1 = arith.constant 0 : i32
    return %c0_i32, %c0_i32_0 : i32, i32
  }
  func.func @transform_1(%arg0: i32) -> (i32, i32) {
    %c0_i32 = arith.constant 0 : i32
    %c0_i32_0 = arith.constant 0 : i32
    %c0_i32_1 = arith.constant 0 : i32
    return %c0_i32, %c0_i32_0 : i32, i32
  }
  func.func @transform_2(%arg0: i32) -> (i32, i32) {
    %c0_i32 = arith.constant 0 : i32
    %c0_i32_0 = arith.constant 0 : i32
    %c0_i32_1 = arith.constant 0 : i32
    return %c0_i32, %c0_i32_0 : i32, i32
  }
  func.func @transform_3(%arg0: i32) -> (i32, i32) {
    %c0_i32 = arith.constant 0 : i32
    %c0_i32_0 = arith.constant 0 : i32
    %c0_i32_1 = arith.constant 0 : i32
    return %c0_i32, %c0_i32_0 : i32, i32
  }
  func.func @transform_4(%arg0: i32) -> (i32, i32) {
    %c0_i32 = arith.constant 0 : i32
    %c0_i32_0 = arith.constant 0 : i32
    %c0_i32_1 = arith.constant 0 : i32
    return %c0_i32, %c0_i32_0 : i32, i32
  }
  func.func @transform_5(%arg0: i32) -> (i32, i32) {
    %c0_i32 = arith.constant 0 : i32
    %c0_i32_0 = arith.constant 0 : i32
    %c0_i32_1 = arith.constant 0 : i32
    return %c0_i32, %c0_i32_0 : i32, i32
  }
}

</mosaic_0001>

<bundles_post_ra>
// kernel: phobert_lstm_forward.5
= control target key start
LH: loop header
LB: loop body
LE: loop exit
PB: predicated region body
PF: predicated region fallthrough
CT: control target
= control target key end

     0   :  { %v59_v52 = vlaneseq  ;;  %vm449_vm0 = vcmask 31744   ;;  %s797_s1 = inlined_call_operand.vmem [shape: bf16[256,256], index: 1, kind: input, shape index: {}]   ;;  %s798_s0 = inlined_call_operand.vmem [shape: f32[8,256], index: 0, kind: input, shape index: {}]   ;;  %s799_s3 = inlined_call_operand.vmem [shape: bf16[256,4], index: 3, kind: input, shape index: {}]   ;;  %s800_s2 = inlined_call_operand.vmem [shape: f32[1,256], index: 2, kind: input, shape index: {}]   ;;  %s801_s4 = inlined_call_operand.vmem [shape: f32[1,4], index: 4, kind: input, shape index: {}]   ;;  %s802_s5 = inlined_call_operand.vmem [shape: f32[8,4], index: 5, kind: output, shape index: {}]  }
   0x1   :  { %v537_v0 = vld [vmem:[%s797_s1 + $0x74] ss:$8 sps:$4 sm:$0xff]   ;;  %v539_v1 = vld [vmem:[%s797_s1 + $0x70] ss:$8 sps:$4 sm:$0xff]   ;;  %v540_v2 = vld [vmem:[%s797_s1 + $0x64] ss:$8 sps:$4 sm:$0xff]  }
   0x2   :  { %229 = vmatprep.subr.bf16.mxu0 %v537_v0  ;;  %v542_v3 = vld [vmem:[%s797_s1 + $0x60] ss:$8 sps:$4 sm:$0xff]   ;;  %v543_v4 = vld [vmem:[%s797_s1 + $0x54] ss:$8 sps:$4 sm:$0xff]   ;;  %v545_v5 = vld [vmem:[%s797_s1 + $0x50] ss:$8 sps:$4 sm:$0xff]  }
   0x3   :  { %230 = vmatpush1.bf16.msra.mxu0 %v539_v1  ;;  %v546_v6 = vld [vmem:[%s797_s1 + $0x44] ss:$8 sps:$4 sm:$0xff]   ;;  %v548_v7 = vld [vmem:[%s797_s1 + $0x40] ss:$8 sps:$4 sm:$0xff]   ;;  %v549_v8 = vld [vmem:[%s797_s1 + $0x34] ss:$8 sps:$4 sm:$0xff]  }
   0x4   :  { %231 = vmatprep.subr.bf16.mxu0 %v540_v2  ;;  %v551_v9 = vld [vmem:[%s797_s1 + $0x30] ss:$8 sps:$4 sm:$0xff]   ;;  %v552_v10 = vld [vmem:[%s797_s1 + $0x24] ss:$8 sps:$4 sm:$0xff]   ;;  %v554_v11 = vld [vmem:[%s797_s1 + $0x20] ss:$8 sps:$4 sm:$0xff]  }
   0x5   :  { %v555_v12 = vld [vmem:[%s797_s1 + $0x14] ss:$8 sps:$4 sm:$0xff]   ;;  %v557_v13 = vld [vmem:[%s797_s1 + $0x10] ss:$8 sps:$4 sm:$0xff]   ;;  %v22_v14 = vld [vmem:[%s798_s0 + $0x8] sm:$0xff]  ;;  %v60_v53 = vshrl.u32 %v59_v52, 7 }
   0x6   :  { %v558_v15 = vld [vmem:[%s797_s1 + $0x4] ss:$8 sps:$4 sm:$0xff]   ;;  %v24_v16 = vpack.c.bf16 %v22_v14, %v22_v14  ;;  %v585_v17 = vld [vmem:[%s799_s3 + $0x78] sm:$0xff]   ;;  %v587_v19 = vld [vmem:[%s799_s3 + $0x70] sm:$0xff]  }
   0x7   :  { %232 = vmatpush1.bf16.msra.mxu0 %v542_v3  ;;  %v586_v18 = vld [vmem:[%s799_s3 + $0x38] sm:$0xff]   ;;  %v560_v20 = vld [vmem:[%s797_s1] ss:$8 sps:$4 sm:$0xff]   ;;  %515 = vmatprep.subr.bf16.mxu1 %v585_v17  ;;  %v588_v21 = vld [vmem:[%s799_s3 + $0x30] sm:$0xff]   ;;  %v61_v54 = vsub.s32 0, %v60_v53  ;;  %v65_v56 = vsub.s32 1, %v60_v53 }
   0x8   :  { %233 = vmatprep.subr.bf16.mxu0 %v543_v4  ;;  %261 = vmatprep.mubr.bf16.mxu0 %v24_v16  ;;  %v589_v22 = vld [vmem:[%s799_s3 + $0x68] sm:$0xff]   ;;  %v561_v23 = vld [vmem:[%s797_s1 + $0xf4] ss:$8 sps:$4 sm:$0xff]   ;;  %v563_v24 = vld [vmem:[%s797_s1 + $0xf0] ss:$8 sps:$4 sm:$0xff]  }
   0x9   :  { %516 = vmatpush3.bf16.msra.mxu1 %v586_v18  ;;  %v590_v25 = vld [vmem:[%s799_s3 + $0x28] sm:$0xff]   ;;  %v591_v26 = vld [vmem:[%s799_s3 + $0x60] sm:$0xff]   ;;  %v567_v30 = vld [vmem:[%s797_s1 + $0xd4] ss:$8 sps:$4 sm:$0xff]  }
   0xa   :  { %517 = vmatprep.subr.bf16.mxu1 %v587_v19  ;;  %v564_v27 = vld [vmem:[%s797_s1 + $0xe4] ss:$8 sps:$4 sm:$0xff]   ;;  %v566_v28 = vld [vmem:[%s797_s1 + $0xe0] ss:$8 sps:$4 sm:$0xff]   ;;  %v593_v31 = vld [vmem:[%s799_s3 + $0x58] sm:$0xff]  }
   0xb   :  { %234 = vmatpush1.bf16.msra.mxu0 %v545_v5  ;;  %v592_v29 = vld [vmem:[%s799_s3 + $0x20] sm:$0xff]   ;;  %v594_v32 = vld [vmem:[%s799_s3 + $0x18] sm:$0xff]   ;;  %v595_v34 = vld [vmem:[%s799_s3 + $0x50] sm:$0xff]  }
   0xc   :  { %235 = vmatprep.subr.bf16.mxu0 %v546_v6  ;;  %v569_v33 = vld [vmem:[%s797_s1 + $0xd0] ss:$8 sps:$4 sm:$0xff]   ;;  %v570_v35 = vld [vmem:[%s797_s1 + $0xc4] ss:$8 sps:$4 sm:$0xff]   ;;  %v572_v37 = vld [vmem:[%s797_s1 + $0xc0] ss:$8 sps:$4 sm:$0xff]  }
   0xd   :  { %518 = vmatpush3.bf16.msra.mxu1 %v588_v21  ;;  %v596_v36 = vld [vmem:[%s799_s3 + $0x10] sm:$0xff]   ;;  %v576_v40 = vld [vmem:[%s797_s1 + $0xa4] ss:$8 sps:$4 sm:$0xff]   ;;  %v578_v41 = vld [vmem:[%s797_s1 + $0xa0] ss:$8 sps:$4 sm:$0xff]  }
   0xe   :  { %519 = vmatprep.subr.bf16.mxu1 %v589_v22  ;;  %v573_v38 = vld [vmem:[%s797_s1 + $0xb4] ss:$8 sps:$4 sm:$0xff]   ;;  %v575_v39 = vld [vmem:[%s797_s1 + $0xb0] ss:$8 sps:$4 sm:$0xff]   ;;  %v582_v44 = vld [vmem:[%s797_s1 + $0x84] ss:$8 sps:$4 sm:$0xff]  }
   0xf   :  { %236 = vmatpush1.bf16.msra.mxu0 %v548_v7  ;;  %v579_v42 = vld [vmem:[%s797_s1 + $0x94] ss:$8 sps:$4 sm:$0xff]   ;;  %v581_v43 = vld [vmem:[%s797_s1 + $0x90] ss:$8 sps:$4 sm:$0xff]   ;;  %v584_v45 = vld [vmem:[%s797_s1 + $0x80] ss:$8 sps:$4 sm:$0xff]  }
  0x10   :  { %237 = vmatprep.subr.bf16.mxu0 %v549_v8  ;;  %v21_v46 = vld [vmem:[%s798_s0] sm:$0xff]  ;;  %v597_v48 = vld [vmem:[%s799_s3 + $0x48] sm:$0xff]  }
  0x11   :  { %520 = vmatpush3.bf16.msra.mxu1 %v590_v25  ;;  %v23_v47 = vpack.c.bf16 %v21_v46, %v21_v46  ;;  %v598_v49 = vld [vmem:[%s799_s3 + $0x8] sm:$0xff]   ;;  %v599_v50 = vld [vmem:[%s799_s3 + $0x40] sm:$0xff]  }
  0x12   :  { %521 = vmatprep.subr.bf16.mxu1 %v591_v26  ;;  %v600_v51 = vld [vmem:[%s799_s3] sm:$0xff]  }
  0x13   :  { %238 = vmatpush1.bf16.msra.mxu0 %v551_v9  ;;  %v57_v55 = vld [vmem:[%s800_s2] sm:$0x3] }
  0x14   :  { %239 = vmatprep.subr.bf16.mxu0 %v552_v10  ;;  %v62_v57 = vrot.slane %v57_v55, %v61_v54  ;;  %v66_v58 = vrot.slane %v57_v55, %v65_v56  ;;  %v498_v7 = vld [vmem:[%s801_s4] ss:$0 sm:$0xff] }
  0x15   :  { %522 = vmatpush3.bf16.msra.mxu1 %v592_v29 }
  0x16   :  { %523 = vmatprep.subr.bf16.mxu1 %v593_v31 }
  0x17   :  { %240 = vmatpush1.bf16.msra.mxu0 %v554_v11 }
  0x18   :  { %241 = vmatprep.subr.bf16.mxu0 %v555_v12 }
  0x19   :  { %524 = vmatpush3.bf16.msra.mxu1 %v594_v32 }
  0x1a   :  { %525 = vmatprep.subr.bf16.mxu1 %v595_v34 }
  0x1b   :  { %242 = vmatpush1.bf16.msra.mxu0 %v557_v13 }
  0x1c   :  { %243 = vmatprep.subr.bf16.mxu0 %v558_v15 }
  0x1d   :  { %526 = vmatpush3.bf16.msra.mxu1 %v596_v36 }
  0x1e   :  { %527 = vmatprep.subr.bf16.mxu1 %v597_v48 }
  0x1f   :  { %244 = vmatpush1.bf16.msra.mxu0 %v560_v20 }
  0x20   :  { %245 = vmatprep.subr.bf16.mxu0 %v561_v23 }
  0x21   :  { %528 = vmatpush3.bf16.msra.mxu1 %v598_v49 }
  0x22   :  { %529 = vmatprep.subr.bf16.mxu1 %v599_v50 }
  0x23   :  { %246 = vmatpush2.bf16.msra.mxu0 %v563_v24 }
  0x24   :  { %247 = vmatprep.subr.bf16.mxu0 %v564_v27 }
  0x25   :  { %530 = vmatpush3.bf16.msra.mxu1 %v600_v51 }
  0x27   :  { %248 = vmatpush2.bf16.msra.mxu0 %v566_v28 }
  0x28   :  { %249 = vmatprep.subr.bf16.mxu0 %v567_v30 }
  0x2b   :  { %250 = vmatpush2.bf16.msra.mxu0 %v569_v33 }
  0x2c   :  { %251 = vmatprep.subr.bf16.mxu0 %v570_v35 }
  0x2f   :  { %252 = vmatpush2.bf16.msra.mxu0 %v572_v37 }
  0x30   :  { %253 = vmatprep.subr.bf16.mxu0 %v573_v38 }
  0x33   :  { %254 = vmatpush2.bf16.msra.mxu0 %v575_v39 }
  0x34   :  { %255 = vmatprep.subr.bf16.mxu0 %v576_v40 }
  0x37   :  { %256 = vmatpush2.bf16.msra.mxu0 %v578_v41 }
  0x38   :  { %257 = vmatprep.subr.bf16.mxu0 %v579_v42 }
  0x3b   :  { %258 = vmatpush2.bf16.msra.mxu0 %v581_v43 }
  0x3c   :  { %259 = vmatprep.subr.bf16.mxu0 %v582_v44 }
  0x3f   :  { %260 = vmatpush2.bf16.msra.mxu0 %v584_v45 }
  0x42   :  { %262 = vmatmul.mubr.bf16.vlgmr.msra.gmra.mxu0 %v23_v47 }
 0x102   :  { %v263_v59 = vpop.f32.mrf.mxu0 }
 0x103   :  { %v264_v60 = vadd.f32 %v263_v59, %v62_v57 }
 0x104   :  { %v265_v61 = vpop.f32.mrf.mxu0 }
 0x105   :  { %v266_v62 = vadd.f32 %v265_v61, %v66_v58  ;;  %v270_v63 = vmax.f32 %v264_v60, 0.0 }
 0x106   :  { %v267_v0 = vpop.f32.mrf.mxu0 }
 0x107   :  { %v271_v1 = vmax.f32 %v266_v62, 0.0  ;;  %v272_v4 = vpack.c.bf16 %v270_v63, %v270_v63 }
 0x108   :  { %v268_v2 = vpop.f32.mrf.mxu0 }
 0x109   :  { %v273_v3 = vpack.c.bf16 %v271_v1, %v271_v1 }
 0x10b   :  { %441 = vmatprep.mubr.bf16.mxu1 %v273_v3 }
 0x10c   :  { %442 = vmatmul.mubr.bf16.vlgmr.msra.gmra.mxu1 %v272_v4 }
 0x1cc   :  { %v531_v5 = vpop.f32.mrf.mxu1 }
 0x1ce   :  { %v532_v6 = vpop.f32.mrf.mxu1 }
 0x1cf   :  { %v533_v8 = vadd.f32 %v532_v6, %v531_v5 }
 0x1d0   :  { %v534_v9 = vpop.f32.mrf.mxu1 }
 0x1d1   :  { %v444_v10 = vadd.f32 %v533_v8, %v498_v7 }
 0x1d2   :  { %v535_v11 = vpop.f32.mrf.mxu1 }
 0x1d3   :  { %v450_v12 = vsel %vm449_vm0, %v444_v10, -inf }
 0x1d4   :  { %451 = vmax.xlane.f32.xlu0 %v450_v12 }
 0x25d   :  { %v452_v13 = vpop.xlane.xlu0 %451 }
 0x25e   :  { %v453_v14 = vsub.f32 %v444_v10, %v452_v13 }
 0x260   :  { %v454_v15 = vmul.f32 1.442695, %v453_v14 }
 0x262   :  { %601 = vpow2.f32 %v454_v15 }
 0x26f   :  { %v602_v16 = vpop.eup %601 }
 0x270   :  { %v456_v17 = vsel %vm449_vm0, %v602_v16, 0.0 }
 0x271   :  { %457 = vadd.xlane.f32.xlu0 %v456_v17 }
 0x2fa   :  { %v458_v18 = vpop.xlane.xlu0 %457 }
 0x2fb   :  { %603 = vrcp.f32 %v458_v18 }
 0x308   :  { %v604_v19 = vpop.eup %603 }
 0x309   :  { %v460_v20 = vmul.f32 %v604_v19, %v602_v16 }
 0x30b   :  { %461 = vst.msk [vmem:[%s802_s5] sm:$0xff] %vm449_vm0, %v460_v20 }

// kernel: phobert_lstm_forward.3
= control target key start
LH: loop header
LB: loop body
LE: loop exit
PB: predicated region body
PF: predicated region fallthrough
CT: control target
= control target key end

     0   :  { %v5835_v3 = vmov 0   ;;  %s5829_s1 = inlined_call_operand.vmem [shape: bf16[128,1024], index: 1, kind: input, shape index: {}]   ;;  %s5830_s0 = inlined_call_operand.vmem [shape: bf16[8,8,128], index: 0, kind: input, shape index: {}]   ;;  %s5831_s2 = inlined_call_operand.vmem [shape: bf16[128,512], index: 2, kind: input, shape index: {}]   ;;  %s5832_s3 = inlined_call_operand.vmem [shape: bf16[128,512], index: 3, kind: input, shape index: {}]   ;;  %s5833_s4 = inlined_call_operand.vmem [shape: f32[1,1024], index: 4, kind: input, shape index: {}]   ;;  %s5834_s5 = inlined_call_operand.vmem [shape: f32[8,8,256], index: 5, kind: output, shape index: {}]  }
   0x1   :  { %v85_v0 = vld [vmem:[%s5829_s1 + $0x1c0] sm:$0xff]  ;;  %v86_v2 = vld [vmem:[%s5829_s1 + $0x1c8] sm:$0xff]  ;;  %511 = vmatprep.mubr.bf16.mxu0 %v5835_v3  ;;  %584 = vmatprep.mubr.bf16.mxu1 %v5835_v3  ;;  %v87_v62 = vld [vmem:[%s5829_s1 + $0x1d0] sm:$0xff] }
   0x2   :  { %v89_v1 = vld [vmem:[%s5829_s1 + $0x1e0] sm:$0xff]  ;;  %v90_v5 = vld [vmem:[%s5829_s1 + $0x1e8] sm:$0xff] }
   0x3   :  { %v3231_v4 = vcombine.high %v85_v0, %v89_v1  ;;  %v3230_v6 = vcombine.low %v85_v0, %v89_v1  ;;  %v77_v7 = vld [vmem:[%s5829_s1 + $0x180] sm:$0xff]  ;;  %v3233_v9 = vcombine.high %v86_v2, %v90_v5  ;;  %v3232_v10 = vcombine.low %v86_v2, %v90_v5  ;;  %v78_v12 = vld [vmem:[%s5829_s1 + $0x188] sm:$0xff]  ;;  %v91_v0 = vld [vmem:[%s5829_s1 + $0x1f0] sm:$0xff] }
   0x4   :  { %v81_v8 = vld [vmem:[%s5829_s1 + $0x1a0] sm:$0xff]  ;;  %v82_v13 = vld [vmem:[%s5829_s1 + $0x1a8] sm:$0xff]  ;;  %v88_v1 = vld [vmem:[%s5829_s1 + $0x1d8] sm:$0xff] }
   0x5   :  { %v3223_v11 = vcombine.high %v77_v7, %v81_v8  ;;  %v69_v14 = vld [vmem:[%s5829_s1 + $0x140] sm:$0xff]  ;;  %479 = vmatprep.subr.bf16.mxu0 %v3231_v4  ;;  %v3225_v15 = vcombine.high %v78_v12, %v82_v13  ;;  %v70_v17 = vld [vmem:[%s5829_s1 + $0x148] sm:$0xff]  ;;  %552 = vmatprep.subr.bf16.mxu1 %v3233_v9  ;;  %v3222_v19 = vcombine.low %v77_v7, %v81_v8  ;;  %v92_v2 = vld [vmem:[%s5829_s1 + $0x1f8] sm:$0xff] }
   0x6   :  { %v73_v16 = vld [vmem:[%s5829_s1 + $0x160] sm:$0xff]  ;;  %v74_v18 = vld [vmem:[%s5829_s1 + $0x168] sm:$0xff]  ;;  %480 = vmatpush1.bf16.msra.mxu0 %v3230_v6  ;;  %553 = vmatpush1.bf16.msra.mxu1 %v3232_v10  ;;  %v3224_v20 = vcombine.low %v78_v12, %v82_v13  ;;  %v3235_v7 = vcombine.high %v87_v62, %v91_v0  ;;  %v79_v8 = vld [vmem:[%s5829_s1 + $0x190] sm:$0xff]  ;;  %v3237_v9 = vcombine.high %v88_v1, %v92_v2 }
   0x7   :  { %481 = vmatprep.subr.bf16.mxu0 %v3223_v11  ;;  %v3215_v21 = vcombine.high %v69_v14, %v73_v16  ;;  %554 = vmatprep.subr.bf16.mxu1 %v3225_v15  ;;  %v3217_v22 = vcombine.high %v70_v17, %v74_v18  ;;  %v61_v23 = vld [vmem:[%s5829_s1 + $0x100] sm:$0xff]  ;;  %v62_v25 = vld [vmem:[%s5829_s1 + $0x108] sm:$0xff]  ;;  %v3214_v27 = vcombine.low %v69_v14, %v73_v16  ;;  %v83_v10 = vld [vmem:[%s5829_s1 + $0x1b0] sm:$0xff] }
   0x8   :  { %v65_v24 = vld [vmem:[%s5829_s1 + $0x120] sm:$0xff]  ;;  %v66_v26 = vld [vmem:[%s5829_s1 + $0x128] sm:$0xff]  ;;  %v3216_v28 = vcombine.low %v70_v17, %v74_v18  ;;  %v80_v11 = vld [vmem:[%s5829_s1 + $0x198] sm:$0xff]  ;;  %v3234_v13 = vcombine.low %v87_v62, %v91_v0  ;;  %v3236_v14 = vcombine.low %v88_v1, %v92_v2  ;;  %v3227_v15 = vcombine.high %v79_v8, %v83_v10 }
   0x9   :  { %v3207_v29 = vcombine.high %v61_v23, %v65_v24  ;;  %v3209_v30 = vcombine.high %v62_v25, %v66_v26  ;;  %v53_v31 = vld [vmem:[%s5829_s1 + $0xc0] sm:$0xff]  ;;  %v54_v33 = vld [vmem:[%s5829_s1 + $0xc8] sm:$0xff]  ;;  %v3206_v35 = vcombine.low %v61_v23, %v65_v24  ;;  %v3208_v36 = vcombine.low %v62_v25, %v66_v26  ;;  %v84_v12 = vld [vmem:[%s5829_s1 + $0x1b8] sm:$0xff] }
   0xa   :  { %482 = vmatpush1.bf16.msra.mxu0 %v3222_v19  ;;  %555 = vmatpush1.bf16.msra.mxu1 %v3224_v20  ;;  %v57_v32 = vld [vmem:[%s5829_s1 + $0xe0] sm:$0xff]  ;;  %v58_v34 = vld [vmem:[%s5829_s1 + $0xe8] sm:$0xff]  ;;  %v71_v16 = vld [vmem:[%s5829_s1 + $0x150] sm:$0xff]  ;;  %v3229_v17 = vcombine.high %v80_v11, %v84_v12 }
   0xb   :  { %483 = vmatprep.subr.bf16.mxu0 %v3215_v21  ;;  %556 = vmatprep.subr.bf16.mxu1 %v3217_v22  ;;  %v3199_v37 = vcombine.high %v53_v31, %v57_v32  ;;  %v45_v38 = vld [vmem:[%s5829_s1 + $0x80] sm:$0xff]  ;;  %v3201_v39 = vcombine.high %v54_v33, %v58_v34  ;;  %v46_v41 = vld [vmem:[%s5829_s1 + $0x88] sm:$0xff]  ;;  %v3198_v43 = vcombine.low %v53_v31, %v57_v32  ;;  %v75_v18 = vld [vmem:[%s5829_s1 + $0x170] sm:$0xff] }
   0xc   :  { %v49_v40 = vld [vmem:[%s5829_s1 + $0xa0] sm:$0xff]  ;;  %v50_v42 = vld [vmem:[%s5829_s1 + $0xa8] sm:$0xff]  ;;  %v3200_v44 = vcombine.low %v54_v33, %v58_v34  ;;  %v72_v19 = vld [vmem:[%s5829_s1 + $0x158] sm:$0xff]  ;;  %v3226_v21 = vcombine.low %v79_v8, %v83_v10  ;;  %v3228_v22 = vcombine.low %v80_v11, %v84_v12  ;;  %v3219_v24 = vcombine.high %v71_v16, %v75_v18 }
   0xd   :  { %v3191_v45 = vcombine.high %v45_v38, %v49_v40  ;;  %v37_v46 = vld [vmem:[%s5829_s1 + $0x40] sm:$0xff]  ;;  %v3193_v47 = vcombine.high %v46_v41, %v50_v42  ;;  %v38_v49 = vld [vmem:[%s5829_s1 + $0x48] sm:$0xff]  ;;  %v3190_v51 = vcombine.low %v45_v38, %v49_v40  ;;  %v3192_v52 = vcombine.low %v46_v41, %v50_v42  ;;  %v76_v20 = vld [vmem:[%s5829_s1 + $0x178] sm:$0xff] }
   0xe   :  { %484 = vmatpush1.bf16.msra.mxu0 %v3214_v27  ;;  %557 = vmatpush1.bf16.msra.mxu1 %v3216_v28  ;;  %v41_v48 = vld [vmem:[%s5829_s1 + $0x60] sm:$0xff]  ;;  %v42_v50 = vld [vmem:[%s5829_s1 + $0x68] sm:$0xff]  ;;  %v63_v25 = vld [vmem:[%s5829_s1 + $0x110] sm:$0xff]  ;;  %v3221_v26 = vcombine.high %v72_v19, %v76_v20  ;;  %v3220_v31 = vcombine.low %v72_v19, %v76_v20 }
   0xf   :  { %485 = vmatprep.subr.bf16.mxu0 %v3207_v29  ;;  %558 = vmatprep.subr.bf16.mxu1 %v3209_v30  ;;  %v3183_v53 = vcombine.high %v37_v46, %v41_v48  ;;  %v3185_v54 = vcombine.high %v38_v49, %v42_v50  ;;  %v29_v55 = vld [vmem:[%s5829_s1] sm:$0xff]  ;;  %v30_v57 = vld [vmem:[%s5829_s1 + $0x8] sm:$0xff]  ;;  %v3182_v59 = vcombine.low %v37_v46, %v41_v48  ;;  %v67_v27 = vld [vmem:[%s5829_s1 + $0x130] sm:$0xff] }
  0x10   :  { %v33_v56 = vld [vmem:[%s5829_s1 + $0x20] sm:$0xff]  ;;  %v34_v58 = vld [vmem:[%s5829_s1 + $0x28] sm:$0xff]  ;;  %v3184_v60 = vcombine.low %v38_v49, %v42_v50  ;;  %v64_v28 = vld [vmem:[%s5829_s1 + $0x118] sm:$0xff]  ;;  %v3218_v30 = vcombine.low %v71_v16, %v75_v18  ;;  %v3211_v32 = vcombine.high %v63_v25, %v67_v27  ;;  %v3210_v38 = vcombine.low %v63_v25, %v67_v27 }
  0x11   :  { %v3175_v61 = vcombine.high %v29_v55, %v33_v56  ;;  %v3177_v63 = vcombine.high %v30_v57, %v34_v58  ;;  %v3174_v4 = vcombine.low %v29_v55, %v33_v56  ;;  %v3176_v5 = vcombine.low %v30_v57, %v34_v58  ;;  %v3995_v6 = vld [vmem:[%s5830_s0] sm:$0xff]   ;;  %v4026_v23 = vld [vmem:[%s5830_s0 + $0x8] sm:$0xff]   ;;  %v68_v29 = vld [vmem:[%s5829_s1 + $0x138] sm:$0xff] }
  0x12   :  { %486 = vmatpush1.bf16.msra.mxu0 %v3206_v35  ;;  %559 = vmatpush1.bf16.msra.mxu1 %v3208_v36  ;;  %v55_v33 = vld [vmem:[%s5829_s1 + $0xd0] sm:$0xff]  ;;  %v3213_v34 = vcombine.high %v64_v28, %v68_v29  ;;  %v56_v36 = vld [vmem:[%s5829_s1 + $0xd8] sm:$0xff] }
  0x13   :  { %487 = vmatprep.subr.bf16.mxu0 %v3199_v37  ;;  %560 = vmatprep.subr.bf16.mxu1 %v3201_v39  ;;  %v59_v35 = vld [vmem:[%s5829_s1 + $0xf0] sm:$0xff]  ;;  %v60_v37 = vld [vmem:[%s5829_s1 + $0xf8] sm:$0xff]  ;;  %v3212_v39 = vcombine.low %v64_v28, %v68_v29 }
  0x14   :  { %v4059_v40 = vld [vmem:[%s5830_s0 + $0x10] sm:$0xff]   ;;  %v3203_v41 = vcombine.high %v55_v33, %v59_v35  ;;  %v52_v46 = vld [vmem:[%s5829_s1 + $0xb8] sm:$0xff]  ;;  %v3204_v48 = vcombine.low %v56_v36, %v60_v37 }
  0x15   :  { %v47_v42 = vld [vmem:[%s5829_s1 + $0x90] sm:$0xff]  ;;  %v4092_v57 = vld [vmem:[%s5830_s0 + $0x18] sm:$0xff]  }
  0x16   :  { %488 = vmatpush1.bf16.msra.mxu0 %v3198_v43  ;;  %561 = vmatpush1.bf16.msra.mxu1 %v3200_v44  ;;  %v3205_v43 = vcombine.high %v56_v36, %v60_v37  ;;  %v51_v44 = vld [vmem:[%s5829_s1 + $0xb0] sm:$0xff]  ;;  %v32_v62 = vld [vmem:[%s5829_s1 + $0x18] sm:$0xff] }
  0x17   :  { %489 = vmatprep.subr.bf16.mxu0 %v3191_v45  ;;  %562 = vmatprep.subr.bf16.mxu1 %v3193_v47  ;;  %v48_v45 = vld [vmem:[%s5829_s1 + $0x98] sm:$0xff]  ;;  %v3202_v47 = vcombine.low %v55_v33, %v59_v35  ;;  %v3195_v49 = vcombine.high %v47_v42, %v51_v44  ;;  %v39_v50 = vld [vmem:[%s5829_s1 + $0x50] sm:$0xff]  ;;  %v3194_v55 = vcombine.low %v47_v42, %v51_v44 }
  0x18   :  { %v3196_v56 = vcombine.low %v48_v45, %v52_v46  ;;  %v4113_v8 = vld [vmem:[%s5831_s2 + $0xe4] ss:$16 sps:$4 sm:$0xff]   ;;  %v4125_v10 = vld [vmem:[%s5831_s2 + $0xe0] ss:$16 sps:$4 sm:$0xff]   ;;  %v4130_v11 = vld [vmem:[%s5831_s2 + $0xe8] ss:$16 sps:$4 sm:$0xff]  }
  0x19   :  { %v4136_v12 = vld [vmem:[%s5831_s2 + $0xc4] ss:$16 sps:$4 sm:$0xff]   ;;  %v4169_v16 = vld [vmem:[%s5831_s2 + $0xac] ss:$16 sps:$4 sm:$0xff]   ;;  %v4183_v18 = vld [vmem:[%s5831_s2 + $0xa8] ss:$16 sps:$4 sm:$0xff]  }
  0x1a   :  { %490 = vmatpush1.bf16.msra.mxu0 %v3190_v51  ;;  %563 = vmatpush1.bf16.msra.mxu1 %v3192_v52  ;;  %v3197_v51 = vcombine.high %v48_v45, %v52_v46  ;;  %v43_v52 = vld [vmem:[%s5829_s1 + $0x70] sm:$0xff]  ;;  %5933 = vst [vmem:[#allocation10_spill] sm:$0xff] %v4169_v16  ;;  %5935 = vst [vmem:[#allocation12_spill] sm:$0xff] %v4183_v18  ;;  %v4194_v20 = vld [vmem:[%s5831_s2 + $0x8c] ss:$16 sps:$4 sm:$0xff]   ;;  %v5837_v45 = vmov 0.0|0.0  }
  0x1b   :  { %491 = vmatprep.subr.bf16.mxu0 %v3183_v53  ;;  %564 = vmatprep.subr.bf16.mxu1 %v3185_v54  ;;  %v40_v53 = vld [vmem:[%s5829_s1 + $0x58] sm:$0xff]  ;;  %v3187_v58 = vcombine.high %v39_v50, %v43_v52  ;;  %v3186_v0 = vcombine.low %v39_v50, %v43_v52  ;;  %v4188_v19 = vld [vmem:[%s5831_s2 + $0x84] ss:$16 sps:$4 sm:$0xff]   ;;  %5937 = vst [vmem:[#allocation14_spill] sm:$0xff] %v4194_v20  ;;  %v4228_v25 = vld [vmem:[%s5831_s2 + $0x60] ss:$16 sps:$4 sm:$0xff]  }
  0x1c   :  { %v44_v54 = vld [vmem:[%s5829_s1 + $0x78] sm:$0xff]  ;;  %5936 = vst [vmem:[#allocation13_spill] sm:$0xff] %v4188_v19  ;;  %5942 = vst [vmem:[#allocation19_spill] sm:$0xff] %v4228_v25  ;;  %v4240_v27 = vld [vmem:[%s5831_s2 + $0x44] ss:$16 sps:$4 sm:$0xff]  }
  0x1d   :  { %v3188_v1 = vcombine.low %v40_v53, %v44_v54  ;;  %5944 = vst [vmem:[#allocation21_spill] sm:$0xff] %v4240_v27  ;;  %v4246_v28 = vld [vmem:[%s5831_s2 + $0x4c] ss:$16 sps:$4 sm:$0xff]   ;;  %v4254_v29 = vld [vmem:[%s5831_s2 + $0x40] ss:$16 sps:$4 sm:$0xff]  }
  0x1e   :  { %492 = vmatpush1.bf16.msra.mxu0 %v3182_v59  ;;  %565 = vmatpush1.bf16.msra.mxu1 %v3184_v60  ;;  %v31_v59 = vld [vmem:[%s5829_s1 + $0x10] sm:$0xff]  ;;  %v3189_v60 = vcombine.high %v40_v53, %v44_v54  ;;  %5945 = vst [vmem:[#allocation22_spill] sm:$0xff] %v4246_v28  ;;  %5946 = vst [vmem:[#allocation23_spill] sm:$0xff] %v4254_v29  ;;  %v4298_v36 = vld [vmem:[%s5831_s2 + $0xc] ss:$16 sps:$4 sm:$0xff]  }
  0x1f   :  { %493 = vmatprep.subr.bf16.mxu0 %v3175_v61  ;;  %566 = vmatprep.subr.bf16.mxu1 %v3177_v63  ;;  %v35_v61 = vld [vmem:[%s5829_s1 + $0x30] sm:$0xff]  ;;  %v36_v63 = vld [vmem:[%s5829_s1 + $0x38] sm:$0xff]  ;;  %5953 = vst [vmem:[#allocation30_spill] sm:$0xff] %v4298_v36 }
  0x20   :  { %v3179_v2 = vcombine.high %v31_v59, %v35_v61  ;;  %v4280_v33 = vld [vmem:[%s5831_s2 + $0x20] ss:$16 sps:$4 sm:$0xff]   ;;  %v4292_v35 = vld [vmem:[%s5831_s2 + $0x4] ss:$16 sps:$4 sm:$0xff]   ;;  %v4339_v42 = vld [vmem:[%s5832_s3 + $0xe8] ss:$16 sps:$4 sm:$0xff]  }
  0x21   :  { %5950 = vst [vmem:[#allocation27_spill] sm:$0xff] %v4280_v33  ;;  %5952 = vst [vmem:[#allocation29_spill] sm:$0xff] %v4292_v35  ;;  %v4306_v37 = vld [vmem:[%s5831_s2] ss:$16 sps:$4 sm:$0xff]   ;;  %v4350_v44 = vld [vmem:[%s5832_s3 + $0xcc] ss:$16 sps:$4 sm:$0xff]  }
  0x22   :  { %494 = vmatpush1.bf16.msra.mxu0 %v3174_v4  ;;  %567 = vmatpush1.bf16.msra.mxu1 %v3176_v5  ;;  %v3181_v4 = vcombine.high %v32_v62, %v36_v63  ;;  %v3178_v5 = vcombine.low %v31_v59, %v35_v61  ;;  %5954 = vst [vmem:[#allocation31_spill] sm:$0xff] %v4306_v37  ;;  %v4358_v46 = vld [vmem:[%s5832_s3 + $0xc0] ss:$16 sps:$4 sm:$0xff]   ;;  %v4396_v52 = vld [vmem:[%s5832_s3 + $0x84] ss:$16 sps:$4 sm:$0xff]  }
  0x23   :  { %625 = vmatprep.subr.bf16.mxu0 %v3235_v7  ;;  %698 = vmatprep.subr.bf16.mxu1 %v3237_v9  ;;  %v3180_v7 = vcombine.low %v32_v62, %v36_v63  ;;  %v4119_v9 = vld [vmem:[%s5831_s2 + $0xec] ss:$16 sps:$4 sm:$0xff]   ;;  %v4384_v50 = vld [vmem:[%s5832_s3 + $0xa0] ss:$16 sps:$4 sm:$0xff]   ;;  %v4439_v59 = vld [vmem:[%s5832_s3 + $0x68] ss:$16 sps:$4 sm:$0xff]  }
  0x24   :  { %v4402_v53 = vld [vmem:[%s5832_s3 + $0x8c] ss:$16 sps:$4 sm:$0xff]   ;;  %v4408_v54 = vld [vmem:[%s5832_s3 + $0x80] ss:$16 sps:$4 sm:$0xff]   ;;  %v4463_v63 = vld [vmem:[%s5832_s3 + $0x48] ss:$16 sps:$4 sm:$0xff]  }
  0x25   :  { %512 = vmatmul.mubr.bf16.vlgmr.msra.gmra.mxu0 %v3995_v6  ;;  %585 = vmatmul.mubr.bf16.vlgmr.msra.gmra.mxu1 %v3995_v6  ;;  %v4450_v61 = vld [vmem:[%s5832_s3 + $0x4c] ss:$16 sps:$4 sm:$0xff]   ;;  %v4456_v62 = vld [vmem:[%s5832_s3 + $0x40] ss:$16 sps:$4 sm:$0xff]  }
  0x26   :  { %626 = vmatpush1.bf16.msra.mxu0 %v3234_v13  ;;  %699 = vmatpush1.bf16.msra.mxu1 %v3236_v14  ;;  %v4142_v13 = vld [vmem:[%s5831_s2 + $0xcc] ss:$16 sps:$4 sm:$0xff]   ;;  %v4150_v14 = vld [vmem:[%s5831_s2 + $0xc0] ss:$16 sps:$4 sm:$0xff]  }
  0x27   :  { %627 = vmatprep.subr.bf16.mxu0 %v3227_v15  ;;  %700 = vmatprep.subr.bf16.mxu1 %v3229_v17  ;;  %5929 = vst [vmem:[#allocation6_spill] sm:$0xff] %v4142_v13  ;;  %5930 = vst [vmem:[#allocation7_spill] sm:$0xff] %v4150_v14  ;;  %v4157_v15 = vld [vmem:[%s5831_s2 + $0xc8] ss:$16 sps:$4 sm:$0xff]   ;;  %v4176_v17 = vld [vmem:[%s5831_s2 + $0xa0] ss:$16 sps:$4 sm:$0xff]  }
  0x28   :  { %521 = vmatprep.mubr.bf16.mxu0 %v5835_v3  ;;  %594 = vmatprep.mubr.bf16.mxu1 %v5835_v3  ;;  %5931 = vst [vmem:[#allocation8_spill] sm:$0xff] %v4157_v15  ;;  %5934 = vst [vmem:[#allocation11_spill] sm:$0xff] %v4176_v17 }
  0x2a   :  { %628 = vmatpush1.bf16.msra.mxu0 %v3226_v21  ;;  %701 = vmatpush1.bf16.msra.mxu1 %v3228_v22  ;;  %v4202_v21 = vld [vmem:[%s5831_s2 + $0x80] ss:$16 sps:$4 sm:$0xff]   ;;  %v4209_v22 = vld [vmem:[%s5831_s2 + $0x88] ss:$16 sps:$4 sm:$0xff]  }
  0x2b   :  { %629 = vmatprep.subr.bf16.mxu0 %v3219_v24  ;;  %702 = vmatprep.subr.bf16.mxu1 %v3221_v26  ;;  %5938 = vst [vmem:[#allocation15_spill] sm:$0xff] %v4202_v21  ;;  %5939 = vst [vmem:[#allocation16_spill] sm:$0xff] %v4209_v22  ;;  %v4221_v24 = vld [vmem:[%s5831_s2 + $0x6c] ss:$16 sps:$4 sm:$0xff]   ;;  %v4235_v26 = vld [vmem:[%s5831_s2 + $0x68] ss:$16 sps:$4 sm:$0xff]  }
  0x2c   :  { %5941 = vst [vmem:[#allocation18_spill] sm:$0xff] %v4221_v24  ;;  %5943 = vst [vmem:[#allocation20_spill] sm:$0xff] %v4235_v26 }
  0x2d   :  { %522 = vmatmul.mubr.bf16.gmra.mxu0 %v4026_v23  ;;  %595 = vmatmul.mubr.bf16.gmra.mxu1 %v4026_v23 }
  0x2e   :  { %630 = vmatpush1.bf16.msra.mxu0 %v3218_v30  ;;  %703 = vmatpush1.bf16.msra.mxu1 %v3220_v31  ;;  %v4261_v30 = vld [vmem:[%s5831_s2 + $0x48] ss:$16 sps:$4 sm:$0xff]   ;;  %v4266_v31 = vld [vmem:[%s5831_s2 + $0x24] ss:$16 sps:$4 sm:$0xff]  }
  0x2f   :  { %631 = vmatprep.subr.bf16.mxu0 %v3211_v32  ;;  %704 = vmatprep.subr.bf16.mxu1 %v3213_v34  ;;  %5947 = vst [vmem:[#allocation24_spill] sm:$0xff] %v4261_v30  ;;  %5948 = vst [vmem:[#allocation25_spill] sm:$0xff] %v4266_v31  ;;  %v4273_v32 = vld [vmem:[%s5831_s2 + $0x2c] ss:$16 sps:$4 sm:$0xff]   ;;  %v4287_v34 = vld [vmem:[%s5831_s2 + $0x28] ss:$16 sps:$4 sm:$0xff]  }
  0x30   :  { %531 = vmatprep.mubr.bf16.mxu0 %v5835_v3  ;;  %604 = vmatprep.mubr.bf16.mxu1 %v5835_v3  ;;  %5949 = vst [vmem:[#allocation26_spill] sm:$0xff] %v4273_v32  ;;  %5951 = vst [vmem:[#allocation28_spill] sm:$0xff] %v4287_v34 }
  0x32   :  { %632 = vmatpush1.bf16.msra.mxu0 %v3210_v38  ;;  %705 = vmatpush1.bf16.msra.mxu1 %v3212_v39  ;;  %v4313_v38 = vld [vmem:[%s5831_s2 + $0x8] ss:$16 sps:$4 sm:$0xff]   ;;  %v4318_v39 = vld [vmem:[%s5832_s3 + $0xe4] ss:$16 sps:$4 sm:$0xff]  }
  0x33   :  { %633 = vmatprep.subr.bf16.mxu0 %v3203_v41  ;;  %706 = vmatprep.subr.bf16.mxu1 %v3205_v43  ;;  %5955 = vst [vmem:[#allocation32_spill] sm:$0xff] %v4313_v38  ;;  %5956 = vst [vmem:[#allocation33_spill] sm:$0xff] %v4318_v39  ;;  %v4332_v41 = vld [vmem:[%s5832_s3 + $0xe0] ss:$16 sps:$4 sm:$0xff]   ;;  %v4344_v43 = vld [vmem:[%s5832_s3 + $0xc4] ss:$16 sps:$4 sm:$0xff]  }
  0x35   :  { %532 = vmatmul.mubr.bf16.gmra.mxu0 %v4059_v40  ;;  %605 = vmatmul.mubr.bf16.gmra.mxu1 %v4059_v40 }
  0x36   :  { %634 = vmatpush1.bf16.msra.mxu0 %v3202_v47  ;;  %707 = vmatpush1.bf16.msra.mxu1 %v3204_v48  ;;  %v4365_v47 = vld [vmem:[%s5832_s3 + $0xc8] ss:$16 sps:$4 sm:$0xff]   ;;  %v4370_v48 = vld [vmem:[%s5832_s3 + $0xa4] ss:$16 sps:$4 sm:$0xff]  }
  0x37   :  { %635 = vmatprep.subr.bf16.mxu0 %v3195_v49  ;;  %708 = vmatprep.subr.bf16.mxu1 %v3197_v51  ;;  %v4376_v49 = vld [vmem:[%s5832_s3 + $0xac] ss:$16 sps:$4 sm:$0xff]   ;;  %v4391_v51 = vld [vmem:[%s5832_s3 + $0xa8] ss:$16 sps:$4 sm:$0xff]  }
  0x38   :  { %541 = vmatprep.mubr.bf16.mxu0 %v5835_v3  ;;  %614 = vmatprep.mubr.bf16.mxu1 %v5835_v3 }
  0x3a   :  { %636 = vmatpush1.bf16.msra.mxu0 %v3194_v55  ;;  %709 = vmatpush1.bf16.msra.mxu1 %v3196_v56  ;;  %v4415_v55 = vld [vmem:[%s5832_s3 + $0x88] ss:$16 sps:$4 sm:$0xff]   ;;  %v4420_v56 = vld [vmem:[%s5832_s3 + $0x64] ss:$16 sps:$4 sm:$0xff]  }
  0x3b   :  { %637 = vmatprep.subr.bf16.mxu0 %v3187_v58  ;;  %710 = vmatprep.subr.bf16.mxu1 %v3189_v60  ;;  %v4432_v58 = vld [vmem:[%s5832_s3 + $0x60] ss:$16 sps:$4 sm:$0xff]   ;;  %v4444_v60 = vld [vmem:[%s5832_s3 + $0x44] ss:$16 sps:$4 sm:$0xff]  }
  0x3d   :  { %542 = vmatmul.mubr.bf16.gmra.mxu0 %v4092_v57  ;;  %615 = vmatmul.mubr.bf16.gmra.mxu1 %v4092_v57 }
  0x3e   :  { %638 = vmatpush1.bf16.msra.mxu0 %v3186_v0  ;;  %711 = vmatpush1.bf16.msra.mxu1 %v3188_v1  ;;  %v4468_v0 = vld [vmem:[%s5832_s3 + $0x24] ss:$16 sps:$4 sm:$0xff]   ;;  %v4474_v1 = vld [vmem:[%s5832_s3 + $0x2c] ss:$16 sps:$4 sm:$0xff]  }
  0x3f   :  { %639 = vmatprep.subr.bf16.mxu0 %v3179_v2  ;;  %712 = vmatprep.subr.bf16.mxu1 %v3181_v4  ;;  %v4480_v2 = vld [vmem:[%s5832_s3 + $0x20] ss:$16 sps:$4 sm:$0xff]   ;;  %v4487_v4 = vld [vmem:[%s5832_s3 + $0x28] ss:$16 sps:$4 sm:$0xff]  }
  0x40   :  { %657 = vmatprep.mubr.bf16.mxu0 %v5835_v3  ;;  %730 = vmatprep.mubr.bf16.mxu1 %v5835_v3  ;;  %5958 = vst [vmem:[#allocation35_spill] sm:$0xff] %v4480_v2 }
  0x42   :  { %640 = vmatpush1.bf16.msra.mxu0 %v3178_v5  ;;  %713 = vmatpush1.bf16.msra.mxu1 %v3180_v7  ;;  %v4492_v5 = vld [vmem:[%s5832_s3 + $0x4] ss:$16 sps:$4 sm:$0xff]   ;;  %v4498_v7 = vld [vmem:[%s5832_s3 + $0xc] ss:$16 sps:$4 sm:$0xff]  }
  0x43   :  { %1070 = vmatprep.subr.bf16.mxu0 %v4113_v8  ;;  %1111 = vmatprep.subr.bf16.mxu1 %v4119_v9  ;;  %5959 = vst [vmem:[#allocation36_spill] sm:$0xff] %v4498_v7 }
  0x45   :  { %658 = vmatmul.mubr.bf16.vlgmr.msra.gmra.mxu0 %v3995_v6  ;;  %731 = vmatmul.mubr.bf16.vlgmr.msra.gmra.mxu1 %v3995_v6  ;;  %v4162_v6 = vld [vmem:[%s5831_s2 + $0xa4] ss:$16 sps:$4 sm:$0xff]  }
  0x46   :  { %1071 = vmatpush1.bf16.msra.mxu0 %v4125_v10  ;;  %1112 = vmatpush1.bf16.msra.mxu1 %v4130_v11  ;;  %5932 = vst [vmem:[#allocation9_spill] sm:$0xff] %v4162_v6 }
  0x47   :  { %1072 = vmatprep.subr.bf16.mxu0 %v4136_v12  ;;  %1113 = vmatprep.subr.bf16.mxu1 %v4142_v13 }
  0x48   :  { %667 = vmatprep.mubr.bf16.mxu0 %v5835_v3  ;;  %740 = vmatprep.mubr.bf16.mxu1 %v5835_v3 }
  0x4a   :  { %1073 = vmatpush1.bf16.msra.mxu0 %v4150_v14  ;;  %1114 = vmatpush1.bf16.msra.mxu1 %v4157_v15 }
  0x4b   :  { %1074 = vmatprep.subr.bf16.mxu0 %v4162_v6  ;;  %1115 = vmatprep.subr.bf16.mxu1 %v4169_v16 }
  0x4d   :  { %668 = vmatmul.mubr.bf16.gmra.mxu0 %v4026_v23  ;;  %741 = vmatmul.mubr.bf16.gmra.mxu1 %v4026_v23  ;;  %v4214_v23 = vld [vmem:[%s5831_s2 + $0x64] ss:$16 sps:$4 sm:$0xff]  }
  0x4e   :  { %1075 = vmatpush1.bf16.msra.mxu0 %v4176_v17  ;;  %1116 = vmatpush1.bf16.msra.mxu1 %v4183_v18  ;;  %5940 = vst [vmem:[#allocation17_spill] sm:$0xff] %v4214_v23 }
  0x4f   :  { %1076 = vmatprep.subr.bf16.mxu0 %v4188_v19  ;;  %1117 = vmatprep.subr.bf16.mxu1 %v4194_v20 }
  0x50   :  { %677 = vmatprep.mubr.bf16.mxu0 %v5835_v3  ;;  %750 = vmatprep.mubr.bf16.mxu1 %v5835_v3 }
  0x52   :  { %1077 = vmatpush1.bf16.msra.mxu0 %v4202_v21  ;;  %1118 = vmatpush1.bf16.msra.mxu1 %v4209_v22 }
  0x53   :  { %1078 = vmatprep.subr.bf16.mxu0 %v4214_v23  ;;  %1119 = vmatprep.subr.bf16.mxu1 %v4221_v24 }
  0x55   :  { %678 = vmatmul.mubr.bf16.gmra.mxu0 %v4059_v40  ;;  %751 = vmatmul.mubr.bf16.gmra.mxu1 %v4059_v40  ;;  %v4325_v40 = vld [vmem:[%s5832_s3 + $0xec] ss:$16 sps:$4 sm:$0xff]  }
  0x56   :  { %1079 = vmatpush1.bf16.msra.mxu0 %v4228_v25  ;;  %1120 = vmatpush1.bf16.msra.mxu1 %v4235_v26  ;;  %5957 = vst [vmem:[#allocation34_spill] sm:$0xff] %v4325_v40 }
  0x57   :  { %1080 = vmatprep.subr.bf16.mxu0 %v4240_v27  ;;  %1121 = vmatprep.subr.bf16.mxu1 %v4246_v28 }
  0x58   :  { %687 = vmatprep.mubr.bf16.mxu0 %v5835_v3  ;;  %760 = vmatprep.mubr.bf16.mxu1 %v5835_v3 }
  0x5a   :  { %1081 = vmatpush1.bf16.msra.mxu0 %v4254_v29  ;;  %1122 = vmatpush1.bf16.msra.mxu1 %v4261_v30 }
  0x5b   :  { %1082 = vmatprep.subr.bf16.mxu0 %v4266_v31  ;;  %1123 = vmatprep.subr.bf16.mxu1 %v4273_v32 }
  0x5d   :  { %688 = vmatmul.mubr.bf16.gmra.mxu0 %v4092_v57  ;;  %761 = vmatmul.mubr.bf16.gmra.mxu1 %v4092_v57  ;;  %v4426_v57 = vld [vmem:[%s5832_s3 + $0x6c] ss:$16 sps:$4 sm:$0xff]  }
  0x5e   :  { %1083 = vmatpush1.bf16.msra.mxu0 %v4280_v33  ;;  %1124 = vmatpush1.bf16.msra.mxu1 %v4287_v34 }
  0x5f   :  { %1084 = vmatprep.subr.bf16.mxu0 %v4292_v35  ;;  %1125 = vmatprep.subr.bf16.mxu1 %v4298_v36 }
  0x60   :  { %1102 = vmatprep.mubr.bf16.mxu0 %v5835_v3  ;;  %1143 = vmatprep.mubr.bf16.mxu1 %v5835_v3 }
  0x62   :  { %1085 = vmatpush1.bf16.msra.mxu0 %v4306_v37  ;;  %1126 = vmatpush1.bf16.msra.mxu1 %v4313_v38 }
  0x63   :  { %1350 = vmatprep.subr.bf16.mxu0 %v4318_v39  ;;  %1391 = vmatprep.subr.bf16.mxu1 %v4325_v40 }
  0x65   :  { %1103 = vmatmul.mubr.bf16.vlgmr.msra.gmra.mxu0 %v5837_v45  ;;  %1144 = vmatmul.mubr.bf16.vlgmr.msra.gmra.mxu1 %v5837_v45  ;;  %v4511_v45 = vld [vmem:[%s5832_s3 + $0x8] ss:$16 sps:$4 sm:$0xff]  }
  0x66   :  { %1351 = vmatpush1.bf16.msra.mxu0 %v4332_v41  ;;  %1392 = vmatpush1.bf16.msra.mxu1 %v4339_v42 }
  0x67   :  { %1352 = vmatprep.subr.bf16.mxu0 %v4344_v43  ;;  %1393 = vmatprep.subr.bf16.mxu1 %v4350_v44 }
  0x68   :  { %1382 = vmatprep.mubr.bf16.mxu0 %v5835_v3  ;;  %1423 = vmatprep.mubr.bf16.mxu1 %v5835_v3  ;;  %v4504_v3 = vld [vmem:[%s5832_s3] ss:$16 sps:$4 sm:$0xff]  }
  0x6a   :  { %1353 = vmatpush1.bf16.msra.mxu0 %v4358_v46  ;;  %1394 = vmatpush1.bf16.msra.mxu1 %v4365_v47 }
  0x6b   :  { %1354 = vmatprep.subr.bf16.mxu0 %v4370_v48  ;;  %1395 = vmatprep.subr.bf16.mxu1 %v4376_v49 }
  0x6e   :  { %1355 = vmatpush1.bf16.msra.mxu0 %v4384_v50  ;;  %1396 = vmatpush1.bf16.msra.mxu1 %v4391_v51 }
  0x6f   :  { %1356 = vmatprep.subr.bf16.mxu0 %v4396_v52  ;;  %1397 = vmatprep.subr.bf16.mxu1 %v4402_v53 }
  0x72   :  { %1357 = vmatpush1.bf16.msra.mxu0 %v4408_v54  ;;  %1398 = vmatpush1.bf16.msra.mxu1 %v4415_v55 }
  0x73   :  { %1358 = vmatprep.subr.bf16.mxu0 %v4420_v56  ;;  %1399 = vmatprep.subr.bf16.mxu1 %v4426_v57 }
  0x76   :  { %1359 = vmatpush1.bf16.msra.mxu0 %v4432_v58  ;;  %1400 = vmatpush1.bf16.msra.mxu1 %v4439_v59 }
  0x77   :  { %1360 = vmatprep.subr.bf16.mxu0 %v4444_v60  ;;  %1401 = vmatprep.subr.bf16.mxu1 %v4450_v61 }
  0x7a   :  { %1361 = vmatpush1.bf16.msra.mxu0 %v4456_v62  ;;  %1402 = vmatpush1.bf16.msra.mxu1 %v4463_v63 }
  0x7b   :  { %1362 = vmatprep.subr.bf16.mxu0 %v4468_v0  ;;  %1403 = vmatprep.subr.bf16.mxu1 %v4474_v1 }
  0x7e   :  { %1363 = vmatpush1.bf16.msra.mxu0 %v4480_v2  ;;  %1404 = vmatpush1.bf16.msra.mxu1 %v4487_v4  ;;  %v5960_v2 = vmov 0.0|0.0  }
  0x7f   :  { %1364 = vmatprep.subr.bf16.mxu0 %v4492_v5  ;;  %1405 = vmatprep.subr.bf16.mxu1 %v4498_v7  ;;  %v5961_v7 = vmov 0  }
  0x82   :  { %1365 = vmatpush1.bf16.msra.mxu0 %v4504_v3  ;;  %1406 = vmatpush1.bf16.msra.mxu1 %v4511_v45 }
  0x83   :  { %1475 = vmatprep.subr.bf16.mxu0 %v4113_v8  ;;  %1516 = vmatprep.subr.bf16.mxu1 %v4119_v9 }
  0x85   :  { %1383 = vmatmul.mubr.bf16.vlgmr.msra.gmra.mxu0 %v5960_v2  ;;  %1424 = vmatmul.mubr.bf16.vlgmr.msra.gmra.mxu1 %v5960_v2  ;;  %v95_v2 = vlaneseq }
  0x86   :  { %1476 = vmatpush1.bf16.msra.mxu0 %v4125_v10  ;;  %1517 = vmatpush1.bf16.msra.mxu1 %v4130_v11 }
  0x87   :  { %1477 = vmatprep.subr.bf16.mxu0 %v4136_v12  ;;  %1518 = vmatprep.subr.bf16.mxu1 %v4142_v13 }
  0x88   :  { %1507 = vmatprep.mubr.bf16.mxu0 %v5961_v7  ;;  %1548 = vmatprep.mubr.bf16.mxu1 %v5961_v7 }
  0x8a   :  { %1478 = vmatpush1.bf16.msra.mxu0 %v4150_v14  ;;  %1519 = vmatpush1.bf16.msra.mxu1 %v4157_v15 }
  0x8b   :  { %1479 = vmatprep.subr.bf16.mxu0 %v4162_v6  ;;  %1520 = vmatprep.subr.bf16.mxu1 %v4169_v16 }
  0x8e   :  { %1480 = vmatpush1.bf16.msra.mxu0 %v4176_v17  ;;  %1521 = vmatpush1.bf16.msra.mxu1 %v4183_v18 }
  0x8f   :  { %1481 = vmatprep.subr.bf16.mxu0 %v4188_v19  ;;  %1522 = vmatprep.subr.bf16.mxu1 %v4194_v20 }
  0x92   :  { %1482 = vmatpush1.bf16.msra.mxu0 %v4202_v21  ;;  %1523 = vmatpush1.bf16.msra.mxu1 %v4209_v22 }
  0x93   :  { %1483 = vmatprep.subr.bf16.mxu0 %v4214_v23  ;;  %1524 = vmatprep.subr.bf16.mxu1 %v4221_v24 }
  0x96   :  { %1484 = vmatpush1.bf16.msra.mxu0 %v4228_v25  ;;  %1525 = vmatpush1.bf16.msra.mxu1 %v4235_v26 }
  0x97   :  { %1485 = vmatprep.subr.bf16.mxu0 %v4240_v27  ;;  %1526 = vmatprep.subr.bf16.mxu1 %v4246_v28 }
  0x9a   :  { %1486 = vmatpush1.bf16.msra.mxu0 %v4254_v29  ;;  %1527 = vmatpush1.bf16.msra.mxu1 %v4261_v30 }
  0x9b   :  { %1487 = vmatprep.subr.bf16.mxu0 %v4266_v31  ;;  %1528 = vmatprep.subr.bf16.mxu1 %v4273_v32  ;;  %v4554_v31 = vshrl.u32 %v95_v2, 7 }
  0x9d   :  { %v105_v32 = vsub.s32 2, %v4554_v31 }
  0x9e   :  { %1488 = vmatpush1.bf16.msra.mxu0 %v4280_v33  ;;  %1529 = vmatpush1.bf16.msra.mxu1 %v4287_v34  ;;  %v97_v33 = vsub.s32 0, %v4554_v31 }
  0x9f   :  { %1489 = vmatprep.subr.bf16.mxu0 %v4292_v35  ;;  %1530 = vmatprep.subr.bf16.mxu1 %v4298_v36  ;;  %v4561_v35 = vld [vmem:[%s5833_s4] sm:$0xff] }
  0xa0   :  { %v4570_v2 = vrot.slane %v4561_v35, %v105_v32  ;;  %v4575_v34 = vrot.slane %v4561_v35, %v97_v33 }
  0xa2   :  { %1490 = vmatpush1.bf16.msra.mxu0 %v4306_v37  ;;  %1531 = vmatpush1.bf16.msra.mxu1 %v4313_v38  ;;  %v109_v38 = vsub.s32 3, %v4554_v31 }
  0xa3   :  { %1593 = vmatprep.subr.bf16.mxu0 %v4318_v39  ;;  %1634 = vmatprep.subr.bf16.mxu1 %v4325_v40  ;;  %v101_v40 = vsub.s32 1, %v4554_v31 }
  0xa4   :  { %v4580_v29 = vrot.slane %v4561_v35, %v109_v38 }
  0xa5   :  { %v4583_v27 = vrot.slane %v4561_v35, %v101_v40 }
  0xe5   :  { %v4563_v36 = vpop.f32.mrf.mxu0  ;;  %v4566_v37 = vpop.f32.mrf.mxu1 }
  0xe7   :  { %v4572_v39 = vpop.f32.mrf.mxu0  ;;  %v4577_v30 = vpop.f32.mrf.mxu1 }
  0xe9   :  { %v517_v28 = vpop.f32.mrf.mxu0  ;;  %v590_v25 = vpop.f32.mrf.mxu1 }
  0xea   :  { %v4586_v26 = vadd.f32 %v517_v28, %v4575_v34  ;;  %v4589_v32 = vadd.f32 %v590_v25, %v4570_v2 }
  0xeb   :  { %v519_v24 = vpop.f32.mrf.mxu0  ;;  %v592_v23 = vpop.f32.mrf.mxu1 }
  0xec   :  { %5962 = vst [vmem:[#allocation37_spill] sm:$0xff] %v4586_v26  ;;  %5963 = vst [vmem:[#allocation38_spill] sm:$0xff] %v4589_v32  ;;  %v4592_v33 = vadd.f32 %v519_v24, %v4583_v27  ;;  %v4595_v22 = vadd.f32 %v592_v23, %v4580_v29 }
  0xed   :  { %v523_v38 = vpop.f32.mrf.mxu0  ;;  %v596_v40 = vpop.f32.mrf.mxu1 }
  0xee   :  { %5964 = vst [vmem:[#allocation39_spill] sm:$0xff] %v4592_v33  ;;  %5965 = vst [vmem:[#allocation40_spill] sm:$0xff] %v4595_v22  ;;  %v4598_v21 = vadd.f32 %v523_v38, %v4575_v34  ;;  %v4601_v28 = vadd.f32 %v596_v40, %v4570_v2 }
  0xef   :  { %v525_v26 = vpop.f32.mrf.mxu0  ;;  %v598_v32 = vpop.f32.mrf.mxu1 }
  0xf0   :  { %5966 = vst [vmem:[#allocation41_spill] sm:$0xff] %v4598_v21  ;;  %5967 = vst [vmem:[#allocation42_spill] sm:$0xff] %v4601_v28  ;;  %v4604_v25 = vadd.f32 %v525_v26, %v4583_v27  ;;  %v4607_v24 = vadd.f32 %v598_v32, %v4580_v29 }
  0xf1   :  { %v527_v33 = vpop.f32.mrf.mxu0  ;;  %v600_v22 = vpop.f32.mrf.mxu1 }
  0xf2   :  { %5968 = vst [vmem:[#allocation43_spill] sm:$0xff] %v4604_v25  ;;  %5969 = vst [vmem:[#allocation44_spill] sm:$0xff] %v4607_v24  ;;  %v4610_v23 = vadd.f32 %v527_v33, %v4575_v34  ;;  %v4613_v38 = vadd.f32 %v600_v22, %v4570_v2 }
  0xf3   :  { %v529_v21 = vpop.f32.mrf.mxu0  ;;  %v602_v28 = vpop.f32.mrf.mxu1 }
  0xf4   :  { %5970 = vst [vmem:[#allocation45_spill] sm:$0xff] %v4610_v23  ;;  %5971 = vst [vmem:[#allocation46_spill] sm:$0xff] %v4613_v38  ;;  %v4616_v40 = vadd.f32 %v529_v21, %v4583_v27  ;;  %v4619_v26 = vadd.f32 %v602_v28, %v4580_v29 }
  0xf5   :  { %v533_v25 = vpop.f32.mrf.mxu0  ;;  %v606_v24 = vpop.f32.mrf.mxu1 }
  0xf6   :  { %5972 = vst [vmem:[#allocation47_spill] sm:$0xff] %v4616_v40  ;;  %5973 = vst [vmem:[#allocation48_spill] sm:$0xff] %v4619_v26  ;;  %v4622_v32 = vadd.f32 %v533_v25, %v4575_v34  ;;  %v4625_v33 = vadd.f32 %v606_v24, %v4570_v2 }
  0xf7   :  { %v535_v23 = vpop.f32.mrf.mxu0  ;;  %v608_v38 = vpop.f32.mrf.mxu1 }
  0xf8   :  { %5974 = vst [vmem:[#allocation49_spill] sm:$0xff] %v4622_v32  ;;  %5975 = vst [vmem:[#allocation50_spill] sm:$0xff] %v4625_v33  ;;  %v4628_v22 = vadd.f32 %v535_v23, %v4583_v27  ;;  %v4631_v21 = vadd.f32 %v608_v38, %v4580_v29 }
  0xf9   :  { %v537_v40 = vpop.f32.mrf.mxu0  ;;  %v610_v26 = vpop.f32.mrf.mxu1 }
  0xfa   :  { %5976 = vst [vmem:[#allocation51_spill] sm:$0xff] %v4628_v22  ;;  %5977 = vst [vmem:[#allocation52_spill] sm:$0xff] %v4631_v21  ;;  %v4634_v28 = vadd.f32 %v537_v40, %v4575_v34  ;;  %v4637_v25 = vadd.f32 %v610_v26, %v4570_v2  ;;  %v113_v40 = vsub.s32 4, %v4554_v31 }
  0xfb   :  { %v539_v32 = vpop.f32.mrf.mxu0  ;;  %v612_v33 = vpop.f32.mrf.mxu1 }
  0xfc   :  { %5978 = vst [vmem:[#allocation53_spill] sm:$0xff] %v4634_v28  ;;  %5979 = vst [vmem:[#allocation54_spill] sm:$0xff] %v4637_v25  ;;  %v4640_v24 = vadd.f32 %v539_v32, %v4583_v27  ;;  %v4643_v23 = vadd.f32 %v612_v33, %v4580_v29  ;;  %v121_v25 = vsub.s32 6, %v4554_v31  ;;  %v117_v33 = vsub.s32 5, %v4554_v31 }
  0xfd   :  { %v543_v22 = vpop.f32.mrf.mxu0  ;;  %v616_v21 = vpop.f32.mrf.mxu1 }
  0xfe   :  { %5980 = vst [vmem:[#allocation55_spill] sm:$0xff] %v4640_v24  ;;  %5981 = vst [vmem:[#allocation56_spill] sm:$0xff] %v4643_v23  ;;  %v4646_v38 = vadd.f32 %v543_v22, %v4575_v34  ;;  %v4650_v28 = vadd.f32 %v616_v21, %v4570_v2 }
  0xff   :  { %v545_v26 = vpop.f32.mrf.mxu0  ;;  %v618_v24 = vpop.f32.mrf.mxu1 }
 0x100   :  { %5982 = vst [vmem:[#allocation57_spill] sm:$0xff] %v4646_v38  ;;  %5983 = vst [vmem:[#allocation58_spill] sm:$0xff] %v4650_v28  ;;  %v4654_v32 = vadd.f32 %v545_v26, %v4583_v27  ;;  %v4658_v23 = vadd.f32 %v618_v24, %v4580_v29  ;;  %v125_v38 = vsub.s32 7, %v4554_v31  ;;  %v4665_v28 = vrot.slane %v4561_v35, %v113_v40 }
 0x101   :  { %v547_v22 = vpop.f32.mrf.mxu0  ;;  %v620_v21 = vpop.f32.mrf.mxu1  ;;  %v4677_v31 = vrot.slane %v4561_v35, %v117_v33 }
 0x102   :  { %5984 = vst [vmem:[#allocation59_spill] sm:$0xff] %v4654_v32  ;;  %5985 = vst [vmem:[#allocation60_spill] sm:$0xff] %v4658_v23  ;;  %v4662_v20 = vadd.f32 %v547_v22, %v4575_v34  ;;  %v4668_v19 = vadd.f32 %v620_v21, %v4570_v2  ;;  %v4671_v32 = vrot.slane %v4561_v35, %v121_v25 }
 0x103   :  { %v549_v26 = vpop.f32.mrf.mxu0  ;;  %v622_v23 = vpop.f32.mrf.mxu1  ;;  %v4683_v40 = vrot.slane %v4561_v35, %v125_v38 }
 0x104   :  { %5986 = vst [vmem:[#allocation61_spill] sm:$0xff] %v4662_v20  ;;  %5987 = vst [vmem:[#allocation62_spill] sm:$0xff] %v4668_v19  ;;  %v4674_v24 = vadd.f32 %v549_v26, %v4583_v27  ;;  %v4680_v22 = vadd.f32 %v622_v23, %v4580_v29 }
 0x105   :  { %v659_v20 = vpop.f32.mrf.mxu0  ;;  %v732_v19 = vpop.f32.mrf.mxu1 }
 0x106   :  { %5988 = vst [vmem:[#allocation63_spill] sm:$0xff] %v4674_v24  ;;  %5989 = vst [vmem:[#allocation64_spill] sm:$0xff] %v4680_v22  ;;  %v4686_v21 = vadd.f32 %v659_v20, %v4665_v28  ;;  %v4689_v25 = vadd.f32 %v732_v19, %v4671_v32 }
 0x107   :  { %v661_v26 = vpop.f32.mrf.mxu0  ;;  %v734_v33 = vpop.f32.mrf.mxu1 }
 0x108   :  { %5990 = vst [vmem:[#allocation65_spill] sm:$0xff] %v4686_v21  ;;  %5991 = vst [vmem:[#allocation66_spill] sm:$0xff] %v4689_v25  ;;  %v4692_v24 = vadd.f32 %v661_v26, %v4677_v31  ;;  %v4695_v18 = vadd.f32 %v734_v33, %v4683_v40 }
 0x109   :  { %v663_v23 = vpop.f32.mrf.mxu0  ;;  %v736_v35 = vpop.f32.mrf.mxu1 }
 0x10a   :  { %5992 = vst [vmem:[#allocation67_spill] sm:$0xff] %v4692_v24  ;;  %5993 = vst [vmem:[#allocation68_spill] sm:$0xff] %v4695_v18  ;;  %v4698_v22 = vadd.f32 %v663_v23, %v4665_v28  ;;  %v4701_v20 = vadd.f32 %v736_v35, %v4671_v32 }
 0x10b   :  { %v665_v38 = vpop.f32.mrf.mxu0  ;;  %v738_v25 = vpop.f32.mrf.mxu1 }
 0x10c   :  { %5994 = vst [vmem:[#allocation69_spill] sm:$0xff] %v4698_v22  ;;  %5995 = vst [vmem:[#allocation70_spill] sm:$0xff] %v4701_v20  ;;  %v4704_v19 = vadd.f32 %v665_v38, %v4677_v31  ;;  %v4707_v26 = vadd.f32 %v738_v25, %v4683_v40 }
 0x10d   :  { %v669_v24 = vpop.f32.mrf.mxu0  ;;  %v742_v18 = vpop.f32.mrf.mxu1 }
 0x10e   :  { %5996 = vst [vmem:[#allocation71_spill] sm:$0xff] %v4704_v19  ;;  %5997 = vst [vmem:[#allocation72_spill] sm:$0xff] %v4707_v26  ;;  %v4710_v33 = vadd.f32 %v669_v24, %v4665_v28  ;;  %v4713_v23 = vadd.f32 %v742_v18, %v4671_v32 }
 0x10f   :  { %v671_v21 = vpop.f32.mrf.mxu0  ;;  %v744_v20 = vpop.f32.mrf.mxu1 }
 0x110   :  { %5998 = vst [vmem:[#allocation73_spill] sm:$0xff] %v4710_v33  ;;  %5999 = vst [vmem:[#allocation74_spill] sm:$0xff] %v4713_v23  ;;  %v4716_v35 = vadd.f32 %v671_v21, %v4677_v31  ;;  %v4719_v38 = vadd.f32 %v744_v20, %v4683_v40 }
 0x111   :  { %v673_v19 = vpop.f32.mrf.mxu0  ;;  %v746_v26 = vpop.f32.mrf.mxu1 }
 0x112   :  { %6000 = vst [vmem:[#allocation75_spill] sm:$0xff] %v4716_v35  ;;  %6001 = vst [vmem:[#allocation76_spill] sm:$0xff] %v4719_v38  ;;  %v4722_v25 = vadd.f32 %v673_v19, %v4665_v28  ;;  %v4725_v24 = vadd.f32 %v746_v26, %v4671_v32 }
 0x113   :  { %v675_v22 = vpop.f32.mrf.mxu0  ;;  %v748_v23 = vpop.f32.mrf.mxu1 }
 0x114   :  { %6002 = vst [vmem:[#allocation77_spill] sm:$0xff] %v4722_v25  ;;  %6003 = vst [vmem:[#allocation78_spill] sm:$0xff] %v4725_v24  ;;  %v4728_v18 = vadd.f32 %v675_v22, %v4677_v31  ;;  %v4731_v21 = vadd.f32 %v748_v23, %v4683_v40 }
 0x115   :  { %v679_v35 = vpop.f32.mrf.mxu0  ;;  %v752_v38 = vpop.f32.mrf.mxu1 }
 0x116   :  { %6004 = vst [vmem:[#allocation79_spill] sm:$0xff] %v4728_v18  ;;  %6005 = vst [vmem:[#allocation80_spill] sm:$0xff] %v4731_v21  ;;  %v4734_v20 = vadd.f32 %v679_v35, %v4665_v28  ;;  %v4737_v19 = vadd.f32 %v752_v38, %v4671_v32 }
 0x117   :  { %v681_v33 = vpop.f32.mrf.mxu0  ;;  %v754_v24 = vpop.f32.mrf.mxu1 }
 0x118   :  { %6006 = vst [vmem:[#allocation81_spill] sm:$0xff] %v4734_v20  ;;  %6007 = vst [vmem:[#allocation82_spill] sm:$0xff] %v4737_v19  ;;  %v4740_v26 = vadd.f32 %v681_v33, %v4677_v31  ;;  %v4743_v22 = vadd.f32 %v754_v24, %v4683_v40 }
 0x119   :  { %v683_v18 = vpop.f32.mrf.mxu0  ;;  %v756_v21 = vpop.f32.mrf.mxu1 }
 0x11a   :  { %6008 = vst [vmem:[#allocation83_spill] sm:$0xff] %v4740_v26  ;;  %6009 = vst [vmem:[#allocation84_spill] sm:$0xff] %v4743_v22  ;;  %v4746_v23 = vadd.f32 %v683_v18, %v4665_v28  ;;  %v4749_v35 = vadd.f32 %v756_v21, %v4671_v32 }
 0x11b   :  { %v685_v25 = vpop.f32.mrf.mxu0  ;;  %v758_v19 = vpop.f32.mrf.mxu1 }
 0x11c   :  { %6010 = vst [vmem:[#allocation85_spill] sm:$0xff] %v4746_v23  ;;  %6011 = vst [vmem:[#allocation86_spill] sm:$0xff] %v4749_v35  ;;  %v4752_v38 = vadd.f32 %v685_v25, %v4677_v31  ;;  %v4755_v33 = vadd.f32 %v758_v19, %v4683_v40 }
 0x11d   :  { %v689_v26 = vpop.f32.mrf.mxu0  ;;  %v762_v22 = vpop.f32.mrf.mxu1 }
 0x11e   :  { %6012 = vst [vmem:[#allocation87_spill] sm:$0xff] %v4752_v38  ;;  %6013 = vst [vmem:[#allocation88_spill] sm:$0xff] %v4755_v33  ;;  %v4758_v24 = vadd.f32 %v689_v26, %v4665_v28  ;;  %v4761_v18 = vadd.f32 %v762_v22, %v4671_v32  ;;  %v514_v33 = vadd.f32 %v4563_v36, %v4575_v34 }
 0x11f   :  { %v691_v20 = vpop.f32.mrf.mxu0  ;;  %v764_v35 = vpop.f32.mrf.mxu1  ;;  %v516_v22 = vadd.f32 %v4572_v39, %v4583_v27  ;;  %v589_v34 = vadd.f32 %v4577_v30, %v4580_v29  ;;  %v587_v27 = vadd.f32 %v4566_v37, %v4570_v2 }
 0x120   :  { %6014 = vst [vmem:[#allocation89_spill] sm:$0xff] %v4758_v24  ;;  %6015 = vst [vmem:[#allocation90_spill] sm:$0xff] %v4761_v18  ;;  %v4764_v21 = vadd.f32 %v691_v20, %v4677_v31  ;;  %v4767_v25 = vadd.f32 %v764_v35, %v4683_v40 }
 0x121   :  { %v693_v38 = vpop.f32.mrf.mxu0  ;;  %v766_v23 = vpop.f32.mrf.mxu1 }
 0x122   :  { %6016 = vst [vmem:[#allocation91_spill] sm:$0xff] %v4764_v21  ;;  %6017 = vst [vmem:[#allocation92_spill] sm:$0xff] %v4767_v25 }
 0x123   :  { %v695_v19 = vpop.f32.mrf.mxu0  ;;  %v768_v26 = vpop.f32.mrf.mxu1 }
 0x125   :  { %v1104_v24 = vpop.f32.mrf.mxu0  ;;  %v1145_v17 = vpop.f32.mrf.mxu1 }
 0x126   :  { %v1152_v18 = vadd.f32 %v1104_v24, %v514_v33  ;;  %v1154_v39 = vadd.f32 %v1145_v17, %v587_v27 }
 0x127   :  { %v1106_v16 = vpop.f32.mrf.mxu0  ;;  %v1147_v6 = vpop.f32.mrf.mxu1 }
 0x128   :  { %v3270_v20 = vmul.f32 -1.442695, %v1152_v18  ;;  %v1153_v21 = vadd.f32 %v1106_v16, %v516_v22  ;;  %v1155_v36 = vadd.f32 %v1147_v6, %v589_v34  ;;  %v696_v6 = vadd.f32 %v695_v19, %v4677_v31 }
 0x129   :  { %v1108_v15 = vpop.f32.mrf.mxu0  ;;  %v1149_v25 = vpop.f32.mrf.mxu1  ;;  %v769_v19 = vadd.f32 %v768_v26, %v4683_v40 }
 0x12a   :  { %3466 = vpow2.f32 %v3270_v20  ;;  %v3271_v35 = vmul.f32 -1.442695, %v1153_v21  ;;  %v3272_v33 = vmul.f32 -1.442695, %v1155_v36 }
 0x12b   :  { %v1109_v14 = vpop.f32.mrf.mxu0  ;;  %v1150_v13 = vpop.f32.mrf.mxu1 }
 0x12c   :  { %3468 = vpow2.f32 %v3271_v35  ;;  %v694_v14 = vadd.f32 %v693_v38, %v4665_v28 }
 0x12d   :  { %3470 = vtanh.f32 %v1154_v39 }
 0x12e   :  { %3472 = vpow2.f32 %v3272_v33 }
 0x137   :  { %v3467_v24 = vpop.eup %3466 }
 0x138   :  { %v1159_v18 = vadd.f32 1.0, %v3467_v24 }
 0x139   :  { %v3469_v16 = vpop.eup %3468 }
 0x13a   :  { %3474 = vrcp.f32 %v1159_v18  ;;  %v1165_v15 = vadd.f32 1.0, %v3469_v16  ;;  %v3471_v13 = vpop.eup %3470  ;;  %v767_v16 = vadd.f32 %v766_v23, %v4671_v32 }
 0x13b   :  { %v3473_v25 = vpop.eup %3472 }
 0x13c   :  { %3476 = vrcp.f32 %v1165_v15  ;;  %v1172_v36 = vadd.f32 1.0, %v3473_v25 }
 0x145   :  { %v1384_v21 = vpop.f32.mrf.mxu0  ;;  %v1425_v30 = vpop.f32.mrf.mxu1 }
 0x146   :  { %v1432_v29 = vadd.f32 %v1384_v21, %v694_v14 }
 0x147   :  { %v3475_v37 = vpop.eup %3474  ;;  %v1386_v17 = vpop.f32.mrf.mxu0 }
 0x148   :  { %v1176_v2 = vmul.f32 %v3475_v37, %v3471_v13  ;;  %v3305_v22 = vmul.f32 -1.442695, %v1432_v29  ;;  %v1433_v20 = vadd.f32 %v1386_v17, %v696_v6  ;;  %v1427_v35 = vpop.f32.mrf.mxu1  ;;  %v1434_v13 = vadd.f32 %v1425_v30, %v767_v16  ;;  %v6029_v16 = vld [vmem:[#allocation15_spill] sm:$0xff] }
 0x149   :  { %v3477_v34 = vpop.eup %3476  ;;  %v1388_v27 = vpop.f32.mrf.mxu0  ;;  %v1435_v18 = vadd.f32 %v1427_v35, %v769_v19  ;;  %v6022_v19 = vld [vmem:[#allocation8_spill] sm:$0xff] }
 0x14a   :  { %v1175_v39 = vmul.f32 0.0, %v3477_v34  ;;  %3478 = vpow2.f32 %v3305_v22  ;;  %v3306_v33 = vmul.f32 -1.442695, %v1433_v20  ;;  %v1429_v28 = vpop.f32.mrf.mxu1  ;;  %v6018_v34 = vld [vmem:[#allocation35_spill] sm:$0xff]  ;;  %v6019_v27 = vld [vmem:[#allocation36_spill] sm:$0xff] }
 0x14b   :  { %v1389_v38 = vpop.f32.mrf.mxu0  ;;  %v3307_v15 = vmul.f32 -1.442695, %v1435_v18  ;;  %v6025_v18 = vld [vmem:[#allocation11_spill] sm:$0xff] }
 0x14c   :  { %v4779_v24 = vadd.f32 %v1176_v2, %v1175_v39  ;;  %3480 = vpow2.f32 %v3306_v33  ;;  %v1430_v31 = vpop.f32.mrf.mxu1  ;;  %v6020_v38 = vld [vmem:[#allocation6_spill] sm:$0xff] }
 0x14d   :  { %3482 = vrcp.f32 %v1172_v36  ;;  %v6021_v31 = vld [vmem:[#allocation7_spill] sm:$0xff] }
 0x14e   :  { %3484 = vtanh.f32 %v4779_v24 }
 0x14f   :  { %3486 = vpow2.f32 %v3307_v15  ;;  %v6030_v15 = vld [vmem:[#allocation16_spill] sm:$0xff] }
 0x157   :  { %v3479_v14 = vpop.eup %3478 }
 0x158   :  { %v1439_v21 = vadd.f32 1.0, %v3479_v14  ;;  %v6031_v14 = vld [vmem:[#allocation17_spill] sm:$0xff] }
 0x159   :  { %v3481_v25 = vpop.eup %3480 }
 0x15a   :  { %v3483_v6 = vpop.eup %3482  ;;  %3488 = vrcp.f32 %v1439_v21  ;;  %v1445_v29 = vadd.f32 1.0, %v3481_v25  ;;  %v6033_v21 = vld [vmem:[#allocation19_spill] sm:$0xff]  ;;  %v6034_v25 = vld [vmem:[#allocation20_spill] sm:$0xff] }
 0x15b   :  { %v3485_v37 = vpop.eup %3484  ;;  %3490 = vtanh.f32 %v1434_v13  ;;  %v6032_v13 = vld [vmem:[#allocation18_spill] sm:$0xff] }
 0x15c   :  { %3492 = vrcp.f32 %v1445_v29  ;;  %v1179_v17 = vmul.f32 %v3485_v37, %v3483_v6  ;;  %v3487_v32 = vpop.eup %3486  ;;  %v6035_v6 = vld [vmem:[#allocation21_spill] sm:$0xff]  ;;  %v6036_v29 = vld [vmem:[#allocation22_spill] sm:$0xff]  ;;  %v6037_v37 = vld [vmem:[#allocation23_spill] sm:$0xff] }
 0x15d   :  { %v1452_v2 = vadd.f32 1.0, %v3487_v32  ;;  %v6040_v32 = vld [vmem:[#allocation26_spill] sm:$0xff] }
 0x15e   :  { %1464 = vst [vmem:[%s5834_s5] sm:$0xff] %v1179_v17  ;;  %v1474_v40 = vpack.c.bf16 %v1179_v17, %v1179_v17  ;;  %v6038_v17 = vld [vmem:[#allocation24_spill] sm:$0xff] }
 0x15f   :  { %3494 = vrcp.f32 %v1452_v2  ;;  %v6044_v2 = vld [vmem:[#allocation30_spill] sm:$0xff] }
 0x160   :  { %1508 = vmatmul.mubr.bf16.vlgmr.msra.gmra.mxu0 %v1474_v40  ;;  %1549 = vmatmul.mubr.bf16.vlgmr.msra.gmra.mxu1 %v1474_v40  ;;  %v6039_v40 = vld [vmem:[#allocation25_spill] sm:$0xff] }
 0x161   :  { %1594 = vmatpush1.bf16.msra.mxu0 %v4332_v41  ;;  %1635 = vmatpush1.bf16.msra.mxu1 %v4339_v42 }
 0x162   :  { %1595 = vmatprep.subr.bf16.mxu0 %v4344_v43  ;;  %1636 = vmatprep.subr.bf16.mxu1 %v4350_v44 }
 0x163   :  { %1625 = vmatprep.mubr.bf16.mxu0 %v5961_v7  ;;  %1666 = vmatprep.mubr.bf16.mxu1 %v5961_v7 }
 0x165   :  { %1596 = vmatpush1.bf16.msra.mxu0 %v4358_v46  ;;  %1637 = vmatpush1.bf16.msra.mxu1 %v4365_v47 }
 0x166   :  { %1597 = vmatprep.subr.bf16.mxu0 %v4370_v48  ;;  %1638 = vmatprep.subr.bf16.mxu1 %v4376_v49 }
 0x167   :  { %v3489_v23 = vpop.eup %3488 }
 0x168   :  { %v3491_v26 = vpop.eup %3490 }
 0x169   :  { %v3493_v30 = vpop.eup %3492  ;;  %1598 = vmatpush1.bf16.msra.mxu0 %v4384_v50  ;;  %1639 = vmatpush1.bf16.msra.mxu1 %v4391_v51  ;;  %v1456_v20 = vmul.f32 %v3491_v26, %v3489_v23  ;;  %v6041_v23 = vld [vmem:[#allocation27_spill] sm:$0xff]  ;;  %v6042_v26 = vld [vmem:[#allocation28_spill] sm:$0xff] }
 0x16a   :  { %v1455_v22 = vmul.f32 0.0, %v3493_v30  ;;  %1599 = vmatprep.subr.bf16.mxu0 %v4396_v52  ;;  %1640 = vmatprep.subr.bf16.mxu1 %v4402_v53  ;;  %v6043_v30 = vld [vmem:[#allocation29_spill] sm:$0xff] }
 0x16c   :  { %v4801_v35 = vadd.f32 %v1456_v20, %v1455_v22  ;;  %v3495_v36 = vpop.eup %3494  ;;  %v6045_v22 = vld [vmem:[#allocation31_spill] sm:$0xff]  ;;  %v6046_v20 = vld [vmem:[#allocation32_spill] sm:$0xff] }
 0x16d   :  { %1600 = vmatpush1.bf16.msra.mxu0 %v4408_v54  ;;  %1641 = vmatpush1.bf16.msra.mxu1 %v4415_v55 }
 0x16e   :  { %3496 = vtanh.f32 %v4801_v35  ;;  %1601 = vmatprep.subr.bf16.mxu0 %v4420_v56  ;;  %1642 = vmatprep.subr.bf16.mxu1 %v4426_v57 }
 0x171   :  { %1602 = vmatpush1.bf16.msra.mxu0 %v4432_v58  ;;  %1643 = vmatpush1.bf16.msra.mxu1 %v4439_v59 }
 0x172   :  { %1603 = vmatprep.subr.bf16.mxu0 %v4444_v60  ;;  %1644 = vmatprep.subr.bf16.mxu1 %v4450_v61 }
 0x175   :  { %1604 = vmatpush1.bf16.msra.mxu0 %v4456_v62  ;;  %1645 = vmatpush1.bf16.msra.mxu1 %v4463_v63 }
 0x176   :  { %1605 = vmatprep.subr.bf16.mxu0 %v4468_v0  ;;  %1646 = vmatprep.subr.bf16.mxu1 %v4474_v1 }
 0x179   :  { %1606 = vmatpush1.bf16.msra.mxu0 %v6018_v34  ;;  %1647 = vmatpush1.bf16.msra.mxu1 %v4487_v4 }
 0x17a   :  { %1607 = vmatprep.subr.bf16.mxu0 %v4492_v5  ;;  %1648 = vmatprep.subr.bf16.mxu1 %v6019_v27 }
 0x17b   :  { %v3497_v39 = vpop.eup %3496 }
 0x17c   :  { %v1459_v33 = vmul.f32 %v3497_v39, %v3495_v36  ;;  %v6047_v36 = vld [vmem:[#allocation33_spill] sm:$0xff]  ;;  %v6048_v39 = vld [vmem:[#allocation34_spill] sm:$0xff] }
 0x17d   :  { %1608 = vmatpush1.bf16.msra.mxu0 %v4504_v3  ;;  %1649 = vmatpush1.bf16.msra.mxu1 %v4511_v45 }
 0x17e   :  { %3308 = vst [vmem:[%s5834_s5 + $0x78] sm:$0xff] %v1459_v33  ;;  %v1592_v28 = vpack.c.bf16 %v1459_v33, %v1459_v33  ;;  %1719 = vmatprep.subr.bf16.mxu0 %v4113_v8  ;;  %1760 = vmatprep.subr.bf16.mxu1 %v4119_v9  ;;  %v6023_v8 = vld [vmem:[#allocation9_spill] sm:$0xff]  ;;  %v6024_v9 = vld [vmem:[#allocation10_spill] sm:$0xff] }
 0x180   :  { %1626 = vmatmul.mubr.bf16.vlgmr.msra.gmra.mxu0 %v1592_v28  ;;  %1667 = vmatmul.mubr.bf16.vlgmr.msra.gmra.mxu1 %v1592_v28 }
 0x181   :  { %1720 = vmatpush1.bf16.msra.mxu0 %v4125_v10  ;;  %1761 = vmatpush1.bf16.msra.mxu1 %v4130_v11  ;;  %v6026_v10 = vld [vmem:[#allocation12_spill] sm:$0xff]  ;;  %v6027_v11 = vld [vmem:[#allocation13_spill] sm:$0xff] }
 0x182   :  { %1721 = vmatprep.subr.bf16.mxu0 %v4136_v12  ;;  %1762 = vmatprep.subr.bf16.mxu1 %v6020_v38  ;;  %v6028_v12 = vld [vmem:[#allocation14_spill] sm:$0xff]  ;;  %v6049_v38 = vld [vmem:[#allocation37_spill] sm:$0xff] }
 0x183   :  { %1751 = vmatprep.mubr.bf16.mxu0 %v5961_v7  ;;  %1792 = vmatprep.mubr.bf16.mxu1 %v5961_v7 }
 0x185   :  { %1722 = vmatpush1.bf16.msra.mxu0 %v6021_v31  ;;  %1763 = vmatpush1.bf16.msra.mxu1 %v6022_v19 }
 0x186   :  { %1723 = vmatprep.subr.bf16.mxu0 %v6023_v8  ;;  %1764 = vmatprep.subr.bf16.mxu1 %v6024_v9 }
 0x189   :  { %1724 = vmatpush1.bf16.msra.mxu0 %v6025_v18  ;;  %1765 = vmatpush1.bf16.msra.mxu1 %v6026_v10  ;;  %v6050_v18 = vld [vmem:[#allocation39_spill] sm:$0xff] }
 0x18a   :  { %1725 = vmatprep.subr.bf16.mxu0 %v6027_v11  ;;  %1766 = vmatprep.subr.bf16.mxu1 %v6028_v12 }
 0x18d   :  { %1726 = vmatpush1.bf16.msra.mxu0 %v6029_v16  ;;  %1767 = vmatpush1.bf16.msra.mxu1 %v6030_v15 }
 0x18e   :  { %1727 = vmatprep.subr.bf16.mxu0 %v6031_v14  ;;  %1768 = vmatprep.subr.bf16.mxu1 %v6032_v13  ;;  %v6051_v13 = vld [vmem:[#allocation40_spill] sm:$0xff] }
 0x191   :  { %1728 = vmatpush1.bf16.msra.mxu0 %v6033_v21  ;;  %1769 = vmatpush1.bf16.msra.mxu1 %v6034_v25  ;;  %v6052_v25 = vld [vmem:[#allocation38_spill] sm:$0xff] }
 0x192   :  { %1729 = vmatprep.subr.bf16.mxu0 %v6035_v6  ;;  %1770 = vmatprep.subr.bf16.mxu1 %v6036_v29 }
 0x195   :  { %1730 = vmatpush1.bf16.msra.mxu0 %v6037_v37  ;;  %1771 = vmatpush1.bf16.msra.mxu1 %v6038_v17 }
 0x196   :  { %1731 = vmatprep.subr.bf16.mxu0 %v6039_v40  ;;  %1772 = vmatprep.subr.bf16.mxu1 %v6040_v32 }
 0x199   :  { %1732 = vmatpush1.bf16.msra.mxu0 %v6041_v23  ;;  %1773 = vmatpush1.bf16.msra.mxu1 %v6042_v26 }
 0x19a   :  { %1733 = vmatprep.subr.bf16.mxu0 %v6043_v30  ;;  %1774 = vmatprep.subr.bf16.mxu1 %v6044_v2 }
 0x19d   :  { %1734 = vmatpush1.bf16.msra.mxu0 %v6045_v22  ;;  %1775 = vmatpush1.bf16.msra.mxu1 %v6046_v20  ;;  %v6053_v22 = vld [vmem:[#allocation89_spill] sm:$0xff] }
 0x19e   :  { %1837 = vmatprep.subr.bf16.mxu0 %v6047_v36  ;;  %1878 = vmatprep.subr.bf16.mxu1 %v6048_v39 }
 0x220   :  { %v1509_v33 = vpop.f32.mrf.mxu0  ;;  %v1550_v28 = vpop.f32.mrf.mxu1 }
 0x221   :  { %v1557_v31 = vadd.f32 %v1509_v33, %v6049_v38  ;;  %v1559_v6 = vadd.f32 %v1550_v28, %v6052_v25  ;;  %v6056_v25 = vld [vmem:[#allocation90_spill] sm:$0xff] }
 0x222   :  { %v1511_v19 = vpop.f32.mrf.mxu0  ;;  %v1552_v8 = vpop.f32.mrf.mxu1 }
 0x223   :  { %v3309_v9 = vmul.f32 -1.442695, %v1557_v31  ;;  %v1558_v10 = vadd.f32 %v1511_v19, %v6050_v18  ;;  %v1560_v21 = vadd.f32 %v1552_v8, %v6051_v13  ;;  %v6054_v31 = vld [vmem:[#allocation91_spill] sm:$0xff]  ;;  %v6055_v13 = vld [vmem:[#allocation92_spill] sm:$0xff] }
 0x224   :  { %v1513_v11 = vpop.f32.mrf.mxu0  ;;  %v1554_v12 = vpop.f32.mrf.mxu1 }
 0x225   :  { %3498 = vpow2.f32 %v3309_v9  ;;  %v3310_v16 = vmul.f32 -1.442695, %v1558_v10  ;;  %v3311_v29 = vmul.f32 -1.442695, %v1560_v21 }
 0x226   :  { %v1514_v15 = vpop.f32.mrf.mxu0  ;;  %v1555_v14 = vpop.f32.mrf.mxu1 }
 0x227   :  { %3500 = vpow2.f32 %v3310_v16 }
 0x228   :  { %3502 = vtanh.f32 %v1559_v6 }
 0x229   :  { %3504 = vpow2.f32 %v3311_v29 }
 0x232   :  { %v3499_v37 = vpop.eup %3498 }
 0x233   :  { %v1564_v17 = vadd.f32 1.0, %v3499_v37 }
 0x234   :  { %v3501_v40 = vpop.eup %3500 }
 0x235   :  { %3506 = vrcp.f32 %v1564_v17  ;;  %v1570_v32 = vadd.f32 1.0, %v3501_v40  ;;  %v3503_v23 = vpop.eup %3502 }
 0x236   :  { %v3505_v2 = vpop.eup %3504 }
 0x237   :  { %3508 = vrcp.f32 %v1570_v32  ;;  %v1577_v9 = vadd.f32 1.0, %v3505_v2 }
 0x240   :  { %v1627_v26 = vpop.f32.mrf.mxu0  ;;  %v1668_v30 = vpop.f32.mrf.mxu1 }
 0x241   :  { %v1675_v20 = vadd.f32 %v1627_v26, %v6053_v22  ;;  %v1677_v6 = vadd.f32 %v1668_v30, %v6056_v25 }
 0x242   :  { %v3507_v36 = vpop.eup %3506  ;;  %v1629_v39 = vpop.f32.mrf.mxu0 }
 0x243   :  { %v1670_v33 = vpop.f32.mrf.mxu1  ;;  %v1581_v38 = vmul.f32 %v3507_v36, %v3503_v23  ;;  %v3312_v28 = vmul.f32 -1.442695, %v1675_v20  ;;  %v1676_v19 = vadd.f32 %v1629_v39, %v6054_v31  ;;  %v5052_v36 = vld [vmem:[%s5831_s2 + $0x40] ss:$16 sps:$4 sm:$0xff]   ;;  %v5058_v39 = vld [vmem:[%s5831_s2 + $0x48] ss:$16 sps:$4 sm:$0xff]  }
 0x244   :  { %v3509_v8 = vpop.eup %3508  ;;  %v1631_v18 = vpop.f32.mrf.mxu0  ;;  %v1678_v21 = vadd.f32 %v1670_v33, %v6055_v13  ;;  %6070 = vst [vmem:[#allocation17_spill] sm:$0xff] %v5052_v36  ;;  %6071 = vst [vmem:[#allocation18_spill] sm:$0xff] %v5058_v39  ;;  %v5064_v33 = vld [vmem:[%s5831_s2 + $0x24] ss:$16 sps:$4 sm:$0xff]   ;;  %v5082_v31 = vld [vmem:[%s5831_s2 + $0x28] ss:$16 sps:$4 sm:$0xff]  }
 0x245   :  { %v1672_v10 = vpop.f32.mrf.mxu1  ;;  %v1580_v11 = vmul.f32 %v3509_v8, %v4779_v24  ;;  %3510 = vpow2.f32 %v3312_v28  ;;  %v3313_v12 = vmul.f32 -1.442695, %v1676_v19  ;;  %6072 = vst [vmem:[#allocation19_spill] sm:$0xff] %v5064_v33  ;;  %v5076_v28 = vld [vmem:[%s5831_s2 + $0x20] ss:$16 sps:$4 sm:$0xff]   ;;  %6075 = vst [vmem:[#allocation22_spill] sm:$0xff] %v5082_v31 }
 0x246   :  { %v1632_v16 = vpop.f32.mrf.mxu0  ;;  %v3314_v29 = vmul.f32 -1.442695, %v1678_v21  ;;  %6074 = vst [vmem:[#allocation21_spill] sm:$0xff] %v5076_v28  ;;  %v5088_v19 = vld [vmem:[%s5831_s2 + $0x4] ss:$16 sps:$4 sm:$0xff]  }
 0x247   :  { %v1673_v15 = vpop.f32.mrf.mxu1  ;;  %v4868_v14 = vadd.f32 %v1581_v38, %v1580_v11  ;;  %3512 = vpow2.f32 %v3313_v12  ;;  %v5070_v38 = vld [vmem:[%s5831_s2 + $0x2c] ss:$16 sps:$4 sm:$0xff]   ;;  %6076 = vst [vmem:[#allocation23_spill] sm:$0xff] %v5088_v19  ;;  %v5106_v18 = vld [vmem:[%s5831_s2 + $0x8] ss:$16 sps:$4 sm:$0xff]  }
 0x248   :  { %3514 = vrcp.f32 %v1577_v9  ;;  %6073 = vst [vmem:[#allocation20_spill] sm:$0xff] %v5070_v38  ;;  %v5094_v8 = vld [vmem:[%s5831_s2 + $0xc] ss:$16 sps:$4 sm:$0xff]   ;;  %v5100_v9 = vld [vmem:[%s5831_s2] ss:$16 sps:$4 sm:$0xff]   ;;  %6079 = vst [vmem:[#allocation26_spill] sm:$0xff] %v5106_v18 }
 0x249   :  { %3516 = vtanh.f32 %v4868_v14  ;;  %6077 = vst [vmem:[#allocation24_spill] sm:$0xff] %v5094_v8  ;;  %6078 = vst [vmem:[#allocation25_spill] sm:$0xff] %v5100_v9  ;;  %v5112_v10 = vld [vmem:[%s5832_s3 + $0xe4] ss:$16 sps:$4 sm:$0xff]   ;;  %v5118_v11 = vld [vmem:[%s5832_s3 + $0xec] ss:$16 sps:$4 sm:$0xff]  }
 0x24a   :  { %3518 = vtanh.f32 %v1677_v6  ;;  %6080 = vst [vmem:[#allocation27_spill] sm:$0xff] %v5112_v10  ;;  %6081 = vst [vmem:[#allocation28_spill] sm:$0xff] %v5118_v11  ;;  %v6082_v15 = vld [vmem:[#allocation41_spill] sm:$0xff] }
 0x24b   :  { %3520 = vpow2.f32 %v3314_v29  ;;  %v6083_v29 = vld [vmem:[#allocation43_spill] sm:$0xff] }
 0x252   :  { %v3511_v37 = vpop.eup %3510 }
 0x253   :  { %v1682_v17 = vadd.f32 1.0, %v3511_v37 }
 0x254   :  { %v3513_v40 = vpop.eup %3512 }
 0x255   :  { %v3515_v24 = vpop.eup %3514  ;;  %3522 = vrcp.f32 %v1682_v17  ;;  %v1688_v32 = vadd.f32 1.0, %v3513_v40 }
 0x256   :  { %v3517_v23 = vpop.eup %3516 }
 0x257   :  { %3524 = vrcp.f32 %v1688_v32  ;;  %v1584_v26 = vmul.f32 %v3517_v23, %v3515_v24  ;;  %v3519_v30 = vpop.eup %3518 }
 0x258   :  { %v3521_v22 = vpop.eup %3520 }
 0x259   :  { %3315 = vst [vmem:[%s5834_s5 + $0x10] sm:$0xff] %v1584_v26  ;;  %v1718_v2 = vpack.c.bf16 %v1584_v26, %v1584_v26  ;;  %v6084_v26 = vld [vmem:[#allocation44_spill] sm:$0xff] }
 0x25b   :  { %1752 = vmatmul.mubr.bf16.vlgmr.msra.gmra.mxu0 %v1718_v2  ;;  %1793 = vmatmul.mubr.bf16.vlgmr.msra.gmra.mxu1 %v1718_v2 }
 0x25c   :  { %1838 = vmatpush1.bf16.msra.mxu0 %v4332_v41  ;;  %1879 = vmatpush1.bf16.msra.mxu1 %v4339_v42 }
 0x25d   :  { %1839 = vmatprep.subr.bf16.mxu0 %v4344_v43  ;;  %1880 = vmatprep.subr.bf16.mxu1 %v4350_v44  ;;  %v1695_v43 = vadd.f32 1.0, %v3521_v22 }
 0x25e   :  { %1869 = vmatprep.mubr.bf16.mxu0 %v5961_v7  ;;  %1910 = vmatprep.mubr.bf16.mxu1 %v5961_v7 }
 0x25f   :  { %3526 = vrcp.f32 %v1695_v43 }
 0x260   :  { %1840 = vmatpush1.bf16.msra.mxu0 %v4358_v46  ;;  %1881 = vmatpush1.bf16.msra.mxu1 %v4365_v47 }
 0x261   :  { %1841 = vmatprep.subr.bf16.mxu0 %v4370_v48  ;;  %1882 = vmatprep.subr.bf16.mxu1 %v4376_v49 }
 0x262   :  { %v3523_v41 = vpop.eup %3522 }
 0x263   :  { %v1699_v42 = vmul.f32 %v3523_v41, %v3519_v30  ;;  %v6085_v30 = vld [vmem:[#allocation42_spill] sm:$0xff] }
 0x264   :  { %v3525_v20 = vpop.eup %3524  ;;  %1842 = vmatpush1.bf16.msra.mxu0 %v4384_v50  ;;  %1883 = vmatpush1.bf16.msra.mxu1 %v4391_v51  ;;  %v4918_v51 = vld [vmem:[%s5831_s2 + $0xe4] ss:$16 sps:$4 sm:$0xff]  }
 0x265   :  { %v1698_v44 = vmul.f32 %v3525_v20, %v4801_v35  ;;  %1843 = vmatprep.subr.bf16.mxu0 %v4396_v52  ;;  %1884 = vmatprep.subr.bf16.mxu1 %v4402_v53  ;;  %v4924_v52 = vld [vmem:[%s5831_s2 + $0xec] ss:$16 sps:$4 sm:$0xff]   ;;  %v4942_v53 = vld [vmem:[%s5831_s2 + $0xc4] ss:$16 sps:$4 sm:$0xff]   ;;  %v5034_v35 = vld [vmem:[%s5831_s2 + $0x68] ss:$16 sps:$4 sm:$0xff]  }
 0x266   :  { %6067 = vst [vmem:[#allocation14_spill] sm:$0xff] %v5034_v35 }
 0x267   :  { %v4891_v46 = vadd.f32 %v1699_v42, %v1698_v44 }
 0x268   :  { %1844 = vmatpush1.bf16.msra.mxu0 %v4408_v54  ;;  %1885 = vmatpush1.bf16.msra.mxu1 %v4415_v55  ;;  %v4948_v54 = vld [vmem:[%s5831_s2 + $0xcc] ss:$16 sps:$4 sm:$0xff]   ;;  %v4956_v55 = vld [vmem:[%s5831_s2 + $0xc0] ss:$16 sps:$4 sm:$0xff]  }
 0x269   :  { %1845 = vmatprep.subr.bf16.mxu0 %v4420_v56  ;;  %1886 = vmatprep.subr.bf16.mxu1 %v4426_v57  ;;  %3528 = vtanh.f32 %v4891_v46  ;;  %v4962_v56 = vld [vmem:[%s5831_s2 + $0xc8] ss:$16 sps:$4 sm:$0xff]   ;;  %v4968_v57 = vld [vmem:[%s5831_s2 + $0xa4] ss:$16 sps:$4 sm:$0xff]  }
 0x26c   :  { %1846 = vmatpush1.bf16.msra.mxu0 %v4432_v58  ;;  %1887 = vmatpush1.bf16.msra.mxu1 %v4439_v59  ;;  %v3527_v47 = vpop.eup %3526  ;;  %v4974_v58 = vld [vmem:[%s5831_s2 + $0xac] ss:$16 sps:$4 sm:$0xff]   ;;  %v4980_v59 = vld [vmem:[%s5831_s2 + $0xa0] ss:$16 sps:$4 sm:$0xff]  }
 0x26d   :  { %1847 = vmatprep.subr.bf16.mxu0 %v4444_v60  ;;  %1888 = vmatprep.subr.bf16.mxu1 %v4450_v61  ;;  %6057 = vst [vmem:[#allocation35_spill] sm:$0xff] %v4974_v58  ;;  %6058 = vst [vmem:[#allocation36_spill] sm:$0xff] %v4980_v59  ;;  %v4986_v60 = vld [vmem:[%s5831_s2 + $0xa8] ss:$16 sps:$4 sm:$0xff]   ;;  %v4992_v61 = vld [vmem:[%s5831_s2 + $0x84] ss:$16 sps:$4 sm:$0xff]  }
 0x26e   :  { %6059 = vst [vmem:[#allocation6_spill] sm:$0xff] %v4986_v60  ;;  %6060 = vst [vmem:[#allocation7_spill] sm:$0xff] %v4992_v61 }
 0x270   :  { %1848 = vmatpush1.bf16.msra.mxu0 %v4456_v62  ;;  %1889 = vmatpush1.bf16.msra.mxu1 %v4463_v63  ;;  %v4998_v62 = vld [vmem:[%s5831_s2 + $0x8c] ss:$16 sps:$4 sm:$0xff]   ;;  %v5004_v63 = vld [vmem:[%s5831_s2 + $0x80] ss:$16 sps:$4 sm:$0xff]  }
 0x271   :  { %1849 = vmatprep.subr.bf16.mxu0 %v4468_v0  ;;  %1890 = vmatprep.subr.bf16.mxu1 %v4474_v1  ;;  %6061 = vst [vmem:[#allocation8_spill] sm:$0xff] %v4998_v62  ;;  %6062 = vst [vmem:[#allocation9_spill] sm:$0xff] %v5004_v63  ;;  %v5010_v0 = vld [vmem:[%s5831_s2 + $0x88] ss:$16 sps:$4 sm:$0xff]   ;;  %v5016_v1 = vld [vmem:[%s5831_s2 + $0x64] ss:$16 sps:$4 sm:$0xff]  }
 0x272   :  { %6063 = vst [vmem:[#allocation10_spill] sm:$0xff] %v5010_v0  ;;  %6064 = vst [vmem:[#allocation11_spill] sm:$0xff] %v5016_v1 }
 0x274   :  { %1850 = vmatpush1.bf16.msra.mxu0 %v6018_v34  ;;  %1891 = vmatpush1.bf16.msra.mxu1 %v4487_v4  ;;  %v5022_v4 = vld [vmem:[%s5831_s2 + $0x6c] ss:$16 sps:$4 sm:$0xff]   ;;  %v5040_v34 = vld [vmem:[%s5831_s2 + $0x44] ss:$16 sps:$4 sm:$0xff]  }
 0x275   :  { %1851 = vmatprep.subr.bf16.mxu0 %v4492_v5  ;;  %1892 = vmatprep.subr.bf16.mxu1 %v6019_v27  ;;  %6065 = vst [vmem:[#allocation12_spill] sm:$0xff] %v5022_v4  ;;  %v5028_v5 = vld [vmem:[%s5831_s2 + $0x60] ss:$16 sps:$4 sm:$0xff]   ;;  %6068 = vst [vmem:[#allocation15_spill] sm:$0xff] %v5040_v34  ;;  %v5046_v27 = vld [vmem:[%s5831_s2 + $0x4c] ss:$16 sps:$4 sm:$0xff]  }
 0x276   :  { %v3529_v48 = vpop.eup %3528  ;;  %6066 = vst [vmem:[#allocation13_spill] sm:$0xff] %v5028_v5  ;;  %6069 = vst [vmem:[#allocation16_spill] sm:$0xff] %v5046_v27 }
 0x277   :  { %v1702_v49 = vmul.f32 %v3529_v48, %v3527_v47 }
 0x278   :  { %1852 = vmatpush1.bf16.msra.mxu0 %v4504_v3  ;;  %1893 = vmatpush1.bf16.msra.mxu1 %v4511_v45  ;;  %v4930_v3 = vld [vmem:[%s5831_s2 + $0xe0] ss:$16 sps:$4 sm:$0xff]   ;;  %v4936_v45 = vld [vmem:[%s5831_s2 + $0xe8] ss:$16 sps:$4 sm:$0xff]  }
 0x279   :  { %3316 = vst [vmem:[%s5834_s5 + $0x68] sm:$0xff] %v1702_v49  ;;  %v1836_v50 = vpack.c.bf16 %v1702_v49, %v1702_v49  ;;  %1963 = vmatprep.subr.bf16.mxu0 %v4918_v51  ;;  %2004 = vmatprep.subr.bf16.mxu1 %v4924_v52 }
 0x27b   :  { %1870 = vmatmul.mubr.bf16.vlgmr.msra.gmra.mxu0 %v1836_v50  ;;  %1911 = vmatmul.mubr.bf16.vlgmr.msra.gmra.mxu1 %v1836_v50 }
 0x27c   :  { %1964 = vmatpush1.bf16.msra.mxu0 %v4930_v3  ;;  %2005 = vmatpush1.bf16.msra.mxu1 %v4936_v45 }
 0x27d   :  { %1965 = vmatprep.subr.bf16.mxu0 %v4942_v53  ;;  %2006 = vmatprep.subr.bf16.mxu1 %v4948_v54 }
 0x27e   :  { %1995 = vmatprep.mubr.bf16.mxu0 %v5961_v7  ;;  %2036 = vmatprep.mubr.bf16.mxu1 %v5961_v7 }
 0x280   :  { %1966 = vmatpush1.bf16.msra.mxu0 %v4956_v55  ;;  %2007 = vmatpush1.bf16.msra.mxu1 %v4962_v56 }
 0x281   :  { %1967 = vmatprep.subr.bf16.mxu0 %v4968_v57  ;;  %2008 = vmatprep.subr.bf16.mxu1 %v4974_v58 }
 0x284   :  { %1968 = vmatpush1.bf16.msra.mxu0 %v4980_v59  ;;  %2009 = vmatpush1.bf16.msra.mxu1 %v4986_v60 }
 0x285   :  { %1969 = vmatprep.subr.bf16.mxu0 %v4992_v61  ;;  %2010 = vmatprep.subr.bf16.mxu1 %v4998_v62 }
 0x288   :  { %1970 = vmatpush1.bf16.msra.mxu0 %v5004_v63  ;;  %2011 = vmatpush1.bf16.msra.mxu1 %v5010_v0 }
 0x289   :  { %1971 = vmatprep.subr.bf16.mxu0 %v5016_v1  ;;  %2012 = vmatprep.subr.bf16.mxu1 %v5022_v4 }
 0x28c   :  { %1972 = vmatpush1.bf16.msra.mxu0 %v5028_v5  ;;  %2013 = vmatpush1.bf16.msra.mxu1 %v5034_v35 }
 0x28d   :  { %1973 = vmatprep.subr.bf16.mxu0 %v5040_v34  ;;  %2014 = vmatprep.subr.bf16.mxu1 %v5046_v27 }
 0x290   :  { %1974 = vmatpush1.bf16.msra.mxu0 %v5052_v36  ;;  %2015 = vmatpush1.bf16.msra.mxu1 %v5058_v39 }
 0x291   :  { %1975 = vmatprep.subr.bf16.mxu0 %v5064_v33  ;;  %2016 = vmatprep.subr.bf16.mxu1 %v5070_v38 }
 0x294   :  { %1976 = vmatpush1.bf16.msra.mxu0 %v5076_v28  ;;  %2017 = vmatpush1.bf16.msra.mxu1 %v5082_v31 }
 0x295   :  { %1977 = vmatprep.subr.bf16.mxu0 %v5088_v19  ;;  %2018 = vmatprep.subr.bf16.mxu1 %v5094_v8 }
 0x298   :  { %1978 = vmatpush1.bf16.msra.mxu0 %v5100_v9  ;;  %2019 = vmatpush1.bf16.msra.mxu1 %v5106_v18 }
 0x299   :  { %2081 = vmatprep.subr.bf16.mxu0 %v5112_v10  ;;  %2122 = vmatprep.subr.bf16.mxu1 %v5118_v11 }
 0x31b   :  { %v1753_v12 = vpop.f32.mrf.mxu0  ;;  %v1794_v16 = vpop.f32.mrf.mxu1 }
 0x31c   :  { %v1801_v13 = vadd.f32 %v1753_v12, %v6082_v15  ;;  %v1803_v22 = vadd.f32 %v1794_v16, %v6085_v30  ;;  %v6086_v12 = vld [vmem:[#allocation85_spill] sm:$0xff] }
 0x31d   :  { %v1755_v21 = vpop.f32.mrf.mxu0  ;;  %v1796_v25 = vpop.f32.mrf.mxu1 }
 0x31e   :  { %v3317_v6 = vmul.f32 -1.442695, %v1801_v13  ;;  %v1802_v37 = vadd.f32 %v1755_v21, %v6083_v29  ;;  %v1804_v2 = vadd.f32 %v1796_v25, %v6084_v26  ;;  %v6087_v29 = vld [vmem:[#allocation87_spill] sm:$0xff] }
 0x31f   :  { %v1757_v17 = vpop.f32.mrf.mxu0  ;;  %v1798_v40 = vpop.f32.mrf.mxu1 }
 0x320   :  { %3530 = vpow2.f32 %v3317_v6  ;;  %v3318_v24 = vmul.f32 -1.442695, %v1802_v37  ;;  %v3319_v41 = vmul.f32 -1.442695, %v1804_v2 }
 0x321   :  { %v1758_v32 = vpop.f32.mrf.mxu0  ;;  %v1799_v23 = vpop.f32.mrf.mxu1 }
 0x322   :  { %3532 = vpow2.f32 %v3318_v24 }
 0x323   :  { %3534 = vtanh.f32 %v1803_v22 }
 0x324   :  { %3536 = vpow2.f32 %v3319_v41  ;;  %v6088_v41 = vld [vmem:[#allocation88_spill] sm:$0xff] }
 0x32d   :  { %v3531_v42 = vpop.eup %3530 }
 0x32e   :  { %v1808_v20 = vadd.f32 1.0, %v3531_v42 }
 0x32f   :  { %v3533_v43 = vpop.eup %3532 }
 0x330   :  { %3538 = vrcp.f32 %v1808_v20  ;;  %v1814_v44 = vadd.f32 1.0, %v3533_v43  ;;  %v3535_v47 = vpop.eup %3534  ;;  %v6089_v20 = vld [vmem:[#allocation86_spill] sm:$0xff] }
 0x331   :  { %v3537_v50 = vpop.eup %3536 }
 0x332   :  { %3540 = vrcp.f32 %v1814_v44  ;;  %v1821_v40 = vadd.f32 1.0, %v3537_v50 }
 0x33b   :  { %v1871_v48 = vpop.f32.mrf.mxu0  ;;  %v1912_v49 = vpop.f32.mrf.mxu1 }
 0x33c   :  { %v1919_v15 = vadd.f32 %v1871_v48, %v6086_v12  ;;  %v1921_v43 = vadd.f32 %v1912_v49, %v6089_v20  ;;  %v5139_v49 = vld [vmem:[%s5832_s3 + $0xe0] ss:$16 sps:$4 sm:$0xff]  }
 0x33d   :  { %v3539_v13 = vpop.eup %3538  ;;  %v1873_v21 = vpop.f32.mrf.mxu0 }
 0x33e   :  { %v1914_v25 = vpop.f32.mrf.mxu1  ;;  %v1825_v6 = vmul.f32 %v3539_v13, %v3535_v47  ;;  %v3320_v16 = vmul.f32 -1.442695, %v1919_v15  ;;  %v1920_v37 = vadd.f32 %v1873_v21, %v6087_v29 }
 0x33f   :  { %v3541_v17 = vpop.eup %3540  ;;  %v1875_v24 = vpop.f32.mrf.mxu0  ;;  %v1922_v42 = vadd.f32 %v1914_v25, %v6088_v41  ;;  %v5145_v25 = vld [vmem:[%s5832_s3 + $0xe8] ss:$16 sps:$4 sm:$0xff]   ;;  %v5189_v41 = vld [vmem:[%s5832_s3 + $0xa0] ss:$16 sps:$4 sm:$0xff]  }
 0x340   :  { %v1916_v32 = vpop.f32.mrf.mxu1  ;;  %v1824_v23 = vmul.f32 %v3541_v17, %v4868_v14  ;;  %3542 = vpow2.f32 %v3320_v16  ;;  %v3321_v26 = vmul.f32 -1.442695, %v1920_v37  ;;  %v5157_v16 = vld [vmem:[%s5832_s3 + $0xcc] ss:$16 sps:$4 sm:$0xff]   ;;  %v5165_v37 = vld [vmem:[%s5832_s3 + $0xc0] ss:$16 sps:$4 sm:$0xff]  }
 0x341   :  { %v1876_v2 = vpop.f32.mrf.mxu0  ;;  %v3322_v44 = vmul.f32 -1.442695, %v1922_v42  ;;  %v5171_v17 = vld [vmem:[%s5832_s3 + $0xc8] ss:$16 sps:$4 sm:$0xff]   ;;  %v5177_v24 = vld [vmem:[%s5832_s3 + $0xa4] ss:$16 sps:$4 sm:$0xff]  }
 0x342   :  { %v1917_v30 = vpop.f32.mrf.mxu1  ;;  %v5128_v22 = vadd.f32 %v1825_v6, %v1824_v23  ;;  %3544 = vpow2.f32 %v3321_v26  ;;  %v5151_v6 = vld [vmem:[%s5832_s3 + $0xc4] ss:$16 sps:$4 sm:$0xff]   ;;  %v5183_v32 = vld [vmem:[%s5832_s3 + $0xac] ss:$16 sps:$4 sm:$0xff]   ;;  %v5195_v42 = vld [vmem:[%s5832_s3 + $0xa8] ss:$16 sps:$4 sm:$0xff]  }
 0x343   :  { %3546 = vrcp.f32 %v1821_v40 }
 0x344   :  { %3548 = vtanh.f32 %v5128_v22 }
 0x345   :  { %3550 = vtanh.f32 %v1921_v43  ;;  %v5202_v43 = vld [vmem:[%s5832_s3 + $0x84] ss:$16 sps:$4 sm:$0xff]  }
 0x346   :  { %3552 = vpow2.f32 %v3322_v44  ;;  %v5208_v44 = vld [vmem:[%s5832_s3 + $0x8c] ss:$16 sps:$4 sm:$0xff]  }
 0x34d   :  { %v3543_v47 = vpop.eup %3542 }
 0x34e   :  { %v1926_v48 = vadd.f32 1.0, %v3543_v47 }
 0x34f   :  { %v3545_v50 = vpop.eup %3544 }
 0x350   :  { %v3547_v14 = vpop.eup %3546  ;;  %3554 = vrcp.f32 %v1926_v48  ;;  %v1932_v12 = vadd.f32 1.0, %v3545_v50  ;;  %v5222_v48 = vld [vmem:[%s5832_s3 + $0x88] ss:$16 sps:$4 sm:$0xff]   ;;  %v5228_v50 = vld [vmem:[%s5832_s3 + $0x64] ss:$16 sps:$4 sm:$0xff]  }
 0x351   :  { %v3549_v15 = vpop.eup %3548 }
 0x352   :  { %3556 = vrcp.f32 %v1932_v12  ;;  %v1828_v13 = vmul.f32 %v3549_v15, %v3547_v14  ;;  %v3551_v29 = vpop.eup %3550  ;;  %v5234_v14 = vld [vmem:[%s5832_s3 + $0x6c] ss:$16 sps:$4 sm:$0xff]   ;;  %v5241_v12 = vld [vmem:[%s5832_s3 + $0x60] ss:$16 sps:$4 sm:$0xff]   ;;  %v5247_v15 = vld [vmem:[%s5832_s3 + $0x68] ss:$16 sps:$4 sm:$0xff]  }
 0x353   :  { %v3553_v40 = vpop.eup %3552 }
 0x354   :  { %3323 = vst [vmem:[%s5834_s5 + $0x20] sm:$0xff] %v1828_v13  ;;  %v1962_v21 = vpack.c.bf16 %v1828_v13, %v1828_v13  ;;  %v1939_v30 = vadd.f32 1.0, %v3553_v40  ;;  %v5253_v13 = vld [vmem:[%s5832_s3 + $0x44] ss:$16 sps:$4 sm:$0xff]   ;;  %v5271_v40 = vld [vmem:[%s5832_s3 + $0x48] ss:$16 sps:$4 sm:$0xff]  }
 0x355   :  { %6090 = vst [vmem:[#allocation29_spill] sm:$0xff] %v5271_v40 }
 0x356   :  { %1996 = vmatmul.mubr.bf16.vlgmr.msra.gmra.mxu0 %v1962_v21  ;;  %2037 = vmatmul.mubr.bf16.vlgmr.msra.gmra.mxu1 %v1962_v21  ;;  %3558 = vrcp.f32 %v1939_v30  ;;  %v5259_v21 = vld [vmem:[%s5832_s3 + $0x4c] ss:$16 sps:$4 sm:$0xff]   ;;  %v5295_v30 = vld [vmem:[%s5832_s3 + $0x28] ss:$16 sps:$4 sm:$0xff]  }
 0x357   :  { %2082 = vmatpush1.bf16.msra.mxu0 %v5139_v49  ;;  %2123 = vmatpush1.bf16.msra.mxu1 %v5145_v25  ;;  %6094 = vst [vmem:[#allocation33_spill] sm:$0xff] %v5295_v30 }
 0x358   :  { %2083 = vmatprep.subr.bf16.mxu0 %v5151_v6  ;;  %2124 = vmatprep.subr.bf16.mxu1 %v5157_v16 }
 0x359   :  { %2113 = vmatprep.mubr.bf16.mxu0 %v5961_v7  ;;  %2154 = vmatprep.mubr.bf16.mxu1 %v5961_v7 }
 0x35b   :  { %2084 = vmatpush1.bf16.msra.mxu0 %v5165_v37  ;;  %2125 = vmatpush1.bf16.msra.mxu1 %v5171_v17 }
 0x35c   :  { %2085 = vmatprep.subr.bf16.mxu0 %v5177_v24  ;;  %2126 = vmatprep.subr.bf16.mxu1 %v5183_v32 }
 0x35d   :  { %v3555_v23 = vpop.eup %3554 }
 0x35e   :  { %v1943_v26 = vmul.f32 %v3555_v23, %v3551_v29  ;;  %v5265_v29 = vld [vmem:[%s5832_s3 + $0x40] ss:$16 sps:$4 sm:$0xff]   ;;  %v5277_v23 = vld [vmem:[%s5832_s3 + $0x24] ss:$16 sps:$4 sm:$0xff]  }
 0x35f   :  { %v3557_v2 = vpop.eup %3556  ;;  %2086 = vmatpush1.bf16.msra.mxu0 %v5189_v41  ;;  %2127 = vmatpush1.bf16.msra.mxu1 %v5195_v42  ;;  %6091 = vst [vmem:[#allocation30_spill] sm:$0xff] %v5277_v23 }
 0x360   :  { %v1942_v20 = vmul.f32 %v3557_v2, %v4891_v46  ;;  %2087 = vmatprep.subr.bf16.mxu0 %v5202_v43  ;;  %2128 = vmatprep.subr.bf16.mxu1 %v5208_v44  ;;  %v5216_v46 = vld [vmem:[%s5832_s3 + $0x80] ss:$16 sps:$4 sm:$0xff]  }
 0x361   :  { %v5289_v2 = vld [vmem:[%s5832_s3 + $0x20] ss:$16 sps:$4 sm:$0xff]  }
 0x362   :  { %v5211_v47 = vadd.f32 %v1943_v26, %v1942_v20  ;;  %v5283_v26 = vld [vmem:[%s5832_s3 + $0x2c] ss:$16 sps:$4 sm:$0xff]   ;;  %6093 = vst [vmem:[#allocation32_spill] sm:$0xff] %v5289_v2 }
 0x363   :  { %2088 = vmatpush1.bf16.msra.mxu0 %v5216_v46  ;;  %2129 = vmatpush1.bf16.msra.mxu1 %v5222_v48  ;;  %6092 = vst [vmem:[#allocation31_spill] sm:$0xff] %v5283_v26  ;;  %v3559_v20 = vpop.eup %3558 }
 0x364   :  { %2089 = vmatprep.subr.bf16.mxu0 %v5228_v50  ;;  %2130 = vmatprep.subr.bf16.mxu1 %v5234_v14  ;;  %3560 = vtanh.f32 %v5211_v47 }
 0x367   :  { %2090 = vmatpush1.bf16.msra.mxu0 %v5241_v12  ;;  %2131 = vmatpush1.bf16.msra.mxu1 %v5247_v15 }
 0x368   :  { %2091 = vmatprep.subr.bf16.mxu0 %v5253_v13  ;;  %2132 = vmatprep.subr.bf16.mxu1 %v5259_v21 }
 0x36b   :  { %2092 = vmatpush1.bf16.msra.mxu0 %v5265_v29  ;;  %2133 = vmatpush1.bf16.msra.mxu1 %v5271_v40 }
 0x36c   :  { %2093 = vmatprep.subr.bf16.mxu0 %v5277_v23  ;;  %2134 = vmatprep.subr.bf16.mxu1 %v5283_v26  ;;  %v5301_v23 = vld [vmem:[%s5832_s3 + $0x4] ss:$16 sps:$4 sm:$0xff]   ;;  %v5307_v26 = vld [vmem:[%s5832_s3 + $0xc] ss:$16 sps:$4 sm:$0xff]  }
 0x36d   :  { %6095 = vst [vmem:[#allocation34_spill] sm:$0xff] %v5301_v23  ;;  %6096 = vst [vmem:[#allocation37_spill] sm:$0xff] %v5307_v26 }
 0x36f   :  { %2094 = vmatpush1.bf16.msra.mxu0 %v5289_v2  ;;  %2135 = vmatpush1.bf16.msra.mxu1 %v5295_v30  ;;  %v5313_v30 = vld [vmem:[%s5832_s3] ss:$16 sps:$4 sm:$0xff]  }
 0x370   :  { %2095 = vmatprep.subr.bf16.mxu0 %v5301_v23  ;;  %2136 = vmatprep.subr.bf16.mxu1 %v5307_v26  ;;  %v5319_v23 = vld [vmem:[%s5832_s3 + $0x8] ss:$16 sps:$4 sm:$0xff]  }
 0x371   :  { %v3561_v2 = vpop.eup %3560 }
 0x372   :  { %v1946_v40 = vmul.f32 %v3561_v2, %v3559_v20  ;;  %v6097_v2 = vld [vmem:[#allocation45_spill] sm:$0xff] }
 0x373   :  { %2096 = vmatpush1.bf16.msra.mxu0 %v5313_v30  ;;  %2137 = vmatpush1.bf16.msra.mxu1 %v5319_v23 }
 0x374   :  { %3324 = vst [vmem:[%s5834_s5 + $0x58] sm:$0xff] %v1946_v40  ;;  %v2080_v26 = vpack.c.bf16 %v1946_v40, %v1946_v40  ;;  %2207 = vmatprep.subr.bf16.mxu0 %v4918_v51  ;;  %2248 = vmatprep.subr.bf16.mxu1 %v4924_v52 }
 0x376   :  { %2114 = vmatmul.mubr.bf16.vlgmr.msra.gmra.mxu0 %v2080_v26  ;;  %2155 = vmatmul.mubr.bf16.vlgmr.msra.gmra.mxu1 %v2080_v26 }
 0x377   :  { %2208 = vmatpush1.bf16.msra.mxu0 %v4930_v3  ;;  %2249 = vmatpush1.bf16.msra.mxu1 %v4936_v45 }
 0x378   :  { %2209 = vmatprep.subr.bf16.mxu0 %v4942_v53  ;;  %2250 = vmatprep.subr.bf16.mxu1 %v4948_v54 }
 0x379   :  { %2239 = vmatprep.mubr.bf16.mxu0 %v5961_v7  ;;  %2280 = vmatprep.mubr.bf16.mxu1 %v5961_v7 }
 0x37b   :  { %2210 = vmatpush1.bf16.msra.mxu0 %v4956_v55  ;;  %2251 = vmatpush1.bf16.msra.mxu1 %v4962_v56 }
 0x37c   :  { %2211 = vmatprep.subr.bf16.mxu0 %v4968_v57  ;;  %2252 = vmatprep.subr.bf16.mxu1 %v4974_v58 }
 0x37f   :  { %2212 = vmatpush1.bf16.msra.mxu0 %v4980_v59  ;;  %2253 = vmatpush1.bf16.msra.mxu1 %v4986_v60 }
 0x380   :  { %2213 = vmatprep.subr.bf16.mxu0 %v4992_v61  ;;  %2254 = vmatprep.subr.bf16.mxu1 %v4998_v62 }
 0x383   :  { %2214 = vmatpush1.bf16.msra.mxu0 %v5004_v63  ;;  %2255 = vmatpush1.bf16.msra.mxu1 %v5010_v0 }
 0x384   :  { %2215 = vmatprep.subr.bf16.mxu0 %v5016_v1  ;;  %2256 = vmatprep.subr.bf16.mxu1 %v5022_v4 }
 0x387   :  { %2216 = vmatpush1.bf16.msra.mxu0 %v5028_v5  ;;  %2257 = vmatpush1.bf16.msra.mxu1 %v5034_v35 }
 0x388   :  { %2217 = vmatprep.subr.bf16.mxu0 %v5040_v34  ;;  %2258 = vmatprep.subr.bf16.mxu1 %v5046_v27  ;;  %v6100_v34 = vld [vmem:[#allocation46_spill] sm:$0xff] }
 0x38b   :  { %2218 = vmatpush1.bf16.msra.mxu0 %v5052_v36  ;;  %2259 = vmatpush1.bf16.msra.mxu1 %v5058_v39 }
 0x38c   :  { %2219 = vmatprep.subr.bf16.mxu0 %v5064_v33  ;;  %2260 = vmatprep.subr.bf16.mxu1 %v5070_v38 }
 0x38f   :  { %2220 = vmatpush1.bf16.msra.mxu0 %v5076_v28  ;;  %2261 = vmatpush1.bf16.msra.mxu1 %v5082_v31  ;;  %v6098_v31 = vld [vmem:[#allocation47_spill] sm:$0xff] }
 0x390   :  { %2221 = vmatprep.subr.bf16.mxu0 %v5088_v19  ;;  %2262 = vmatprep.subr.bf16.mxu1 %v5094_v8 }
 0x393   :  { %2222 = vmatpush1.bf16.msra.mxu0 %v5100_v9  ;;  %2263 = vmatpush1.bf16.msra.mxu1 %v5106_v18  ;;  %v6099_v18 = vld [vmem:[#allocation48_spill] sm:$0xff] }
 0x394   :  { %2325 = vmatprep.subr.bf16.mxu0 %v5112_v10  ;;  %2366 = vmatprep.subr.bf16.mxu1 %v5118_v11 }
 0x416   :  { %v1997_v40 = vpop.f32.mrf.mxu0  ;;  %v2038_v26 = vpop.f32.mrf.mxu1 }
 0x417   :  { %v2045_v20 = vadd.f32 %v1997_v40, %v6097_v2  ;;  %v2047_v11 = vadd.f32 %v2038_v26, %v6100_v34 }
 0x418   :  { %v1999_v38 = vpop.f32.mrf.mxu0  ;;  %v2040_v28 = vpop.f32.mrf.mxu1 }
 0x419   :  { %v3325_v33 = vmul.f32 -1.442695, %v2045_v20  ;;  %v2046_v39 = vadd.f32 %v1999_v38, %v6098_v31  ;;  %v2048_v10 = vadd.f32 %v2040_v28, %v6099_v18  ;;  %v6101_v31 = vld [vmem:[#allocation81_spill] sm:$0xff]  ;;  %v6102_v18 = vld [vmem:[#allocation83_spill] sm:$0xff] }
 0x41a   :  { %v2001_v19 = vpop.f32.mrf.mxu0  ;;  %v2042_v36 = vpop.f32.mrf.mxu1 }
 0x41b   :  { %3562 = vpow2.f32 %v3325_v33  ;;  %v3326_v8 = vmul.f32 -1.442695, %v2046_v39  ;;  %v3327_v35 = vmul.f32 -1.442695, %v2048_v10 }
 0x41c   :  { %v2002_v9 = vpop.f32.mrf.mxu0  ;;  %v2043_v27 = vpop.f32.mrf.mxu1 }
 0x41d   :  { %3564 = vpow2.f32 %v3326_v8 }
 0x41e   :  { %3566 = vtanh.f32 %v2047_v11 }
 0x41f   :  { %3568 = vpow2.f32 %v3327_v35 }
 0x428   :  { %v3563_v5 = vpop.eup %3562 }
 0x429   :  { %v2052_v4 = vadd.f32 1.0, %v3563_v5 }
 0x42a   :  { %v3565_v40 = vpop.eup %3564 }
 0x42b   :  { %3570 = vrcp.f32 %v2052_v4  ;;  %v2058_v2 = vadd.f32 1.0, %v3565_v40  ;;  %v3567_v38 = vpop.eup %3566 }
 0x42c   :  { %v3569_v39 = vpop.eup %3568 }
 0x42d   :  { %3572 = vrcp.f32 %v2058_v2  ;;  %v2065_v11 = vadd.f32 1.0, %v3569_v39 }
 0x436   :  { %v2115_v36 = vpop.f32.mrf.mxu0  ;;  %v2156_v33 = vpop.f32.mrf.mxu1 }
 0x437   :  { %v2163_v27 = vadd.f32 %v2115_v36, %v6101_v31  ;;  %v6104_v31 = vld [vmem:[#allocation82_spill] sm:$0xff] }
 0x438   :  { %v3571_v19 = vpop.eup %3570  ;;  %v2117_v8 = vpop.f32.mrf.mxu0 }
 0x439   :  { %v2158_v28 = vpop.f32.mrf.mxu1  ;;  %v2069_v9 = vmul.f32 %v3571_v19, %v3567_v38  ;;  %v3328_v34 = vmul.f32 -1.442695, %v2163_v27  ;;  %v2164_v10 = vadd.f32 %v2117_v8, %v6102_v18  ;;  %v6103_v38 = vld [vmem:[#allocation84_spill] sm:$0xff]  ;;  %v2165_v27 = vadd.f32 %v2156_v33, %v6104_v31  ;;  %v6109_v31 = vld [vmem:[#allocation33_spill] sm:$0xff] }
 0x43a   :  { %v3573_v5 = vpop.eup %3572  ;;  %v2119_v26 = vpop.f32.mrf.mxu0  ;;  %v2166_v36 = vadd.f32 %v2158_v28, %v6103_v38  ;;  %v6107_v38 = vld [vmem:[#allocation31_spill] sm:$0xff] }
 0x43b   :  { %v2160_v35 = vpop.f32.mrf.mxu1  ;;  %v2068_v4 = vmul.f32 %v3573_v5, %v5128_v22  ;;  %3574 = vpow2.f32 %v3328_v34  ;;  %v3329_v20 = vmul.f32 -1.442695, %v2164_v10 }
 0x43c   :  { %v2120_v40 = vpop.f32.mrf.mxu0  ;;  %v3330_v19 = vmul.f32 -1.442695, %v2166_v36  ;;  %v6108_v36 = vld [vmem:[#allocation32_spill] sm:$0xff] }
 0x43d   :  { %v2161_v2 = vpop.f32.mrf.mxu1  ;;  %v5368_v1 = vadd.f32 %v2069_v9, %v2068_v4  ;;  %3576 = vpow2.f32 %v3329_v20 }
 0x43e   :  { %3578 = vrcp.f32 %v2065_v11  ;;  %v6106_v2 = vld [vmem:[#allocation30_spill] sm:$0xff] }
 0x43f   :  { %3580 = vtanh.f32 %v5368_v1 }
 0x440   :  { %3582 = vtanh.f32 %v2165_v27 }
 0x441   :  { %3584 = vpow2.f32 %v3330_v19  ;;  %v6110_v19 = vld [vmem:[#allocation34_spill] sm:$0xff] }
 0x448   :  { %v3575_v39 = vpop.eup %3574 }
 0x449   :  { %v2170_v8 = vadd.f32 1.0, %v3575_v39  ;;  %v6111_v39 = vld [vmem:[#allocation37_spill] sm:$0xff] }
 0x44a   :  { %v3577_v18 = vpop.eup %3576 }
 0x44b   :  { %v3579_v22 = vpop.eup %3578  ;;  %3586 = vrcp.f32 %v2170_v8  ;;  %v2176_v34 = vadd.f32 1.0, %v3577_v18 }
 0x44c   :  { %v3581_v10 = vpop.eup %3580 }
 0x44d   :  { %3588 = vrcp.f32 %v2176_v34  ;;  %v2072_v9 = vmul.f32 %v3581_v10, %v3579_v22  ;;  %v3583_v33 = vpop.eup %3582  ;;  %v6112_v34 = vld [vmem:[#allocation11_spill] sm:$0xff]  ;;  %v6113_v10 = vld [vmem:[#allocation12_spill] sm:$0xff] }
 0x44e   :  { %v3585_v28 = vpop.eup %3584 }
 0x44f   :  { %3331 = vst [vmem:[%s5834_s5 + $0x30] sm:$0xff] %v2072_v9  ;;  %v2206_v5 = vpack.c.bf16 %v2072_v9, %v2072_v9  ;;  %v2183_v4 = vadd.f32 1.0, %v3585_v28  ;;  %v6114_v9 = vld [vmem:[#allocation13_spill] sm:$0xff]  ;;  %v6117_v28 = vld [vmem:[#allocation16_spill] sm:$0xff] }
 0x451   :  { %2240 = vmatmul.mubr.bf16.vlgmr.msra.gmra.mxu0 %v2206_v5  ;;  %2281 = vmatmul.mubr.bf16.vlgmr.msra.gmra.mxu1 %v2206_v5  ;;  %3590 = vrcp.f32 %v2183_v4  ;;  %v6115_v5 = vld [vmem:[#allocation14_spill] sm:$0xff]  ;;  %v6121_v4 = vld [vmem:[#allocation20_spill] sm:$0xff] }
 0x452   :  { %2326 = vmatpush1.bf16.msra.mxu0 %v5139_v49  ;;  %2367 = vmatpush1.bf16.msra.mxu1 %v5145_v25 }
 0x453   :  { %2327 = vmatprep.subr.bf16.mxu0 %v5151_v6  ;;  %2368 = vmatprep.subr.bf16.mxu1 %v5157_v16 }
 0x454   :  { %2357 = vmatprep.mubr.bf16.mxu0 %v5961_v7  ;;  %2398 = vmatprep.mubr.bf16.mxu1 %v5961_v7 }
 0x456   :  { %2328 = vmatpush1.bf16.msra.mxu0 %v5165_v37  ;;  %2369 = vmatpush1.bf16.msra.mxu1 %v5171_v17 }
 0x457   :  { %2329 = vmatprep.subr.bf16.mxu0 %v5177_v24  ;;  %2370 = vmatprep.subr.bf16.mxu1 %v5183_v32 }
 0x458   :  { %v3587_v11 = vpop.eup %3586 }
 0x459   :  { %v2187_v26 = vmul.f32 %v3587_v11, %v3583_v33  ;;  %v6116_v33 = vld [vmem:[#allocation15_spill] sm:$0xff]  ;;  %v6118_v11 = vld [vmem:[#allocation17_spill] sm:$0xff] }
 0x45a   :  { %v3589_v35 = vpop.eup %3588  ;;  %2330 = vmatpush1.bf16.msra.mxu0 %v5189_v41  ;;  %2371 = vmatpush1.bf16.msra.mxu1 %v5195_v42 }
 0x45b   :  { %v2186_v20 = vmul.f32 %v3589_v35, %v5211_v47  ;;  %2331 = vmatprep.subr.bf16.mxu0 %v5202_v43  ;;  %2372 = vmatprep.subr.bf16.mxu1 %v5208_v44  ;;  %v6105_v47 = vld [vmem:[#allocation29_spill] sm:$0xff]  ;;  %v6120_v35 = vld [vmem:[#allocation19_spill] sm:$0xff] }
 0x45d   :  { %v5391_v40 = vadd.f32 %v2187_v26, %v2186_v20  ;;  %v6119_v26 = vld [vmem:[#allocation18_spill] sm:$0xff]  ;;  %v6122_v20 = vld [vmem:[#allocation21_spill] sm:$0xff] }
 0x45e   :  { %2332 = vmatpush1.bf16.msra.mxu0 %v5216_v46  ;;  %2373 = vmatpush1.bf16.msra.mxu1 %v5222_v48  ;;  %v3591_v27 = vpop.eup %3590 }
 0x45f   :  { %2333 = vmatprep.subr.bf16.mxu0 %v5228_v50  ;;  %2374 = vmatprep.subr.bf16.mxu1 %v5234_v14  ;;  %3592 = vtanh.f32 %v5391_v40 }
 0x462   :  { %2334 = vmatpush1.bf16.msra.mxu0 %v5241_v12  ;;  %2375 = vmatpush1.bf16.msra.mxu1 %v5247_v15 }
 0x463   :  { %2335 = vmatprep.subr.bf16.mxu0 %v5253_v13  ;;  %2376 = vmatprep.subr.bf16.mxu1 %v5259_v21 }
 0x466   :  { %2336 = vmatpush1.bf16.msra.mxu0 %v5265_v29  ;;  %2377 = vmatpush1.bf16.msra.mxu1 %v6105_v47 }
 0x467   :  { %2337 = vmatprep.subr.bf16.mxu0 %v6106_v2  ;;  %2378 = vmatprep.subr.bf16.mxu1 %v6107_v38 }
 0x46a   :  { %2338 = vmatpush1.bf16.msra.mxu0 %v6108_v36  ;;  %2379 = vmatpush1.bf16.msra.mxu1 %v6109_v31 }
 0x46b   :  { %2339 = vmatprep.subr.bf16.mxu0 %v6110_v19  ;;  %2380 = vmatprep.subr.bf16.mxu1 %v6111_v39 }
 0x46c   :  { %v3593_v8 = vpop.eup %3592 }
 0x46d   :  { %v2190_v18 = vmul.f32 %v3593_v8, %v3591_v27  ;;  %v6123_v27 = vld [vmem:[#allocation22_spill] sm:$0xff]  ;;  %v6124_v8 = vld [vmem:[#allocation23_spill] sm:$0xff] }
 0x46e   :  { %2340 = vmatpush1.bf16.msra.mxu0 %v5313_v30  ;;  %2381 = vmatpush1.bf16.msra.mxu1 %v5319_v23 }
 0x46f   :  { %3332 = vst [vmem:[%s5834_s5 + $0x48] sm:$0xff] %v2190_v18  ;;  %v2324_v22 = vpack.c.bf16 %v2190_v18, %v2190_v18  ;;  %2449 = vmatprep.subr.bf16.mxu0 %v4918_v51  ;;  %2490 = vmatprep.subr.bf16.mxu1 %v4924_v52  ;;  %v6125_v18 = vld [vmem:[#allocation24_spill] sm:$0xff] }
 0x471   :  { %2358 = vmatmul.mubr.bf16.vlgmr.msra.gmra.mxu0 %v2324_v22  ;;  %2399 = vmatmul.mubr.bf16.vlgmr.msra.gmra.mxu1 %v2324_v22  ;;  %v6126_v22 = vld [vmem:[#allocation25_spill] sm:$0xff] }
 0x472   :  { %2450 = vmatpush1.bf16.msra.mxu0 %v4930_v3  ;;  %2491 = vmatpush1.bf16.msra.mxu1 %v4936_v45 }
 0x473   :  { %2451 = vmatprep.subr.bf16.mxu0 %v4942_v53  ;;  %2492 = vmatprep.subr.bf16.mxu1 %v4948_v54 }
 0x474   :  { %2481 = vmatprep.mubr.bf16.mxu0 %v5961_v7  ;;  %2522 = vmatprep.mubr.bf16.mxu1 %v5961_v7 }
 0x476   :  { %2452 = vmatpush1.bf16.msra.mxu0 %v4956_v55  ;;  %2493 = vmatpush1.bf16.msra.mxu1 %v4962_v56 }
 0x477   :  { %2453 = vmatprep.subr.bf16.mxu0 %v4968_v57  ;;  %2494 = vmatprep.subr.bf16.mxu1 %v4974_v58 }
 0x47a   :  { %2454 = vmatpush1.bf16.msra.mxu0 %v4980_v59  ;;  %2495 = vmatpush1.bf16.msra.mxu1 %v4986_v60 }
 0x47b   :  { %2455 = vmatprep.subr.bf16.mxu0 %v4992_v61  ;;  %2496 = vmatprep.subr.bf16.mxu1 %v4998_v62  ;;  %v6133_v62 = vld [vmem:[#allocation50_spill] sm:$0xff] }
 0x47e   :  { %2456 = vmatpush1.bf16.msra.mxu0 %v5004_v63  ;;  %2497 = vmatpush1.bf16.msra.mxu1 %v5010_v0 }
 0x47f   :  { %2457 = vmatprep.subr.bf16.mxu0 %v6112_v34  ;;  %2498 = vmatprep.subr.bf16.mxu1 %v6113_v10 }
 0x482   :  { %2458 = vmatpush1.bf16.msra.mxu0 %v6114_v9  ;;  %2499 = vmatpush1.bf16.msra.mxu1 %v6115_v5  ;;  %v6130_v5 = vld [vmem:[#allocation49_spill] sm:$0xff] }
 0x483   :  { %2459 = vmatprep.subr.bf16.mxu0 %v6116_v33  ;;  %2500 = vmatprep.subr.bf16.mxu1 %v6117_v28  ;;  %v6127_v33 = vld [vmem:[#allocation26_spill] sm:$0xff]  ;;  %v6128_v28 = vld [vmem:[#allocation27_spill] sm:$0xff] }
 0x486   :  { %2460 = vmatpush1.bf16.msra.mxu0 %v6118_v11  ;;  %2501 = vmatpush1.bf16.msra.mxu1 %v6119_v26  ;;  %v6129_v11 = vld [vmem:[#allocation28_spill] sm:$0xff] }
 0x487   :  { %2461 = vmatprep.subr.bf16.mxu0 %v6120_v35  ;;  %2502 = vmatprep.subr.bf16.mxu1 %v6121_v4 }
 0x48a   :  { %2462 = vmatpush1.bf16.msra.mxu0 %v6122_v20  ;;  %2503 = vmatpush1.bf16.msra.mxu1 %v6123_v27  ;;  %v6131_v27 = vld [vmem:[#allocation51_spill] sm:$0xff] }
 0x48b   :  { %2463 = vmatprep.subr.bf16.mxu0 %v6124_v8  ;;  %2504 = vmatprep.subr.bf16.mxu1 %v6125_v18 }
 0x48e   :  { %2464 = vmatpush1.bf16.msra.mxu0 %v6126_v22  ;;  %2505 = vmatpush1.bf16.msra.mxu1 %v6127_v33  ;;  %v6132_v33 = vld [vmem:[#allocation52_spill] sm:$0xff] }
 0x48f   :  { %2567 = vmatprep.subr.bf16.mxu0 %v6128_v28  ;;  %2608 = vmatprep.subr.bf16.mxu1 %v6129_v11 }
 0x511   :  { %v2241_v26 = vpop.f32.mrf.mxu0  ;;  %v2282_v35 = vpop.f32.mrf.mxu1 }
 0x512   :  { %v2289_v4 = vadd.f32 %v2241_v26, %v6130_v5  ;;  %v2291_v11 = vadd.f32 %v2282_v35, %v6133_v62 }
 0x513   :  { %v2243_v9 = vpop.f32.mrf.mxu0  ;;  %v2284_v20 = vpop.f32.mrf.mxu1 }
 0x514   :  { %v3333_v10 = vmul.f32 -1.442695, %v2289_v4  ;;  %v2290_v34 = vadd.f32 %v2243_v9, %v6131_v27  ;;  %v2292_v28 = vadd.f32 %v2284_v20, %v6132_v33  ;;  %v6134_v4 = vld [vmem:[#allocation77_spill] sm:$0xff] }
 0x515   :  { %v2245_v8 = vpop.f32.mrf.mxu0  ;;  %v2286_v0 = vpop.f32.mrf.mxu1 }
 0x516   :  { %3594 = vpow2.f32 %v3333_v10  ;;  %v3334_v18 = vmul.f32 -1.442695, %v2290_v34  ;;  %v3335_v61 = vmul.f32 -1.442695, %v2292_v28  ;;  %v6135_v28 = vld [vmem:[#allocation79_spill] sm:$0xff] }
 0x517   :  { %v2246_v22 = vpop.f32.mrf.mxu0  ;;  %v2287_v63 = vpop.f32.mrf.mxu1 }
 0x518   :  { %3596 = vpow2.f32 %v3334_v18 }
 0x519   :  { %3598 = vtanh.f32 %v2291_v11 }
 0x51a   :  { %3600 = vpow2.f32 %v3335_v61 }
 0x523   :  { %v3595_v60 = vpop.eup %3594 }
 0x524   :  { %v2296_v59 = vadd.f32 1.0, %v3595_v60 }
 0x525   :  { %v3597_v5 = vpop.eup %3596 }
 0x526   :  { %3602 = vrcp.f32 %v2296_v59  ;;  %v2302_v26 = vadd.f32 1.0, %v3597_v5  ;;  %v3599_v9 = vpop.eup %3598 }
 0x527   :  { %v3601_v34 = vpop.eup %3600 }
 0x528   :  { %3604 = vrcp.f32 %v2302_v26  ;;  %v2309_v11 = vadd.f32 1.0, %v3601_v34 }
 0x531   :  { %v2359_v0 = vpop.f32.mrf.mxu0  ;;  %v2400_v10 = vpop.f32.mrf.mxu1 }
 0x532   :  { %v2407_v63 = vadd.f32 %v2359_v0, %v6134_v4  ;;  %v6137_v4 = vld [vmem:[#allocation78_spill] sm:$0xff] }
 0x533   :  { %v3603_v27 = vpop.eup %3602  ;;  %v2361_v8 = vpop.f32.mrf.mxu0 }
 0x534   :  { %v2402_v33 = vpop.f32.mrf.mxu1  ;;  %v2313_v20 = vmul.f32 %v3603_v27, %v3599_v9  ;;  %v3336_v62 = vmul.f32 -1.442695, %v2407_v63  ;;  %v2408_v35 = vadd.f32 %v2361_v8, %v6135_v28  ;;  %v6136_v9 = vld [vmem:[#allocation80_spill] sm:$0xff]  ;;  %v2409_v63 = vadd.f32 %v2400_v10, %v6137_v4  ;;  %v6144_v4 = vld [vmem:[#allocation10_spill] sm:$0xff] }
 0x535   :  { %v3605_v60 = vpop.eup %3604  ;;  %v2363_v18 = vpop.f32.mrf.mxu0  ;;  %v2410_v0 = vadd.f32 %v2402_v33, %v6136_v9 }
 0x536   :  { %v2404_v61 = vpop.f32.mrf.mxu1  ;;  %v2312_v59 = vmul.f32 %v3605_v60, %v5368_v1  ;;  %3606 = vpow2.f32 %v3336_v62  ;;  %v3337_v22 = vmul.f32 -1.442695, %v2408_v35 }
 0x537   :  { %v2364_v5 = vpop.f32.mrf.mxu0  ;;  %v3338_v27 = vmul.f32 -1.442695, %v2410_v0 }
 0x538   :  { %v2405_v26 = vpop.f32.mrf.mxu1  ;;  %v5458_v58 = vadd.f32 %v2313_v20, %v2312_v59  ;;  %3608 = vpow2.f32 %v3337_v22 }
 0x539   :  { %3610 = vrcp.f32 %v2309_v11 }
 0x53a   :  { %3612 = vtanh.f32 %v5458_v58 }
 0x53b   :  { %3614 = vtanh.f32 %v2409_v63  ;;  %v6145_v63 = vld [vmem:[#allocation11_spill] sm:$0xff] }
 0x53c   :  { %3616 = vpow2.f32 %v3338_v27  ;;  %v6149_v27 = vld [vmem:[#allocation15_spill] sm:$0xff] }
 0x543   :  { %v3607_v34 = vpop.eup %3606 }
 0x544   :  { %v2414_v8 = vadd.f32 1.0, %v3607_v34  ;;  %v6150_v34 = vld [vmem:[#allocation16_spill] sm:$0xff] }
 0x545   :  { %v3609_v28 = vpop.eup %3608 }
 0x546   :  { %v3611_v1 = vpop.eup %3610  ;;  %3618 = vrcp.f32 %v2414_v8  ;;  %v2420_v62 = vadd.f32 1.0, %v3609_v28  ;;  %v6151_v8 = vld [vmem:[#allocation17_spill] sm:$0xff]  ;;  %v6152_v28 = vld [vmem:[#allocation18_spill] sm:$0xff] }
 0x547   :  { %v3613_v35 = vpop.eup %3612 }
 0x548   :  { %3620 = vrcp.f32 %v2420_v62  ;;  %v2316_v20 = vmul.f32 %v3613_v35, %v3611_v1  ;;  %v3615_v10 = vpop.eup %3614  ;;  %v6153_v1 = vld [vmem:[#allocation19_spill] sm:$0xff]  ;;  %v6154_v62 = vld [vmem:[#allocation20_spill] sm:$0xff]  ;;  %v6155_v35 = vld [vmem:[#allocation21_spill] sm:$0xff] }
 0x549   :  { %v3617_v33 = vpop.eup %3616 }
 0x54a   :  { %3339 = vst [vmem:[%s5834_s5 + $0x40] sm:$0xff] %v2316_v20  ;;  %v2448_v60 = vpack.c.bf16 %v2316_v20, %v2316_v20  ;;  %v2427_v59 = vadd.f32 1.0, %v3617_v33  ;;  %v6156_v20 = vld [vmem:[#allocation22_spill] sm:$0xff]  ;;  %v6159_v33 = vld [vmem:[#allocation25_spill] sm:$0xff] }
 0x54c   :  { %2482 = vmatmul.mubr.bf16.vlgmr.msra.gmra.mxu0 %v2448_v60  ;;  %2523 = vmatmul.mubr.bf16.vlgmr.msra.gmra.mxu1 %v2448_v60  ;;  %3622 = vrcp.f32 %v2427_v59  ;;  %v6157_v60 = vld [vmem:[#allocation23_spill] sm:$0xff] }
 0x54d   :  { %2568 = vmatpush1.bf16.msra.mxu0 %v5139_v49  ;;  %2609 = vmatpush1.bf16.msra.mxu1 %v5145_v25 }
 0x54e   :  { %2569 = vmatprep.subr.bf16.mxu0 %v5151_v6  ;;  %2610 = vmatprep.subr.bf16.mxu1 %v5157_v16 }
 0x54f   :  { %2599 = vmatprep.mubr.bf16.mxu0 %v5961_v7  ;;  %2640 = vmatprep.mubr.bf16.mxu1 %v5961_v7 }
 0x551   :  { %2570 = vmatpush1.bf16.msra.mxu0 %v5165_v37  ;;  %2611 = vmatpush1.bf16.msra.mxu1 %v5171_v17 }
 0x552   :  { %2571 = vmatprep.subr.bf16.mxu0 %v5177_v24  ;;  %2612 = vmatprep.subr.bf16.mxu1 %v5183_v32 }
 0x553   :  { %v3619_v11 = vpop.eup %3618 }
 0x554   :  { %v2431_v18 = vmul.f32 %v3619_v11, %v3615_v10  ;;  %v6158_v10 = vld [vmem:[#allocation24_spill] sm:$0xff]  ;;  %v6160_v11 = vld [vmem:[#allocation26_spill] sm:$0xff] }
 0x555   :  { %v3621_v61 = vpop.eup %3620  ;;  %2572 = vmatpush1.bf16.msra.mxu0 %v5189_v41  ;;  %2613 = vmatpush1.bf16.msra.mxu1 %v5195_v42 }
 0x556   :  { %v2430_v22 = vmul.f32 %v3621_v61, %v5391_v40  ;;  %2573 = vmatprep.subr.bf16.mxu0 %v5202_v43  ;;  %2614 = vmatprep.subr.bf16.mxu1 %v5208_v44  ;;  %v6162_v61 = vld [vmem:[#allocation28_spill] sm:$0xff] }
 0x558   :  { %v5481_v5 = vadd.f32 %v2431_v18, %v2430_v22  ;;  %v6161_v18 = vld [vmem:[#allocation27_spill] sm:$0xff] }
 0x559   :  { %2574 = vmatpush1.bf16.msra.mxu0 %v5216_v46  ;;  %2615 = vmatpush1.bf16.msra.mxu1 %v5222_v48  ;;  %v3623_v40 = vpop.eup %3622 }
 0x55a   :  { %2575 = vmatprep.subr.bf16.mxu0 %v5228_v50  ;;  %2616 = vmatprep.subr.bf16.mxu1 %v5234_v14  ;;  %3624 = vtanh.f32 %v5481_v5 }
 0x55d   :  { %2576 = vmatpush1.bf16.msra.mxu0 %v5241_v12  ;;  %2617 = vmatpush1.bf16.msra.mxu1 %v5247_v15 }
 0x55e   :  { %2577 = vmatprep.subr.bf16.mxu0 %v5253_v13  ;;  %2618 = vmatprep.subr.bf16.mxu1 %v5259_v21 }
 0x561   :  { %2578 = vmatpush1.bf16.msra.mxu0 %v5265_v29  ;;  %2619 = vmatpush1.bf16.msra.mxu1 %v6105_v47 }
 0x562   :  { %2579 = vmatprep.subr.bf16.mxu0 %v6106_v2  ;;  %2620 = vmatprep.subr.bf16.mxu1 %v6107_v38 }
 0x565   :  { %2580 = vmatpush1.bf16.msra.mxu0 %v6108_v36  ;;  %2621 = vmatpush1.bf16.msra.mxu1 %v6109_v31 }
 0x566   :  { %2581 = vmatprep.subr.bf16.mxu0 %v6110_v19  ;;  %2622 = vmatprep.subr.bf16.mxu1 %v6111_v39 }
 0x567   :  { %v3625_v26 = vpop.eup %3624 }
 0x568   :  { %v2434_v9 = vmul.f32 %v3625_v26, %v3623_v40  ;;  %v6163_v40 = vld [vmem:[#allocation53_spill] sm:$0xff] }
 0x569   :  { %2582 = vmatpush1.bf16.msra.mxu0 %v5313_v30  ;;  %2623 = vmatpush1.bf16.msra.mxu1 %v5319_v23 }
 0x56a   :  { %3340 = vst [vmem:[%s5834_s5 + $0x38] sm:$0xff] %v2434_v9  ;;  %v2566_v0 = vpack.c.bf16 %v2434_v9, %v2434_v9  ;;  %2691 = vmatprep.subr.bf16.mxu0 %v4918_v51  ;;  %2732 = vmatprep.subr.bf16.mxu1 %v4924_v52  ;;  %v6138_v51 = vld [vmem:[#allocation35_spill] sm:$0xff]  ;;  %v6139_v52 = vld [vmem:[#allocation36_spill] sm:$0xff] }
 0x56c   :  { %2600 = vmatmul.mubr.bf16.vlgmr.msra.gmra.mxu0 %v2566_v0  ;;  %2641 = vmatmul.mubr.bf16.vlgmr.msra.gmra.mxu1 %v2566_v0 }
 0x56d   :  { %2692 = vmatpush1.bf16.msra.mxu0 %v4930_v3  ;;  %2733 = vmatpush1.bf16.msra.mxu1 %v4936_v45  ;;  %v6140_v3 = vld [vmem:[#allocation6_spill] sm:$0xff]  ;;  %v6141_v45 = vld [vmem:[#allocation7_spill] sm:$0xff] }
 0x56e   :  { %2693 = vmatprep.subr.bf16.mxu0 %v4942_v53  ;;  %2734 = vmatprep.subr.bf16.mxu1 %v4948_v54  ;;  %v6142_v53 = vld [vmem:[#allocation8_spill] sm:$0xff]  ;;  %v6143_v54 = vld [vmem:[#allocation9_spill] sm:$0xff] }
 0x56f   :  { %2723 = vmatprep.mubr.bf16.mxu0 %v5961_v7  ;;  %2764 = vmatprep.mubr.bf16.mxu1 %v5961_v7 }
 0x571   :  { %2694 = vmatpush1.bf16.msra.mxu0 %v4956_v55  ;;  %2735 = vmatpush1.bf16.msra.mxu1 %v4962_v56  ;;  %v6146_v55 = vld [vmem:[#allocation12_spill] sm:$0xff]  ;;  %v6147_v56 = vld [vmem:[#allocation13_spill] sm:$0xff] }
 0x572   :  { %2695 = vmatprep.subr.bf16.mxu0 %v4968_v57  ;;  %2736 = vmatprep.subr.bf16.mxu1 %v6138_v51  ;;  %v6148_v57 = vld [vmem:[#allocation14_spill] sm:$0xff] }
 0x575   :  { %2696 = vmatpush1.bf16.msra.mxu0 %v6139_v52  ;;  %2737 = vmatpush1.bf16.msra.mxu1 %v6140_v3  ;;  %v6164_v52 = vld [vmem:[#allocation55_spill] sm:$0xff] }
 0x576   :  { %2697 = vmatprep.subr.bf16.mxu0 %v6141_v45  ;;  %2738 = vmatprep.subr.bf16.mxu1 %v6142_v53 }
 0x579   :  { %2698 = vmatpush1.bf16.msra.mxu0 %v6143_v54  ;;  %2739 = vmatpush1.bf16.msra.mxu1 %v6144_v4 }
 0x57a   :  { %2699 = vmatprep.subr.bf16.mxu0 %v6145_v63  ;;  %2740 = vmatprep.subr.bf16.mxu1 %v6146_v55  ;;  %v6165_v55 = vld [vmem:[#allocation56_spill] sm:$0xff] }
 0x57d   :  { %2700 = vmatpush1.bf16.msra.mxu0 %v6147_v56  ;;  %2741 = vmatpush1.bf16.msra.mxu1 %v6148_v57  ;;  %v6166_v57 = vld [vmem:[#allocation54_spill] sm:$0xff] }
 0x57e   :  { %2701 = vmatprep.subr.bf16.mxu0 %v6149_v27  ;;  %2742 = vmatprep.subr.bf16.mxu1 %v6150_v34 }
 0x581   :  { %2702 = vmatpush1.bf16.msra.mxu0 %v6151_v8  ;;  %2743 = vmatpush1.bf16.msra.mxu1 %v6152_v28 }
 0x582   :  { %2703 = vmatprep.subr.bf16.mxu0 %v6153_v1  ;;  %2744 = vmatprep.subr.bf16.mxu1 %v6154_v62 }
 0x585   :  { %2704 = vmatpush1.bf16.msra.mxu0 %v6155_v35  ;;  %2745 = vmatpush1.bf16.msra.mxu1 %v6156_v20 }
 0x586   :  { %2705 = vmatprep.subr.bf16.mxu0 %v6157_v60  ;;  %2746 = vmatprep.subr.bf16.mxu1 %v6158_v10 }
 0x589   :  { %2706 = vmatpush1.bf16.msra.mxu0 %v6159_v33  ;;  %2747 = vmatpush1.bf16.msra.mxu1 %v6160_v11  ;;  %v6167_v33 = vld [vmem:[#allocation73_spill] sm:$0xff] }
 0x58a   :  { %2809 = vmatprep.subr.bf16.mxu0 %v6161_v18  ;;  %2850 = vmatprep.subr.bf16.mxu1 %v6162_v61 }
 0x60c   :  { %v2483_v59 = vpop.f32.mrf.mxu0  ;;  %v2524_v22 = vpop.f32.mrf.mxu1 }
 0x60d   :  { %v2531_v26 = vadd.f32 %v2483_v59, %v6163_v40  ;;  %v2533_v27 = vadd.f32 %v2524_v22, %v6166_v57  ;;  %v6170_v57 = vld [vmem:[#allocation74_spill] sm:$0xff] }
 0x60e   :  { %v2485_v9 = vpop.f32.mrf.mxu0  ;;  %v2526_v0 = vpop.f32.mrf.mxu1 }
 0x60f   :  { %v3341_v51 = vmul.f32 -1.442695, %v2531_v26  ;;  %v2532_v3 = vadd.f32 %v2485_v9, %v6164_v52  ;;  %v2534_v56 = vadd.f32 %v2526_v0, %v6165_v55  ;;  %v6168_v26 = vld [vmem:[#allocation75_spill] sm:$0xff]  ;;  %v6169_v55 = vld [vmem:[#allocation76_spill] sm:$0xff] }
 0x610   :  { %v2487_v45 = vpop.f32.mrf.mxu0  ;;  %v2528_v53 = vpop.f32.mrf.mxu1 }
 0x611   :  { %3626 = vpow2.f32 %v3341_v51  ;;  %v3342_v54 = vmul.f32 -1.442695, %v2532_v3  ;;  %v3343_v34 = vmul.f32 -1.442695, %v2534_v56 }
 0x612   :  { %v2488_v4 = vpop.f32.mrf.mxu0  ;;  %v2529_v63 = vpop.f32.mrf.mxu1 }
 0x613   :  { %3628 = vpow2.f32 %v3342_v54 }
 0x614   :  { %3630 = vtanh.f32 %v2533_v27 }
 0x615   :  { %3632 = vpow2.f32 %v3343_v34 }
 0x61e   :  { %v3627_v8 = vpop.eup %3626 }
 0x61f   :  { %v2538_v28 = vadd.f32 1.0, %v3627_v8 }
 0x620   :  { %v3629_v1 = vpop.eup %3628 }
 0x621   :  { %3634 = vrcp.f32 %v2538_v28  ;;  %v2544_v62 = vadd.f32 1.0, %v3629_v1  ;;  %v3631_v35 = vpop.eup %3630 }
 0x622   :  { %v3633_v10 = vpop.eup %3632 }
 0x623   :  { %3636 = vrcp.f32 %v2544_v62  ;;  %v2551_v51 = vadd.f32 1.0, %v3633_v10 }
 0x62c   :  { %v2601_v20 = vpop.f32.mrf.mxu0  ;;  %v2642_v60 = vpop.f32.mrf.mxu1 }
 0x62d   :  { %v2649_v11 = vadd.f32 %v2601_v20, %v6167_v33  ;;  %v2651_v27 = vadd.f32 %v2642_v60, %v6170_v57 }
 0x62e   :  { %v3635_v18 = vpop.eup %3634  ;;  %v2603_v61 = vpop.f32.mrf.mxu0 }
 0x62f   :  { %v2644_v59 = vpop.f32.mrf.mxu1  ;;  %v2555_v40 = vmul.f32 %v3635_v18, %v3631_v35  ;;  %v3344_v22 = vmul.f32 -1.442695, %v2649_v11  ;;  %v2650_v9 = vadd.f32 %v2603_v61, %v6168_v26  ;;  %v3808_v18 = vld [vmem:[%s5831_s2 + $0x40] ss:$16 sps:$4 sm:$0xff]   ;;  %v3809_v61 = vld [vmem:[%s5831_s2 + $0x48] ss:$16 sps:$4 sm:$0xff]  }
 0x630   :  { %v3637_v0 = vpop.eup %3636  ;;  %v2605_v52 = vpop.f32.mrf.mxu0  ;;  %v2652_v56 = vadd.f32 %v2644_v59, %v6169_v55  ;;  %v3810_v59 = vld [vmem:[%s5831_s2 + $0x24] ss:$16 sps:$4 sm:$0xff]   ;;  %v3813_v26 = vld [vmem:[%s5831_s2 + $0x28] ss:$16 sps:$4 sm:$0xff]  }
 0x631   :  { %v2646_v3 = vpop.f32.mrf.mxu1  ;;  %v2554_v45 = vmul.f32 %v3637_v0, %v5458_v58  ;;  %3638 = vpow2.f32 %v3344_v22  ;;  %v3345_v53 = vmul.f32 -1.442695, %v2650_v9  ;;  %v3812_v22 = vld [vmem:[%s5831_s2 + $0x20] ss:$16 sps:$4 sm:$0xff]   ;;  %v3814_v9 = vld [vmem:[%s5831_s2 + $0x4] ss:$16 sps:$4 sm:$0xff]  }
 0x632   :  { %v2606_v54 = vpop.f32.mrf.mxu0  ;;  %v3346_v34 = vmul.f32 -1.442695, %v2652_v56  ;;  %v3815_v0 = vld [vmem:[%s5831_s2 + $0xc] ss:$16 sps:$4 sm:$0xff]   ;;  %v3817_v52 = vld [vmem:[%s5831_s2 + $0x8] ss:$16 sps:$4 sm:$0xff]  }
 0x633   :  { %v2647_v4 = vpop.f32.mrf.mxu1  ;;  %v5548_v63 = vadd.f32 %v2555_v40, %v2554_v45  ;;  %3640 = vpow2.f32 %v3345_v53  ;;  %v3811_v40 = vld [vmem:[%s5831_s2 + $0x2c] ss:$16 sps:$4 sm:$0xff]   ;;  %v3818_v3 = vld [vmem:[%s5832_s3 + $0xe4] ss:$16 sps:$4 sm:$0xff]  }
 0x634   :  { %3642 = vrcp.f32 %v2551_v51  ;;  %v3816_v51 = vld [vmem:[%s5831_s2] ss:$16 sps:$4 sm:$0xff]   ;;  %v3819_v45 = vld [vmem:[%s5832_s3 + $0xec] ss:$16 sps:$4 sm:$0xff]  }
 0x635   :  { %3644 = vtanh.f32 %v5548_v63  ;;  %v6171_v4 = vld [vmem:[#allocation57_spill] sm:$0xff] }
 0x636   :  { %3646 = vtanh.f32 %v2651_v27 }
 0x637   :  { %3648 = vpow2.f32 %v3346_v34  ;;  %v6172_v34 = vld [vmem:[#allocation59_spill] sm:$0xff] }
 0x63e   :  { %v3639_v8 = vpop.eup %3638 }
 0x63f   :  { %v2656_v28 = vadd.f32 1.0, %v3639_v8 }
 0x640   :  { %v3641_v1 = vpop.eup %3640 }
 0x641   :  { %v3643_v58 = vpop.eup %3642  ;;  %3650 = vrcp.f32 %v2656_v28  ;;  %v2662_v62 = vadd.f32 1.0, %v3641_v1 }
 0x642   :  { %v3645_v35 = vpop.eup %3644 }
 0x643   :  { %3652 = vrcp.f32 %v2662_v62  ;;  %v2558_v20 = vmul.f32 %v3645_v35, %v3643_v58  ;;  %v3647_v60 = vpop.eup %3646 }
 0x644   :  { %v3649_v33 = vpop.eup %3648 }
 0x645   :  { %3347 = vst [vmem:[%s5834_s5 + $0x50] sm:$0xff] %v2558_v20  ;;  %v2690_v10 = vpack.c.bf16 %v2558_v20, %v2558_v20  ;;  %v6173_v20 = vld [vmem:[#allocation60_spill] sm:$0xff] }
 0x647   :  { %2724 = vmatmul.mubr.bf16.vlgmr.msra.gmra.mxu0 %v2690_v10  ;;  %2765 = vmatmul.mubr.bf16.vlgmr.msra.gmra.mxu1 %v2690_v10 }
 0x648   :  { %2810 = vmatpush1.bf16.msra.mxu0 %v5139_v49  ;;  %2851 = vmatpush1.bf16.msra.mxu1 %v5145_v25 }
 0x649   :  { %2811 = vmatprep.subr.bf16.mxu0 %v5151_v6  ;;  %2852 = vmatprep.subr.bf16.mxu1 %v5157_v16  ;;  %v2669_v6 = vadd.f32 1.0, %v3649_v33 }
 0x64a   :  { %2841 = vmatprep.mubr.bf16.mxu0 %v5961_v7  ;;  %2882 = vmatprep.mubr.bf16.mxu1 %v5961_v7 }
 0x64b   :  { %3654 = vrcp.f32 %v2669_v6 }
 0x64c   :  { %2812 = vmatpush1.bf16.msra.mxu0 %v5165_v37  ;;  %2853 = vmatpush1.bf16.msra.mxu1 %v5171_v17 }
 0x64d   :  { %2813 = vmatprep.subr.bf16.mxu0 %v5177_v24  ;;  %2854 = vmatprep.subr.bf16.mxu1 %v5183_v32 }
 0x64e   :  { %v3651_v49 = vpop.eup %3650 }
 0x64f   :  { %v2673_v25 = vmul.f32 %v3651_v49, %v3647_v60  ;;  %v6174_v60 = vld [vmem:[#allocation58_spill] sm:$0xff] }
 0x650   :  { %v3653_v11 = vpop.eup %3652  ;;  %2814 = vmatpush1.bf16.msra.mxu0 %v5189_v41  ;;  %2855 = vmatpush1.bf16.msra.mxu1 %v5195_v42  ;;  %v3786_v42 = vld [vmem:[%s5831_s2 + $0xe4] ss:$16 sps:$4 sm:$0xff]  }
 0x651   :  { %v2672_v16 = vmul.f32 %v3653_v11, %v5481_v5  ;;  %2815 = vmatprep.subr.bf16.mxu0 %v5202_v43  ;;  %2856 = vmatprep.subr.bf16.mxu1 %v5208_v44  ;;  %v3787_v43 = vld [vmem:[%s5831_s2 + $0xec] ss:$16 sps:$4 sm:$0xff]   ;;  %v3788_v44 = vld [vmem:[%s5831_s2 + $0xe0] ss:$16 sps:$4 sm:$0xff]  }
 0x652   :  { %v3807_v5 = vld [vmem:[%s5831_s2 + $0x4c] ss:$16 sps:$4 sm:$0xff]  }
 0x653   :  { %v5571_v37 = vadd.f32 %v2673_v25, %v2672_v16 }
 0x654   :  { %2816 = vmatpush1.bf16.msra.mxu0 %v5216_v46  ;;  %2857 = vmatpush1.bf16.msra.mxu1 %v5222_v48  ;;  %v3789_v46 = vld [vmem:[%s5831_s2 + $0xe8] ss:$16 sps:$4 sm:$0xff]   ;;  %v3790_v48 = vld [vmem:[%s5831_s2 + $0xc4] ss:$16 sps:$4 sm:$0xff]  }
 0x655   :  { %2817 = vmatprep.subr.bf16.mxu0 %v5228_v50  ;;  %2858 = vmatprep.subr.bf16.mxu1 %v5234_v14  ;;  %3656 = vtanh.f32 %v5571_v37  ;;  %v3791_v50 = vld [vmem:[%s5831_s2 + $0xcc] ss:$16 sps:$4 sm:$0xff]   ;;  %v3792_v14 = vld [vmem:[%s5831_s2 + $0xc0] ss:$16 sps:$4 sm:$0xff]  }
 0x658   :  { %2818 = vmatpush1.bf16.msra.mxu0 %v5241_v12  ;;  %2859 = vmatpush1.bf16.msra.mxu1 %v5247_v15  ;;  %v3655_v17 = vpop.eup %3654  ;;  %v3793_v12 = vld [vmem:[%s5831_s2 + $0xc8] ss:$16 sps:$4 sm:$0xff]   ;;  %v3794_v15 = vld [vmem:[%s5831_s2 + $0xa4] ss:$16 sps:$4 sm:$0xff]  }
 0x659   :  { %2819 = vmatprep.subr.bf16.mxu0 %v5253_v13  ;;  %2860 = vmatprep.subr.bf16.mxu1 %v5259_v21  ;;  %v3795_v13 = vld [vmem:[%s5831_s2 + $0xac] ss:$16 sps:$4 sm:$0xff]   ;;  %v3796_v21 = vld [vmem:[%s5831_s2 + $0xa0] ss:$16 sps:$4 sm:$0xff]  }
 0x65c   :  { %2820 = vmatpush1.bf16.msra.mxu0 %v5265_v29  ;;  %2861 = vmatpush1.bf16.msra.mxu1 %v6105_v47  ;;  %v3797_v29 = vld [vmem:[%s5831_s2 + $0xa8] ss:$16 sps:$4 sm:$0xff]   ;;  %v3800_v47 = vld [vmem:[%s5831_s2 + $0x80] ss:$16 sps:$4 sm:$0xff]  }
 0x65d   :  { %2821 = vmatprep.subr.bf16.mxu0 %v6106_v2  ;;  %2862 = vmatprep.subr.bf16.mxu1 %v6107_v38  ;;  %v3801_v2 = vld [vmem:[%s5831_s2 + $0x88] ss:$16 sps:$4 sm:$0xff]   ;;  %v3802_v38 = vld [vmem:[%s5831_s2 + $0x64] ss:$16 sps:$4 sm:$0xff]  }
 0x660   :  { %2822 = vmatpush1.bf16.msra.mxu0 %v6108_v36  ;;  %2863 = vmatpush1.bf16.msra.mxu1 %v6109_v31  ;;  %v3803_v36 = vld [vmem:[%s5831_s2 + $0x6c] ss:$16 sps:$4 sm:$0xff]   ;;  %v3804_v31 = vld [vmem:[%s5831_s2 + $0x60] ss:$16 sps:$4 sm:$0xff]  }
 0x661   :  { %2823 = vmatprep.subr.bf16.mxu0 %v6110_v19  ;;  %2864 = vmatprep.subr.bf16.mxu1 %v6111_v39  ;;  %v3805_v19 = vld [vmem:[%s5831_s2 + $0x68] ss:$16 sps:$4 sm:$0xff]   ;;  %v3806_v39 = vld [vmem:[%s5831_s2 + $0x44] ss:$16 sps:$4 sm:$0xff]  }
 0x662   :  { %v3657_v24 = vpop.eup %3656 }
 0x663   :  { %v2676_v32 = vmul.f32 %v3657_v24, %v3655_v17 }
 0x664   :  { %2824 = vmatpush1.bf16.msra.mxu0 %v5313_v30  ;;  %2865 = vmatpush1.bf16.msra.mxu1 %v5319_v23  ;;  %v3798_v23 = vld [vmem:[%s5831_s2 + $0x84] ss:$16 sps:$4 sm:$0xff]   ;;  %v3799_v30 = vld [vmem:[%s5831_s2 + $0x8c] ss:$16 sps:$4 sm:$0xff]  }
 0x665   :  { %3348 = vst [vmem:[%s5834_s5 + $0x28] sm:$0xff] %v2676_v32  ;;  %v2808_v41 = vpack.c.bf16 %v2676_v32, %v2676_v32  ;;  %2933 = vmatprep.subr.bf16.mxu0 %v3786_v42  ;;  %2974 = vmatprep.subr.bf16.mxu1 %v3787_v43  ;;  %v6175_v42 = vld [vmem:[#allocation69_spill] sm:$0xff] }
 0x667   :  { %2842 = vmatmul.mubr.bf16.vlgmr.msra.gmra.mxu0 %v2808_v41  ;;  %2883 = vmatmul.mubr.bf16.vlgmr.msra.gmra.mxu1 %v2808_v41 }
 0x668   :  { %2934 = vmatpush1.bf16.msra.mxu0 %v3788_v44  ;;  %2975 = vmatpush1.bf16.msra.mxu1 %v3789_v46 }
 0x669   :  { %2935 = vmatprep.subr.bf16.mxu0 %v3790_v48  ;;  %2976 = vmatprep.subr.bf16.mxu1 %v3791_v50 }
 0x66a   :  { %2965 = vmatprep.mubr.bf16.mxu0 %v5961_v7  ;;  %3006 = vmatprep.mubr.bf16.mxu1 %v5961_v7 }
 0x66c   :  { %2936 = vmatpush1.bf16.msra.mxu0 %v3792_v14  ;;  %2977 = vmatpush1.bf16.msra.mxu1 %v3793_v12  ;;  %v6176_v12 = vld [vmem:[#allocation71_spill] sm:$0xff] }
 0x66d   :  { %2937 = vmatprep.subr.bf16.mxu0 %v3794_v15  ;;  %2978 = vmatprep.subr.bf16.mxu1 %v3795_v13 }
 0x670   :  { %2938 = vmatpush1.bf16.msra.mxu0 %v3796_v21  ;;  %2979 = vmatpush1.bf16.msra.mxu1 %v3797_v29 }
 0x671   :  { %2939 = vmatprep.subr.bf16.mxu0 %v3798_v23  ;;  %2980 = vmatprep.subr.bf16.mxu1 %v3799_v30 }
 0x674   :  { %2940 = vmatpush1.bf16.msra.mxu0 %v3800_v47  ;;  %2981 = vmatpush1.bf16.msra.mxu1 %v3801_v2 }
 0x675   :  { %2941 = vmatprep.subr.bf16.mxu0 %v3802_v38  ;;  %2982 = vmatprep.subr.bf16.mxu1 %v3803_v36 }
 0x678   :  { %2942 = vmatpush1.bf16.msra.mxu0 %v3804_v31  ;;  %2983 = vmatpush1.bf16.msra.mxu1 %v3805_v19  ;;  %v6177_v31 = vld [vmem:[#allocation72_spill] sm:$0xff] }
 0x679   :  { %2943 = vmatprep.subr.bf16.mxu0 %v3806_v39  ;;  %2984 = vmatprep.subr.bf16.mxu1 %v3807_v5  ;;  %v6178_v39 = vld [vmem:[#allocation70_spill] sm:$0xff] }
 0x67c   :  { %2944 = vmatpush1.bf16.msra.mxu0 %v3808_v18  ;;  %2985 = vmatpush1.bf16.msra.mxu1 %v3809_v61 }
 0x67d   :  { %2945 = vmatprep.subr.bf16.mxu0 %v3810_v59  ;;  %2986 = vmatprep.subr.bf16.mxu1 %v3811_v40 }
 0x680   :  { %2946 = vmatpush1.bf16.msra.mxu0 %v3812_v22  ;;  %2987 = vmatpush1.bf16.msra.mxu1 %v3813_v26 }
 0x681   :  { %2947 = vmatprep.subr.bf16.mxu0 %v3814_v9  ;;  %2988 = vmatprep.subr.bf16.mxu1 %v3815_v0 }
 0x684   :  { %2948 = vmatpush1.bf16.msra.mxu0 %v3816_v51  ;;  %2989 = vmatpush1.bf16.msra.mxu1 %v3817_v52  ;;  %v3820_v51 = vld [vmem:[%s5832_s3 + $0xe0] ss:$16 sps:$4 sm:$0xff]   ;;  %v3821_v52 = vld [vmem:[%s5832_s3 + $0xe8] ss:$16 sps:$4 sm:$0xff]  }
 0x685   :  { %3050 = vmatprep.subr.bf16.mxu0 %v3818_v3  ;;  %3091 = vmatprep.subr.bf16.mxu1 %v3819_v45  ;;  %v3822_v3 = vld [vmem:[%s5832_s3 + $0xc4] ss:$16 sps:$4 sm:$0xff]   ;;  %v3823_v45 = vld [vmem:[%s5832_s3 + $0xcc] ss:$16 sps:$4 sm:$0xff]  }
 0x707   :  { %v2725_v53 = vpop.f32.mrf.mxu0  ;;  %v2766_v54 = vpop.f32.mrf.mxu1 }
 0x708   :  { %v2773_v55 = vadd.f32 %v2725_v53, %v6171_v4  ;;  %v2775_v33 = vadd.f32 %v2766_v54, %v6174_v60  ;;  %v3824_v54 = vld [vmem:[%s5832_s3 + $0xc0] ss:$16 sps:$4 sm:$0xff]   ;;  %v3825_v4 = vld [vmem:[%s5832_s3 + $0xc8] ss:$16 sps:$4 sm:$0xff]   ;;  %v3834_v60 = vld [vmem:[%s5832_s3 + $0x64] ss:$16 sps:$4 sm:$0xff]  }
 0x709   :  { %v2727_v56 = vpop.f32.mrf.mxu0  ;;  %v2768_v57 = vpop.f32.mrf.mxu1 }
 0x70a   :  { %v3349_v27 = vmul.f32 -1.442695, %v2773_v55  ;;  %v2774_v8 = vadd.f32 %v2727_v56, %v6172_v34  ;;  %v2776_v10 = vadd.f32 %v2768_v57, %v6173_v20  ;;  %v3826_v56 = vld [vmem:[%s5832_s3 + $0xa4] ss:$16 sps:$4 sm:$0xff]  }
 0x70b   :  { %v2729_v28 = vpop.f32.mrf.mxu0  ;;  %v2770_v1 = vpop.f32.mrf.mxu1 }
 0x70c   :  { %3658 = vpow2.f32 %v3349_v27  ;;  %v3350_v58 = vmul.f32 -1.442695, %v2774_v8  ;;  %v3351_v49 = vmul.f32 -1.442695, %v2776_v10  ;;  %v3828_v28 = vld [vmem:[%s5832_s3 + $0xa0] ss:$16 sps:$4 sm:$0xff]  }
 0x70d   :  { %v2730_v62 = vpop.f32.mrf.mxu0  ;;  %v2771_v35 = vpop.f32.mrf.mxu1  ;;  %v3829_v1 = vld [vmem:[%s5832_s3 + $0xa8] ss:$16 sps:$4 sm:$0xff]   ;;  %v3832_v10 = vld [vmem:[%s5832_s3 + $0x80] ss:$16 sps:$4 sm:$0xff]  }
 0x70e   :  { %3660 = vpow2.f32 %v3350_v58  ;;  %v3830_v62 = vld [vmem:[%s5832_s3 + $0x84] ss:$16 sps:$4 sm:$0xff]   ;;  %v3831_v35 = vld [vmem:[%s5832_s3 + $0x8c] ss:$16 sps:$4 sm:$0xff]  }
 0x70f   :  { %3662 = vtanh.f32 %v2775_v33  ;;  %v3835_v33 = vld [vmem:[%s5832_s3 + $0x6c] ss:$16 sps:$4 sm:$0xff]  }
 0x710   :  { %3664 = vpow2.f32 %v3351_v49  ;;  %v3836_v49 = vld [vmem:[%s5832_s3 + $0x60] ss:$16 sps:$4 sm:$0xff]  }
 0x719   :  { %v3659_v25 = vpop.eup %3658 }
 0x71a   :  { %v2780_v11 = vadd.f32 1.0, %v3659_v25  ;;  %v3837_v25 = vld [vmem:[%s5832_s3 + $0x68] ss:$16 sps:$4 sm:$0xff]  }
 0x71b   :  { %v3661_v6 = vpop.eup %3660 }
 0x71c   :  { %3666 = vrcp.f32 %v2780_v11  ;;  %v2786_v16 = vadd.f32 1.0, %v3661_v6  ;;  %v3663_v17 = vpop.eup %3662  ;;  %v3838_v11 = vld [vmem:[%s5832_s3 + $0x44] ss:$16 sps:$4 sm:$0xff]   ;;  %v3839_v6 = vld [vmem:[%s5832_s3 + $0x4c] ss:$16 sps:$4 sm:$0xff]  }
 0x71d   :  { %v3665_v41 = vpop.eup %3664 }
 0x71e   :  { %3668 = vrcp.f32 %v2786_v16  ;;  %v2793_v21 = vadd.f32 1.0, %v3665_v41  ;;  %v3840_v16 = vld [vmem:[%s5832_s3 + $0x40] ss:$16 sps:$4 sm:$0xff]  }
 0x71f   :  { %v3844_v41 = vld [vmem:[%s5832_s3 + $0x20] ss:$16 sps:$4 sm:$0xff]  }
 0x727   :  { %v2843_v24 = vpop.f32.mrf.mxu0  ;;  %v2884_v32 = vpop.f32.mrf.mxu1 }
 0x728   :  { %v2891_v43 = vadd.f32 %v2843_v24, %v6175_v42  ;;  %v2893_v5 = vadd.f32 %v2884_v32, %v6178_v39  ;;  %v3842_v24 = vld [vmem:[%s5832_s3 + $0x24] ss:$16 sps:$4 sm:$0xff]   ;;  %v3843_v32 = vld [vmem:[%s5832_s3 + $0x2c] ss:$16 sps:$4 sm:$0xff]   ;;  %v3845_v42 = vld [vmem:[%s5832_s3 + $0x28] ss:$16 sps:$4 sm:$0xff]  }
 0x729   :  { %v3667_v44 = vpop.eup %3666  ;;  %v2845_v46 = vpop.f32.mrf.mxu0 }
 0x72a   :  { %v2886_v48 = vpop.f32.mrf.mxu1  ;;  %v2797_v50 = vmul.f32 %v3667_v44, %v3663_v17  ;;  %v3352_v14 = vmul.f32 -1.442695, %v2891_v43  ;;  %v2892_v15 = vadd.f32 %v2845_v46, %v6176_v12  ;;  %v3841_v17 = vld [vmem:[%s5832_s3 + $0x48] ss:$16 sps:$4 sm:$0xff]   ;;  %v3846_v44 = vld [vmem:[%s5832_s3 + $0x4] ss:$16 sps:$4 sm:$0xff]  }
 0x72b   :  { %v3669_v13 = vpop.eup %3668  ;;  %v2847_v29 = vpop.f32.mrf.mxu0  ;;  %v2894_v19 = vadd.f32 %v2886_v48, %v6177_v31  ;;  %v3847_v46 = vld [vmem:[%s5832_s3 + $0xc] ss:$16 sps:$4 sm:$0xff]   ;;  %v3849_v12 = vld [vmem:[%s5832_s3 + $0x8] ss:$16 sps:$4 sm:$0xff]  }
 0x72c   :  { %v2888_v23 = vpop.f32.mrf.mxu1  ;;  %v2796_v30 = vmul.f32 %v3669_v13, %v5548_v63  ;;  %3670 = vpow2.f32 %v3352_v14  ;;  %v3353_v47 = vmul.f32 -1.442695, %v2892_v15  ;;  %v3848_v14 = vld [vmem:[%s5832_s3] ss:$16 sps:$4 sm:$0xff]   ;;  %v6179_v29 = vld [vmem:[#allocation61_spill] sm:$0xff] }
 0x72d   :  { %v2848_v2 = vpop.f32.mrf.mxu0  ;;  %v3354_v18 = vmul.f32 -1.442695, %v2894_v19 }
 0x72e   :  { %v2889_v38 = vpop.f32.mrf.mxu1  ;;  %v5706_v36 = vadd.f32 %v2797_v50, %v2796_v30  ;;  %3672 = vpow2.f32 %v3353_v47 }
 0x72f   :  { %3674 = vrcp.f32 %v2793_v21  ;;  %v6180_v38 = vld [vmem:[#allocation63_spill] sm:$0xff] }
 0x730   :  { %3676 = vtanh.f32 %v5706_v36 }
 0x731   :  { %3678 = vtanh.f32 %v2893_v5 }
 0x732   :  { %3680 = vpow2.f32 %v3354_v18 }
 0x739   :  { %v3671_v61 = vpop.eup %3670 }
 0x73a   :  { %v2898_v59 = vadd.f32 1.0, %v3671_v61 }
 0x73b   :  { %v3673_v40 = vpop.eup %3672 }
 0x73c   :  { %v3675_v63 = vpop.eup %3674  ;;  %3682 = vrcp.f32 %v2898_v59  ;;  %v2904_v22 = vadd.f32 1.0, %v3673_v40  ;;  %v6181_v59 = vld [vmem:[#allocation64_spill] sm:$0xff] }
 0x73d   :  { %v3677_v26 = vpop.eup %3676 }
 0x73e   :  { %3684 = vrcp.f32 %v2904_v22  ;;  %v2800_v9 = vmul.f32 %v3677_v26, %v3675_v63  ;;  %v3679_v53 = vpop.eup %3678  ;;  %v6182_v63 = vld [vmem:[#allocation62_spill] sm:$0xff] }
 0x73f   :  { %v3681_v55 = vpop.eup %3680 }
 0x740   :  { %3355 = vst [vmem:[%s5834_s5 + $0x60] sm:$0xff] %v2800_v9  ;;  %v2932_v0 = vpack.c.bf16 %v2800_v9, %v2800_v9  ;;  %v2911_v8 = vadd.f32 1.0, %v3681_v55 }
 0x742   :  { %2966 = vmatmul.mubr.bf16.vlgmr.msra.gmra.mxu0 %v2932_v0  ;;  %3007 = vmatmul.mubr.bf16.vlgmr.msra.gmra.mxu1 %v2932_v0  ;;  %3686 = vrcp.f32 %v2911_v8  ;;  %v6184_v8 = vld [vmem:[#allocation67_spill] sm:$0xff] }
 0x743   :  { %3051 = vmatpush1.bf16.msra.mxu0 %v3820_v51  ;;  %3092 = vmatpush1.bf16.msra.mxu1 %v3821_v52 }
 0x744   :  { %3052 = vmatprep.subr.bf16.mxu0 %v3822_v3  ;;  %3093 = vmatprep.subr.bf16.mxu1 %v3823_v45 }
 0x745   :  { %3082 = vmatprep.mubr.bf16.mxu0 %v5961_v7  ;;  %3123 = vmatprep.mubr.bf16.mxu1 %v5961_v7  ;;  %v3827_v7 = vld [vmem:[%s5832_s3 + $0xac] ss:$16 sps:$4 sm:$0xff]  }
 0x747   :  { %3053 = vmatpush1.bf16.msra.mxu0 %v3824_v54  ;;  %3094 = vmatpush1.bf16.msra.mxu1 %v3825_v4  ;;  %v6183_v4 = vld [vmem:[#allocation65_spill] sm:$0xff] }
 0x748   :  { %3054 = vmatprep.subr.bf16.mxu0 %v3826_v56  ;;  %3095 = vmatprep.subr.bf16.mxu1 %v3827_v7 }
 0x749   :  { %v3683_v57 = vpop.eup %3682 }
 0x74a   :  { %v2915_v27 = vmul.f32 %v3683_v57, %v3679_v53 }
 0x74b   :  { %v3685_v34 = vpop.eup %3684  ;;  %3055 = vmatpush1.bf16.msra.mxu0 %v3828_v28  ;;  %3096 = vmatpush1.bf16.msra.mxu1 %v3829_v1 }
 0x74c   :  { %v2914_v58 = vmul.f32 %v3685_v34, %v5571_v37  ;;  %3056 = vmatprep.subr.bf16.mxu0 %v3830_v62  ;;  %3097 = vmatprep.subr.bf16.mxu1 %v3831_v35  ;;  %v3833_v37 = vld [vmem:[%s5832_s3 + $0x88] ss:$16 sps:$4 sm:$0xff]  }
 0x74e   :  { %v5753_v20 = vadd.f32 %v2915_v27, %v2914_v58 }
 0x74f   :  { %3057 = vmatpush1.bf16.msra.mxu0 %v3832_v10  ;;  %3098 = vmatpush1.bf16.msra.mxu1 %v3833_v37  ;;  %v3687_v43 = vpop.eup %3686 }
 0x750   :  { %3058 = vmatprep.subr.bf16.mxu0 %v3834_v60  ;;  %3099 = vmatprep.subr.bf16.mxu1 %v3835_v33  ;;  %3688 = vtanh.f32 %v5753_v20 }
 0x753   :  { %3059 = vmatpush1.bf16.msra.mxu0 %v3836_v49  ;;  %3100 = vmatpush1.bf16.msra.mxu1 %v3837_v25  ;;  %v6185_v25 = vld [vmem:[#allocation68_spill] sm:$0xff] }
 0x754   :  { %3060 = vmatprep.subr.bf16.mxu0 %v3838_v11  ;;  %3101 = vmatprep.subr.bf16.mxu1 %v3839_v6  ;;  %v6186_v6 = vld [vmem:[#allocation66_spill] sm:$0xff] }
 0x757   :  { %3061 = vmatpush1.bf16.msra.mxu0 %v3840_v16  ;;  %3102 = vmatpush1.bf16.msra.mxu1 %v3841_v17 }
 0x758   :  { %3062 = vmatprep.subr.bf16.mxu0 %v3842_v24  ;;  %3103 = vmatprep.subr.bf16.mxu1 %v3843_v32 }
 0x75b   :  { %3063 = vmatpush1.bf16.msra.mxu0 %v3844_v41  ;;  %3104 = vmatpush1.bf16.msra.mxu1 %v3845_v42 }
 0x75c   :  { %3064 = vmatprep.subr.bf16.mxu0 %v3846_v44  ;;  %3105 = vmatprep.subr.bf16.mxu1 %v3847_v46 }
 0x75d   :  { %v3689_v48 = vpop.eup %3688 }
 0x75e   :  { %v2918_v50 = vmul.f32 %v3689_v48, %v3687_v43 }
 0x75f   :  { %3065 = vmatpush1.bf16.msra.mxu0 %v3848_v14  ;;  %3106 = vmatpush1.bf16.msra.mxu1 %v3849_v12 }
 0x760   :  { %3356 = vst [vmem:[%s5834_s5 + $0x18] sm:$0xff] %v2918_v50  ;;  %v3049_v15 = vpack.c.bf16 %v2918_v50, %v2918_v50 }
 0x762   :  { %3083 = vmatmul.mubr.bf16.vlgmr.msra.gmra.mxu0 %v3049_v15  ;;  %3124 = vmatmul.mubr.bf16.vlgmr.msra.gmra.mxu1 %v3049_v15 }
 0x802   :  { %v2967_v13 = vpop.f32.mrf.mxu0  ;;  %v3008_v21 = vpop.f32.mrf.mxu1 }
 0x803   :  { %v3015_v23 = vadd.f32 %v2967_v13, %v6179_v29  ;;  %v3017_v22 = vadd.f32 %v3008_v21, %v6182_v63 }
 0x804   :  { %v2969_v30 = vpop.f32.mrf.mxu0  ;;  %v3010_v47 = vpop.f32.mrf.mxu1 }
 0x805   :  { %v3357_v2 = vmul.f32 -1.442695, %v3015_v23  ;;  %v3016_v31 = vadd.f32 %v2969_v30, %v6180_v38  ;;  %v3018_v40 = vadd.f32 %v3010_v47, %v6181_v59 }
 0x806   :  { %v2971_v19 = vpop.f32.mrf.mxu0  ;;  %v3012_v39 = vpop.f32.mrf.mxu1 }
 0x807   :  { %3690 = vpow2.f32 %v3357_v2  ;;  %v3358_v5 = vmul.f32 -1.442695, %v3016_v31  ;;  %v3359_v26 = vmul.f32 -1.442695, %v3018_v40 }
 0x808   :  { %v2972_v18 = vpop.f32.mrf.mxu0  ;;  %v3013_v61 = vpop.f32.mrf.mxu1 }
 0x809   :  { %3692 = vpow2.f32 %v3358_v5 }
 0x80a   :  { %3694 = vtanh.f32 %v3017_v22 }
 0x80b   :  { %3696 = vpow2.f32 %v3359_v26 }
 0x814   :  { %v3691_v9 = vpop.eup %3690 }
 0x815   :  { %v3022_v0 = vadd.f32 1.0, %v3691_v9 }
 0x816   :  { %v3693_v51 = vpop.eup %3692 }
 0x817   :  { %3698 = vrcp.f32 %v3022_v0  ;;  %v3028_v52 = vadd.f32 1.0, %v3693_v51  ;;  %v3695_v3 = vpop.eup %3694 }
 0x818   :  { %v3697_v54 = vpop.eup %3696 }
 0x819   :  { %3700 = vrcp.f32 %v3028_v52  ;;  %v3035_v58 = vadd.f32 1.0, %v3697_v54 }
 0x822   :  { %v3084_v45 = vpop.f32.mrf.mxu0  ;;  %v3125_v53 = vpop.f32.mrf.mxu1 }
 0x823   :  { %v3132_v55 = vadd.f32 %v3084_v45, %v6183_v4  ;;  %v3134_v16 = vadd.f32 %v3125_v53, %v6186_v6 }
 0x824   :  { %v3699_v56 = vpop.eup %3698  ;;  %v3086_v7 = vpop.f32.mrf.mxu0 }
 0x825   :  { %v3127_v57 = vpop.f32.mrf.mxu1  ;;  %v3039_v27 = vmul.f32 %v3699_v56, %v3695_v3  ;;  %v3360_v34 = vmul.f32 -1.442695, %v3132_v55  ;;  %v3133_v28 = vadd.f32 %v3086_v7, %v6184_v8 }
 0x826   :  { %v3701_v1 = vpop.eup %3700  ;;  %v3088_v62 = vpop.f32.mrf.mxu0  ;;  %v3135_v11 = vadd.f32 %v3127_v57, %v6185_v25 }
 0x827   :  { %v3129_v35 = vpop.f32.mrf.mxu1  ;;  %v3038_v10 = vmul.f32 %v3701_v1, %v5706_v36  ;;  %3702 = vpow2.f32 %v3360_v34  ;;  %v3361_v37 = vmul.f32 -1.442695, %v3133_v28 }
 0x828   :  { %v3089_v60 = vpop.f32.mrf.mxu0  ;;  %v3362_v17 = vmul.f32 -1.442695, %v3135_v11 }
 0x829   :  { %v3130_v33 = vpop.f32.mrf.mxu1  ;;  %v3040_v49 = vadd.f32 %v3039_v27, %v3038_v10  ;;  %3704 = vpow2.f32 %v3361_v37 }
 0x82a   :  { %3706 = vrcp.f32 %v3035_v58 }
 0x82b   :  { %3708 = vtanh.f32 %v3040_v49 }
 0x82c   :  { %3710 = vtanh.f32 %v3134_v16 }
 0x82d   :  { %3712 = vpow2.f32 %v3362_v17 }
 0x834   :  { %v3703_v24 = vpop.eup %3702 }
 0x835   :  { %v3139_v32 = vadd.f32 1.0, %v3703_v24 }
 0x836   :  { %v3705_v41 = vpop.eup %3704 }
 0x837   :  { %v3707_v42 = vpop.eup %3706  ;;  %3714 = vrcp.f32 %v3139_v32  ;;  %v3145_v36 = vadd.f32 1.0, %v3705_v41 }
 0x838   :  { %v3709_v43 = vpop.eup %3708 }
 0x839   :  { %v3042_v44 = vmul.f32 %v3709_v43, %v3707_v42  ;;  %3716 = vrcp.f32 %v3145_v36  ;;  %v3711_v46 = vpop.eup %3710 }
 0x83a   :  { %v3713_v48 = vpop.eup %3712 }
 0x83b   :  { %3363 = vst [vmem:[%s5834_s5 + $0x70] sm:$0xff] %v3042_v44  ;;  %v3152_v15 = vadd.f32 1.0, %v3713_v48 }
 0x83d   :  { %3718 = vrcp.f32 %v3152_v15 }
 0x844   :  { %v3715_v50 = vpop.eup %3714 }
 0x845   :  { %v3156_v14 = vmul.f32 %v3715_v50, %v3711_v46 }
 0x846   :  { %v3717_v12 = vpop.eup %3716 }
 0x847   :  { %v3155_v13 = vmul.f32 %v3717_v12, %v5753_v20 }
 0x849   :  { %v3157_v21 = vadd.f32 %v3156_v14, %v3155_v13 }
 0x84a   :  { %v3719_v29 = vpop.eup %3718 }
 0x84b   :  { %3720 = vtanh.f32 %v3157_v21 }
 0x858   :  { %v3721_v23 = vpop.eup %3720 }
 0x859   :  { %v3159_v30 = vmul.f32 %v3721_v23, %v3719_v29 }
 0x85b   :  { %3165 = vst [vmem:[%s5834_s5 + $0x8] sm:$0xff] %v3159_v30 }

// kernel: phobert_lstm_forward.4
= control target key start
LH: loop header
LB: loop body
LE: loop exit
PB: predicated region body
PF: predicated region fallthrough
CT: control target
= control target key end

     0   :  { %s6517_s1 = inlined_call_operand.vmem [shape: bf16[256,1024], index: 1, kind: input, shape index: {}]   ;;  %s6518_s0 = inlined_call_operand.vmem [shape: bf16[8,8,256], index: 0, kind: input, shape index: {}]   ;;  %s6519_s2 = inlined_call_operand.vmem [shape: bf16[128,512], index: 2, kind: input, shape index: {}]   ;;  %s6520_s3 = inlined_call_operand.vmem [shape: bf16[128,512], index: 3, kind: input, shape index: {}]   ;;  %s6521_s4 = inlined_call_operand.vmem [shape: f32[1,1024], index: 4, kind: input, shape index: {}]   ;;  %s6522_s5 = inlined_call_operand.vmem [shape: f32[8,8,256], index: 5, kind: output, shape index: {}]  }
   0x1   :  { %v85_v0 = vld [vmem:[%s6517_s1 + $0x1c0] sm:$0xff]  ;;  %v86_v2 = vld [vmem:[%s6517_s1 + $0x1c8] sm:$0xff] }
   0x2   :  { %v89_v1 = vld [vmem:[%s6517_s1 + $0x1e0] sm:$0xff]  ;;  %v90_v4 = vld [vmem:[%s6517_s1 + $0x1e8] sm:$0xff] }
   0x3   :  { %v3635_v3 = vcombine.high %v85_v0, %v89_v1  ;;  %v3634_v5 = vcombine.low %v85_v0, %v89_v1  ;;  %v77_v6 = vld [vmem:[%s6517_s1 + $0x180] sm:$0xff]  ;;  %v3637_v8 = vcombine.high %v86_v2, %v90_v4  ;;  %v3636_v9 = vcombine.low %v86_v2, %v90_v4  ;;  %v78_v11 = vld [vmem:[%s6517_s1 + $0x188] sm:$0xff] }
   0x4   :  { %v81_v7 = vld [vmem:[%s6517_s1 + $0x1a0] sm:$0xff]  ;;  %v82_v12 = vld [vmem:[%s6517_s1 + $0x1a8] sm:$0xff] }
   0x5   :  { %v3627_v10 = vcombine.high %v77_v6, %v81_v7  ;;  %v69_v13 = vld [vmem:[%s6517_s1 + $0x140] sm:$0xff]  ;;  %879 = vmatprep.subr.bf16.mxu0 %v3635_v3  ;;  %v3629_v14 = vcombine.high %v78_v11, %v82_v12  ;;  %v70_v16 = vld [vmem:[%s6517_s1 + $0x148] sm:$0xff]  ;;  %952 = vmatprep.subr.bf16.mxu1 %v3637_v8  ;;  %v3626_v18 = vcombine.low %v77_v6, %v81_v7 }
   0x6   :  { %v73_v15 = vld [vmem:[%s6517_s1 + $0x160] sm:$0xff]  ;;  %v74_v17 = vld [vmem:[%s6517_s1 + $0x168] sm:$0xff]  ;;  %880 = vmatpush1.bf16.msra.mxu0 %v3634_v5  ;;  %953 = vmatpush1.bf16.msra.mxu1 %v3636_v9  ;;  %v3628_v19 = vcombine.low %v78_v11, %v82_v12 }
   0x7   :  { %881 = vmatprep.subr.bf16.mxu0 %v3627_v10  ;;  %v3619_v20 = vcombine.high %v69_v13, %v73_v15  ;;  %954 = vmatprep.subr.bf16.mxu1 %v3629_v14  ;;  %v3621_v21 = vcombine.high %v70_v16, %v74_v17  ;;  %v61_v22 = vld [vmem:[%s6517_s1 + $0x100] sm:$0xff]  ;;  %v62_v24 = vld [vmem:[%s6517_s1 + $0x108] sm:$0xff]  ;;  %v3618_v26 = vcombine.low %v69_v13, %v73_v15 }
   0x8   :  { %v65_v23 = vld [vmem:[%s6517_s1 + $0x120] sm:$0xff]  ;;  %v66_v25 = vld [vmem:[%s6517_s1 + $0x128] sm:$0xff]  ;;  %v3620_v27 = vcombine.low %v70_v16, %v74_v17 }
   0x9   :  { %v3611_v28 = vcombine.high %v61_v22, %v65_v23  ;;  %v3613_v29 = vcombine.high %v62_v24, %v66_v25  ;;  %v53_v30 = vld [vmem:[%s6517_s1 + $0xc0] sm:$0xff]  ;;  %v54_v32 = vld [vmem:[%s6517_s1 + $0xc8] sm:$0xff]  ;;  %v3610_v34 = vcombine.low %v61_v22, %v65_v23  ;;  %v3612_v35 = vcombine.low %v62_v24, %v66_v25 }
   0xa   :  { %882 = vmatpush1.bf16.msra.mxu0 %v3626_v18  ;;  %955 = vmatpush1.bf16.msra.mxu1 %v3628_v19  ;;  %v57_v31 = vld [vmem:[%s6517_s1 + $0xe0] sm:$0xff]  ;;  %v58_v33 = vld [vmem:[%s6517_s1 + $0xe8] sm:$0xff] }
   0xb   :  { %883 = vmatprep.subr.bf16.mxu0 %v3619_v20  ;;  %956 = vmatprep.subr.bf16.mxu1 %v3621_v21  ;;  %v3603_v36 = vcombine.high %v53_v30, %v57_v31  ;;  %v3605_v37 = vcombine.high %v54_v32, %v58_v33  ;;  %v45_v38 = vld [vmem:[%s6517_s1 + $0x80] sm:$0xff]  ;;  %v46_v40 = vld [vmem:[%s6517_s1 + $0x88] sm:$0xff]  ;;  %v3602_v42 = vcombine.low %v53_v30, %v57_v31 }
   0xc   :  { %v49_v39 = vld [vmem:[%s6517_s1 + $0xa0] sm:$0xff]  ;;  %v50_v41 = vld [vmem:[%s6517_s1 + $0xa8] sm:$0xff]  ;;  %v3604_v43 = vcombine.low %v54_v32, %v58_v33 }
   0xd   :  { %v3595_v44 = vcombine.high %v45_v38, %v49_v39  ;;  %v3597_v45 = vcombine.high %v46_v40, %v50_v41  ;;  %v37_v46 = vld [vmem:[%s6517_s1 + $0x40] sm:$0xff]  ;;  %v38_v48 = vld [vmem:[%s6517_s1 + $0x48] sm:$0xff]  ;;  %v3594_v50 = vcombine.low %v45_v38, %v49_v39  ;;  %v3596_v51 = vcombine.low %v46_v40, %v50_v41 }
   0xe   :  { %884 = vmatpush1.bf16.msra.mxu0 %v3618_v26  ;;  %957 = vmatpush1.bf16.msra.mxu1 %v3620_v27  ;;  %v41_v47 = vld [vmem:[%s6517_s1 + $0x60] sm:$0xff]  ;;  %v42_v49 = vld [vmem:[%s6517_s1 + $0x68] sm:$0xff] }
   0xf   :  { %885 = vmatprep.subr.bf16.mxu0 %v3611_v28  ;;  %958 = vmatprep.subr.bf16.mxu1 %v3613_v29  ;;  %v3587_v52 = vcombine.high %v37_v46, %v41_v47  ;;  %v3589_v53 = vcombine.high %v38_v48, %v42_v49  ;;  %v29_v54 = vld [vmem:[%s6517_s1] sm:$0xff]  ;;  %v30_v57 = vld [vmem:[%s6517_s1 + $0x8] sm:$0xff]  ;;  %v3586_v59 = vcombine.low %v37_v46, %v41_v47 }
  0x10   :  { %v33_v55 = vld [vmem:[%s6517_s1 + $0x20] sm:$0xff]  ;;  %v34_v58 = vld [vmem:[%s6517_s1 + $0x28] sm:$0xff]  ;;  %v3588_v60 = vcombine.low %v38_v48, %v42_v49 }
  0x11   :  { %v4451_v56 = vld [vmem:[%s6518_s0 + $0x4] ss:$8 sps:$4 sm:$0xff]   ;;  %v3579_v61 = vcombine.high %v29_v54, %v33_v55  ;;  %v3581_v62 = vcombine.high %v30_v57, %v34_v58  ;;  %v3578_v3 = vcombine.low %v29_v54, %v33_v55  ;;  %v3580_v4 = vcombine.low %v30_v57, %v34_v58 }
  0x12   :  { %886 = vmatpush1.bf16.msra.mxu0 %v3610_v34  ;;  %959 = vmatpush1.bf16.msra.mxu1 %v3612_v35  ;;  %v149_v63 = vld [vmem:[%s6517_s1 + $0x3c0] sm:$0xff]  ;;  %v150_v1 = vld [vmem:[%s6517_s1 + $0x3c8] sm:$0xff] }
  0x13   :  { %887 = vmatprep.subr.bf16.mxu0 %v3603_v36  ;;  %960 = vmatprep.subr.bf16.mxu1 %v3605_v37  ;;  %v153_v0 = vld [vmem:[%s6517_s1 + $0x3e0] sm:$0xff]  ;;  %v154_v2 = vld [vmem:[%s6517_s1 + $0x3e8] sm:$0xff] }
  0x14   :  { %911 = vmatprep.mubr.bf16.mxu0 %v4451_v56  ;;  %984 = vmatprep.mubr.bf16.mxu1 %v4451_v56  ;;  %v3699_v5 = vcombine.high %v149_v63, %v153_v0  ;;  %v3701_v6 = vcombine.high %v150_v1, %v154_v2  ;;  %v141_v7 = vld [vmem:[%s6517_s1 + $0x380] sm:$0xff]  ;;  %v142_v9 = vld [vmem:[%s6517_s1 + $0x388] sm:$0xff]  ;;  %v3698_v11 = vcombine.low %v149_v63, %v153_v0  ;;  %v87_v63 = vld [vmem:[%s6517_s1 + $0x1d0] sm:$0xff] }
  0x15   :  { %v145_v8 = vld [vmem:[%s6517_s1 + $0x3a0] sm:$0xff]  ;;  %v146_v10 = vld [vmem:[%s6517_s1 + $0x3a8] sm:$0xff]  ;;  %v3700_v12 = vcombine.low %v150_v1, %v154_v2  ;;  %v91_v1 = vld [vmem:[%s6517_s1 + $0x1f0] sm:$0xff] }
  0x16   :  { %888 = vmatpush1.bf16.msra.mxu0 %v3602_v42  ;;  %961 = vmatpush1.bf16.msra.mxu1 %v3604_v43  ;;  %v3691_v13 = vcombine.high %v141_v7, %v145_v8  ;;  %v3693_v14 = vcombine.high %v142_v9, %v146_v10  ;;  %v133_v15 = vld [vmem:[%s6517_s1 + $0x340] sm:$0xff]  ;;  %v134_v17 = vld [vmem:[%s6517_s1 + $0x348] sm:$0xff]  ;;  %v3690_v19 = vcombine.low %v141_v7, %v145_v8  ;;  %v88_v2 = vld [vmem:[%s6517_s1 + $0x1d8] sm:$0xff] }
  0x17   :  { %889 = vmatprep.subr.bf16.mxu0 %v3595_v44  ;;  %962 = vmatprep.subr.bf16.mxu1 %v3597_v45  ;;  %v137_v16 = vld [vmem:[%s6517_s1 + $0x360] sm:$0xff]  ;;  %v138_v18 = vld [vmem:[%s6517_s1 + $0x368] sm:$0xff]  ;;  %v3692_v20 = vcombine.low %v142_v9, %v146_v10  ;;  %v79_v7 = vld [vmem:[%s6517_s1 + $0x190] sm:$0xff] }
  0x18   :  { %v3683_v21 = vcombine.high %v133_v15, %v137_v16  ;;  %v3685_v22 = vcombine.high %v134_v17, %v138_v18  ;;  %v125_v23 = vld [vmem:[%s6517_s1 + $0x300] sm:$0xff]  ;;  %v126_v25 = vld [vmem:[%s6517_s1 + $0x308] sm:$0xff]  ;;  %v3682_v27 = vcombine.low %v133_v15, %v137_v16  ;;  %v3684_v28 = vcombine.low %v134_v17, %v138_v18  ;;  %v83_v9 = vld [vmem:[%s6517_s1 + $0x1b0] sm:$0xff] }
  0x19   :  { %v129_v24 = vld [vmem:[%s6517_s1 + $0x320] sm:$0xff]  ;;  %v130_v26 = vld [vmem:[%s6517_s1 + $0x328] sm:$0xff]  ;;  %v3631_v16 = vcombine.high %v79_v7, %v83_v9  ;;  %v75_v17 = vld [vmem:[%s6517_s1 + $0x170] sm:$0xff] }
  0x1a   :  { %890 = vmatpush1.bf16.msra.mxu0 %v3594_v50  ;;  %963 = vmatpush1.bf16.msra.mxu1 %v3596_v51  ;;  %v3675_v29 = vcombine.high %v125_v23, %v129_v24  ;;  %v3677_v30 = vcombine.high %v126_v25, %v130_v26  ;;  %v117_v31 = vld [vmem:[%s6517_s1 + $0x2c0] sm:$0xff]  ;;  %v118_v33 = vld [vmem:[%s6517_s1 + $0x2c8] sm:$0xff]  ;;  %v3674_v35 = vcombine.low %v125_v23, %v129_v24 }
  0x1b   :  { %891 = vmatprep.subr.bf16.mxu0 %v3587_v52  ;;  %964 = vmatprep.subr.bf16.mxu1 %v3589_v53  ;;  %v121_v32 = vld [vmem:[%s6517_s1 + $0x2e0] sm:$0xff]  ;;  %v122_v34 = vld [vmem:[%s6517_s1 + $0x2e8] sm:$0xff]  ;;  %v3676_v36 = vcombine.low %v126_v25, %v130_v26  ;;  %v63_v25 = vld [vmem:[%s6517_s1 + $0x110] sm:$0xff] }
  0x1c   :  { %v3667_v37 = vcombine.high %v117_v31, %v121_v32  ;;  %v3669_v38 = vcombine.high %v118_v33, %v122_v34  ;;  %v109_v39 = vld [vmem:[%s6517_s1 + $0x280] sm:$0xff]  ;;  %v110_v41 = vld [vmem:[%s6517_s1 + $0x288] sm:$0xff]  ;;  %v3666_v43 = vcombine.low %v117_v31, %v121_v32  ;;  %v3668_v44 = vcombine.low %v118_v33, %v122_v34  ;;  %v55_v32 = vld [vmem:[%s6517_s1 + $0xd0] sm:$0xff] }
  0x1d   :  { %v113_v40 = vld [vmem:[%s6517_s1 + $0x2a0] sm:$0xff]  ;;  %v114_v42 = vld [vmem:[%s6517_s1 + $0x2a8] sm:$0xff] }
  0x1e   :  { %892 = vmatpush1.bf16.msra.mxu0 %v3586_v59  ;;  %965 = vmatpush1.bf16.msra.mxu1 %v3588_v60  ;;  %v3659_v45 = vcombine.high %v109_v39, %v113_v40  ;;  %v101_v46 = vld [vmem:[%s6517_s1 + $0x240] sm:$0xff]  ;;  %v3661_v47 = vcombine.high %v110_v41, %v114_v42  ;;  %v102_v49 = vld [vmem:[%s6517_s1 + $0x248] sm:$0xff]  ;;  %v3658_v51 = vcombine.low %v109_v39, %v113_v40  ;;  %v60_v39 = vld [vmem:[%s6517_s1 + $0xf8] sm:$0xff] }
  0x1f   :  { %893 = vmatprep.subr.bf16.mxu0 %v3579_v61  ;;  %966 = vmatprep.subr.bf16.mxu1 %v3581_v62  ;;  %v105_v48 = vld [vmem:[%s6517_s1 + $0x260] sm:$0xff]  ;;  %v106_v50 = vld [vmem:[%s6517_s1 + $0x268] sm:$0xff]  ;;  %v3660_v52 = vcombine.low %v110_v41, %v114_v42 }
  0x20   :  { %v3651_v53 = vcombine.high %v101_v46, %v105_v48  ;;  %v93_v54 = vld [vmem:[%s6517_s1 + $0x200] sm:$0xff]  ;;  %v3653_v55 = vcombine.high %v102_v49, %v106_v50  ;;  %v94_v58 = vld [vmem:[%s6517_s1 + $0x208] sm:$0xff]  ;;  %v3650_v60 = vcombine.low %v101_v46, %v105_v48  ;;  %v3652_v61 = vcombine.low %v102_v49, %v106_v50  ;;  %v48_v46 = vld [vmem:[%s6517_s1 + $0x98] sm:$0xff] }
  0x21   :  { %v97_v57 = vld [vmem:[%s6517_s1 + $0x220] sm:$0xff]  ;;  %v98_v59 = vld [vmem:[%s6517_s1 + $0x228] sm:$0xff]  ;;  %v39_v50 = vld [vmem:[%s6517_s1 + $0x50] sm:$0xff] }
  0x22   :  { %894 = vmatpush1.bf16.msra.mxu0 %v3578_v3  ;;  %967 = vmatpush1.bf16.msra.mxu1 %v3580_v4  ;;  %v3643_v62 = vcombine.high %v93_v54, %v97_v57  ;;  %v3645_v0 = vcombine.high %v94_v58, %v98_v59  ;;  %v92_v3 = vld [vmem:[%s6517_s1 + $0x1f8] sm:$0xff]  ;;  %v3642_v4 = vcombine.low %v93_v54, %v97_v57  ;;  %v4578_v10 = vld [vmem:[%s6518_s0] ss:$8 sps:$4 sm:$0xff]  }
  0x23   :  { %895 = vmatprep.subr.bf16.mxu0 %v3699_v5  ;;  %968 = vmatprep.subr.bf16.mxu1 %v3701_v6  ;;  %v3644_v5 = vcombine.low %v94_v58, %v98_v59  ;;  %v3639_v6 = vcombine.high %v87_v63, %v91_v1  ;;  %v3641_v8 = vcombine.high %v88_v2, %v92_v3  ;;  %v4659_v48 = vld [vmem:[%s6518_s0 + $0x20] ss:$8 sps:$4 sm:$0xff]   ;;  %v4674_v57 = vld [vmem:[%s6518_s0 + $0x34] ss:$8 sps:$4 sm:$0xff]  }
  0x24   :  { %v3640_v15 = vcombine.low %v88_v2, %v92_v3  ;;  %v44_v58 = vld [vmem:[%s6517_s1 + $0x78] sm:$0xff] }
  0x25   :  { %v36_v2 = vld [vmem:[%s6517_s1 + $0x38] sm:$0xff] }
  0x26   :  { %896 = vmatpush2.bf16.msra.mxu0 %v3698_v11  ;;  %969 = vmatpush2.bf16.msra.mxu1 %v3700_v12  ;;  %v80_v11 = vld [vmem:[%s6517_s1 + $0x198] sm:$0xff] }
  0x27   :  { %897 = vmatprep.subr.bf16.mxu0 %v3691_v13  ;;  %970 = vmatprep.subr.bf16.mxu1 %v3693_v14  ;;  %v84_v12 = vld [vmem:[%s6517_s1 + $0x1b8] sm:$0xff]  ;;  %v3638_v13 = vcombine.low %v87_v63, %v91_v1  ;;  %v71_v14 = vld [vmem:[%s6517_s1 + $0x150] sm:$0xff] }
  0x28   :  { %v3633_v18 = vcombine.high %v80_v11, %v84_v12  ;;  %v3632_v23 = vcombine.low %v80_v11, %v84_v12  ;;  %v3623_v24 = vcombine.high %v71_v14, %v75_v17  ;;  %v3622_v31 = vcombine.low %v71_v14, %v75_v17  ;;  %v32_v1 = vld [vmem:[%s6517_s1 + $0x18] sm:$0xff]  ;;  %v143_v17 = vld [vmem:[%s6517_s1 + $0x390] sm:$0xff] }
  0x29   :  { %v4697_v3 = vld [vmem:[%s6518_s0 + $0x30] ss:$8 sps:$4 sm:$0xff]   ;;  %v3584_v14 = vcombine.low %v32_v1, %v36_v2 }
  0x2a   :  { %898 = vmatpush2.bf16.msra.mxu0 %v3690_v19  ;;  %971 = vmatpush2.bf16.msra.mxu1 %v3692_v20  ;;  %v72_v19 = vld [vmem:[%s6517_s1 + $0x158] sm:$0xff] }
  0x2b   :  { %899 = vmatprep.subr.bf16.mxu0 %v3683_v21  ;;  %972 = vmatprep.subr.bf16.mxu1 %v3685_v22  ;;  %v4598_v20 = vld [vmem:[%s6518_s0 + $0x14] ss:$8 sps:$4 sm:$0xff]   ;;  %v3630_v22 = vcombine.low %v79_v7, %v83_v9  ;;  %v3585_v7 = vcombine.high %v32_v1, %v36_v2 }
  0x2c   :  { %v76_v21 = vld [vmem:[%s6517_s1 + $0x178] sm:$0xff]  ;;  %v155_v9 = vld [vmem:[%s6517_s1 + $0x3f0] sm:$0xff] }
  0x2d   :  { %v3625_v26 = vcombine.high %v72_v19, %v76_v21  ;;  %v3624_v33 = vcombine.low %v72_v19, %v76_v21  ;;  %v152_v11 = vld [vmem:[%s6517_s1 + $0x3d8] sm:$0xff] }
  0x2e   :  { %900 = vmatpush2.bf16.msra.mxu0 %v3682_v27  ;;  %973 = vmatpush2.bf16.msra.mxu1 %v3684_v28  ;;  %v67_v27 = vld [vmem:[%s6517_s1 + $0x130] sm:$0xff]  ;;  %v64_v28 = vld [vmem:[%s6517_s1 + $0x118] sm:$0xff] }
  0x2f   :  { %901 = vmatprep.subr.bf16.mxu0 %v3675_v29  ;;  %974 = vmatprep.subr.bf16.mxu1 %v3677_v30  ;;  %v68_v29 = vld [vmem:[%s6517_s1 + $0x138] sm:$0xff]  ;;  %v3615_v34 = vcombine.high %v63_v25, %v67_v27  ;;  %v3614_v40 = vcombine.low %v63_v25, %v67_v27  ;;  %v139_v27 = vld [vmem:[%s6517_s1 + $0x370] sm:$0xff] }
  0x30   :  { %v4621_v30 = vld [vmem:[%s6518_s0 + $0x10] ss:$8 sps:$4 sm:$0xff]   ;;  %v3616_v41 = vcombine.low %v64_v28, %v68_v29 }
  0x31   :  { %v156_v12 = vld [vmem:[%s6517_s1 + $0x3f8] sm:$0xff] }
  0x32   :  { %902 = vmatpush2.bf16.msra.mxu0 %v3674_v35  ;;  %975 = vmatpush2.bf16.msra.mxu1 %v3676_v36  ;;  %v59_v35 = vld [vmem:[%s6517_s1 + $0xf0] sm:$0xff]  ;;  %v3617_v36 = vcombine.high %v64_v28, %v68_v29  ;;  %v144_v19 = vld [vmem:[%s6517_s1 + $0x398] sm:$0xff] }
  0x33   :  { %903 = vmatprep.subr.bf16.mxu0 %v3667_v37  ;;  %976 = vmatprep.subr.bf16.mxu1 %v3669_v38  ;;  %v56_v37 = vld [vmem:[%s6517_s1 + $0xd8] sm:$0xff]  ;;  %v4636_v38 = vld [vmem:[%s6518_s0 + $0x24] ss:$8 sps:$4 sm:$0xff]   ;;  %v3607_v42 = vcombine.high %v55_v32, %v59_v35  ;;  %v3606_v49 = vcombine.low %v55_v32, %v59_v35  ;;  %v131_v35 = vld [vmem:[%s6517_s1 + $0x330] sm:$0xff] }
  0x34   :  { %v148_v21 = vld [vmem:[%s6517_s1 + $0x3b8] sm:$0xff] }
  0x35   :  { %v3697_v25 = vcombine.high %v144_v19, %v148_v21  ;;  %v140_v28 = vld [vmem:[%s6517_s1 + $0x378] sm:$0xff] }
  0x36   :  { %904 = vmatpush2.bf16.msra.mxu0 %v3666_v43  ;;  %977 = vmatpush2.bf16.msra.mxu1 %v3668_v44  ;;  %v47_v43 = vld [vmem:[%s6517_s1 + $0x90] sm:$0xff]  ;;  %v3609_v44 = vcombine.high %v56_v37, %v60_v39  ;;  %v108_v1 = vld [vmem:[%s6517_s1 + $0x278] sm:$0xff] }
  0x37   :  { %905 = vmatprep.subr.bf16.mxu0 %v3659_v45  ;;  %978 = vmatprep.subr.bf16.mxu1 %v3661_v47  ;;  %v51_v45 = vld [vmem:[%s6517_s1 + $0xb0] sm:$0xff]  ;;  %v52_v47 = vld [vmem:[%s6517_s1 + $0xb8] sm:$0xff] }
  0x38   :  { %v3601_v54 = vcombine.high %v48_v46, %v52_v47  ;;  %v3598_v59 = vcombine.low %v47_v43, %v51_v45 }
  0x3a   :  { %906 = vmatpush2.bf16.msra.mxu0 %v3658_v51  ;;  %979 = vmatpush2.bf16.msra.mxu1 %v3660_v52  ;;  %v3608_v51 = vcombine.low %v56_v37, %v60_v39  ;;  %v3599_v52 = vcombine.high %v47_v43, %v51_v45  ;;  %v132_v37 = vld [vmem:[%s6517_s1 + $0x338] sm:$0xff]  ;;  %v119_v43 = vld [vmem:[%s6517_s1 + $0x2d0] sm:$0xff] }
  0x3b   :  { %907 = vmatprep.subr.bf16.mxu0 %v3651_v53  ;;  %980 = vmatprep.subr.bf16.mxu1 %v3653_v55  ;;  %v43_v53 = vld [vmem:[%s6517_s1 + $0x70] sm:$0xff]  ;;  %v40_v55 = vld [vmem:[%s6517_s1 + $0x58] sm:$0xff] }
  0x3c   :  { %v3593_v63 = vcombine.high %v40_v55, %v44_v58  ;;  %v120_v45 = vld [vmem:[%s6517_s1 + $0x2d8] sm:$0xff] }
  0x3e   :  { %908 = vmatpush2.bf16.msra.mxu0 %v3650_v60  ;;  %981 = vmatpush2.bf16.msra.mxu1 %v3652_v61  ;;  %v3600_v60 = vcombine.low %v48_v46, %v52_v47  ;;  %v3591_v61 = vcombine.high %v39_v50, %v43_v53  ;;  %v124_v46 = vld [vmem:[%s6517_s1 + $0x2f8] sm:$0xff] }
  0x3f   :  { %909 = vmatprep.subr.bf16.mxu0 %v3643_v62  ;;  %982 = vmatprep.subr.bf16.mxu1 %v3645_v0  ;;  %v31_v62 = vld [vmem:[%s6517_s1 + $0x10] sm:$0xff] }
  0x40   :  { %v35_v0 = vld [vmem:[%s6517_s1 + $0x30] sm:$0xff] }
  0x42   :  { %910 = vmatpush2.bf16.msra.mxu0 %v3642_v4  ;;  %983 = vmatpush2.bf16.msra.mxu1 %v3644_v5  ;;  %v3590_v4 = vcombine.low %v39_v50, %v43_v53  ;;  %v3592_v5 = vcombine.low %v40_v55, %v44_v58  ;;  %v115_v53 = vld [vmem:[%s6517_s1 + $0x2b0] sm:$0xff]  ;;  %v116_v55 = vld [vmem:[%s6517_s1 + $0x2b8] sm:$0xff] }
  0x43   :  { %1025 = vmatprep.subr.bf16.mxu0 %v3639_v6  ;;  %1098 = vmatprep.subr.bf16.mxu1 %v3641_v8  ;;  %v3583_v6 = vcombine.high %v31_v62, %v35_v0  ;;  %v151_v8 = vld [vmem:[%s6517_s1 + $0x3d0] sm:$0xff] }
  0x45   :  { %912 = vmatmul.mubr.bf16.vlgmr.msra.gmra.mxu0 %v4578_v10  ;;  %985 = vmatmul.mubr.bf16.vlgmr.msra.gmra.mxu1 %v4578_v10 }
  0x46   :  { %1026 = vmatpush1.bf16.msra.mxu0 %v3638_v13  ;;  %1099 = vmatpush1.bf16.msra.mxu1 %v3640_v15  ;;  %v3582_v13 = vcombine.low %v31_v62, %v35_v0  ;;  %v3703_v15 = vcombine.high %v151_v8, %v155_v9  ;;  %v103_v62 = vld [vmem:[%s6517_s1 + $0x250] sm:$0xff]  ;;  %v104_v0 = vld [vmem:[%s6517_s1 + $0x258] sm:$0xff] }
  0x47   :  { %1027 = vmatprep.subr.bf16.mxu0 %v3631_v16  ;;  %1100 = vmatprep.subr.bf16.mxu1 %v3633_v18  ;;  %v3705_v16 = vcombine.high %v152_v11, %v156_v12  ;;  %v147_v18 = vld [vmem:[%s6517_s1 + $0x3b0] sm:$0xff] }
  0x48   :  { %921 = vmatprep.mubr.bf16.mxu0 %v4598_v20  ;;  %994 = vmatprep.mubr.bf16.mxu1 %v4598_v20  ;;  %v3694_v29 = vcombine.low %v143_v17, %v147_v18 }
  0x4a   :  { %1028 = vmatpush1.bf16.msra.mxu0 %v3630_v22  ;;  %1101 = vmatpush1.bf16.msra.mxu1 %v3632_v23  ;;  %v3702_v22 = vcombine.low %v151_v8, %v155_v9  ;;  %v3704_v23 = vcombine.low %v152_v11, %v156_v12  ;;  %v99_v8 = vld [vmem:[%s6517_s1 + $0x230] sm:$0xff]  ;;  %v96_v9 = vld [vmem:[%s6517_s1 + $0x218] sm:$0xff] }
  0x4b   :  { %1029 = vmatprep.subr.bf16.mxu0 %v3623_v24  ;;  %1102 = vmatprep.subr.bf16.mxu1 %v3625_v26  ;;  %v3695_v24 = vcombine.high %v143_v17, %v147_v18  ;;  %v135_v26 = vld [vmem:[%s6517_s1 + $0x350] sm:$0xff]  ;;  %v100_v11 = vld [vmem:[%s6517_s1 + $0x238] sm:$0xff] }
  0x4c   :  { %v3687_v32 = vcombine.high %v135_v26, %v139_v27  ;;  %v3686_v39 = vcombine.low %v135_v26, %v139_v27  ;;  %v3648_v17 = vcombine.low %v96_v9, %v100_v11  ;;  %v4803_v18 = vld [vmem:[%s6519_s2 + $0xe4] ss:$16 sps:$4 sm:$0xff]   ;;  %v4845_v26 = vld [vmem:[%s6519_s2 + $0xc8] ss:$16 sps:$4 sm:$0xff]   ;;  %v4857_v27 = vld [vmem:[%s6519_s2 + $0xac] ss:$16 sps:$4 sm:$0xff]  }
  0x4d   :  { %922 = vmatmul.mubr.bf16.gmra.mxu0 %v4621_v30  ;;  %995 = vmatmul.mubr.bf16.gmra.mxu1 %v4621_v30  ;;  %6619 = vst [vmem:[#allocation8_spill] sm:$0xff] %v4845_v26  ;;  %6621 = vst [vmem:[#allocation10_spill] sm:$0xff] %v4857_v27 }
  0x4e   :  { %1030 = vmatpush1.bf16.msra.mxu0 %v3622_v31  ;;  %1103 = vmatpush1.bf16.msra.mxu1 %v3624_v33  ;;  %v3696_v31 = vcombine.low %v144_v19, %v148_v21  ;;  %v4808_v19 = vld [vmem:[%s6519_s2 + $0xec] ss:$16 sps:$4 sm:$0xff]   ;;  %v4813_v21 = vld [vmem:[%s6519_s2 + $0xe0] ss:$16 sps:$4 sm:$0xff]  }
  0x4f   :  { %1031 = vmatprep.subr.bf16.mxu0 %v3615_v34  ;;  %1104 = vmatprep.subr.bf16.mxu1 %v3617_v36  ;;  %v127_v34 = vld [vmem:[%s6517_s1 + $0x310] sm:$0xff]  ;;  %v128_v36 = vld [vmem:[%s6517_s1 + $0x318] sm:$0xff] }
  0x50   :  { %931 = vmatprep.mubr.bf16.mxu0 %v4636_v38  ;;  %1004 = vmatprep.mubr.bf16.mxu1 %v4636_v38  ;;  %v3678_v47 = vcombine.low %v127_v34, %v131_v35 }
  0x52   :  { %1032 = vmatpush1.bf16.msra.mxu0 %v3614_v40  ;;  %1105 = vmatpush1.bf16.msra.mxu1 %v3616_v41  ;;  %v3679_v41 = vcombine.high %v127_v34, %v131_v35  ;;  %v4916_v34 = vld [vmem:[%s6519_s2 + $0x60] ss:$16 sps:$4 sm:$0xff]   ;;  %v4923_v35 = vld [vmem:[%s6519_s2 + $0x68] ss:$16 sps:$4 sm:$0xff]  }
  0x53   :  { %1033 = vmatprep.subr.bf16.mxu0 %v3607_v42  ;;  %1106 = vmatprep.subr.bf16.mxu1 %v3609_v44  ;;  %v3681_v42 = vcombine.high %v128_v36, %v132_v37  ;;  %v123_v44 = vld [vmem:[%s6517_s1 + $0x2f0] sm:$0xff]  ;;  %6630 = vst [vmem:[#allocation19_spill] sm:$0xff] %v4916_v34  ;;  %6631 = vst [vmem:[#allocation20_spill] sm:$0xff] %v4923_v35 }
  0x54   :  { %v3671_v50 = vcombine.high %v119_v43, %v123_v44  ;;  %v3670_v58 = vcombine.low %v119_v43, %v123_v44  ;;  %v4986_v43 = vld [vmem:[%s6519_s2 + $0xc] ss:$16 sps:$4 sm:$0xff]   ;;  %v4994_v44 = vld [vmem:[%s6519_s2] ss:$16 sps:$4 sm:$0xff]  }
  0x55   :  { %932 = vmatmul.mubr.bf16.gmra.mxu0 %v4659_v48  ;;  %1005 = vmatmul.mubr.bf16.gmra.mxu1 %v4659_v48  ;;  %6641 = vst [vmem:[#allocation30_spill] sm:$0xff] %v4986_v43  ;;  %6642 = vst [vmem:[#allocation31_spill] sm:$0xff] %v4994_v44 }
  0x56   :  { %1034 = vmatpush1.bf16.msra.mxu0 %v3606_v49  ;;  %1107 = vmatpush1.bf16.msra.mxu1 %v3608_v51  ;;  %v3680_v49 = vcombine.low %v128_v36, %v132_v37  ;;  %v3673_v51 = vcombine.high %v120_v45, %v124_v46  ;;  %v4934_v36 = vld [vmem:[%s6519_s2 + $0x4c] ss:$16 sps:$4 sm:$0xff]   ;;  %v4942_v37 = vld [vmem:[%s6519_s2 + $0x40] ss:$16 sps:$4 sm:$0xff]  }
  0x57   :  { %1035 = vmatprep.subr.bf16.mxu0 %v3599_v52  ;;  %1108 = vmatprep.subr.bf16.mxu1 %v3601_v54  ;;  %v111_v52 = vld [vmem:[%s6517_s1 + $0x290] sm:$0xff]  ;;  %v112_v54 = vld [vmem:[%s6517_s1 + $0x298] sm:$0xff]  ;;  %6633 = vst [vmem:[#allocation22_spill] sm:$0xff] %v4934_v36  ;;  %6634 = vst [vmem:[#allocation23_spill] sm:$0xff] %v4942_v37 }
  0x58   :  { %941 = vmatprep.mubr.bf16.mxu0 %v4674_v57  ;;  %1014 = vmatprep.mubr.bf16.mxu1 %v4674_v57  ;;  %v3662_v2 = vcombine.low %v111_v52, %v115_v53 }
  0x5a   :  { %1036 = vmatpush1.bf16.msra.mxu0 %v3598_v59  ;;  %1109 = vmatpush1.bf16.msra.mxu1 %v3600_v60  ;;  %v3672_v59 = vcombine.low %v120_v45, %v124_v46  ;;  %v3663_v60 = vcombine.high %v111_v52, %v115_v53  ;;  %v5001_v45 = vld [vmem:[%s6519_s2 + $0x8] ss:$16 sps:$4 sm:$0xff]   ;;  %v6523_v46 = vmov 0   ;;  %v5038_v52 = vld [vmem:[%s6520_s3 + $0xcc] ss:$16 sps:$4 sm:$0xff]   ;;  %v6525_v53 = vmov 0.0|0.0  }
  0x5b   :  { %1037 = vmatprep.subr.bf16.mxu0 %v3591_v61  ;;  %1110 = vmatprep.subr.bf16.mxu1 %v3593_v63  ;;  %v3665_v61 = vcombine.high %v112_v54, %v116_v55  ;;  %v107_v63 = vld [vmem:[%s6517_s1 + $0x270] sm:$0xff]  ;;  %6643 = vst [vmem:[#allocation32_spill] sm:$0xff] %v5001_v45 }
  0x5c   :  { %v3654_v12 = vcombine.low %v103_v62, %v107_v63 }
  0x5d   :  { %942 = vmatmul.mubr.bf16.gmra.mxu0 %v4697_v3  ;;  %1015 = vmatmul.mubr.bf16.gmra.mxu1 %v4697_v3 }
  0x5e   :  { %1038 = vmatpush1.bf16.msra.mxu0 %v3590_v4  ;;  %1111 = vmatpush1.bf16.msra.mxu1 %v3592_v5  ;;  %v3664_v4 = vcombine.low %v112_v54, %v116_v55  ;;  %v3655_v5 = vcombine.high %v103_v62, %v107_v63  ;;  %v5046_v54 = vld [vmem:[%s6520_s3 + $0xc0] ss:$16 sps:$4 sm:$0xff]   ;;  %v5053_v55 = vld [vmem:[%s6520_s3 + $0xc8] ss:$16 sps:$4 sm:$0xff]   ;;  %v5084_v62 = vld [vmem:[%s6520_s3 + $0x84] ss:$16 sps:$4 sm:$0xff]  }
  0x5f   :  { %1039 = vmatprep.subr.bf16.mxu0 %v3583_v6  ;;  %1112 = vmatprep.subr.bf16.mxu1 %v3585_v7  ;;  %v3657_v6 = vcombine.high %v104_v0, %v108_v1  ;;  %v95_v7 = vld [vmem:[%s6517_s1 + $0x210] sm:$0xff]  ;;  %v5090_v63 = vld [vmem:[%s6520_s3 + $0x8c] ss:$16 sps:$4 sm:$0xff]  }
  0x60   :  { %1057 = vmatprep.mubr.bf16.mxu0 %v4451_v56  ;;  %1130 = vmatprep.mubr.bf16.mxu1 %v4451_v56  ;;  %v136_v56 = vld [vmem:[%s6517_s1 + $0x358] sm:$0xff] }
  0x61   :  { %v3689_v33 = vcombine.high %v136_v56, %v140_v28  ;;  %v3688_v40 = vcombine.low %v136_v56, %v140_v28  ;;  %v4864_v56 = vld [vmem:[%s6519_s2 + $0xa0] ss:$16 sps:$4 sm:$0xff]   ;;  %v4871_v28 = vld [vmem:[%s6519_s2 + $0xa8] ss:$16 sps:$4 sm:$0xff]  }
  0x62   :  { %1040 = vmatpush1.bf16.msra.mxu0 %v3582_v13  ;;  %1113 = vmatpush1.bf16.msra.mxu1 %v3584_v14  ;;  %v3656_v13 = vcombine.low %v104_v0, %v108_v1  ;;  %v3647_v14 = vcombine.high %v95_v7, %v99_v8  ;;  %6622 = vst [vmem:[#allocation11_spill] sm:$0xff] %v4864_v56  ;;  %6623 = vst [vmem:[#allocation12_spill] sm:$0xff] %v4871_v28  ;;  %v5096_v0 = vld [vmem:[%s6520_s3 + $0x80] ss:$16 sps:$4 sm:$0xff]   ;;  %v5103_v1 = vld [vmem:[%s6520_s3 + $0x88] ss:$16 sps:$4 sm:$0xff]  }
  0x63   :  { %1041 = vmatprep.subr.bf16.mxu0 %v3703_v15  ;;  %1114 = vmatprep.subr.bf16.mxu1 %v3705_v16  ;;  %v3649_v15 = vcombine.high %v96_v9, %v100_v11  ;;  %v3646_v16 = vcombine.low %v95_v7, %v99_v8  ;;  %v5132_v7 = vld [vmem:[%s6520_s3 + $0x44] ss:$16 sps:$4 sm:$0xff]   ;;  %v5138_v8 = vld [vmem:[%s6520_s3 + $0x4c] ss:$16 sps:$4 sm:$0xff]   ;;  %v5144_v9 = vld [vmem:[%s6520_s3 + $0x40] ss:$16 sps:$4 sm:$0xff]  }
  0x64   :  { %v5151_v11 = vld [vmem:[%s6520_s3 + $0x48] ss:$16 sps:$4 sm:$0xff]  }
  0x66   :  { %1042 = vmatpush2.bf16.msra.mxu0 %v3702_v22  ;;  %1115 = vmatpush2.bf16.msra.mxu1 %v3704_v23  ;;  %v4819_v22 = vld [vmem:[%s6519_s2 + $0xe8] ss:$16 sps:$4 sm:$0xff]   ;;  %v4824_v23 = vld [vmem:[%s6519_s2 + $0xc4] ss:$16 sps:$4 sm:$0xff]  }
  0x67   :  { %1043 = vmatprep.subr.bf16.mxu0 %v3695_v24  ;;  %1116 = vmatprep.subr.bf16.mxu1 %v3697_v25  ;;  %v4830_v24 = vld [vmem:[%s6519_s2 + $0xcc] ss:$16 sps:$4 sm:$0xff]   ;;  %v4838_v25 = vld [vmem:[%s6519_s2 + $0xc0] ss:$16 sps:$4 sm:$0xff]  }
  0x68   :  { %6617 = vst [vmem:[#allocation6_spill] sm:$0xff] %v4830_v24  ;;  %6618 = vst [vmem:[#allocation7_spill] sm:$0xff] %v4838_v25 }
  0x6a   :  { %1044 = vmatpush2.bf16.msra.mxu0 %v3694_v29  ;;  %1117 = vmatpush2.bf16.msra.mxu1 %v3696_v31  ;;  %v4882_v29 = vld [vmem:[%s6519_s2 + $0x8c] ss:$16 sps:$4 sm:$0xff]   ;;  %v4890_v31 = vld [vmem:[%s6519_s2 + $0x80] ss:$16 sps:$4 sm:$0xff]  }
  0x6b   :  { %1045 = vmatprep.subr.bf16.mxu0 %v3687_v32  ;;  %1118 = vmatprep.subr.bf16.mxu1 %v3689_v33  ;;  %6625 = vst [vmem:[#allocation14_spill] sm:$0xff] %v4882_v29  ;;  %6626 = vst [vmem:[#allocation15_spill] sm:$0xff] %v4890_v31  ;;  %v4897_v32 = vld [vmem:[%s6519_s2 + $0x88] ss:$16 sps:$4 sm:$0xff]   ;;  %v4909_v33 = vld [vmem:[%s6519_s2 + $0x6c] ss:$16 sps:$4 sm:$0xff]  }
  0x6c   :  { %6627 = vst [vmem:[#allocation16_spill] sm:$0xff] %v4897_v32  ;;  %6629 = vst [vmem:[#allocation18_spill] sm:$0xff] %v4909_v33 }
  0x6e   :  { %1046 = vmatpush2.bf16.msra.mxu0 %v3686_v39  ;;  %1119 = vmatpush2.bf16.msra.mxu1 %v3688_v40  ;;  %v4949_v39 = vld [vmem:[%s6519_s2 + $0x48] ss:$16 sps:$4 sm:$0xff]   ;;  %v4961_v40 = vld [vmem:[%s6519_s2 + $0x2c] ss:$16 sps:$4 sm:$0xff]  }
  0x6f   :  { %1047 = vmatprep.subr.bf16.mxu0 %v3679_v41  ;;  %1120 = vmatprep.subr.bf16.mxu1 %v3681_v42  ;;  %6635 = vst [vmem:[#allocation24_spill] sm:$0xff] %v4949_v39  ;;  %6637 = vst [vmem:[#allocation26_spill] sm:$0xff] %v4961_v40  ;;  %v4968_v41 = vld [vmem:[%s6519_s2 + $0x20] ss:$16 sps:$4 sm:$0xff]   ;;  %v4975_v42 = vld [vmem:[%s6519_s2 + $0x28] ss:$16 sps:$4 sm:$0xff]  }
  0x70   :  { %6638 = vst [vmem:[#allocation27_spill] sm:$0xff] %v4968_v41  ;;  %6639 = vst [vmem:[#allocation28_spill] sm:$0xff] %v4975_v42 }
  0x72   :  { %1048 = vmatpush2.bf16.msra.mxu0 %v3678_v47  ;;  %1121 = vmatpush2.bf16.msra.mxu1 %v3680_v49  ;;  %v5013_v47 = vld [vmem:[%s6520_s3 + $0xec] ss:$16 sps:$4 sm:$0xff]   ;;  %v5020_v49 = vld [vmem:[%s6520_s3 + $0xe0] ss:$16 sps:$4 sm:$0xff]  }
  0x73   :  { %1049 = vmatprep.subr.bf16.mxu0 %v3671_v50  ;;  %1122 = vmatprep.subr.bf16.mxu1 %v3673_v51  ;;  %6645 = vst [vmem:[#allocation34_spill] sm:$0xff] %v5013_v47  ;;  %v5027_v50 = vld [vmem:[%s6520_s3 + $0xe8] ss:$16 sps:$4 sm:$0xff]   ;;  %v5032_v51 = vld [vmem:[%s6520_s3 + $0xc4] ss:$16 sps:$4 sm:$0xff]  }
  0x76   :  { %1050 = vmatpush2.bf16.msra.mxu0 %v3670_v58  ;;  %1123 = vmatpush2.bf16.msra.mxu1 %v3672_v59  ;;  %v5058_v58 = vld [vmem:[%s6520_s3 + $0xa4] ss:$16 sps:$4 sm:$0xff]   ;;  %v5064_v59 = vld [vmem:[%s6520_s3 + $0xac] ss:$16 sps:$4 sm:$0xff]  }
  0x77   :  { %1051 = vmatprep.subr.bf16.mxu0 %v3663_v60  ;;  %1124 = vmatprep.subr.bf16.mxu1 %v3665_v61  ;;  %v5072_v60 = vld [vmem:[%s6520_s3 + $0xa0] ss:$16 sps:$4 sm:$0xff]   ;;  %v5079_v61 = vld [vmem:[%s6520_s3 + $0xa8] ss:$16 sps:$4 sm:$0xff]  }
  0x7a   :  { %1052 = vmatpush2.bf16.msra.mxu0 %v3662_v2  ;;  %1125 = vmatpush2.bf16.msra.mxu1 %v3664_v4  ;;  %v5108_v2 = vld [vmem:[%s6520_s3 + $0x64] ss:$16 sps:$4 sm:$0xff]   ;;  %v5114_v4 = vld [vmem:[%s6520_s3 + $0x6c] ss:$16 sps:$4 sm:$0xff]  }
  0x7b   :  { %1053 = vmatprep.subr.bf16.mxu0 %v3655_v5  ;;  %1126 = vmatprep.subr.bf16.mxu1 %v3657_v6  ;;  %v5120_v5 = vld [vmem:[%s6520_s3 + $0x60] ss:$16 sps:$4 sm:$0xff]   ;;  %v5127_v6 = vld [vmem:[%s6520_s3 + $0x68] ss:$16 sps:$4 sm:$0xff]  }
  0x7e   :  { %1054 = vmatpush2.bf16.msra.mxu0 %v3654_v12  ;;  %1127 = vmatpush2.bf16.msra.mxu1 %v3656_v13  ;;  %v5156_v12 = vld [vmem:[%s6520_s3 + $0x24] ss:$16 sps:$4 sm:$0xff]   ;;  %v5162_v13 = vld [vmem:[%s6520_s3 + $0x2c] ss:$16 sps:$4 sm:$0xff]  }
  0x7f   :  { %1055 = vmatprep.subr.bf16.mxu0 %v3647_v14  ;;  %1128 = vmatprep.subr.bf16.mxu1 %v3649_v15  ;;  %v5168_v14 = vld [vmem:[%s6520_s3 + $0x20] ss:$16 sps:$4 sm:$0xff]   ;;  %v5175_v15 = vld [vmem:[%s6520_s3 + $0x28] ss:$16 sps:$4 sm:$0xff]  }
  0x80   :  { %6646 = vst [vmem:[#allocation35_spill] sm:$0xff] %v5168_v14 }
  0x82   :  { %1056 = vmatpush2.bf16.msra.mxu0 %v3646_v16  ;;  %1129 = vmatpush2.bf16.msra.mxu1 %v3648_v17  ;;  %v5180_v16 = vld [vmem:[%s6520_s3 + $0x4] ss:$16 sps:$4 sm:$0xff]   ;;  %v5186_v17 = vld [vmem:[%s6520_s3 + $0xc] ss:$16 sps:$4 sm:$0xff]  }
  0x83   :  { %1470 = vmatprep.subr.bf16.mxu0 %v4803_v18  ;;  %1511 = vmatprep.subr.bf16.mxu1 %v4808_v19  ;;  %6647 = vst [vmem:[#allocation36_spill] sm:$0xff] %v5186_v17 }
  0x85   :  { %1058 = vmatmul.mubr.bf16.vlgmr.msra.gmra.mxu0 %v4578_v10  ;;  %1131 = vmatmul.mubr.bf16.vlgmr.msra.gmra.mxu1 %v4578_v10  ;;  %v4850_v10 = vld [vmem:[%s6519_s2 + $0xa4] ss:$16 sps:$4 sm:$0xff]  }
  0x86   :  { %1471 = vmatpush1.bf16.msra.mxu0 %v4813_v21  ;;  %1512 = vmatpush1.bf16.msra.mxu1 %v4819_v22  ;;  %6620 = vst [vmem:[#allocation9_spill] sm:$0xff] %v4850_v10 }
  0x87   :  { %1472 = vmatprep.subr.bf16.mxu0 %v4824_v23  ;;  %1513 = vmatprep.subr.bf16.mxu1 %v4830_v24 }
  0x88   :  { %1067 = vmatprep.mubr.bf16.mxu0 %v4598_v20  ;;  %1140 = vmatprep.mubr.bf16.mxu1 %v4598_v20  ;;  %v4876_v20 = vld [vmem:[%s6519_s2 + $0x84] ss:$16 sps:$4 sm:$0xff]  }
  0x89   :  { %6624 = vst [vmem:[#allocation13_spill] sm:$0xff] %v4876_v20 }
  0x8a   :  { %1473 = vmatpush1.bf16.msra.mxu0 %v4838_v25  ;;  %1514 = vmatpush1.bf16.msra.mxu1 %v4845_v26 }
  0x8b   :  { %1474 = vmatprep.subr.bf16.mxu0 %v4850_v10  ;;  %1515 = vmatprep.subr.bf16.mxu1 %v4857_v27 }
  0x8d   :  { %1068 = vmatmul.mubr.bf16.gmra.mxu0 %v4621_v30  ;;  %1141 = vmatmul.mubr.bf16.gmra.mxu1 %v4621_v30  ;;  %v4902_v30 = vld [vmem:[%s6519_s2 + $0x64] ss:$16 sps:$4 sm:$0xff]  }
  0x8e   :  { %1475 = vmatpush1.bf16.msra.mxu0 %v4864_v56  ;;  %1516 = vmatpush1.bf16.msra.mxu1 %v4871_v28  ;;  %6628 = vst [vmem:[#allocation17_spill] sm:$0xff] %v4902_v30 }
  0x8f   :  { %1476 = vmatprep.subr.bf16.mxu0 %v4876_v20  ;;  %1517 = vmatprep.subr.bf16.mxu1 %v4882_v29 }
  0x90   :  { %1077 = vmatprep.mubr.bf16.mxu0 %v4636_v38  ;;  %1150 = vmatprep.mubr.bf16.mxu1 %v4636_v38  ;;  %v4928_v38 = vld [vmem:[%s6519_s2 + $0x44] ss:$16 sps:$4 sm:$0xff]  }
  0x91   :  { %6632 = vst [vmem:[#allocation21_spill] sm:$0xff] %v4928_v38 }
  0x92   :  { %1477 = vmatpush1.bf16.msra.mxu0 %v4890_v31  ;;  %1518 = vmatpush1.bf16.msra.mxu1 %v4897_v32 }
  0x93   :  { %1478 = vmatprep.subr.bf16.mxu0 %v4902_v30  ;;  %1519 = vmatprep.subr.bf16.mxu1 %v4909_v33 }
  0x95   :  { %1078 = vmatmul.mubr.bf16.gmra.mxu0 %v4659_v48  ;;  %1151 = vmatmul.mubr.bf16.gmra.mxu1 %v4659_v48  ;;  %v4954_v48 = vld [vmem:[%s6519_s2 + $0x24] ss:$16 sps:$4 sm:$0xff]  }
  0x96   :  { %1479 = vmatpush1.bf16.msra.mxu0 %v4916_v34  ;;  %1520 = vmatpush1.bf16.msra.mxu1 %v4923_v35  ;;  %6636 = vst [vmem:[#allocation25_spill] sm:$0xff] %v4954_v48 }
  0x97   :  { %1480 = vmatprep.subr.bf16.mxu0 %v4928_v38  ;;  %1521 = vmatprep.subr.bf16.mxu1 %v4934_v36 }
  0x98   :  { %1087 = vmatprep.mubr.bf16.mxu0 %v4674_v57  ;;  %1160 = vmatprep.mubr.bf16.mxu1 %v4674_v57  ;;  %v4980_v57 = vld [vmem:[%s6519_s2 + $0x4] ss:$16 sps:$4 sm:$0xff]  }
  0x99   :  { %6640 = vst [vmem:[#allocation29_spill] sm:$0xff] %v4980_v57 }
  0x9a   :  { %1481 = vmatpush1.bf16.msra.mxu0 %v4942_v37  ;;  %1522 = vmatpush1.bf16.msra.mxu1 %v4949_v39 }
  0x9b   :  { %1482 = vmatprep.subr.bf16.mxu0 %v4954_v48  ;;  %1523 = vmatprep.subr.bf16.mxu1 %v4961_v40 }
  0x9d   :  { %1088 = vmatmul.mubr.bf16.gmra.mxu0 %v4697_v3  ;;  %1161 = vmatmul.mubr.bf16.gmra.mxu1 %v4697_v3  ;;  %v5006_v3 = vld [vmem:[%s6520_s3 + $0xe4] ss:$16 sps:$4 sm:$0xff]  }
  0x9e   :  { %1483 = vmatpush1.bf16.msra.mxu0 %v4968_v41  ;;  %1524 = vmatpush1.bf16.msra.mxu1 %v4975_v42  ;;  %6644 = vst [vmem:[#allocation33_spill] sm:$0xff] %v5006_v3 }
  0x9f   :  { %1484 = vmatprep.subr.bf16.mxu0 %v4980_v57  ;;  %1525 = vmatprep.subr.bf16.mxu1 %v4986_v43 }
  0xa0   :  { %1502 = vmatprep.mubr.bf16.mxu0 %v6523_v46  ;;  %1543 = vmatprep.mubr.bf16.mxu1 %v6523_v46 }
  0xa2   :  { %1485 = vmatpush1.bf16.msra.mxu0 %v4994_v44  ;;  %1526 = vmatpush1.bf16.msra.mxu1 %v5001_v45 }
  0xa3   :  { %1750 = vmatprep.subr.bf16.mxu0 %v5006_v3  ;;  %1791 = vmatprep.subr.bf16.mxu1 %v5013_v47 }
  0xa5   :  { %1503 = vmatmul.mubr.bf16.vlgmr.msra.gmra.mxu0 %v6525_v53  ;;  %1544 = vmatmul.mubr.bf16.vlgmr.msra.gmra.mxu1 %v6525_v53  ;;  %v5199_v53 = vld [vmem:[%s6520_s3 + $0x8] ss:$16 sps:$4 sm:$0xff]  }
  0xa6   :  { %1751 = vmatpush1.bf16.msra.mxu0 %v5020_v49  ;;  %1792 = vmatpush1.bf16.msra.mxu1 %v5027_v50 }
  0xa7   :  { %1752 = vmatprep.subr.bf16.mxu0 %v5032_v51  ;;  %1793 = vmatprep.subr.bf16.mxu1 %v5038_v52 }
  0xa8   :  { %1782 = vmatprep.mubr.bf16.mxu0 %v6523_v46  ;;  %1823 = vmatprep.mubr.bf16.mxu1 %v6523_v46  ;;  %v5192_v46 = vld [vmem:[%s6520_s3] ss:$16 sps:$4 sm:$0xff]  }
  0xaa   :  { %1753 = vmatpush1.bf16.msra.mxu0 %v5046_v54  ;;  %1794 = vmatpush1.bf16.msra.mxu1 %v5053_v55 }
  0xab   :  { %1754 = vmatprep.subr.bf16.mxu0 %v5058_v58  ;;  %1795 = vmatprep.subr.bf16.mxu1 %v5064_v59 }
  0xae   :  { %1755 = vmatpush1.bf16.msra.mxu0 %v5072_v60  ;;  %1796 = vmatpush1.bf16.msra.mxu1 %v5079_v61 }
  0xaf   :  { %1756 = vmatprep.subr.bf16.mxu0 %v5084_v62  ;;  %1797 = vmatprep.subr.bf16.mxu1 %v5090_v63 }
  0xb2   :  { %1757 = vmatpush1.bf16.msra.mxu0 %v5096_v0  ;;  %1798 = vmatpush1.bf16.msra.mxu1 %v5103_v1 }
  0xb3   :  { %1758 = vmatprep.subr.bf16.mxu0 %v5108_v2  ;;  %1799 = vmatprep.subr.bf16.mxu1 %v5114_v4 }
  0xb6   :  { %1759 = vmatpush1.bf16.msra.mxu0 %v5120_v5  ;;  %1800 = vmatpush1.bf16.msra.mxu1 %v5127_v6 }
  0xb7   :  { %1760 = vmatprep.subr.bf16.mxu0 %v5132_v7  ;;  %1801 = vmatprep.subr.bf16.mxu1 %v5138_v8 }
  0xba   :  { %1761 = vmatpush1.bf16.msra.mxu0 %v5144_v9  ;;  %1802 = vmatpush1.bf16.msra.mxu1 %v5151_v11 }
  0xbb   :  { %1762 = vmatprep.subr.bf16.mxu0 %v5156_v12  ;;  %1803 = vmatprep.subr.bf16.mxu1 %v5162_v13 }
  0xbe   :  { %1763 = vmatpush1.bf16.msra.mxu0 %v5168_v14  ;;  %1804 = vmatpush1.bf16.msra.mxu1 %v5175_v15  ;;  %v6648_v14 = vmov 0.0|0.0  }
  0xbf   :  { %1764 = vmatprep.subr.bf16.mxu0 %v5180_v16  ;;  %1805 = vmatprep.subr.bf16.mxu1 %v5186_v17  ;;  %v6649_v17 = vmov 0  }
  0xc2   :  { %1765 = vmatpush1.bf16.msra.mxu0 %v5192_v46  ;;  %1806 = vmatpush1.bf16.msra.mxu1 %v5199_v53 }
  0xc3   :  { %1875 = vmatprep.subr.bf16.mxu0 %v4803_v18  ;;  %1916 = vmatprep.subr.bf16.mxu1 %v4808_v19 }
  0xc5   :  { %1783 = vmatmul.mubr.bf16.vlgmr.msra.gmra.mxu0 %v6648_v14  ;;  %1824 = vmatmul.mubr.bf16.vlgmr.msra.gmra.mxu1 %v6648_v14  ;;  %v159_v14 = vlaneseq }
  0xc6   :  { %1876 = vmatpush1.bf16.msra.mxu0 %v4813_v21  ;;  %1917 = vmatpush1.bf16.msra.mxu1 %v4819_v22 }
  0xc7   :  { %1877 = vmatprep.subr.bf16.mxu0 %v4824_v23  ;;  %1918 = vmatprep.subr.bf16.mxu1 %v4830_v24 }
  0xc8   :  { %1907 = vmatprep.mubr.bf16.mxu0 %v6649_v17  ;;  %1948 = vmatprep.mubr.bf16.mxu1 %v6649_v17 }
  0xca   :  { %1878 = vmatpush1.bf16.msra.mxu0 %v4838_v25  ;;  %1919 = vmatpush1.bf16.msra.mxu1 %v4845_v26 }
  0xcb   :  { %1879 = vmatprep.subr.bf16.mxu0 %v4850_v10  ;;  %1920 = vmatprep.subr.bf16.mxu1 %v4857_v27 }
  0xce   :  { %1880 = vmatpush1.bf16.msra.mxu0 %v4864_v56  ;;  %1921 = vmatpush1.bf16.msra.mxu1 %v4871_v28 }
  0xcf   :  { %1881 = vmatprep.subr.bf16.mxu0 %v4876_v20  ;;  %1922 = vmatprep.subr.bf16.mxu1 %v4882_v29 }
  0xd2   :  { %1882 = vmatpush1.bf16.msra.mxu0 %v4890_v31  ;;  %1923 = vmatpush1.bf16.msra.mxu1 %v4897_v32 }
  0xd3   :  { %1883 = vmatprep.subr.bf16.mxu0 %v4902_v30  ;;  %1924 = vmatprep.subr.bf16.mxu1 %v4909_v33 }
  0xd6   :  { %1884 = vmatpush1.bf16.msra.mxu0 %v4916_v34  ;;  %1925 = vmatpush1.bf16.msra.mxu1 %v4923_v35 }
  0xd7   :  { %1885 = vmatprep.subr.bf16.mxu0 %v4928_v38  ;;  %1926 = vmatprep.subr.bf16.mxu1 %v4934_v36 }
  0xda   :  { %1886 = vmatpush1.bf16.msra.mxu0 %v4942_v37  ;;  %1927 = vmatpush1.bf16.msra.mxu1 %v4949_v39 }
  0xdb   :  { %1887 = vmatprep.subr.bf16.mxu0 %v4954_v48  ;;  %1928 = vmatprep.subr.bf16.mxu1 %v4961_v40  ;;  %v5242_v48 = vshrl.u32 %v159_v14, 7 }
  0xdd   :  { %v169_v40 = vsub.s32 2, %v5242_v48 }
  0xde   :  { %1888 = vmatpush1.bf16.msra.mxu0 %v4968_v41  ;;  %1929 = vmatpush1.bf16.msra.mxu1 %v4975_v42  ;;  %v161_v41 = vsub.s32 0, %v5242_v48 }
  0xdf   :  { %1889 = vmatprep.subr.bf16.mxu0 %v4980_v57  ;;  %1930 = vmatprep.subr.bf16.mxu1 %v4986_v43  ;;  %v5249_v57 = vld [vmem:[%s6521_s4] sm:$0xff] }
  0xe0   :  { %v5260_v14 = vrot.slane %v5249_v57, %v169_v40  ;;  %v5263_v42 = vrot.slane %v5249_v57, %v161_v41 }
  0xe2   :  { %1890 = vmatpush1.bf16.msra.mxu0 %v4994_v44  ;;  %1931 = vmatpush1.bf16.msra.mxu1 %v5001_v45  ;;  %v173_v45 = vsub.s32 3, %v5242_v48 }
  0xe3   :  { %1993 = vmatprep.subr.bf16.mxu0 %v5006_v3  ;;  %2034 = vmatprep.subr.bf16.mxu1 %v5013_v47  ;;  %v165_v3 = vsub.s32 1, %v5242_v48 }
  0xe4   :  { %v5268_v36 = vrot.slane %v5249_v57, %v173_v45 }
  0xe5   :  { %v5271_v38 = vrot.slane %v5249_v57, %v165_v3 }
 0x105   :  { %v5251_v43 = vpop.f32.mrf.mxu0  ;;  %v5255_v44 = vpop.f32.mrf.mxu1 }
 0x107   :  { %v5257_v47 = vpop.f32.mrf.mxu0  ;;  %v5265_v39 = vpop.f32.mrf.mxu1 }
 0x109   :  { %v917_v37 = vpop.f32.mrf.mxu0  ;;  %v990_v34 = vpop.f32.mrf.mxu1 }
 0x10a   :  { %v5274_v35 = vadd.f32 %v917_v37, %v5263_v42  ;;  %v5277_v40 = vadd.f32 %v990_v34, %v5260_v14 }
 0x10b   :  { %v919_v33 = vpop.f32.mrf.mxu0  ;;  %v992_v30 = vpop.f32.mrf.mxu1 }
 0x10c   :  { %6650 = vst [vmem:[#allocation37_spill] sm:$0xff] %v5274_v35  ;;  %6651 = vst [vmem:[#allocation38_spill] sm:$0xff] %v5277_v40  ;;  %v5280_v41 = vadd.f32 %v919_v33, %v5271_v38  ;;  %v5283_v32 = vadd.f32 %v992_v30, %v5268_v36 }
 0x10d   :  { %v923_v45 = vpop.f32.mrf.mxu0  ;;  %v996_v3 = vpop.f32.mrf.mxu1 }
 0x10e   :  { %6652 = vst [vmem:[#allocation39_spill] sm:$0xff] %v5280_v41  ;;  %6653 = vst [vmem:[#allocation40_spill] sm:$0xff] %v5283_v32  ;;  %v5286_v31 = vadd.f32 %v923_v45, %v5263_v42  ;;  %v5289_v37 = vadd.f32 %v996_v3, %v5260_v14 }
 0x10f   :  { %v925_v29 = vpop.f32.mrf.mxu0  ;;  %v998_v34 = vpop.f32.mrf.mxu1 }
 0x110   :  { %6654 = vst [vmem:[#allocation41_spill] sm:$0xff] %v5286_v31  ;;  %6655 = vst [vmem:[#allocation42_spill] sm:$0xff] %v5289_v37  ;;  %v5292_v35 = vadd.f32 %v925_v29, %v5271_v38  ;;  %v5295_v33 = vadd.f32 %v998_v34, %v5268_v36 }
 0x111   :  { %v927_v40 = vpop.f32.mrf.mxu0  ;;  %v1000_v32 = vpop.f32.mrf.mxu1 }
 0x112   :  { %6656 = vst [vmem:[#allocation43_spill] sm:$0xff] %v5292_v35  ;;  %6657 = vst [vmem:[#allocation44_spill] sm:$0xff] %v5295_v33  ;;  %v5298_v30 = vadd.f32 %v927_v40, %v5263_v42  ;;  %v5301_v45 = vadd.f32 %v1000_v32, %v5260_v14 }
 0x113   :  { %v929_v41 = vpop.f32.mrf.mxu0  ;;  %v1002_v3 = vpop.f32.mrf.mxu1 }
 0x114   :  { %6658 = vst [vmem:[#allocation45_spill] sm:$0xff] %v5298_v30  ;;  %6659 = vst [vmem:[#allocation46_spill] sm:$0xff] %v5301_v45  ;;  %v5304_v31 = vadd.f32 %v929_v41, %v5271_v38  ;;  %v5307_v29 = vadd.f32 %v1002_v3, %v5268_v36 }
 0x115   :  { %v933_v37 = vpop.f32.mrf.mxu0  ;;  %v1006_v34 = vpop.f32.mrf.mxu1 }
 0x116   :  { %6660 = vst [vmem:[#allocation47_spill] sm:$0xff] %v5304_v31  ;;  %6661 = vst [vmem:[#allocation48_spill] sm:$0xff] %v5307_v29  ;;  %v5310_v35 = vadd.f32 %v933_v37, %v5263_v42  ;;  %v5313_v40 = vadd.f32 %v1006_v34, %v5260_v14 }
 0x117   :  { %v935_v33 = vpop.f32.mrf.mxu0  ;;  %v1008_v32 = vpop.f32.mrf.mxu1 }
 0x118   :  { %6662 = vst [vmem:[#allocation49_spill] sm:$0xff] %v5310_v35  ;;  %6663 = vst [vmem:[#allocation50_spill] sm:$0xff] %v5313_v40  ;;  %v5316_v30 = vadd.f32 %v935_v33, %v5271_v38  ;;  %v5319_v41 = vadd.f32 %v1008_v32, %v5268_v36 }
 0x119   :  { %v937_v45 = vpop.f32.mrf.mxu0  ;;  %v1010_v3 = vpop.f32.mrf.mxu1 }
 0x11a   :  { %6664 = vst [vmem:[#allocation51_spill] sm:$0xff] %v5316_v30  ;;  %6665 = vst [vmem:[#allocation52_spill] sm:$0xff] %v5319_v41  ;;  %v5322_v31 = vadd.f32 %v937_v45, %v5263_v42  ;;  %v5325_v37 = vadd.f32 %v1010_v3, %v5260_v14 }
 0x11b   :  { %v939_v29 = vpop.f32.mrf.mxu0  ;;  %v1012_v34 = vpop.f32.mrf.mxu1 }
 0x11c   :  { %6666 = vst [vmem:[#allocation53_spill] sm:$0xff] %v5322_v31  ;;  %6667 = vst [vmem:[#allocation54_spill] sm:$0xff] %v5325_v37  ;;  %v5328_v35 = vadd.f32 %v939_v29, %v5271_v38  ;;  %v5331_v33 = vadd.f32 %v1012_v34, %v5268_v36 }
 0x11d   :  { %v943_v40 = vpop.f32.mrf.mxu0  ;;  %v1016_v32 = vpop.f32.mrf.mxu1 }
 0x11e   :  { %6668 = vst [vmem:[#allocation55_spill] sm:$0xff] %v5328_v35  ;;  %6669 = vst [vmem:[#allocation56_spill] sm:$0xff] %v5331_v33  ;;  %v5334_v30 = vadd.f32 %v943_v40, %v5263_v42  ;;  %v5337_v45 = vadd.f32 %v1016_v32, %v5260_v14 }
 0x11f   :  { %v945_v41 = vpop.f32.mrf.mxu0  ;;  %v1018_v3 = vpop.f32.mrf.mxu1 }
 0x120   :  { %6670 = vst [vmem:[#allocation57_spill] sm:$0xff] %v5334_v30  ;;  %6671 = vst [vmem:[#allocation58_spill] sm:$0xff] %v5337_v45  ;;  %v5340_v31 = vadd.f32 %v945_v41, %v5271_v38  ;;  %v5343_v29 = vadd.f32 %v1018_v3, %v5268_v36  ;;  %v177_v45 = vsub.s32 4, %v5242_v48  ;;  %v185_v3 = vsub.s32 6, %v5242_v48 }
 0x121   :  { %v947_v37 = vpop.f32.mrf.mxu0  ;;  %v1020_v34 = vpop.f32.mrf.mxu1 }
 0x122   :  { %6672 = vst [vmem:[#allocation59_spill] sm:$0xff] %v5340_v31  ;;  %6673 = vst [vmem:[#allocation60_spill] sm:$0xff] %v5343_v29  ;;  %v5346_v35 = vadd.f32 %v947_v37, %v5263_v42  ;;  %v5349_v40 = vadd.f32 %v1020_v34, %v5260_v14  ;;  %v181_v29 = vsub.s32 5, %v5242_v48  ;;  %v189_v37 = vsub.s32 7, %v5242_v48 }
 0x123   :  { %v949_v33 = vpop.f32.mrf.mxu0  ;;  %v1022_v32 = vpop.f32.mrf.mxu1  ;;  %v5365_v34 = vrot.slane %v5249_v57, %v185_v3 }
 0x124   :  { %6674 = vst [vmem:[#allocation61_spill] sm:$0xff] %v5346_v35  ;;  %6675 = vst [vmem:[#allocation62_spill] sm:$0xff] %v5349_v40  ;;  %v5352_v30 = vadd.f32 %v949_v33, %v5271_v38  ;;  %v5355_v41 = vadd.f32 %v1022_v32, %v5268_v36  ;;  %v5362_v35 = vrot.slane %v5249_v57, %v177_v45 }
 0x125   :  { %v5368_v33 = vrot.slane %v5249_v57, %v181_v29  ;;  %v5371_v32 = vrot.slane %v5249_v57, %v189_v37 }
 0x126   :  { %6676 = vst [vmem:[#allocation63_spill] sm:$0xff] %v5352_v30  ;;  %6677 = vst [vmem:[#allocation64_spill] sm:$0xff] %v5355_v41 }
 0x145   :  { %v1059_v40 = vpop.f32.mrf.mxu0  ;;  %v1132_v30 = vpop.f32.mrf.mxu1 }
 0x146   :  { %v5374_v41 = vadd.f32 %v1059_v40, %v5362_v35  ;;  %v5377_v31 = vadd.f32 %v1132_v30, %v5365_v34 }
 0x147   :  { %v1061_v48 = vpop.f32.mrf.mxu0  ;;  %v1134_v3 = vpop.f32.mrf.mxu1 }
 0x148   :  { %6678 = vst [vmem:[#allocation65_spill] sm:$0xff] %v5374_v41  ;;  %6679 = vst [vmem:[#allocation66_spill] sm:$0xff] %v5377_v31  ;;  %v5380_v45 = vadd.f32 %v1061_v48, %v5368_v33  ;;  %v5383_v20 = vadd.f32 %v1134_v3, %v5371_v32 }
 0x149   :  { %v1063_v29 = vpop.f32.mrf.mxu0  ;;  %v1136_v57 = vpop.f32.mrf.mxu1 }
 0x14a   :  { %6680 = vst [vmem:[#allocation67_spill] sm:$0xff] %v5380_v45  ;;  %6681 = vst [vmem:[#allocation68_spill] sm:$0xff] %v5383_v20  ;;  %v5386_v28 = vadd.f32 %v1063_v29, %v5362_v35  ;;  %v5389_v40 = vadd.f32 %v1136_v57, %v5365_v34 }
 0x14b   :  { %v1065_v37 = vpop.f32.mrf.mxu0  ;;  %v1138_v31 = vpop.f32.mrf.mxu1 }
 0x14c   :  { %6682 = vst [vmem:[#allocation69_spill] sm:$0xff] %v5386_v28  ;;  %6683 = vst [vmem:[#allocation70_spill] sm:$0xff] %v5389_v40  ;;  %v5392_v30 = vadd.f32 %v1065_v37, %v5368_v33  ;;  %v5395_v48 = vadd.f32 %v1138_v31, %v5371_v32 }
 0x14d   :  { %v1069_v45 = vpop.f32.mrf.mxu0  ;;  %v1142_v20 = vpop.f32.mrf.mxu1 }
 0x14e   :  { %6684 = vst [vmem:[#allocation71_spill] sm:$0xff] %v5392_v30  ;;  %6685 = vst [vmem:[#allocation72_spill] sm:$0xff] %v5395_v48  ;;  %v5398_v3 = vadd.f32 %v1069_v45, %v5362_v35  ;;  %v5401_v29 = vadd.f32 %v1142_v20, %v5365_v34 }
 0x14f   :  { %v1071_v41 = vpop.f32.mrf.mxu0  ;;  %v1144_v40 = vpop.f32.mrf.mxu1 }
 0x150   :  { %6686 = vst [vmem:[#allocation73_spill] sm:$0xff] %v5398_v3  ;;  %6687 = vst [vmem:[#allocation74_spill] sm:$0xff] %v5401_v29  ;;  %v5404_v57 = vadd.f32 %v1071_v41, %v5368_v33  ;;  %v5407_v37 = vadd.f32 %v1144_v40, %v5371_v32 }
 0x151   :  { %v1073_v30 = vpop.f32.mrf.mxu0  ;;  %v1146_v48 = vpop.f32.mrf.mxu1 }
 0x152   :  { %6688 = vst [vmem:[#allocation75_spill] sm:$0xff] %v5404_v57  ;;  %6689 = vst [vmem:[#allocation76_spill] sm:$0xff] %v5407_v37  ;;  %v5410_v31 = vadd.f32 %v1073_v30, %v5362_v35  ;;  %v5413_v45 = vadd.f32 %v1146_v48, %v5365_v34 }
 0x153   :  { %v1075_v28 = vpop.f32.mrf.mxu0  ;;  %v1148_v29 = vpop.f32.mrf.mxu1 }
 0x154   :  { %6690 = vst [vmem:[#allocation77_spill] sm:$0xff] %v5410_v31  ;;  %6691 = vst [vmem:[#allocation78_spill] sm:$0xff] %v5413_v45  ;;  %v5416_v20 = vadd.f32 %v1075_v28, %v5368_v33  ;;  %v5419_v41 = vadd.f32 %v1148_v29, %v5371_v32 }
 0x155   :  { %v1079_v57 = vpop.f32.mrf.mxu0  ;;  %v1152_v37 = vpop.f32.mrf.mxu1 }
 0x156   :  { %6692 = vst [vmem:[#allocation79_spill] sm:$0xff] %v5416_v20  ;;  %6693 = vst [vmem:[#allocation80_spill] sm:$0xff] %v5419_v41  ;;  %v5422_v40 = vadd.f32 %v1079_v57, %v5362_v35  ;;  %v5425_v30 = vadd.f32 %v1152_v37, %v5365_v34 }
 0x157   :  { %v1081_v3 = vpop.f32.mrf.mxu0  ;;  %v1154_v45 = vpop.f32.mrf.mxu1 }
 0x158   :  { %6694 = vst [vmem:[#allocation81_spill] sm:$0xff] %v5422_v40  ;;  %6695 = vst [vmem:[#allocation82_spill] sm:$0xff] %v5425_v30  ;;  %v5428_v48 = vadd.f32 %v1081_v3, %v5368_v33  ;;  %v5431_v28 = vadd.f32 %v1154_v45, %v5371_v32 }
 0x159   :  { %v1083_v20 = vpop.f32.mrf.mxu0  ;;  %v1156_v41 = vpop.f32.mrf.mxu1 }
 0x15a   :  { %6696 = vst [vmem:[#allocation83_spill] sm:$0xff] %v5428_v48  ;;  %6697 = vst [vmem:[#allocation84_spill] sm:$0xff] %v5431_v28  ;;  %v5434_v29 = vadd.f32 %v1083_v20, %v5362_v35  ;;  %v5437_v57 = vadd.f32 %v1156_v41, %v5365_v34 }
 0x15b   :  { %v1085_v31 = vpop.f32.mrf.mxu0  ;;  %v1158_v30 = vpop.f32.mrf.mxu1 }
 0x15c   :  { %6698 = vst [vmem:[#allocation85_spill] sm:$0xff] %v5434_v29  ;;  %6699 = vst [vmem:[#allocation86_spill] sm:$0xff] %v5437_v57  ;;  %v5440_v37 = vadd.f32 %v1085_v31, %v5368_v33  ;;  %v5443_v3 = vadd.f32 %v1158_v30, %v5371_v32 }
 0x15d   :  { %v1089_v48 = vpop.f32.mrf.mxu0  ;;  %v1162_v28 = vpop.f32.mrf.mxu1 }
 0x15e   :  { %6700 = vst [vmem:[#allocation87_spill] sm:$0xff] %v5440_v37  ;;  %6701 = vst [vmem:[#allocation88_spill] sm:$0xff] %v5443_v3  ;;  %v5446_v45 = vadd.f32 %v1089_v48, %v5362_v35  ;;  %v5449_v20 = vadd.f32 %v1162_v28, %v5365_v34  ;;  %v914_v3 = vadd.f32 %v5251_v43, %v5263_v42 }
 0x15f   :  { %v1091_v40 = vpop.f32.mrf.mxu0  ;;  %v1164_v57 = vpop.f32.mrf.mxu1  ;;  %v916_v28 = vadd.f32 %v5257_v47, %v5271_v38  ;;  %v989_v42 = vadd.f32 %v5265_v39, %v5268_v36  ;;  %v987_v38 = vadd.f32 %v5255_v44, %v5260_v14 }
 0x160   :  { %6702 = vst [vmem:[#allocation89_spill] sm:$0xff] %v5446_v45  ;;  %6703 = vst [vmem:[#allocation90_spill] sm:$0xff] %v5449_v20  ;;  %v5452_v41 = vadd.f32 %v1091_v40, %v5368_v33  ;;  %v5455_v31 = vadd.f32 %v1164_v57, %v5371_v32 }
 0x161   :  { %v1093_v37 = vpop.f32.mrf.mxu0  ;;  %v1166_v29 = vpop.f32.mrf.mxu1 }
 0x162   :  { %6704 = vst [vmem:[#allocation91_spill] sm:$0xff] %v5452_v41  ;;  %6705 = vst [vmem:[#allocation92_spill] sm:$0xff] %v5455_v31 }
 0x163   :  { %v1095_v30 = vpop.f32.mrf.mxu0  ;;  %v1168_v48 = vpop.f32.mrf.mxu1 }
 0x165   :  { %v1504_v45 = vpop.f32.mrf.mxu0  ;;  %v1545_v56 = vpop.f32.mrf.mxu1 }
 0x166   :  { %v1552_v20 = vadd.f32 %v1504_v45, %v914_v3  ;;  %v1554_v47 = vadd.f32 %v1545_v56, %v987_v38 }
 0x167   :  { %v1506_v27 = vpop.f32.mrf.mxu0  ;;  %v1547_v10 = vpop.f32.mrf.mxu1 }
 0x168   :  { %v3738_v40 = vmul.f32 -1.442695, %v1552_v20  ;;  %v1553_v41 = vadd.f32 %v1506_v27, %v916_v28  ;;  %v1555_v43 = vadd.f32 %v1547_v10, %v989_v42  ;;  %v1096_v10 = vadd.f32 %v1095_v30, %v5368_v33 }
 0x169   :  { %v1508_v26 = vpop.f32.mrf.mxu0  ;;  %v1549_v31 = vpop.f32.mrf.mxu1  ;;  %v1169_v30 = vadd.f32 %v1168_v48, %v5371_v32 }
 0x16a   :  { %3942 = vpow2.f32 %v3738_v40  ;;  %v3739_v57 = vmul.f32 -1.442695, %v1553_v41  ;;  %v3740_v3 = vmul.f32 -1.442695, %v1555_v43 }
 0x16b   :  { %v1509_v25 = vpop.f32.mrf.mxu0  ;;  %v1550_v24 = vpop.f32.mrf.mxu1 }
 0x16c   :  { %3944 = vpow2.f32 %v3739_v57  ;;  %v1094_v25 = vadd.f32 %v1093_v37, %v5362_v35 }
 0x16d   :  { %3946 = vtanh.f32 %v1554_v47 }
 0x16e   :  { %3948 = vpow2.f32 %v3740_v3 }
 0x177   :  { %v3943_v45 = vpop.eup %3942 }
 0x178   :  { %v1559_v20 = vadd.f32 1.0, %v3943_v45 }
 0x179   :  { %v3945_v27 = vpop.eup %3944 }
 0x17a   :  { %3950 = vrcp.f32 %v1559_v20  ;;  %v1565_v26 = vadd.f32 1.0, %v3945_v27  ;;  %v3947_v24 = vpop.eup %3946  ;;  %v1167_v27 = vadd.f32 %v1166_v29, %v5365_v34 }
 0x17b   :  { %v3949_v31 = vpop.eup %3948 }
 0x17c   :  { %3952 = vrcp.f32 %v1565_v26  ;;  %v1572_v43 = vadd.f32 1.0, %v3949_v31 }
 0x185   :  { %v1784_v41 = vpop.f32.mrf.mxu0  ;;  %v1825_v39 = vpop.f32.mrf.mxu1 }
 0x186   :  { %v1832_v36 = vadd.f32 %v1784_v41, %v1094_v25 }
 0x187   :  { %v3951_v44 = vpop.eup %3950  ;;  %v1786_v56 = vpop.f32.mrf.mxu0 }
 0x188   :  { %v1576_v14 = vmul.f32 %v3951_v44, %v3947_v24  ;;  %v3773_v28 = vmul.f32 -1.442695, %v1832_v36  ;;  %v1833_v40 = vadd.f32 %v1786_v56, %v1096_v10  ;;  %v1827_v57 = vpop.f32.mrf.mxu1  ;;  %v1834_v24 = vadd.f32 %v1825_v39, %v1167_v27  ;;  %v6717_v27 = vld [vmem:[#allocation15_spill] sm:$0xff] }
 0x189   :  { %v3953_v42 = vpop.eup %3952  ;;  %v1788_v38 = vpop.f32.mrf.mxu0  ;;  %v1835_v20 = vadd.f32 %v1827_v57, %v1169_v30  ;;  %v6710_v30 = vld [vmem:[#allocation8_spill] sm:$0xff] }
 0x18a   :  { %v1575_v47 = vmul.f32 0.0, %v3953_v42  ;;  %3954 = vpow2.f32 %v3773_v28  ;;  %v3774_v3 = vmul.f32 -1.442695, %v1833_v40  ;;  %v1829_v35 = vpop.f32.mrf.mxu1  ;;  %v6706_v42 = vld [vmem:[#allocation35_spill] sm:$0xff]  ;;  %v6707_v38 = vld [vmem:[#allocation36_spill] sm:$0xff] }
 0x18b   :  { %v1789_v37 = vpop.f32.mrf.mxu0  ;;  %v3775_v26 = vmul.f32 -1.442695, %v1835_v20  ;;  %v6713_v20 = vld [vmem:[#allocation11_spill] sm:$0xff] }
 0x18c   :  { %v5467_v45 = vadd.f32 %v1576_v14, %v1575_v47  ;;  %3956 = vpow2.f32 %v3774_v3  ;;  %v1830_v33 = vpop.f32.mrf.mxu1  ;;  %v6708_v37 = vld [vmem:[#allocation6_spill] sm:$0xff] }
 0x18d   :  { %3958 = vrcp.f32 %v1572_v43  ;;  %v6709_v33 = vld [vmem:[#allocation7_spill] sm:$0xff] }
 0x18e   :  { %3960 = vtanh.f32 %v5467_v45 }
 0x18f   :  { %3962 = vpow2.f32 %v3775_v26  ;;  %v6718_v26 = vld [vmem:[#allocation16_spill] sm:$0xff] }
 0x197   :  { %v3955_v25 = vpop.eup %3954 }
 0x198   :  { %v1839_v41 = vadd.f32 1.0, %v3955_v25  ;;  %v6719_v25 = vld [vmem:[#allocation17_spill] sm:$0xff] }
 0x199   :  { %v3957_v31 = vpop.eup %3956 }
 0x19a   :  { %v3959_v10 = vpop.eup %3958  ;;  %3964 = vrcp.f32 %v1839_v41  ;;  %v1845_v36 = vadd.f32 1.0, %v3957_v31  ;;  %v6721_v41 = vld [vmem:[#allocation19_spill] sm:$0xff]  ;;  %v6722_v31 = vld [vmem:[#allocation20_spill] sm:$0xff] }
 0x19b   :  { %v3961_v44 = vpop.eup %3960  ;;  %3966 = vtanh.f32 %v1834_v24  ;;  %v6720_v24 = vld [vmem:[#allocation18_spill] sm:$0xff] }
 0x19c   :  { %3968 = vrcp.f32 %v1845_v36  ;;  %v1579_v56 = vmul.f32 %v3961_v44, %v3959_v10  ;;  %v3963_v34 = vpop.eup %3962  ;;  %v6723_v10 = vld [vmem:[#allocation21_spill] sm:$0xff]  ;;  %v6724_v36 = vld [vmem:[#allocation22_spill] sm:$0xff]  ;;  %v6725_v44 = vld [vmem:[#allocation23_spill] sm:$0xff] }
 0x19d   :  { %v1852_v14 = vadd.f32 1.0, %v3963_v34  ;;  %v6728_v34 = vld [vmem:[#allocation26_spill] sm:$0xff] }
 0x19e   :  { %1864 = vst [vmem:[%s6522_s5] sm:$0xff] %v1579_v56  ;;  %v1874_v32 = vpack.c.bf16 %v1579_v56, %v1579_v56  ;;  %v6726_v56 = vld [vmem:[#allocation24_spill] sm:$0xff] }
 0x19f   :  { %3970 = vrcp.f32 %v1852_v14  ;;  %v6732_v14 = vld [vmem:[#allocation30_spill] sm:$0xff] }
 0x1a0   :  { %1908 = vmatmul.mubr.bf16.vlgmr.msra.gmra.mxu0 %v1874_v32  ;;  %1949 = vmatmul.mubr.bf16.vlgmr.msra.gmra.mxu1 %v1874_v32  ;;  %v6727_v32 = vld [vmem:[#allocation25_spill] sm:$0xff] }
 0x1a1   :  { %1994 = vmatpush1.bf16.msra.mxu0 %v5020_v49  ;;  %2035 = vmatpush1.bf16.msra.mxu1 %v5027_v50 }
 0x1a2   :  { %1995 = vmatprep.subr.bf16.mxu0 %v5032_v51  ;;  %2036 = vmatprep.subr.bf16.mxu1 %v5038_v52 }
 0x1a3   :  { %2025 = vmatprep.mubr.bf16.mxu0 %v6649_v17  ;;  %2066 = vmatprep.mubr.bf16.mxu1 %v6649_v17 }
 0x1a5   :  { %1996 = vmatpush1.bf16.msra.mxu0 %v5046_v54  ;;  %2037 = vmatpush1.bf16.msra.mxu1 %v5053_v55 }
 0x1a6   :  { %1997 = vmatprep.subr.bf16.mxu0 %v5058_v58  ;;  %2038 = vmatprep.subr.bf16.mxu1 %v5064_v59 }
 0x1a7   :  { %v3965_v29 = vpop.eup %3964 }
 0x1a8   :  { %v3967_v48 = vpop.eup %3966 }
 0x1a9   :  { %v3969_v39 = vpop.eup %3968  ;;  %1998 = vmatpush1.bf16.msra.mxu0 %v5072_v60  ;;  %2039 = vmatpush1.bf16.msra.mxu1 %v5079_v61  ;;  %v1856_v40 = vmul.f32 %v3967_v48, %v3965_v29  ;;  %v6729_v29 = vld [vmem:[#allocation27_spill] sm:$0xff]  ;;  %v6730_v48 = vld [vmem:[#allocation28_spill] sm:$0xff] }
 0x1aa   :  { %v1855_v28 = vmul.f32 0.0, %v3969_v39  ;;  %1999 = vmatprep.subr.bf16.mxu0 %v5084_v62  ;;  %2040 = vmatprep.subr.bf16.mxu1 %v5090_v63  ;;  %v6731_v39 = vld [vmem:[#allocation29_spill] sm:$0xff] }
 0x1ac   :  { %v5489_v57 = vadd.f32 %v1856_v40, %v1855_v28  ;;  %v3971_v43 = vpop.eup %3970  ;;  %v6733_v28 = vld [vmem:[#allocation31_spill] sm:$0xff]  ;;  %v6734_v40 = vld [vmem:[#allocation32_spill] sm:$0xff] }
 0x1ad   :  { %2000 = vmatpush1.bf16.msra.mxu0 %v5096_v0  ;;  %2041 = vmatpush1.bf16.msra.mxu1 %v5103_v1 }
 0x1ae   :  { %3972 = vtanh.f32 %v5489_v57  ;;  %2001 = vmatprep.subr.bf16.mxu0 %v5108_v2  ;;  %2042 = vmatprep.subr.bf16.mxu1 %v5114_v4 }
 0x1b1   :  { %2002 = vmatpush1.bf16.msra.mxu0 %v5120_v5  ;;  %2043 = vmatpush1.bf16.msra.mxu1 %v5127_v6 }
 0x1b2   :  { %2003 = vmatprep.subr.bf16.mxu0 %v5132_v7  ;;  %2044 = vmatprep.subr.bf16.mxu1 %v5138_v8 }
 0x1b5   :  { %2004 = vmatpush1.bf16.msra.mxu0 %v5144_v9  ;;  %2045 = vmatpush1.bf16.msra.mxu1 %v5151_v11 }
 0x1b6   :  { %2005 = vmatprep.subr.bf16.mxu0 %v5156_v12  ;;  %2046 = vmatprep.subr.bf16.mxu1 %v5162_v13 }
 0x1b9   :  { %2006 = vmatpush1.bf16.msra.mxu0 %v6706_v42  ;;  %2047 = vmatpush1.bf16.msra.mxu1 %v5175_v15 }
 0x1ba   :  { %2007 = vmatprep.subr.bf16.mxu0 %v5180_v16  ;;  %2048 = vmatprep.subr.bf16.mxu1 %v6707_v38 }
 0x1bb   :  { %v3973_v47 = vpop.eup %3972 }
 0x1bc   :  { %v1859_v3 = vmul.f32 %v3973_v47, %v3971_v43  ;;  %v6735_v43 = vld [vmem:[#allocation33_spill] sm:$0xff]  ;;  %v6736_v47 = vld [vmem:[#allocation34_spill] sm:$0xff] }
 0x1bd   :  { %2008 = vmatpush1.bf16.msra.mxu0 %v5192_v46  ;;  %2049 = vmatpush1.bf16.msra.mxu1 %v5199_v53 }
 0x1be   :  { %3776 = vst [vmem:[%s6522_s5 + $0x78] sm:$0xff] %v1859_v3  ;;  %v1992_v35 = vpack.c.bf16 %v1859_v3, %v1859_v3  ;;  %2119 = vmatprep.subr.bf16.mxu0 %v4803_v18  ;;  %2160 = vmatprep.subr.bf16.mxu1 %v4808_v19  ;;  %v6711_v18 = vld [vmem:[#allocation9_spill] sm:$0xff]  ;;  %v6712_v19 = vld [vmem:[#allocation10_spill] sm:$0xff] }
 0x1c0   :  { %2026 = vmatmul.mubr.bf16.vlgmr.msra.gmra.mxu0 %v1992_v35  ;;  %2067 = vmatmul.mubr.bf16.vlgmr.msra.gmra.mxu1 %v1992_v35 }
 0x1c1   :  { %2120 = vmatpush1.bf16.msra.mxu0 %v4813_v21  ;;  %2161 = vmatpush1.bf16.msra.mxu1 %v4819_v22  ;;  %v6714_v21 = vld [vmem:[#allocation12_spill] sm:$0xff]  ;;  %v6715_v22 = vld [vmem:[#allocation13_spill] sm:$0xff] }
 0x1c2   :  { %2121 = vmatprep.subr.bf16.mxu0 %v4824_v23  ;;  %2162 = vmatprep.subr.bf16.mxu1 %v6708_v37  ;;  %v6716_v23 = vld [vmem:[#allocation14_spill] sm:$0xff]  ;;  %v6737_v37 = vld [vmem:[#allocation37_spill] sm:$0xff] }
 0x1c3   :  { %2151 = vmatprep.mubr.bf16.mxu0 %v6649_v17  ;;  %2192 = vmatprep.mubr.bf16.mxu1 %v6649_v17 }
 0x1c5   :  { %2122 = vmatpush1.bf16.msra.mxu0 %v6709_v33  ;;  %2163 = vmatpush1.bf16.msra.mxu1 %v6710_v30 }
 0x1c6   :  { %2123 = vmatprep.subr.bf16.mxu0 %v6711_v18  ;;  %2164 = vmatprep.subr.bf16.mxu1 %v6712_v19 }
 0x1c9   :  { %2124 = vmatpush1.bf16.msra.mxu0 %v6713_v20  ;;  %2165 = vmatpush1.bf16.msra.mxu1 %v6714_v21  ;;  %v6738_v20 = vld [vmem:[#allocation39_spill] sm:$0xff] }
 0x1ca   :  { %2125 = vmatprep.subr.bf16.mxu0 %v6715_v22  ;;  %2166 = vmatprep.subr.bf16.mxu1 %v6716_v23 }
 0x1cd   :  { %2126 = vmatpush1.bf16.msra.mxu0 %v6717_v27  ;;  %2167 = vmatpush1.bf16.msra.mxu1 %v6718_v26 }
 0x1ce   :  { %2127 = vmatprep.subr.bf16.mxu0 %v6719_v25  ;;  %2168 = vmatprep.subr.bf16.mxu1 %v6720_v24  ;;  %v6739_v24 = vld [vmem:[#allocation40_spill] sm:$0xff] }
 0x1d1   :  { %2128 = vmatpush1.bf16.msra.mxu0 %v6721_v41  ;;  %2169 = vmatpush1.bf16.msra.mxu1 %v6722_v31  ;;  %v6740_v31 = vld [vmem:[#allocation38_spill] sm:$0xff] }
 0x1d2   :  { %2129 = vmatprep.subr.bf16.mxu0 %v6723_v10  ;;  %2170 = vmatprep.subr.bf16.mxu1 %v6724_v36 }
 0x1d5   :  { %2130 = vmatpush1.bf16.msra.mxu0 %v6725_v44  ;;  %2171 = vmatpush1.bf16.msra.mxu1 %v6726_v56 }
 0x1d6   :  { %2131 = vmatprep.subr.bf16.mxu0 %v6727_v32  ;;  %2172 = vmatprep.subr.bf16.mxu1 %v6728_v34 }
 0x1d9   :  { %2132 = vmatpush1.bf16.msra.mxu0 %v6729_v29  ;;  %2173 = vmatpush1.bf16.msra.mxu1 %v6730_v48 }
 0x1da   :  { %2133 = vmatprep.subr.bf16.mxu0 %v6731_v39  ;;  %2174 = vmatprep.subr.bf16.mxu1 %v6732_v14 }
 0x1dd   :  { %2134 = vmatpush1.bf16.msra.mxu0 %v6733_v28  ;;  %2175 = vmatpush1.bf16.msra.mxu1 %v6734_v40  ;;  %v6741_v28 = vld [vmem:[#allocation89_spill] sm:$0xff] }
 0x1de   :  { %2237 = vmatprep.subr.bf16.mxu0 %v6735_v43  ;;  %2278 = vmatprep.subr.bf16.mxu1 %v6736_v47 }
 0x260   :  { %v1909_v3 = vpop.f32.mrf.mxu0  ;;  %v1950_v35 = vpop.f32.mrf.mxu1 }
 0x261   :  { %v1957_v33 = vadd.f32 %v1909_v3, %v6737_v37  ;;  %v1959_v10 = vadd.f32 %v1950_v35, %v6740_v31  ;;  %v6744_v31 = vld [vmem:[#allocation90_spill] sm:$0xff] }
 0x262   :  { %v1911_v30 = vpop.f32.mrf.mxu0  ;;  %v1952_v18 = vpop.f32.mrf.mxu1 }
 0x263   :  { %v3777_v19 = vmul.f32 -1.442695, %v1957_v33  ;;  %v1958_v21 = vadd.f32 %v1911_v30, %v6738_v20  ;;  %v1960_v41 = vadd.f32 %v1952_v18, %v6739_v24  ;;  %v6742_v33 = vld [vmem:[#allocation91_spill] sm:$0xff]  ;;  %v6743_v24 = vld [vmem:[#allocation92_spill] sm:$0xff] }
 0x264   :  { %v1913_v22 = vpop.f32.mrf.mxu0  ;;  %v1954_v23 = vpop.f32.mrf.mxu1 }
 0x265   :  { %3974 = vpow2.f32 %v3777_v19  ;;  %v3778_v27 = vmul.f32 -1.442695, %v1958_v21  ;;  %v3779_v36 = vmul.f32 -1.442695, %v1960_v41 }
 0x266   :  { %v1914_v26 = vpop.f32.mrf.mxu0  ;;  %v1955_v25 = vpop.f32.mrf.mxu1 }
 0x267   :  { %3976 = vpow2.f32 %v3778_v27 }
 0x268   :  { %3978 = vtanh.f32 %v1959_v10 }
 0x269   :  { %3980 = vpow2.f32 %v3779_v36 }
 0x272   :  { %v3975_v44 = vpop.eup %3974 }
 0x273   :  { %v1964_v56 = vadd.f32 1.0, %v3975_v44 }
 0x274   :  { %v3977_v32 = vpop.eup %3976 }
 0x275   :  { %3982 = vrcp.f32 %v1964_v56  ;;  %v1970_v34 = vadd.f32 1.0, %v3977_v32  ;;  %v3979_v29 = vpop.eup %3978 }
 0x276   :  { %v3981_v14 = vpop.eup %3980 }
 0x277   :  { %3984 = vrcp.f32 %v1970_v34  ;;  %v1977_v19 = vadd.f32 1.0, %v3981_v14 }
 0x280   :  { %v2027_v48 = vpop.f32.mrf.mxu0  ;;  %v2068_v39 = vpop.f32.mrf.mxu1 }
 0x281   :  { %v2075_v40 = vadd.f32 %v2027_v48, %v6741_v28  ;;  %v2077_v10 = vadd.f32 %v2068_v39, %v6744_v31 }
 0x282   :  { %v3983_v43 = vpop.eup %3982  ;;  %v2029_v47 = vpop.f32.mrf.mxu0 }
 0x283   :  { %v2070_v3 = vpop.f32.mrf.mxu1  ;;  %v1981_v37 = vmul.f32 %v3983_v43, %v3979_v29  ;;  %v3780_v35 = vmul.f32 -1.442695, %v2075_v40  ;;  %v2076_v30 = vadd.f32 %v2029_v47, %v6742_v33  ;;  %v5740_v43 = vld [vmem:[%s6519_s2 + $0x40] ss:$16 sps:$4 sm:$0xff]   ;;  %v5746_v47 = vld [vmem:[%s6519_s2 + $0x48] ss:$16 sps:$4 sm:$0xff]  }
 0x284   :  { %v3985_v18 = vpop.eup %3984  ;;  %v2031_v20 = vpop.f32.mrf.mxu0  ;;  %v2078_v41 = vadd.f32 %v2070_v3, %v6743_v24  ;;  %6758 = vst [vmem:[#allocation17_spill] sm:$0xff] %v5740_v43  ;;  %6759 = vst [vmem:[#allocation18_spill] sm:$0xff] %v5746_v47  ;;  %v5752_v3 = vld [vmem:[%s6519_s2 + $0x24] ss:$16 sps:$4 sm:$0xff]   ;;  %v5770_v33 = vld [vmem:[%s6519_s2 + $0x28] ss:$16 sps:$4 sm:$0xff]  }
 0x285   :  { %v2072_v21 = vpop.f32.mrf.mxu1  ;;  %v1980_v22 = vmul.f32 %v3985_v18, %v5467_v45  ;;  %3986 = vpow2.f32 %v3780_v35  ;;  %v3781_v23 = vmul.f32 -1.442695, %v2076_v30  ;;  %6760 = vst [vmem:[#allocation19_spill] sm:$0xff] %v5752_v3  ;;  %v5764_v35 = vld [vmem:[%s6519_s2 + $0x20] ss:$16 sps:$4 sm:$0xff]   ;;  %6763 = vst [vmem:[#allocation22_spill] sm:$0xff] %v5770_v33 }
 0x286   :  { %v2032_v27 = vpop.f32.mrf.mxu0  ;;  %v3782_v36 = vmul.f32 -1.442695, %v2078_v41  ;;  %6762 = vst [vmem:[#allocation21_spill] sm:$0xff] %v5764_v35  ;;  %v5776_v30 = vld [vmem:[%s6519_s2 + $0x4] ss:$16 sps:$4 sm:$0xff]  }
 0x287   :  { %v2073_v26 = vpop.f32.mrf.mxu1  ;;  %v5556_v25 = vadd.f32 %v1981_v37, %v1980_v22  ;;  %3988 = vpow2.f32 %v3781_v23  ;;  %v5758_v37 = vld [vmem:[%s6519_s2 + $0x2c] ss:$16 sps:$4 sm:$0xff]   ;;  %6764 = vst [vmem:[#allocation23_spill] sm:$0xff] %v5776_v30  ;;  %v5794_v20 = vld [vmem:[%s6519_s2 + $0x8] ss:$16 sps:$4 sm:$0xff]  }
 0x288   :  { %3990 = vrcp.f32 %v1977_v19  ;;  %6761 = vst [vmem:[#allocation20_spill] sm:$0xff] %v5758_v37  ;;  %v5782_v18 = vld [vmem:[%s6519_s2 + $0xc] ss:$16 sps:$4 sm:$0xff]   ;;  %v5788_v19 = vld [vmem:[%s6519_s2] ss:$16 sps:$4 sm:$0xff]   ;;  %6767 = vst [vmem:[#allocation26_spill] sm:$0xff] %v5794_v20 }
 0x289   :  { %3992 = vtanh.f32 %v5556_v25  ;;  %6765 = vst [vmem:[#allocation24_spill] sm:$0xff] %v5782_v18  ;;  %6766 = vst [vmem:[#allocation25_spill] sm:$0xff] %v5788_v19  ;;  %v5800_v21 = vld [vmem:[%s6520_s3 + $0xe4] ss:$16 sps:$4 sm:$0xff]   ;;  %v5806_v22 = vld [vmem:[%s6520_s3 + $0xec] ss:$16 sps:$4 sm:$0xff]  }
 0x28a   :  { %3994 = vtanh.f32 %v2077_v10  ;;  %6768 = vst [vmem:[#allocation27_spill] sm:$0xff] %v5800_v21  ;;  %6769 = vst [vmem:[#allocation28_spill] sm:$0xff] %v5806_v22  ;;  %v6770_v26 = vld [vmem:[#allocation41_spill] sm:$0xff] }
 0x28b   :  { %3996 = vpow2.f32 %v3782_v36  ;;  %v6771_v36 = vld [vmem:[#allocation43_spill] sm:$0xff] }
 0x292   :  { %v3987_v44 = vpop.eup %3986 }
 0x293   :  { %v2082_v56 = vadd.f32 1.0, %v3987_v44 }
 0x294   :  { %v3989_v32 = vpop.eup %3988 }
 0x295   :  { %v3991_v45 = vpop.eup %3990  ;;  %3998 = vrcp.f32 %v2082_v56  ;;  %v2088_v34 = vadd.f32 1.0, %v3989_v32 }
 0x296   :  { %v3993_v29 = vpop.eup %3992 }
 0x297   :  { %4000 = vrcp.f32 %v2088_v34  ;;  %v1984_v48 = vmul.f32 %v3993_v29, %v3991_v45  ;;  %v3995_v39 = vpop.eup %3994 }
 0x298   :  { %v3997_v28 = vpop.eup %3996 }
 0x299   :  { %3783 = vst [vmem:[%s6522_s5 + $0x10] sm:$0xff] %v1984_v48  ;;  %v2118_v14 = vpack.c.bf16 %v1984_v48, %v1984_v48  ;;  %v6772_v48 = vld [vmem:[#allocation44_spill] sm:$0xff] }
 0x29b   :  { %2152 = vmatmul.mubr.bf16.vlgmr.msra.gmra.mxu0 %v2118_v14  ;;  %2193 = vmatmul.mubr.bf16.vlgmr.msra.gmra.mxu1 %v2118_v14 }
 0x29c   :  { %2238 = vmatpush1.bf16.msra.mxu0 %v5020_v49  ;;  %2279 = vmatpush1.bf16.msra.mxu1 %v5027_v50 }
 0x29d   :  { %2239 = vmatprep.subr.bf16.mxu0 %v5032_v51  ;;  %2280 = vmatprep.subr.bf16.mxu1 %v5038_v52  ;;  %v2095_v51 = vadd.f32 1.0, %v3997_v28 }
 0x29e   :  { %2269 = vmatprep.mubr.bf16.mxu0 %v6649_v17  ;;  %2310 = vmatprep.mubr.bf16.mxu1 %v6649_v17 }
 0x29f   :  { %4002 = vrcp.f32 %v2095_v51 }
 0x2a0   :  { %2240 = vmatpush1.bf16.msra.mxu0 %v5046_v54  ;;  %2281 = vmatpush1.bf16.msra.mxu1 %v5053_v55 }
 0x2a1   :  { %2241 = vmatprep.subr.bf16.mxu0 %v5058_v58  ;;  %2282 = vmatprep.subr.bf16.mxu1 %v5064_v59 }
 0x2a2   :  { %v3999_v49 = vpop.eup %3998 }
 0x2a3   :  { %v2099_v50 = vmul.f32 %v3999_v49, %v3995_v39  ;;  %v6773_v39 = vld [vmem:[#allocation42_spill] sm:$0xff] }
 0x2a4   :  { %v4001_v40 = vpop.eup %4000  ;;  %2242 = vmatpush1.bf16.msra.mxu0 %v5072_v60  ;;  %2283 = vmatpush1.bf16.msra.mxu1 %v5079_v61  ;;  %v5606_v61 = vld [vmem:[%s6519_s2 + $0xe4] ss:$16 sps:$4 sm:$0xff]  }
 0x2a5   :  { %v2098_v52 = vmul.f32 %v4001_v40, %v5489_v57  ;;  %2243 = vmatprep.subr.bf16.mxu0 %v5084_v62  ;;  %2284 = vmatprep.subr.bf16.mxu1 %v5090_v63  ;;  %v5612_v62 = vld [vmem:[%s6519_s2 + $0xec] ss:$16 sps:$4 sm:$0xff]   ;;  %v5630_v63 = vld [vmem:[%s6519_s2 + $0xc4] ss:$16 sps:$4 sm:$0xff]   ;;  %v5722_v57 = vld [vmem:[%s6519_s2 + $0x68] ss:$16 sps:$4 sm:$0xff]  }
 0x2a6   :  { %6755 = vst [vmem:[#allocation14_spill] sm:$0xff] %v5722_v57 }
 0x2a7   :  { %v5579_v54 = vadd.f32 %v2099_v50, %v2098_v52 }
 0x2a8   :  { %2244 = vmatpush1.bf16.msra.mxu0 %v5096_v0  ;;  %2285 = vmatpush1.bf16.msra.mxu1 %v5103_v1  ;;  %v5636_v0 = vld [vmem:[%s6519_s2 + $0xcc] ss:$16 sps:$4 sm:$0xff]   ;;  %v5644_v1 = vld [vmem:[%s6519_s2 + $0xc0] ss:$16 sps:$4 sm:$0xff]  }
 0x2a9   :  { %2245 = vmatprep.subr.bf16.mxu0 %v5108_v2  ;;  %2286 = vmatprep.subr.bf16.mxu1 %v5114_v4  ;;  %4004 = vtanh.f32 %v5579_v54  ;;  %v5650_v2 = vld [vmem:[%s6519_s2 + $0xc8] ss:$16 sps:$4 sm:$0xff]   ;;  %v5656_v4 = vld [vmem:[%s6519_s2 + $0xa4] ss:$16 sps:$4 sm:$0xff]  }
 0x2ac   :  { %2246 = vmatpush1.bf16.msra.mxu0 %v5120_v5  ;;  %2287 = vmatpush1.bf16.msra.mxu1 %v5127_v6  ;;  %v4003_v55 = vpop.eup %4002  ;;  %v5662_v5 = vld [vmem:[%s6519_s2 + $0xac] ss:$16 sps:$4 sm:$0xff]   ;;  %v5668_v6 = vld [vmem:[%s6519_s2 + $0xa0] ss:$16 sps:$4 sm:$0xff]  }
 0x2ad   :  { %2247 = vmatprep.subr.bf16.mxu0 %v5132_v7  ;;  %2288 = vmatprep.subr.bf16.mxu1 %v5138_v8  ;;  %6745 = vst [vmem:[#allocation35_spill] sm:$0xff] %v5662_v5  ;;  %6746 = vst [vmem:[#allocation36_spill] sm:$0xff] %v5668_v6  ;;  %v5674_v7 = vld [vmem:[%s6519_s2 + $0xa8] ss:$16 sps:$4 sm:$0xff]   ;;  %v5680_v8 = vld [vmem:[%s6519_s2 + $0x84] ss:$16 sps:$4 sm:$0xff]  }
 0x2ae   :  { %6747 = vst [vmem:[#allocation6_spill] sm:$0xff] %v5674_v7  ;;  %6748 = vst [vmem:[#allocation7_spill] sm:$0xff] %v5680_v8 }
 0x2b0   :  { %2248 = vmatpush1.bf16.msra.mxu0 %v5144_v9  ;;  %2289 = vmatpush1.bf16.msra.mxu1 %v5151_v11  ;;  %v5686_v9 = vld [vmem:[%s6519_s2 + $0x8c] ss:$16 sps:$4 sm:$0xff]   ;;  %v5692_v11 = vld [vmem:[%s6519_s2 + $0x80] ss:$16 sps:$4 sm:$0xff]  }
 0x2b1   :  { %2249 = vmatprep.subr.bf16.mxu0 %v5156_v12  ;;  %2290 = vmatprep.subr.bf16.mxu1 %v5162_v13  ;;  %6749 = vst [vmem:[#allocation8_spill] sm:$0xff] %v5686_v9  ;;  %6750 = vst [vmem:[#allocation9_spill] sm:$0xff] %v5692_v11  ;;  %v5698_v12 = vld [vmem:[%s6519_s2 + $0x88] ss:$16 sps:$4 sm:$0xff]   ;;  %v5704_v13 = vld [vmem:[%s6519_s2 + $0x64] ss:$16 sps:$4 sm:$0xff]  }
 0x2b2   :  { %6751 = vst [vmem:[#allocation10_spill] sm:$0xff] %v5698_v12  ;;  %6752 = vst [vmem:[#allocation11_spill] sm:$0xff] %v5704_v13 }
 0x2b4   :  { %2250 = vmatpush1.bf16.msra.mxu0 %v6706_v42  ;;  %2291 = vmatpush1.bf16.msra.mxu1 %v5175_v15  ;;  %v5710_v15 = vld [vmem:[%s6519_s2 + $0x6c] ss:$16 sps:$4 sm:$0xff]   ;;  %v5728_v42 = vld [vmem:[%s6519_s2 + $0x44] ss:$16 sps:$4 sm:$0xff]  }
 0x2b5   :  { %2251 = vmatprep.subr.bf16.mxu0 %v5180_v16  ;;  %2292 = vmatprep.subr.bf16.mxu1 %v6707_v38  ;;  %6753 = vst [vmem:[#allocation12_spill] sm:$0xff] %v5710_v15  ;;  %v5716_v16 = vld [vmem:[%s6519_s2 + $0x60] ss:$16 sps:$4 sm:$0xff]   ;;  %6756 = vst [vmem:[#allocation15_spill] sm:$0xff] %v5728_v42  ;;  %v5734_v38 = vld [vmem:[%s6519_s2 + $0x4c] ss:$16 sps:$4 sm:$0xff]  }
 0x2b6   :  { %v4005_v58 = vpop.eup %4004  ;;  %6754 = vst [vmem:[#allocation13_spill] sm:$0xff] %v5716_v16  ;;  %6757 = vst [vmem:[#allocation16_spill] sm:$0xff] %v5734_v38 }
 0x2b7   :  { %v2102_v59 = vmul.f32 %v4005_v58, %v4003_v55 }
 0x2b8   :  { %2252 = vmatpush1.bf16.msra.mxu0 %v5192_v46  ;;  %2293 = vmatpush1.bf16.msra.mxu1 %v5199_v53  ;;  %v5618_v46 = vld [vmem:[%s6519_s2 + $0xe0] ss:$16 sps:$4 sm:$0xff]   ;;  %v5624_v53 = vld [vmem:[%s6519_s2 + $0xe8] ss:$16 sps:$4 sm:$0xff]  }
 0x2b9   :  { %3784 = vst [vmem:[%s6522_s5 + $0x68] sm:$0xff] %v2102_v59  ;;  %v2236_v60 = vpack.c.bf16 %v2102_v59, %v2102_v59  ;;  %2363 = vmatprep.subr.bf16.mxu0 %v5606_v61  ;;  %2404 = vmatprep.subr.bf16.mxu1 %v5612_v62 }
 0x2bb   :  { %2270 = vmatmul.mubr.bf16.vlgmr.msra.gmra.mxu0 %v2236_v60  ;;  %2311 = vmatmul.mubr.bf16.vlgmr.msra.gmra.mxu1 %v2236_v60 }
 0x2bc   :  { %2364 = vmatpush1.bf16.msra.mxu0 %v5618_v46  ;;  %2405 = vmatpush1.bf16.msra.mxu1 %v5624_v53 }
 0x2bd   :  { %2365 = vmatprep.subr.bf16.mxu0 %v5630_v63  ;;  %2406 = vmatprep.subr.bf16.mxu1 %v5636_v0 }
 0x2be   :  { %2395 = vmatprep.mubr.bf16.mxu0 %v6649_v17  ;;  %2436 = vmatprep.mubr.bf16.mxu1 %v6649_v17 }
 0x2c0   :  { %2366 = vmatpush1.bf16.msra.mxu0 %v5644_v1  ;;  %2407 = vmatpush1.bf16.msra.mxu1 %v5650_v2 }
 0x2c1   :  { %2367 = vmatprep.subr.bf16.mxu0 %v5656_v4  ;;  %2408 = vmatprep.subr.bf16.mxu1 %v5662_v5 }
 0x2c4   :  { %2368 = vmatpush1.bf16.msra.mxu0 %v5668_v6  ;;  %2409 = vmatpush1.bf16.msra.mxu1 %v5674_v7 }
 0x2c5   :  { %2369 = vmatprep.subr.bf16.mxu0 %v5680_v8  ;;  %2410 = vmatprep.subr.bf16.mxu1 %v5686_v9 }
 0x2c8   :  { %2370 = vmatpush1.bf16.msra.mxu0 %v5692_v11  ;;  %2411 = vmatpush1.bf16.msra.mxu1 %v5698_v12 }
 0x2c9   :  { %2371 = vmatprep.subr.bf16.mxu0 %v5704_v13  ;;  %2412 = vmatprep.subr.bf16.mxu1 %v5710_v15 }
 0x2cc   :  { %2372 = vmatpush1.bf16.msra.mxu0 %v5716_v16  ;;  %2413 = vmatpush1.bf16.msra.mxu1 %v5722_v57 }
 0x2cd   :  { %2373 = vmatprep.subr.bf16.mxu0 %v5728_v42  ;;  %2414 = vmatprep.subr.bf16.mxu1 %v5734_v38 }
 0x2d0   :  { %2374 = vmatpush1.bf16.msra.mxu0 %v5740_v43  ;;  %2415 = vmatpush1.bf16.msra.mxu1 %v5746_v47 }
 0x2d1   :  { %2375 = vmatprep.subr.bf16.mxu0 %v5752_v3  ;;  %2416 = vmatprep.subr.bf16.mxu1 %v5758_v37 }
 0x2d4   :  { %2376 = vmatpush1.bf16.msra.mxu0 %v5764_v35  ;;  %2417 = vmatpush1.bf16.msra.mxu1 %v5770_v33 }
 0x2d5   :  { %2377 = vmatprep.subr.bf16.mxu0 %v5776_v30  ;;  %2418 = vmatprep.subr.bf16.mxu1 %v5782_v18 }
 0x2d8   :  { %2378 = vmatpush1.bf16.msra.mxu0 %v5788_v19  ;;  %2419 = vmatpush1.bf16.msra.mxu1 %v5794_v20 }
 0x2d9   :  { %2481 = vmatprep.subr.bf16.mxu0 %v5800_v21  ;;  %2522 = vmatprep.subr.bf16.mxu1 %v5806_v22 }
 0x35b   :  { %v2153_v23 = vpop.f32.mrf.mxu0  ;;  %v2194_v27 = vpop.f32.mrf.mxu1 }
 0x35c   :  { %v2201_v24 = vadd.f32 %v2153_v23, %v6770_v26  ;;  %v2203_v28 = vadd.f32 %v2194_v27, %v6773_v39  ;;  %v6774_v23 = vld [vmem:[#allocation85_spill] sm:$0xff] }
 0x35d   :  { %v2155_v41 = vpop.f32.mrf.mxu0  ;;  %v2196_v31 = vpop.f32.mrf.mxu1 }
 0x35e   :  { %v3785_v10 = vmul.f32 -1.442695, %v2201_v24  ;;  %v2202_v44 = vadd.f32 %v2155_v41, %v6771_v36  ;;  %v2204_v14 = vadd.f32 %v2196_v31, %v6772_v48  ;;  %v6775_v36 = vld [vmem:[#allocation87_spill] sm:$0xff] }
 0x35f   :  { %v2157_v56 = vpop.f32.mrf.mxu0  ;;  %v2198_v32 = vpop.f32.mrf.mxu1 }
 0x360   :  { %4006 = vpow2.f32 %v3785_v10  ;;  %v3786_v45 = vmul.f32 -1.442695, %v2202_v44  ;;  %v3787_v49 = vmul.f32 -1.442695, %v2204_v14 }
 0x361   :  { %v2158_v34 = vpop.f32.mrf.mxu0  ;;  %v2199_v29 = vpop.f32.mrf.mxu1 }
 0x362   :  { %4008 = vpow2.f32 %v3786_v45 }
 0x363   :  { %4010 = vtanh.f32 %v2203_v28 }
 0x364   :  { %4012 = vpow2.f32 %v3787_v49  ;;  %v6776_v49 = vld [vmem:[#allocation88_spill] sm:$0xff] }
 0x36d   :  { %v4007_v50 = vpop.eup %4006 }
 0x36e   :  { %v2208_v40 = vadd.f32 1.0, %v4007_v50 }
 0x36f   :  { %v4009_v51 = vpop.eup %4008 }
 0x370   :  { %4014 = vrcp.f32 %v2208_v40  ;;  %v2214_v52 = vadd.f32 1.0, %v4009_v51  ;;  %v4011_v55 = vpop.eup %4010  ;;  %v6777_v40 = vld [vmem:[#allocation86_spill] sm:$0xff] }
 0x371   :  { %v4013_v60 = vpop.eup %4012 }
 0x372   :  { %4016 = vrcp.f32 %v2214_v52  ;;  %v2221_v32 = vadd.f32 1.0, %v4013_v60 }
 0x37b   :  { %v2271_v58 = vpop.f32.mrf.mxu0  ;;  %v2312_v59 = vpop.f32.mrf.mxu1 }
 0x37c   :  { %v2319_v26 = vadd.f32 %v2271_v58, %v6774_v23  ;;  %v2321_v51 = vadd.f32 %v2312_v59, %v6777_v40  ;;  %v5827_v59 = vld [vmem:[%s6520_s3 + $0xe0] ss:$16 sps:$4 sm:$0xff]  }
 0x37d   :  { %v4015_v24 = vpop.eup %4014  ;;  %v2273_v41 = vpop.f32.mrf.mxu0 }
 0x37e   :  { %v2314_v31 = vpop.f32.mrf.mxu1  ;;  %v2225_v10 = vmul.f32 %v4015_v24, %v4011_v55  ;;  %v3788_v27 = vmul.f32 -1.442695, %v2319_v26  ;;  %v2320_v44 = vadd.f32 %v2273_v41, %v6775_v36 }
 0x37f   :  { %v4017_v56 = vpop.eup %4016  ;;  %v2275_v45 = vpop.f32.mrf.mxu0  ;;  %v2322_v50 = vadd.f32 %v2314_v31, %v6776_v49  ;;  %v5833_v31 = vld [vmem:[%s6520_s3 + $0xe8] ss:$16 sps:$4 sm:$0xff]   ;;  %v5877_v49 = vld [vmem:[%s6520_s3 + $0xa0] ss:$16 sps:$4 sm:$0xff]  }
 0x380   :  { %v2316_v34 = vpop.f32.mrf.mxu1  ;;  %v2224_v29 = vmul.f32 %v4017_v56, %v5556_v25  ;;  %4018 = vpow2.f32 %v3788_v27  ;;  %v3789_v48 = vmul.f32 -1.442695, %v2320_v44  ;;  %v5845_v27 = vld [vmem:[%s6520_s3 + $0xcc] ss:$16 sps:$4 sm:$0xff]   ;;  %v5853_v44 = vld [vmem:[%s6520_s3 + $0xc0] ss:$16 sps:$4 sm:$0xff]  }
 0x381   :  { %v2276_v14 = vpop.f32.mrf.mxu0  ;;  %v3790_v52 = vmul.f32 -1.442695, %v2322_v50  ;;  %v5859_v56 = vld [vmem:[%s6520_s3 + $0xc8] ss:$16 sps:$4 sm:$0xff]   ;;  %v5865_v45 = vld [vmem:[%s6520_s3 + $0xa4] ss:$16 sps:$4 sm:$0xff]  }
 0x382   :  { %v2317_v39 = vpop.f32.mrf.mxu1  ;;  %v5816_v28 = vadd.f32 %v2225_v10, %v2224_v29  ;;  %4020 = vpow2.f32 %v3789_v48  ;;  %v5839_v10 = vld [vmem:[%s6520_s3 + $0xc4] ss:$16 sps:$4 sm:$0xff]   ;;  %v5871_v34 = vld [vmem:[%s6520_s3 + $0xac] ss:$16 sps:$4 sm:$0xff]   ;;  %v5883_v50 = vld [vmem:[%s6520_s3 + $0xa8] ss:$16 sps:$4 sm:$0xff]  }
 0x383   :  { %4022 = vrcp.f32 %v2221_v32 }
 0x384   :  { %4024 = vtanh.f32 %v5816_v28 }
 0x385   :  { %4026 = vtanh.f32 %v2321_v51  ;;  %v5890_v51 = vld [vmem:[%s6520_s3 + $0x84] ss:$16 sps:$4 sm:$0xff]  }
 0x386   :  { %4028 = vpow2.f32 %v3790_v52  ;;  %v5896_v52 = vld [vmem:[%s6520_s3 + $0x8c] ss:$16 sps:$4 sm:$0xff]  }
 0x38d   :  { %v4019_v55 = vpop.eup %4018 }
 0x38e   :  { %v2326_v58 = vadd.f32 1.0, %v4019_v55 }
 0x38f   :  { %v4021_v60 = vpop.eup %4020 }
 0x390   :  { %v4023_v25 = vpop.eup %4022  ;;  %4030 = vrcp.f32 %v2326_v58  ;;  %v2332_v23 = vadd.f32 1.0, %v4021_v60  ;;  %v5910_v58 = vld [vmem:[%s6520_s3 + $0x88] ss:$16 sps:$4 sm:$0xff]   ;;  %v5916_v60 = vld [vmem:[%s6520_s3 + $0x64] ss:$16 sps:$4 sm:$0xff]  }
 0x391   :  { %v4025_v26 = vpop.eup %4024 }
 0x392   :  { %4032 = vrcp.f32 %v2332_v23  ;;  %v2228_v24 = vmul.f32 %v4025_v26, %v4023_v25  ;;  %v4027_v36 = vpop.eup %4026  ;;  %v5922_v25 = vld [vmem:[%s6520_s3 + $0x6c] ss:$16 sps:$4 sm:$0xff]   ;;  %v5929_v23 = vld [vmem:[%s6520_s3 + $0x60] ss:$16 sps:$4 sm:$0xff]   ;;  %v5935_v26 = vld [vmem:[%s6520_s3 + $0x68] ss:$16 sps:$4 sm:$0xff]  }
 0x393   :  { %v4029_v32 = vpop.eup %4028 }
 0x394   :  { %3791 = vst [vmem:[%s6522_s5 + $0x20] sm:$0xff] %v2228_v24  ;;  %v2362_v41 = vpack.c.bf16 %v2228_v24, %v2228_v24  ;;  %v2339_v39 = vadd.f32 1.0, %v4029_v32  ;;  %v5941_v24 = vld [vmem:[%s6520_s3 + $0x44] ss:$16 sps:$4 sm:$0xff]   ;;  %v5959_v32 = vld [vmem:[%s6520_s3 + $0x48] ss:$16 sps:$4 sm:$0xff]  }
 0x395   :  { %6778 = vst [vmem:[#allocation29_spill] sm:$0xff] %v5959_v32 }
 0x396   :  { %2396 = vmatmul.mubr.bf16.vlgmr.msra.gmra.mxu0 %v2362_v41  ;;  %2437 = vmatmul.mubr.bf16.vlgmr.msra.gmra.mxu1 %v2362_v41  ;;  %4034 = vrcp.f32 %v2339_v39  ;;  %v5947_v41 = vld [vmem:[%s6520_s3 + $0x4c] ss:$16 sps:$4 sm:$0xff]   ;;  %v5983_v39 = vld [vmem:[%s6520_s3 + $0x28] ss:$16 sps:$4 sm:$0xff]  }
 0x397   :  { %2482 = vmatpush1.bf16.msra.mxu0 %v5827_v59  ;;  %2523 = vmatpush1.bf16.msra.mxu1 %v5833_v31  ;;  %6782 = vst [vmem:[#allocation33_spill] sm:$0xff] %v5983_v39 }
 0x398   :  { %2483 = vmatprep.subr.bf16.mxu0 %v5839_v10  ;;  %2524 = vmatprep.subr.bf16.mxu1 %v5845_v27 }
 0x399   :  { %2513 = vmatprep.mubr.bf16.mxu0 %v6649_v17  ;;  %2554 = vmatprep.mubr.bf16.mxu1 %v6649_v17 }
 0x39b   :  { %2484 = vmatpush1.bf16.msra.mxu0 %v5853_v44  ;;  %2525 = vmatpush1.bf16.msra.mxu1 %v5859_v56 }
 0x39c   :  { %2485 = vmatprep.subr.bf16.mxu0 %v5865_v45  ;;  %2526 = vmatprep.subr.bf16.mxu1 %v5871_v34 }
 0x39d   :  { %v4031_v29 = vpop.eup %4030 }
 0x39e   :  { %v2343_v48 = vmul.f32 %v4031_v29, %v4027_v36  ;;  %v5953_v36 = vld [vmem:[%s6520_s3 + $0x40] ss:$16 sps:$4 sm:$0xff]   ;;  %v5965_v29 = vld [vmem:[%s6520_s3 + $0x24] ss:$16 sps:$4 sm:$0xff]  }
 0x39f   :  { %v4033_v14 = vpop.eup %4032  ;;  %2486 = vmatpush1.bf16.msra.mxu0 %v5877_v49  ;;  %2527 = vmatpush1.bf16.msra.mxu1 %v5883_v50  ;;  %6779 = vst [vmem:[#allocation30_spill] sm:$0xff] %v5965_v29 }
 0x3a0   :  { %v2342_v40 = vmul.f32 %v4033_v14, %v5579_v54  ;;  %2487 = vmatprep.subr.bf16.mxu0 %v5890_v51  ;;  %2528 = vmatprep.subr.bf16.mxu1 %v5896_v52  ;;  %v5904_v54 = vld [vmem:[%s6520_s3 + $0x80] ss:$16 sps:$4 sm:$0xff]  }
 0x3a1   :  { %v5977_v14 = vld [vmem:[%s6520_s3 + $0x20] ss:$16 sps:$4 sm:$0xff]  }
 0x3a2   :  { %v5899_v55 = vadd.f32 %v2343_v48, %v2342_v40  ;;  %v5971_v48 = vld [vmem:[%s6520_s3 + $0x2c] ss:$16 sps:$4 sm:$0xff]   ;;  %6781 = vst [vmem:[#allocation32_spill] sm:$0xff] %v5977_v14 }
 0x3a3   :  { %2488 = vmatpush1.bf16.msra.mxu0 %v5904_v54  ;;  %2529 = vmatpush1.bf16.msra.mxu1 %v5910_v58  ;;  %6780 = vst [vmem:[#allocation31_spill] sm:$0xff] %v5971_v48  ;;  %v4035_v40 = vpop.eup %4034 }
 0x3a4   :  { %2489 = vmatprep.subr.bf16.mxu0 %v5916_v60  ;;  %2530 = vmatprep.subr.bf16.mxu1 %v5922_v25  ;;  %4036 = vtanh.f32 %v5899_v55 }
 0x3a7   :  { %2490 = vmatpush1.bf16.msra.mxu0 %v5929_v23  ;;  %2531 = vmatpush1.bf16.msra.mxu1 %v5935_v26 }
 0x3a8   :  { %2491 = vmatprep.subr.bf16.mxu0 %v5941_v24  ;;  %2532 = vmatprep.subr.bf16.mxu1 %v5947_v41 }
 0x3ab   :  { %2492 = vmatpush1.bf16.msra.mxu0 %v5953_v36  ;;  %2533 = vmatpush1.bf16.msra.mxu1 %v5959_v32 }
 0x3ac   :  { %2493 = vmatprep.subr.bf16.mxu0 %v5965_v29  ;;  %2534 = vmatprep.subr.bf16.mxu1 %v5971_v48  ;;  %v5989_v29 = vld [vmem:[%s6520_s3 + $0x4] ss:$16 sps:$4 sm:$0xff]   ;;  %v5995_v48 = vld [vmem:[%s6520_s3 + $0xc] ss:$16 sps:$4 sm:$0xff]  }
 0x3ad   :  { %6783 = vst [vmem:[#allocation34_spill] sm:$0xff] %v5989_v29  ;;  %6784 = vst [vmem:[#allocation37_spill] sm:$0xff] %v5995_v48 }
 0x3af   :  { %2494 = vmatpush1.bf16.msra.mxu0 %v5977_v14  ;;  %2535 = vmatpush1.bf16.msra.mxu1 %v5983_v39  ;;  %v6001_v39 = vld [vmem:[%s6520_s3] ss:$16 sps:$4 sm:$0xff]  }
 0x3b0   :  { %2495 = vmatprep.subr.bf16.mxu0 %v5989_v29  ;;  %2536 = vmatprep.subr.bf16.mxu1 %v5995_v48  ;;  %v6007_v29 = vld [vmem:[%s6520_s3 + $0x8] ss:$16 sps:$4 sm:$0xff]  }
 0x3b1   :  { %v4037_v14 = vpop.eup %4036 }
 0x3b2   :  { %v2346_v32 = vmul.f32 %v4037_v14, %v4035_v40  ;;  %v6785_v14 = vld [vmem:[#allocation45_spill] sm:$0xff] }
 0x3b3   :  { %2496 = vmatpush1.bf16.msra.mxu0 %v6001_v39  ;;  %2537 = vmatpush1.bf16.msra.mxu1 %v6007_v29 }
 0x3b4   :  { %3792 = vst [vmem:[%s6522_s5 + $0x58] sm:$0xff] %v2346_v32  ;;  %v2480_v48 = vpack.c.bf16 %v2346_v32, %v2346_v32  ;;  %2607 = vmatprep.subr.bf16.mxu0 %v5606_v61  ;;  %2648 = vmatprep.subr.bf16.mxu1 %v5612_v62 }
 0x3b6   :  { %2514 = vmatmul.mubr.bf16.vlgmr.msra.gmra.mxu0 %v2480_v48  ;;  %2555 = vmatmul.mubr.bf16.vlgmr.msra.gmra.mxu1 %v2480_v48 }
 0x3b7   :  { %2608 = vmatpush1.bf16.msra.mxu0 %v5618_v46  ;;  %2649 = vmatpush1.bf16.msra.mxu1 %v5624_v53 }
 0x3b8   :  { %2609 = vmatprep.subr.bf16.mxu0 %v5630_v63  ;;  %2650 = vmatprep.subr.bf16.mxu1 %v5636_v0 }
 0x3b9   :  { %2639 = vmatprep.mubr.bf16.mxu0 %v6649_v17  ;;  %2680 = vmatprep.mubr.bf16.mxu1 %v6649_v17 }
 0x3bb   :  { %2610 = vmatpush1.bf16.msra.mxu0 %v5644_v1  ;;  %2651 = vmatpush1.bf16.msra.mxu1 %v5650_v2 }
 0x3bc   :  { %2611 = vmatprep.subr.bf16.mxu0 %v5656_v4  ;;  %2652 = vmatprep.subr.bf16.mxu1 %v5662_v5 }
 0x3bf   :  { %2612 = vmatpush1.bf16.msra.mxu0 %v5668_v6  ;;  %2653 = vmatpush1.bf16.msra.mxu1 %v5674_v7 }
 0x3c0   :  { %2613 = vmatprep.subr.bf16.mxu0 %v5680_v8  ;;  %2654 = vmatprep.subr.bf16.mxu1 %v5686_v9 }
 0x3c3   :  { %2614 = vmatpush1.bf16.msra.mxu0 %v5692_v11  ;;  %2655 = vmatpush1.bf16.msra.mxu1 %v5698_v12 }
 0x3c4   :  { %2615 = vmatprep.subr.bf16.mxu0 %v5704_v13  ;;  %2656 = vmatprep.subr.bf16.mxu1 %v5710_v15 }
 0x3c7   :  { %2616 = vmatpush1.bf16.msra.mxu0 %v5716_v16  ;;  %2657 = vmatpush1.bf16.msra.mxu1 %v5722_v57 }
 0x3c8   :  { %2617 = vmatprep.subr.bf16.mxu0 %v5728_v42  ;;  %2658 = vmatprep.subr.bf16.mxu1 %v5734_v38  ;;  %v6788_v42 = vld [vmem:[#allocation46_spill] sm:$0xff] }
 0x3cb   :  { %2618 = vmatpush1.bf16.msra.mxu0 %v5740_v43  ;;  %2659 = vmatpush1.bf16.msra.mxu1 %v5746_v47 }
 0x3cc   :  { %2619 = vmatprep.subr.bf16.mxu0 %v5752_v3  ;;  %2660 = vmatprep.subr.bf16.mxu1 %v5758_v37 }
 0x3cf   :  { %2620 = vmatpush1.bf16.msra.mxu0 %v5764_v35  ;;  %2661 = vmatpush1.bf16.msra.mxu1 %v5770_v33  ;;  %v6786_v33 = vld [vmem:[#allocation47_spill] sm:$0xff] }
 0x3d0   :  { %2621 = vmatprep.subr.bf16.mxu0 %v5776_v30  ;;  %2662 = vmatprep.subr.bf16.mxu1 %v5782_v18 }
 0x3d3   :  { %2622 = vmatpush1.bf16.msra.mxu0 %v5788_v19  ;;  %2663 = vmatpush1.bf16.msra.mxu1 %v5794_v20  ;;  %v6787_v20 = vld [vmem:[#allocation48_spill] sm:$0xff] }
 0x3d4   :  { %2725 = vmatprep.subr.bf16.mxu0 %v5800_v21  ;;  %2766 = vmatprep.subr.bf16.mxu1 %v5806_v22 }
 0x456   :  { %v2397_v32 = vpop.f32.mrf.mxu0  ;;  %v2438_v48 = vpop.f32.mrf.mxu1 }
 0x457   :  { %v2445_v40 = vadd.f32 %v2397_v32, %v6785_v14  ;;  %v2447_v22 = vadd.f32 %v2438_v48, %v6788_v42 }
 0x458   :  { %v2399_v37 = vpop.f32.mrf.mxu0  ;;  %v2440_v35 = vpop.f32.mrf.mxu1 }
 0x459   :  { %v3793_v3 = vmul.f32 -1.442695, %v2445_v40  ;;  %v2446_v47 = vadd.f32 %v2399_v37, %v6786_v33  ;;  %v2448_v21 = vadd.f32 %v2440_v35, %v6787_v20  ;;  %v6789_v33 = vld [vmem:[#allocation81_spill] sm:$0xff]  ;;  %v6790_v20 = vld [vmem:[#allocation83_spill] sm:$0xff] }
 0x45a   :  { %v2401_v30 = vpop.f32.mrf.mxu0  ;;  %v2442_v43 = vpop.f32.mrf.mxu1 }
 0x45b   :  { %4038 = vpow2.f32 %v3793_v3  ;;  %v3794_v18 = vmul.f32 -1.442695, %v2446_v47  ;;  %v3795_v57 = vmul.f32 -1.442695, %v2448_v21 }
 0x45c   :  { %v2402_v19 = vpop.f32.mrf.mxu0  ;;  %v2443_v38 = vpop.f32.mrf.mxu1 }
 0x45d   :  { %4040 = vpow2.f32 %v3794_v18 }
 0x45e   :  { %4042 = vtanh.f32 %v2447_v22 }
 0x45f   :  { %4044 = vpow2.f32 %v3795_v57 }
 0x468   :  { %v4039_v16 = vpop.eup %4038 }
 0x469   :  { %v2452_v15 = vadd.f32 1.0, %v4039_v16 }
 0x46a   :  { %v4041_v32 = vpop.eup %4040 }
 0x46b   :  { %4046 = vrcp.f32 %v2452_v15  ;;  %v2458_v14 = vadd.f32 1.0, %v4041_v32  ;;  %v4043_v37 = vpop.eup %4042 }
 0x46c   :  { %v4045_v47 = vpop.eup %4044 }
 0x46d   :  { %4048 = vrcp.f32 %v2458_v14  ;;  %v2465_v22 = vadd.f32 1.0, %v4045_v47 }
 0x476   :  { %v2515_v43 = vpop.f32.mrf.mxu0  ;;  %v2556_v3 = vpop.f32.mrf.mxu1 }
 0x477   :  { %v2563_v38 = vadd.f32 %v2515_v43, %v6789_v33  ;;  %v6792_v33 = vld [vmem:[#allocation82_spill] sm:$0xff] }
 0x478   :  { %v4047_v30 = vpop.eup %4046  ;;  %v2517_v18 = vpop.f32.mrf.mxu0 }
 0x479   :  { %v2558_v35 = vpop.f32.mrf.mxu1  ;;  %v2469_v19 = vmul.f32 %v4047_v30, %v4043_v37  ;;  %v3796_v42 = vmul.f32 -1.442695, %v2563_v38  ;;  %v2564_v21 = vadd.f32 %v2517_v18, %v6790_v20  ;;  %v6791_v37 = vld [vmem:[#allocation84_spill] sm:$0xff]  ;;  %v2565_v38 = vadd.f32 %v2556_v3, %v6792_v33  ;;  %v6797_v33 = vld [vmem:[#allocation33_spill] sm:$0xff] }
 0x47a   :  { %v4049_v16 = vpop.eup %4048  ;;  %v2519_v48 = vpop.f32.mrf.mxu0  ;;  %v2566_v43 = vadd.f32 %v2558_v35, %v6791_v37  ;;  %v6795_v37 = vld [vmem:[#allocation31_spill] sm:$0xff] }
 0x47b   :  { %v2560_v57 = vpop.f32.mrf.mxu1  ;;  %v2468_v15 = vmul.f32 %v4049_v16, %v5816_v28  ;;  %4050 = vpow2.f32 %v3796_v42  ;;  %v3797_v40 = vmul.f32 -1.442695, %v2564_v21 }
 0x47c   :  { %v2520_v32 = vpop.f32.mrf.mxu0  ;;  %v3798_v30 = vmul.f32 -1.442695, %v2566_v43  ;;  %v6796_v43 = vld [vmem:[#allocation32_spill] sm:$0xff] }
 0x47d   :  { %v2561_v14 = vpop.f32.mrf.mxu1  ;;  %v6056_v13 = vadd.f32 %v2469_v19, %v2468_v15  ;;  %4052 = vpow2.f32 %v3797_v40 }
 0x47e   :  { %4054 = vrcp.f32 %v2465_v22  ;;  %v6794_v14 = vld [vmem:[#allocation30_spill] sm:$0xff] }
 0x47f   :  { %4056 = vtanh.f32 %v6056_v13 }
 0x480   :  { %4058 = vtanh.f32 %v2565_v38 }
 0x481   :  { %4060 = vpow2.f32 %v3798_v30  ;;  %v6798_v30 = vld [vmem:[#allocation34_spill] sm:$0xff] }
 0x488   :  { %v4051_v47 = vpop.eup %4050 }
 0x489   :  { %v2570_v18 = vadd.f32 1.0, %v4051_v47  ;;  %v6799_v47 = vld [vmem:[#allocation37_spill] sm:$0xff] }
 0x48a   :  { %v4053_v20 = vpop.eup %4052 }
 0x48b   :  { %v4055_v28 = vpop.eup %4054  ;;  %4062 = vrcp.f32 %v2570_v18  ;;  %v2576_v42 = vadd.f32 1.0, %v4053_v20 }
 0x48c   :  { %v4057_v21 = vpop.eup %4056 }
 0x48d   :  { %4064 = vrcp.f32 %v2576_v42  ;;  %v2472_v19 = vmul.f32 %v4057_v21, %v4055_v28  ;;  %v4059_v3 = vpop.eup %4058  ;;  %v6800_v42 = vld [vmem:[#allocation11_spill] sm:$0xff]  ;;  %v6801_v21 = vld [vmem:[#allocation12_spill] sm:$0xff] }
 0x48e   :  { %v4061_v35 = vpop.eup %4060 }
 0x48f   :  { %3799 = vst [vmem:[%s6522_s5 + $0x30] sm:$0xff] %v2472_v19  ;;  %v2606_v16 = vpack.c.bf16 %v2472_v19, %v2472_v19  ;;  %v2583_v15 = vadd.f32 1.0, %v4061_v35  ;;  %v6802_v19 = vld [vmem:[#allocation13_spill] sm:$0xff]  ;;  %v6805_v35 = vld [vmem:[#allocation16_spill] sm:$0xff] }
 0x491   :  { %2640 = vmatmul.mubr.bf16.vlgmr.msra.gmra.mxu0 %v2606_v16  ;;  %2681 = vmatmul.mubr.bf16.vlgmr.msra.gmra.mxu1 %v2606_v16  ;;  %4066 = vrcp.f32 %v2583_v15  ;;  %v6803_v16 = vld [vmem:[#allocation14_spill] sm:$0xff]  ;;  %v6809_v15 = vld [vmem:[#allocation20_spill] sm:$0xff] }
 0x492   :  { %2726 = vmatpush1.bf16.msra.mxu0 %v5827_v59  ;;  %2767 = vmatpush1.bf16.msra.mxu1 %v5833_v31 }
 0x493   :  { %2727 = vmatprep.subr.bf16.mxu0 %v5839_v10  ;;  %2768 = vmatprep.subr.bf16.mxu1 %v5845_v27 }
 0x494   :  { %2757 = vmatprep.mubr.bf16.mxu0 %v6649_v17  ;;  %2798 = vmatprep.mubr.bf16.mxu1 %v6649_v17 }
 0x496   :  { %2728 = vmatpush1.bf16.msra.mxu0 %v5853_v44  ;;  %2769 = vmatpush1.bf16.msra.mxu1 %v5859_v56 }
 0x497   :  { %2729 = vmatprep.subr.bf16.mxu0 %v5865_v45  ;;  %2770 = vmatprep.subr.bf16.mxu1 %v5871_v34 }
 0x498   :  { %v4063_v22 = vpop.eup %4062 }
 0x499   :  { %v2587_v48 = vmul.f32 %v4063_v22, %v4059_v3  ;;  %v6804_v3 = vld [vmem:[#allocation15_spill] sm:$0xff]  ;;  %v6806_v22 = vld [vmem:[#allocation17_spill] sm:$0xff] }
 0x49a   :  { %v4065_v57 = vpop.eup %4064  ;;  %2730 = vmatpush1.bf16.msra.mxu0 %v5877_v49  ;;  %2771 = vmatpush1.bf16.msra.mxu1 %v5883_v50 }
 0x49b   :  { %v2586_v40 = vmul.f32 %v4065_v57, %v5899_v55  ;;  %2731 = vmatprep.subr.bf16.mxu0 %v5890_v51  ;;  %2772 = vmatprep.subr.bf16.mxu1 %v5896_v52  ;;  %v6793_v55 = vld [vmem:[#allocation29_spill] sm:$0xff]  ;;  %v6808_v57 = vld [vmem:[#allocation19_spill] sm:$0xff] }
 0x49d   :  { %v6079_v32 = vadd.f32 %v2587_v48, %v2586_v40  ;;  %v6807_v48 = vld [vmem:[#allocation18_spill] sm:$0xff]  ;;  %v6810_v40 = vld [vmem:[#allocation21_spill] sm:$0xff] }
 0x49e   :  { %2732 = vmatpush1.bf16.msra.mxu0 %v5904_v54  ;;  %2773 = vmatpush1.bf16.msra.mxu1 %v5910_v58  ;;  %v4067_v38 = vpop.eup %4066 }
 0x49f   :  { %2733 = vmatprep.subr.bf16.mxu0 %v5916_v60  ;;  %2774 = vmatprep.subr.bf16.mxu1 %v5922_v25  ;;  %4068 = vtanh.f32 %v6079_v32 }
 0x4a2   :  { %2734 = vmatpush1.bf16.msra.mxu0 %v5929_v23  ;;  %2775 = vmatpush1.bf16.msra.mxu1 %v5935_v26 }
 0x4a3   :  { %2735 = vmatprep.subr.bf16.mxu0 %v5941_v24  ;;  %2776 = vmatprep.subr.bf16.mxu1 %v5947_v41 }
 0x4a6   :  { %2736 = vmatpush1.bf16.msra.mxu0 %v5953_v36  ;;  %2777 = vmatpush1.bf16.msra.mxu1 %v6793_v55 }
 0x4a7   :  { %2737 = vmatprep.subr.bf16.mxu0 %v6794_v14  ;;  %2778 = vmatprep.subr.bf16.mxu1 %v6795_v37 }
 0x4aa   :  { %2738 = vmatpush1.bf16.msra.mxu0 %v6796_v43  ;;  %2779 = vmatpush1.bf16.msra.mxu1 %v6797_v33 }
 0x4ab   :  { %2739 = vmatprep.subr.bf16.mxu0 %v6798_v30  ;;  %2780 = vmatprep.subr.bf16.mxu1 %v6799_v47 }
 0x4ac   :  { %v4069_v18 = vpop.eup %4068 }
 0x4ad   :  { %v2590_v20 = vmul.f32 %v4069_v18, %v4067_v38  ;;  %v6811_v38 = vld [vmem:[#allocation22_spill] sm:$0xff]  ;;  %v6812_v18 = vld [vmem:[#allocation23_spill] sm:$0xff] }
 0x4ae   :  { %2740 = vmatpush1.bf16.msra.mxu0 %v6001_v39  ;;  %2781 = vmatpush1.bf16.msra.mxu1 %v6007_v29 }
 0x4af   :  { %3800 = vst [vmem:[%s6522_s5 + $0x48] sm:$0xff] %v2590_v20  ;;  %v2724_v28 = vpack.c.bf16 %v2590_v20, %v2590_v20  ;;  %2849 = vmatprep.subr.bf16.mxu0 %v5606_v61  ;;  %2890 = vmatprep.subr.bf16.mxu1 %v5612_v62  ;;  %v6813_v20 = vld [vmem:[#allocation24_spill] sm:$0xff] }
 0x4b1   :  { %2758 = vmatmul.mubr.bf16.vlgmr.msra.gmra.mxu0 %v2724_v28  ;;  %2799 = vmatmul.mubr.bf16.vlgmr.msra.gmra.mxu1 %v2724_v28  ;;  %v6814_v28 = vld [vmem:[#allocation25_spill] sm:$0xff] }
 0x4b2   :  { %2850 = vmatpush1.bf16.msra.mxu0 %v5618_v46  ;;  %2891 = vmatpush1.bf16.msra.mxu1 %v5624_v53 }
 0x4b3   :  { %2851 = vmatprep.subr.bf16.mxu0 %v5630_v63  ;;  %2892 = vmatprep.subr.bf16.mxu1 %v5636_v0 }
 0x4b4   :  { %2881 = vmatprep.mubr.bf16.mxu0 %v6649_v17  ;;  %2922 = vmatprep.mubr.bf16.mxu1 %v6649_v17 }
 0x4b6   :  { %2852 = vmatpush1.bf16.msra.mxu0 %v5644_v1  ;;  %2893 = vmatpush1.bf16.msra.mxu1 %v5650_v2 }
 0x4b7   :  { %2853 = vmatprep.subr.bf16.mxu0 %v5656_v4  ;;  %2894 = vmatprep.subr.bf16.mxu1 %v5662_v5 }
 0x4ba   :  { %2854 = vmatpush1.bf16.msra.mxu0 %v5668_v6  ;;  %2895 = vmatpush1.bf16.msra.mxu1 %v5674_v7 }
 0x4bb   :  { %2855 = vmatprep.subr.bf16.mxu0 %v5680_v8  ;;  %2896 = vmatprep.subr.bf16.mxu1 %v5686_v9  ;;  %v6821_v9 = vld [vmem:[#allocation50_spill] sm:$0xff] }
 0x4be   :  { %2856 = vmatpush1.bf16.msra.mxu0 %v5692_v11  ;;  %2897 = vmatpush1.bf16.msra.mxu1 %v5698_v12 }
 0x4bf   :  { %2857 = vmatprep.subr.bf16.mxu0 %v6800_v42  ;;  %2898 = vmatprep.subr.bf16.mxu1 %v6801_v21 }
 0x4c2   :  { %2858 = vmatpush1.bf16.msra.mxu0 %v6802_v19  ;;  %2899 = vmatpush1.bf16.msra.mxu1 %v6803_v16  ;;  %v6818_v16 = vld [vmem:[#allocation49_spill] sm:$0xff] }
 0x4c3   :  { %2859 = vmatprep.subr.bf16.mxu0 %v6804_v3  ;;  %2900 = vmatprep.subr.bf16.mxu1 %v6805_v35  ;;  %v6815_v3 = vld [vmem:[#allocation26_spill] sm:$0xff]  ;;  %v6816_v35 = vld [vmem:[#allocation27_spill] sm:$0xff] }
 0x4c6   :  { %2860 = vmatpush1.bf16.msra.mxu0 %v6806_v22  ;;  %2901 = vmatpush1.bf16.msra.mxu1 %v6807_v48  ;;  %v6817_v22 = vld [vmem:[#allocation28_spill] sm:$0xff] }
 0x4c7   :  { %2861 = vmatprep.subr.bf16.mxu0 %v6808_v57  ;;  %2902 = vmatprep.subr.bf16.mxu1 %v6809_v15 }
 0x4ca   :  { %2862 = vmatpush1.bf16.msra.mxu0 %v6810_v40  ;;  %2903 = vmatpush1.bf16.msra.mxu1 %v6811_v38  ;;  %v6819_v38 = vld [vmem:[#allocation51_spill] sm:$0xff] }
 0x4cb   :  { %2863 = vmatprep.subr.bf16.mxu0 %v6812_v18  ;;  %2904 = vmatprep.subr.bf16.mxu1 %v6813_v20 }
 0x4ce   :  { %2864 = vmatpush1.bf16.msra.mxu0 %v6814_v28  ;;  %2905 = vmatpush1.bf16.msra.mxu1 %v6815_v3  ;;  %v6820_v3 = vld [vmem:[#allocation52_spill] sm:$0xff] }
 0x4cf   :  { %2967 = vmatprep.subr.bf16.mxu0 %v6816_v35  ;;  %3008 = vmatprep.subr.bf16.mxu1 %v6817_v22 }
 0x551   :  { %v2641_v48 = vpop.f32.mrf.mxu0  ;;  %v2682_v57 = vpop.f32.mrf.mxu1 }
 0x552   :  { %v2689_v15 = vadd.f32 %v2641_v48, %v6818_v16  ;;  %v2691_v22 = vadd.f32 %v2682_v57, %v6821_v9 }
 0x553   :  { %v2643_v19 = vpop.f32.mrf.mxu0  ;;  %v2684_v40 = vpop.f32.mrf.mxu1 }
 0x554   :  { %v3801_v21 = vmul.f32 -1.442695, %v2689_v15  ;;  %v2690_v42 = vadd.f32 %v2643_v19, %v6819_v38  ;;  %v2692_v35 = vadd.f32 %v2684_v40, %v6820_v3  ;;  %v6822_v15 = vld [vmem:[#allocation77_spill] sm:$0xff] }
 0x555   :  { %v2645_v18 = vpop.f32.mrf.mxu0  ;;  %v2686_v12 = vpop.f32.mrf.mxu1 }
 0x556   :  { %4070 = vpow2.f32 %v3801_v21  ;;  %v3802_v20 = vmul.f32 -1.442695, %v2690_v42  ;;  %v3803_v8 = vmul.f32 -1.442695, %v2692_v35  ;;  %v6823_v35 = vld [vmem:[#allocation79_spill] sm:$0xff] }
 0x557   :  { %v2646_v28 = vpop.f32.mrf.mxu0  ;;  %v2687_v11 = vpop.f32.mrf.mxu1 }
 0x558   :  { %4072 = vpow2.f32 %v3802_v20 }
 0x559   :  { %4074 = vtanh.f32 %v2691_v22 }
 0x55a   :  { %4076 = vpow2.f32 %v3803_v8 }
 0x563   :  { %v4071_v7 = vpop.eup %4070 }
 0x564   :  { %v2696_v6 = vadd.f32 1.0, %v4071_v7 }
 0x565   :  { %v4073_v16 = vpop.eup %4072 }
 0x566   :  { %4078 = vrcp.f32 %v2696_v6  ;;  %v2702_v48 = vadd.f32 1.0, %v4073_v16  ;;  %v4075_v19 = vpop.eup %4074 }
 0x567   :  { %v4077_v42 = vpop.eup %4076 }
 0x568   :  { %4080 = vrcp.f32 %v2702_v48  ;;  %v2709_v22 = vadd.f32 1.0, %v4077_v42 }
 0x571   :  { %v2759_v12 = vpop.f32.mrf.mxu0  ;;  %v2800_v21 = vpop.f32.mrf.mxu1 }
 0x572   :  { %v2807_v11 = vadd.f32 %v2759_v12, %v6822_v15  ;;  %v6825_v15 = vld [vmem:[#allocation78_spill] sm:$0xff] }
 0x573   :  { %v4079_v38 = vpop.eup %4078  ;;  %v2761_v18 = vpop.f32.mrf.mxu0 }
 0x574   :  { %v2802_v3 = vpop.f32.mrf.mxu1  ;;  %v2713_v40 = vmul.f32 %v4079_v38, %v4075_v19  ;;  %v3804_v9 = vmul.f32 -1.442695, %v2807_v11  ;;  %v2808_v57 = vadd.f32 %v2761_v18, %v6823_v35  ;;  %v6824_v19 = vld [vmem:[#allocation80_spill] sm:$0xff]  ;;  %v2809_v11 = vadd.f32 %v2800_v21, %v6825_v15  ;;  %v6832_v15 = vld [vmem:[#allocation10_spill] sm:$0xff] }
 0x575   :  { %v4081_v7 = vpop.eup %4080  ;;  %v2763_v20 = vpop.f32.mrf.mxu0  ;;  %v2810_v12 = vadd.f32 %v2802_v3, %v6824_v19 }
 0x576   :  { %v2804_v8 = vpop.f32.mrf.mxu1  ;;  %v2712_v6 = vmul.f32 %v4081_v7, %v6056_v13  ;;  %4082 = vpow2.f32 %v3804_v9  ;;  %v3805_v28 = vmul.f32 -1.442695, %v2808_v57 }
 0x577   :  { %v2764_v16 = vpop.f32.mrf.mxu0  ;;  %v3806_v38 = vmul.f32 -1.442695, %v2810_v12 }
 0x578   :  { %v2805_v48 = vpop.f32.mrf.mxu1  ;;  %v6146_v5 = vadd.f32 %v2713_v40, %v2712_v6  ;;  %4084 = vpow2.f32 %v3805_v28 }
 0x579   :  { %4086 = vrcp.f32 %v2709_v22 }
 0x57a   :  { %4088 = vtanh.f32 %v6146_v5 }
 0x57b   :  { %4090 = vtanh.f32 %v2809_v11  ;;  %v6833_v11 = vld [vmem:[#allocation11_spill] sm:$0xff] }
 0x57c   :  { %4092 = vpow2.f32 %v3806_v38  ;;  %v6837_v38 = vld [vmem:[#allocation15_spill] sm:$0xff] }
 0x583   :  { %v4083_v42 = vpop.eup %4082 }
 0x584   :  { %v2814_v18 = vadd.f32 1.0, %v4083_v42  ;;  %v6838_v42 = vld [vmem:[#allocation16_spill] sm:$0xff] }
 0x585   :  { %v4085_v35 = vpop.eup %4084 }
 0x586   :  { %v4087_v13 = vpop.eup %4086  ;;  %4094 = vrcp.f32 %v2814_v18  ;;  %v2820_v9 = vadd.f32 1.0, %v4085_v35  ;;  %v6839_v18 = vld [vmem:[#allocation17_spill] sm:$0xff]  ;;  %v6840_v35 = vld [vmem:[#allocation18_spill] sm:$0xff] }
 0x587   :  { %v4089_v57 = vpop.eup %4088 }
 0x588   :  { %4096 = vrcp.f32 %v2820_v9  ;;  %v2716_v40 = vmul.f32 %v4089_v57, %v4087_v13  ;;  %v4091_v21 = vpop.eup %4090  ;;  %v6841_v13 = vld [vmem:[#allocation19_spill] sm:$0xff]  ;;  %v6842_v9 = vld [vmem:[#allocation20_spill] sm:$0xff]  ;;  %v6843_v57 = vld [vmem:[#allocation21_spill] sm:$0xff] }
 0x589   :  { %v4093_v3 = vpop.eup %4092 }
 0x58a   :  { %3807 = vst [vmem:[%s6522_s5 + $0x40] sm:$0xff] %v2716_v40  ;;  %v2848_v7 = vpack.c.bf16 %v2716_v40, %v2716_v40  ;;  %v2827_v6 = vadd.f32 1.0, %v4093_v3  ;;  %v6844_v40 = vld [vmem:[#allocation22_spill] sm:$0xff]  ;;  %v6847_v3 = vld [vmem:[#allocation25_spill] sm:$0xff] }
 0x58c   :  { %2882 = vmatmul.mubr.bf16.vlgmr.msra.gmra.mxu0 %v2848_v7  ;;  %2923 = vmatmul.mubr.bf16.vlgmr.msra.gmra.mxu1 %v2848_v7  ;;  %4098 = vrcp.f32 %v2827_v6  ;;  %v6845_v7 = vld [vmem:[#allocation23_spill] sm:$0xff] }
 0x58d   :  { %2968 = vmatpush1.bf16.msra.mxu0 %v5827_v59  ;;  %3009 = vmatpush1.bf16.msra.mxu1 %v5833_v31 }
 0x58e   :  { %2969 = vmatprep.subr.bf16.mxu0 %v5839_v10  ;;  %3010 = vmatprep.subr.bf16.mxu1 %v5845_v27 }
 0x58f   :  { %2999 = vmatprep.mubr.bf16.mxu0 %v6649_v17  ;;  %3040 = vmatprep.mubr.bf16.mxu1 %v6649_v17 }
 0x591   :  { %2970 = vmatpush1.bf16.msra.mxu0 %v5853_v44  ;;  %3011 = vmatpush1.bf16.msra.mxu1 %v5859_v56 }
 0x592   :  { %2971 = vmatprep.subr.bf16.mxu0 %v5865_v45  ;;  %3012 = vmatprep.subr.bf16.mxu1 %v5871_v34 }
 0x593   :  { %v4095_v22 = vpop.eup %4094 }
 0x594   :  { %v2831_v20 = vmul.f32 %v4095_v22, %v4091_v21  ;;  %v6846_v21 = vld [vmem:[#allocation24_spill] sm:$0xff]  ;;  %v6848_v22 = vld [vmem:[#allocation26_spill] sm:$0xff] }
 0x595   :  { %v4097_v8 = vpop.eup %4096  ;;  %2972 = vmatpush1.bf16.msra.mxu0 %v5877_v49  ;;  %3013 = vmatpush1.bf16.msra.mxu1 %v5883_v50 }
 0x596   :  { %v2830_v28 = vmul.f32 %v4097_v8, %v6079_v32  ;;  %2973 = vmatprep.subr.bf16.mxu0 %v5890_v51  ;;  %3014 = vmatprep.subr.bf16.mxu1 %v5896_v52  ;;  %v6850_v8 = vld [vmem:[#allocation28_spill] sm:$0xff] }
 0x598   :  { %v6169_v16 = vadd.f32 %v2831_v20, %v2830_v28  ;;  %v6849_v20 = vld [vmem:[#allocation27_spill] sm:$0xff] }
 0x599   :  { %2974 = vmatpush1.bf16.msra.mxu0 %v5904_v54  ;;  %3015 = vmatpush1.bf16.msra.mxu1 %v5910_v58  ;;  %v4099_v32 = vpop.eup %4098 }
 0x59a   :  { %2975 = vmatprep.subr.bf16.mxu0 %v5916_v60  ;;  %3016 = vmatprep.subr.bf16.mxu1 %v5922_v25  ;;  %4100 = vtanh.f32 %v6169_v16 }
 0x59d   :  { %2976 = vmatpush1.bf16.msra.mxu0 %v5929_v23  ;;  %3017 = vmatpush1.bf16.msra.mxu1 %v5935_v26 }
 0x59e   :  { %2977 = vmatprep.subr.bf16.mxu0 %v5941_v24  ;;  %3018 = vmatprep.subr.bf16.mxu1 %v5947_v41 }
 0x5a1   :  { %2978 = vmatpush1.bf16.msra.mxu0 %v5953_v36  ;;  %3019 = vmatpush1.bf16.msra.mxu1 %v6793_v55 }
 0x5a2   :  { %2979 = vmatprep.subr.bf16.mxu0 %v6794_v14  ;;  %3020 = vmatprep.subr.bf16.mxu1 %v6795_v37 }
 0x5a5   :  { %2980 = vmatpush1.bf16.msra.mxu0 %v6796_v43  ;;  %3021 = vmatpush1.bf16.msra.mxu1 %v6797_v33 }
 0x5a6   :  { %2981 = vmatprep.subr.bf16.mxu0 %v6798_v30  ;;  %3022 = vmatprep.subr.bf16.mxu1 %v6799_v47 }
 0x5a7   :  { %v4101_v48 = vpop.eup %4100 }
 0x5a8   :  { %v2834_v19 = vmul.f32 %v4101_v48, %v4099_v32  ;;  %v6851_v32 = vld [vmem:[#allocation53_spill] sm:$0xff] }
 0x5a9   :  { %2982 = vmatpush1.bf16.msra.mxu0 %v6001_v39  ;;  %3023 = vmatpush1.bf16.msra.mxu1 %v6007_v29 }
 0x5aa   :  { %3808 = vst [vmem:[%s6522_s5 + $0x38] sm:$0xff] %v2834_v19  ;;  %v2966_v12 = vpack.c.bf16 %v2834_v19, %v2834_v19  ;;  %3091 = vmatprep.subr.bf16.mxu0 %v5606_v61  ;;  %3132 = vmatprep.subr.bf16.mxu1 %v5612_v62  ;;  %v6826_v61 = vld [vmem:[#allocation35_spill] sm:$0xff]  ;;  %v6827_v62 = vld [vmem:[#allocation36_spill] sm:$0xff] }
 0x5ac   :  { %3000 = vmatmul.mubr.bf16.vlgmr.msra.gmra.mxu0 %v2966_v12  ;;  %3041 = vmatmul.mubr.bf16.vlgmr.msra.gmra.mxu1 %v2966_v12 }
 0x5ad   :  { %3092 = vmatpush1.bf16.msra.mxu0 %v5618_v46  ;;  %3133 = vmatpush1.bf16.msra.mxu1 %v5624_v53  ;;  %v6828_v46 = vld [vmem:[#allocation6_spill] sm:$0xff]  ;;  %v6829_v53 = vld [vmem:[#allocation7_spill] sm:$0xff] }
 0x5ae   :  { %3093 = vmatprep.subr.bf16.mxu0 %v5630_v63  ;;  %3134 = vmatprep.subr.bf16.mxu1 %v5636_v0  ;;  %v6830_v63 = vld [vmem:[#allocation8_spill] sm:$0xff]  ;;  %v6831_v0 = vld [vmem:[#allocation9_spill] sm:$0xff] }
 0x5af   :  { %3123 = vmatprep.mubr.bf16.mxu0 %v6649_v17  ;;  %3164 = vmatprep.mubr.bf16.mxu1 %v6649_v17 }
 0x5b1   :  { %3094 = vmatpush1.bf16.msra.mxu0 %v5644_v1  ;;  %3135 = vmatpush1.bf16.msra.mxu1 %v5650_v2  ;;  %v6834_v1 = vld [vmem:[#allocation12_spill] sm:$0xff]  ;;  %v6835_v2 = vld [vmem:[#allocation13_spill] sm:$0xff] }
 0x5b2   :  { %3095 = vmatprep.subr.bf16.mxu0 %v5656_v4  ;;  %3136 = vmatprep.subr.bf16.mxu1 %v6826_v61  ;;  %v6836_v4 = vld [vmem:[#allocation14_spill] sm:$0xff] }
 0x5b5   :  { %3096 = vmatpush1.bf16.msra.mxu0 %v6827_v62  ;;  %3137 = vmatpush1.bf16.msra.mxu1 %v6828_v46  ;;  %v6852_v62 = vld [vmem:[#allocation55_spill] sm:$0xff] }
 0x5b6   :  { %3097 = vmatprep.subr.bf16.mxu0 %v6829_v53  ;;  %3138 = vmatprep.subr.bf16.mxu1 %v6830_v63 }
 0x5b9   :  { %3098 = vmatpush1.bf16.msra.mxu0 %v6831_v0  ;;  %3139 = vmatpush1.bf16.msra.mxu1 %v6832_v15 }
 0x5ba   :  { %3099 = vmatprep.subr.bf16.mxu0 %v6833_v11  ;;  %3140 = vmatprep.subr.bf16.mxu1 %v6834_v1  ;;  %v6853_v1 = vld [vmem:[#allocation56_spill] sm:$0xff] }
 0x5bd   :  { %3100 = vmatpush1.bf16.msra.mxu0 %v6835_v2  ;;  %3141 = vmatpush1.bf16.msra.mxu1 %v6836_v4  ;;  %v6854_v4 = vld [vmem:[#allocation54_spill] sm:$0xff] }
 0x5be   :  { %3101 = vmatprep.subr.bf16.mxu0 %v6837_v38  ;;  %3142 = vmatprep.subr.bf16.mxu1 %v6838_v42 }
 0x5c1   :  { %3102 = vmatpush1.bf16.msra.mxu0 %v6839_v18  ;;  %3143 = vmatpush1.bf16.msra.mxu1 %v6840_v35 }
 0x5c2   :  { %3103 = vmatprep.subr.bf16.mxu0 %v6841_v13  ;;  %3144 = vmatprep.subr.bf16.mxu1 %v6842_v9 }
 0x5c5   :  { %3104 = vmatpush1.bf16.msra.mxu0 %v6843_v57  ;;  %3145 = vmatpush1.bf16.msra.mxu1 %v6844_v40 }
 0x5c6   :  { %3105 = vmatprep.subr.bf16.mxu0 %v6845_v7  ;;  %3146 = vmatprep.subr.bf16.mxu1 %v6846_v21 }
 0x5c9   :  { %3106 = vmatpush1.bf16.msra.mxu0 %v6847_v3  ;;  %3147 = vmatpush1.bf16.msra.mxu1 %v6848_v22  ;;  %v6855_v3 = vld [vmem:[#allocation73_spill] sm:$0xff] }
 0x5ca   :  { %3209 = vmatprep.subr.bf16.mxu0 %v6849_v20  ;;  %3250 = vmatprep.subr.bf16.mxu1 %v6850_v8 }
 0x64c   :  { %v2883_v6 = vpop.f32.mrf.mxu0  ;;  %v2924_v28 = vpop.f32.mrf.mxu1 }
 0x64d   :  { %v2931_v48 = vadd.f32 %v2883_v6, %v6851_v32  ;;  %v2933_v38 = vadd.f32 %v2924_v28, %v6854_v4  ;;  %v6858_v4 = vld [vmem:[#allocation74_spill] sm:$0xff] }
 0x64e   :  { %v2885_v19 = vpop.f32.mrf.mxu0  ;;  %v2926_v12 = vpop.f32.mrf.mxu1 }
 0x64f   :  { %v3809_v61 = vmul.f32 -1.442695, %v2931_v48  ;;  %v2932_v46 = vadd.f32 %v2885_v19, %v6852_v62  ;;  %v2934_v2 = vadd.f32 %v2926_v12, %v6853_v1  ;;  %v6856_v48 = vld [vmem:[#allocation75_spill] sm:$0xff]  ;;  %v6857_v1 = vld [vmem:[#allocation76_spill] sm:$0xff] }
 0x650   :  { %v2887_v53 = vpop.f32.mrf.mxu0  ;;  %v2928_v63 = vpop.f32.mrf.mxu1 }
 0x651   :  { %4102 = vpow2.f32 %v3809_v61  ;;  %v3810_v0 = vmul.f32 -1.442695, %v2932_v46  ;;  %v3811_v42 = vmul.f32 -1.442695, %v2934_v2 }
 0x652   :  { %v2888_v15 = vpop.f32.mrf.mxu0  ;;  %v2929_v11 = vpop.f32.mrf.mxu1 }
 0x653   :  { %4104 = vpow2.f32 %v3810_v0 }
 0x654   :  { %4106 = vtanh.f32 %v2933_v38 }
 0x655   :  { %4108 = vpow2.f32 %v3811_v42 }
 0x65e   :  { %v4103_v18 = vpop.eup %4102 }
 0x65f   :  { %v2938_v35 = vadd.f32 1.0, %v4103_v18 }
 0x660   :  { %v4105_v13 = vpop.eup %4104 }
 0x661   :  { %4110 = vrcp.f32 %v2938_v35  ;;  %v2944_v9 = vadd.f32 1.0, %v4105_v13  ;;  %v4107_v57 = vpop.eup %4106 }
 0x662   :  { %v4109_v21 = vpop.eup %4108 }
 0x663   :  { %4112 = vrcp.f32 %v2944_v9  ;;  %v2951_v61 = vadd.f32 1.0, %v4109_v21 }
 0x66c   :  { %v3001_v40 = vpop.f32.mrf.mxu0  ;;  %v3042_v7 = vpop.f32.mrf.mxu1 }
 0x66d   :  { %v3049_v22 = vadd.f32 %v3001_v40, %v6855_v3  ;;  %v3051_v38 = vadd.f32 %v3042_v7, %v6858_v4 }
 0x66e   :  { %v4111_v20 = vpop.eup %4110  ;;  %v3003_v8 = vpop.f32.mrf.mxu0 }
 0x66f   :  { %v3044_v6 = vpop.f32.mrf.mxu1  ;;  %v2955_v32 = vmul.f32 %v4111_v20, %v4107_v57  ;;  %v3812_v28 = vmul.f32 -1.442695, %v3049_v22  ;;  %v3050_v19 = vadd.f32 %v3003_v8, %v6856_v48  ;;  %v4284_v20 = vld [vmem:[%s6519_s2 + $0x40] ss:$16 sps:$4 sm:$0xff]   ;;  %v4285_v8 = vld [vmem:[%s6519_s2 + $0x48] ss:$16 sps:$4 sm:$0xff]  }
 0x670   :  { %v4113_v12 = vpop.eup %4112  ;;  %v3005_v62 = vpop.f32.mrf.mxu0  ;;  %v3052_v2 = vadd.f32 %v3044_v6, %v6857_v1  ;;  %v4286_v6 = vld [vmem:[%s6519_s2 + $0x24] ss:$16 sps:$4 sm:$0xff]   ;;  %v4289_v48 = vld [vmem:[%s6519_s2 + $0x28] ss:$16 sps:$4 sm:$0xff]  }
 0x671   :  { %v3046_v46 = vpop.f32.mrf.mxu1  ;;  %v2954_v53 = vmul.f32 %v4113_v12, %v6146_v5  ;;  %4114 = vpow2.f32 %v3812_v28  ;;  %v3813_v63 = vmul.f32 -1.442695, %v3050_v19  ;;  %v4288_v28 = vld [vmem:[%s6519_s2 + $0x20] ss:$16 sps:$4 sm:$0xff]   ;;  %v4290_v19 = vld [vmem:[%s6519_s2 + $0x4] ss:$16 sps:$4 sm:$0xff]  }
 0x672   :  { %v3006_v0 = vpop.f32.mrf.mxu0  ;;  %v3814_v42 = vmul.f32 -1.442695, %v3052_v2  ;;  %v4291_v12 = vld [vmem:[%s6519_s2 + $0xc] ss:$16 sps:$4 sm:$0xff]   ;;  %v4293_v62 = vld [vmem:[%s6519_s2 + $0x8] ss:$16 sps:$4 sm:$0xff]  }
 0x673   :  { %v3047_v15 = vpop.f32.mrf.mxu1  ;;  %v6236_v11 = vadd.f32 %v2955_v32, %v2954_v53  ;;  %4116 = vpow2.f32 %v3813_v63  ;;  %v4287_v32 = vld [vmem:[%s6519_s2 + $0x2c] ss:$16 sps:$4 sm:$0xff]   ;;  %v4294_v46 = vld [vmem:[%s6520_s3 + $0xe4] ss:$16 sps:$4 sm:$0xff]  }
 0x674   :  { %4118 = vrcp.f32 %v2951_v61  ;;  %v4292_v61 = vld [vmem:[%s6519_s2] ss:$16 sps:$4 sm:$0xff]   ;;  %v4295_v53 = vld [vmem:[%s6520_s3 + $0xec] ss:$16 sps:$4 sm:$0xff]  }
 0x675   :  { %4120 = vtanh.f32 %v6236_v11  ;;  %v6859_v15 = vld [vmem:[#allocation57_spill] sm:$0xff] }
 0x676   :  { %4122 = vtanh.f32 %v3051_v38 }
 0x677   :  { %4124 = vpow2.f32 %v3814_v42  ;;  %v6860_v42 = vld [vmem:[#allocation59_spill] sm:$0xff] }
 0x67e   :  { %v4115_v18 = vpop.eup %4114 }
 0x67f   :  { %v3056_v35 = vadd.f32 1.0, %v4115_v18 }
 0x680   :  { %v4117_v13 = vpop.eup %4116 }
 0x681   :  { %v4119_v5 = vpop.eup %4118  ;;  %4126 = vrcp.f32 %v3056_v35  ;;  %v3062_v9 = vadd.f32 1.0, %v4117_v13 }
 0x682   :  { %v4121_v57 = vpop.eup %4120 }
 0x683   :  { %4128 = vrcp.f32 %v3062_v9  ;;  %v2958_v40 = vmul.f32 %v4121_v57, %v4119_v5  ;;  %v4123_v7 = vpop.eup %4122 }
 0x684   :  { %v4125_v3 = vpop.eup %4124 }
 0x685   :  { %3815 = vst [vmem:[%s6522_s5 + $0x50] sm:$0xff] %v2958_v40  ;;  %v3090_v21 = vpack.c.bf16 %v2958_v40, %v2958_v40  ;;  %v6861_v40 = vld [vmem:[#allocation60_spill] sm:$0xff] }
 0x687   :  { %3124 = vmatmul.mubr.bf16.vlgmr.msra.gmra.mxu0 %v3090_v21  ;;  %3165 = vmatmul.mubr.bf16.vlgmr.msra.gmra.mxu1 %v3090_v21 }
 0x688   :  { %3210 = vmatpush1.bf16.msra.mxu0 %v5827_v59  ;;  %3251 = vmatpush1.bf16.msra.mxu1 %v5833_v31 }
 0x689   :  { %3211 = vmatprep.subr.bf16.mxu0 %v5839_v10  ;;  %3252 = vmatprep.subr.bf16.mxu1 %v5845_v27  ;;  %v3069_v10 = vadd.f32 1.0, %v4125_v3 }
 0x68a   :  { %3241 = vmatprep.mubr.bf16.mxu0 %v6649_v17  ;;  %3282 = vmatprep.mubr.bf16.mxu1 %v6649_v17 }
 0x68b   :  { %4130 = vrcp.f32 %v3069_v10 }
 0x68c   :  { %3212 = vmatpush1.bf16.msra.mxu0 %v5853_v44  ;;  %3253 = vmatpush1.bf16.msra.mxu1 %v5859_v56 }
 0x68d   :  { %3213 = vmatprep.subr.bf16.mxu0 %v5865_v45  ;;  %3254 = vmatprep.subr.bf16.mxu1 %v5871_v34 }
 0x68e   :  { %v4127_v59 = vpop.eup %4126 }
 0x68f   :  { %v3073_v31 = vmul.f32 %v4127_v59, %v4123_v7  ;;  %v6862_v7 = vld [vmem:[#allocation58_spill] sm:$0xff] }
 0x690   :  { %v4129_v22 = vpop.eup %4128  ;;  %3214 = vmatpush1.bf16.msra.mxu0 %v5877_v49  ;;  %3255 = vmatpush1.bf16.msra.mxu1 %v5883_v50  ;;  %v4262_v50 = vld [vmem:[%s6519_s2 + $0xe4] ss:$16 sps:$4 sm:$0xff]  }
 0x691   :  { %v3072_v27 = vmul.f32 %v4129_v22, %v6169_v16  ;;  %3215 = vmatprep.subr.bf16.mxu0 %v5890_v51  ;;  %3256 = vmatprep.subr.bf16.mxu1 %v5896_v52  ;;  %v4263_v51 = vld [vmem:[%s6519_s2 + $0xec] ss:$16 sps:$4 sm:$0xff]   ;;  %v4264_v52 = vld [vmem:[%s6519_s2 + $0xe0] ss:$16 sps:$4 sm:$0xff]  }
 0x692   :  { %v4283_v16 = vld [vmem:[%s6519_s2 + $0x4c] ss:$16 sps:$4 sm:$0xff]  }
 0x693   :  { %v6259_v44 = vadd.f32 %v3073_v31, %v3072_v27 }
 0x694   :  { %3216 = vmatpush1.bf16.msra.mxu0 %v5904_v54  ;;  %3257 = vmatpush1.bf16.msra.mxu1 %v5910_v58  ;;  %v4265_v54 = vld [vmem:[%s6519_s2 + $0xe8] ss:$16 sps:$4 sm:$0xff]   ;;  %v4266_v58 = vld [vmem:[%s6519_s2 + $0xc4] ss:$16 sps:$4 sm:$0xff]  }
 0x695   :  { %3217 = vmatprep.subr.bf16.mxu0 %v5916_v60  ;;  %3258 = vmatprep.subr.bf16.mxu1 %v5922_v25  ;;  %4132 = vtanh.f32 %v6259_v44  ;;  %v4267_v60 = vld [vmem:[%s6519_s2 + $0xcc] ss:$16 sps:$4 sm:$0xff]   ;;  %v4268_v25 = vld [vmem:[%s6519_s2 + $0xc0] ss:$16 sps:$4 sm:$0xff]  }
 0x698   :  { %3218 = vmatpush1.bf16.msra.mxu0 %v5929_v23  ;;  %3259 = vmatpush1.bf16.msra.mxu1 %v5935_v26  ;;  %v4131_v56 = vpop.eup %4130  ;;  %v4269_v23 = vld [vmem:[%s6519_s2 + $0xc8] ss:$16 sps:$4 sm:$0xff]   ;;  %v4270_v26 = vld [vmem:[%s6519_s2 + $0xa4] ss:$16 sps:$4 sm:$0xff]  }
 0x699   :  { %3219 = vmatprep.subr.bf16.mxu0 %v5941_v24  ;;  %3260 = vmatprep.subr.bf16.mxu1 %v5947_v41  ;;  %v4271_v24 = vld [vmem:[%s6519_s2 + $0xac] ss:$16 sps:$4 sm:$0xff]   ;;  %v4272_v41 = vld [vmem:[%s6519_s2 + $0xa0] ss:$16 sps:$4 sm:$0xff]  }
 0x69c   :  { %3220 = vmatpush1.bf16.msra.mxu0 %v5953_v36  ;;  %3261 = vmatpush1.bf16.msra.mxu1 %v6793_v55  ;;  %v4273_v36 = vld [vmem:[%s6519_s2 + $0xa8] ss:$16 sps:$4 sm:$0xff]   ;;  %v4276_v55 = vld [vmem:[%s6519_s2 + $0x80] ss:$16 sps:$4 sm:$0xff]  }
 0x69d   :  { %3221 = vmatprep.subr.bf16.mxu0 %v6794_v14  ;;  %3262 = vmatprep.subr.bf16.mxu1 %v6795_v37  ;;  %v4277_v14 = vld [vmem:[%s6519_s2 + $0x88] ss:$16 sps:$4 sm:$0xff]   ;;  %v4278_v37 = vld [vmem:[%s6519_s2 + $0x64] ss:$16 sps:$4 sm:$0xff]  }
 0x6a0   :  { %3222 = vmatpush1.bf16.msra.mxu0 %v6796_v43  ;;  %3263 = vmatpush1.bf16.msra.mxu1 %v6797_v33  ;;  %v4279_v43 = vld [vmem:[%s6519_s2 + $0x6c] ss:$16 sps:$4 sm:$0xff]   ;;  %v4280_v33 = vld [vmem:[%s6519_s2 + $0x60] ss:$16 sps:$4 sm:$0xff]  }
 0x6a1   :  { %3223 = vmatprep.subr.bf16.mxu0 %v6798_v30  ;;  %3264 = vmatprep.subr.bf16.mxu1 %v6799_v47  ;;  %v4281_v30 = vld [vmem:[%s6519_s2 + $0x68] ss:$16 sps:$4 sm:$0xff]   ;;  %v4282_v47 = vld [vmem:[%s6519_s2 + $0x44] ss:$16 sps:$4 sm:$0xff]  }
 0x6a2   :  { %v4133_v45 = vpop.eup %4132 }
 0x6a3   :  { %v3076_v34 = vmul.f32 %v4133_v45, %v4131_v56 }
 0x6a4   :  { %3224 = vmatpush1.bf16.msra.mxu0 %v6001_v39  ;;  %3265 = vmatpush1.bf16.msra.mxu1 %v6007_v29  ;;  %v4274_v29 = vld [vmem:[%s6519_s2 + $0x84] ss:$16 sps:$4 sm:$0xff]   ;;  %v4275_v39 = vld [vmem:[%s6519_s2 + $0x8c] ss:$16 sps:$4 sm:$0xff]  }
 0x6a5   :  { %3816 = vst [vmem:[%s6522_s5 + $0x28] sm:$0xff] %v3076_v34  ;;  %v3208_v49 = vpack.c.bf16 %v3076_v34, %v3076_v34  ;;  %3333 = vmatprep.subr.bf16.mxu0 %v4262_v50  ;;  %3374 = vmatprep.subr.bf16.mxu1 %v4263_v51  ;;  %v6863_v50 = vld [vmem:[#allocation69_spill] sm:$0xff] }
 0x6a7   :  { %3242 = vmatmul.mubr.bf16.vlgmr.msra.gmra.mxu0 %v3208_v49  ;;  %3283 = vmatmul.mubr.bf16.vlgmr.msra.gmra.mxu1 %v3208_v49 }
 0x6a8   :  { %3334 = vmatpush1.bf16.msra.mxu0 %v4264_v52  ;;  %3375 = vmatpush1.bf16.msra.mxu1 %v4265_v54 }
 0x6a9   :  { %3335 = vmatprep.subr.bf16.mxu0 %v4266_v58  ;;  %3376 = vmatprep.subr.bf16.mxu1 %v4267_v60 }
 0x6aa   :  { %3365 = vmatprep.mubr.bf16.mxu0 %v6649_v17  ;;  %3406 = vmatprep.mubr.bf16.mxu1 %v6649_v17 }
 0x6ac   :  { %3336 = vmatpush1.bf16.msra.mxu0 %v4268_v25  ;;  %3377 = vmatpush1.bf16.msra.mxu1 %v4269_v23  ;;  %v6864_v23 = vld [vmem:[#allocation71_spill] sm:$0xff] }
 0x6ad   :  { %3337 = vmatprep.subr.bf16.mxu0 %v4270_v26  ;;  %3378 = vmatprep.subr.bf16.mxu1 %v4271_v24 }
 0x6b0   :  { %3338 = vmatpush1.bf16.msra.mxu0 %v4272_v41  ;;  %3379 = vmatpush1.bf16.msra.mxu1 %v4273_v36 }
 0x6b1   :  { %3339 = vmatprep.subr.bf16.mxu0 %v4274_v29  ;;  %3380 = vmatprep.subr.bf16.mxu1 %v4275_v39 }
 0x6b4   :  { %3340 = vmatpush1.bf16.msra.mxu0 %v4276_v55  ;;  %3381 = vmatpush1.bf16.msra.mxu1 %v4277_v14 }
 0x6b5   :  { %3341 = vmatprep.subr.bf16.mxu0 %v4278_v37  ;;  %3382 = vmatprep.subr.bf16.mxu1 %v4279_v43 }
 0x6b8   :  { %3342 = vmatpush1.bf16.msra.mxu0 %v4280_v33  ;;  %3383 = vmatpush1.bf16.msra.mxu1 %v4281_v30  ;;  %v6865_v33 = vld [vmem:[#allocation72_spill] sm:$0xff] }
 0x6b9   :  { %3343 = vmatprep.subr.bf16.mxu0 %v4282_v47  ;;  %3384 = vmatprep.subr.bf16.mxu1 %v4283_v16  ;;  %v6866_v47 = vld [vmem:[#allocation70_spill] sm:$0xff] }
 0x6bc   :  { %3344 = vmatpush1.bf16.msra.mxu0 %v4284_v20  ;;  %3385 = vmatpush1.bf16.msra.mxu1 %v4285_v8 }
 0x6bd   :  { %3345 = vmatprep.subr.bf16.mxu0 %v4286_v6  ;;  %3386 = vmatprep.subr.bf16.mxu1 %v4287_v32 }
 0x6c0   :  { %3346 = vmatpush1.bf16.msra.mxu0 %v4288_v28  ;;  %3387 = vmatpush1.bf16.msra.mxu1 %v4289_v48 }
 0x6c1   :  { %3347 = vmatprep.subr.bf16.mxu0 %v4290_v19  ;;  %3388 = vmatprep.subr.bf16.mxu1 %v4291_v12 }
 0x6c4   :  { %3348 = vmatpush1.bf16.msra.mxu0 %v4292_v61  ;;  %3389 = vmatpush1.bf16.msra.mxu1 %v4293_v62  ;;  %v4296_v61 = vld [vmem:[%s6520_s3 + $0xe0] ss:$16 sps:$4 sm:$0xff]   ;;  %v4297_v62 = vld [vmem:[%s6520_s3 + $0xe8] ss:$16 sps:$4 sm:$0xff]  }
 0x6c5   :  { %3450 = vmatprep.subr.bf16.mxu0 %v4294_v46  ;;  %3491 = vmatprep.subr.bf16.mxu1 %v4295_v53  ;;  %v4298_v46 = vld [vmem:[%s6520_s3 + $0xc4] ss:$16 sps:$4 sm:$0xff]   ;;  %v4299_v53 = vld [vmem:[%s6520_s3 + $0xcc] ss:$16 sps:$4 sm:$0xff]  }
 0x747   :  { %v3125_v63 = vpop.f32.mrf.mxu0  ;;  %v3166_v0 = vpop.f32.mrf.mxu1 }
 0x748   :  { %v3173_v1 = vadd.f32 %v3125_v63, %v6859_v15  ;;  %v3175_v3 = vadd.f32 %v3166_v0, %v6862_v7  ;;  %v4300_v0 = vld [vmem:[%s6520_s3 + $0xc0] ss:$16 sps:$4 sm:$0xff]   ;;  %v4301_v15 = vld [vmem:[%s6520_s3 + $0xc8] ss:$16 sps:$4 sm:$0xff]   ;;  %v4310_v7 = vld [vmem:[%s6520_s3 + $0x64] ss:$16 sps:$4 sm:$0xff]  }
 0x749   :  { %v3127_v2 = vpop.f32.mrf.mxu0  ;;  %v3168_v4 = vpop.f32.mrf.mxu1 }
 0x74a   :  { %v3817_v38 = vmul.f32 -1.442695, %v3173_v1  ;;  %v3174_v18 = vadd.f32 %v3127_v2, %v6860_v42  ;;  %v3176_v21 = vadd.f32 %v3168_v4, %v6861_v40  ;;  %v4302_v2 = vld [vmem:[%s6520_s3 + $0xa4] ss:$16 sps:$4 sm:$0xff]  }
 0x74b   :  { %v3129_v35 = vpop.f32.mrf.mxu0  ;;  %v3170_v13 = vpop.f32.mrf.mxu1 }
 0x74c   :  { %4134 = vpow2.f32 %v3817_v38  ;;  %v3818_v5 = vmul.f32 -1.442695, %v3174_v18  ;;  %v3819_v59 = vmul.f32 -1.442695, %v3176_v21  ;;  %v4304_v35 = vld [vmem:[%s6520_s3 + $0xa0] ss:$16 sps:$4 sm:$0xff]  }
 0x74d   :  { %v3130_v9 = vpop.f32.mrf.mxu0  ;;  %v3171_v57 = vpop.f32.mrf.mxu1  ;;  %v4305_v13 = vld [vmem:[%s6520_s3 + $0xa8] ss:$16 sps:$4 sm:$0xff]   ;;  %v4308_v21 = vld [vmem:[%s6520_s3 + $0x80] ss:$16 sps:$4 sm:$0xff]  }
 0x74e   :  { %4136 = vpow2.f32 %v3818_v5  ;;  %v4306_v9 = vld [vmem:[%s6520_s3 + $0x84] ss:$16 sps:$4 sm:$0xff]   ;;  %v4307_v57 = vld [vmem:[%s6520_s3 + $0x8c] ss:$16 sps:$4 sm:$0xff]  }
 0x74f   :  { %4138 = vtanh.f32 %v3175_v3  ;;  %v4311_v3 = vld [vmem:[%s6520_s3 + $0x6c] ss:$16 sps:$4 sm:$0xff]  }
 0x750   :  { %4140 = vpow2.f32 %v3819_v59  ;;  %v4312_v59 = vld [vmem:[%s6520_s3 + $0x60] ss:$16 sps:$4 sm:$0xff]  }
 0x759   :  { %v4135_v31 = vpop.eup %4134 }
 0x75a   :  { %v3180_v22 = vadd.f32 1.0, %v4135_v31  ;;  %v4313_v31 = vld [vmem:[%s6520_s3 + $0x68] ss:$16 sps:$4 sm:$0xff]  }
 0x75b   :  { %v4137_v10 = vpop.eup %4136 }
 0x75c   :  { %4142 = vrcp.f32 %v3180_v22  ;;  %v3186_v27 = vadd.f32 1.0, %v4137_v10  ;;  %v4139_v56 = vpop.eup %4138  ;;  %v4314_v22 = vld [vmem:[%s6520_s3 + $0x44] ss:$16 sps:$4 sm:$0xff]   ;;  %v4315_v10 = vld [vmem:[%s6520_s3 + $0x4c] ss:$16 sps:$4 sm:$0xff]  }
 0x75d   :  { %v4141_v49 = vpop.eup %4140 }
 0x75e   :  { %4144 = vrcp.f32 %v3186_v27  ;;  %v3193_v41 = vadd.f32 1.0, %v4141_v49  ;;  %v4316_v27 = vld [vmem:[%s6520_s3 + $0x40] ss:$16 sps:$4 sm:$0xff]  }
 0x75f   :  { %v4320_v49 = vld [vmem:[%s6520_s3 + $0x20] ss:$16 sps:$4 sm:$0xff]  }
 0x767   :  { %v3243_v45 = vpop.f32.mrf.mxu0  ;;  %v3284_v34 = vpop.f32.mrf.mxu1 }
 0x768   :  { %v3291_v51 = vadd.f32 %v3243_v45, %v6863_v50  ;;  %v3293_v16 = vadd.f32 %v3284_v34, %v6866_v47  ;;  %v4318_v45 = vld [vmem:[%s6520_s3 + $0x24] ss:$16 sps:$4 sm:$0xff]   ;;  %v4319_v34 = vld [vmem:[%s6520_s3 + $0x2c] ss:$16 sps:$4 sm:$0xff]   ;;  %v4321_v50 = vld [vmem:[%s6520_s3 + $0x28] ss:$16 sps:$4 sm:$0xff]  }
 0x769   :  { %v4143_v52 = vpop.eup %4142  ;;  %v3245_v54 = vpop.f32.mrf.mxu0 }
 0x76a   :  { %v3286_v58 = vpop.f32.mrf.mxu1  ;;  %v3197_v60 = vmul.f32 %v4143_v52, %v4139_v56  ;;  %v3820_v25 = vmul.f32 -1.442695, %v3291_v51  ;;  %v3292_v26 = vadd.f32 %v3245_v54, %v6864_v23  ;;  %v4317_v56 = vld [vmem:[%s6520_s3 + $0x48] ss:$16 sps:$4 sm:$0xff]   ;;  %v4322_v52 = vld [vmem:[%s6520_s3 + $0x4] ss:$16 sps:$4 sm:$0xff]  }
 0x76b   :  { %v4145_v24 = vpop.eup %4144  ;;  %v3247_v36 = vpop.f32.mrf.mxu0  ;;  %v3294_v30 = vadd.f32 %v3286_v58, %v6865_v33  ;;  %v4323_v54 = vld [vmem:[%s6520_s3 + $0xc] ss:$16 sps:$4 sm:$0xff]   ;;  %v4325_v23 = vld [vmem:[%s6520_s3 + $0x8] ss:$16 sps:$4 sm:$0xff]  }
 0x76c   :  { %v3288_v29 = vpop.f32.mrf.mxu1  ;;  %v3196_v39 = vmul.f32 %v4145_v24, %v6236_v11  ;;  %4146 = vpow2.f32 %v3820_v25  ;;  %v3821_v55 = vmul.f32 -1.442695, %v3292_v26  ;;  %v4324_v25 = vld [vmem:[%s6520_s3] ss:$16 sps:$4 sm:$0xff]   ;;  %v6867_v36 = vld [vmem:[#allocation61_spill] sm:$0xff] }
 0x76d   :  { %v3248_v14 = vpop.f32.mrf.mxu0  ;;  %v3822_v20 = vmul.f32 -1.442695, %v3294_v30 }
 0x76e   :  { %v3289_v37 = vpop.f32.mrf.mxu1  ;;  %v6394_v43 = vadd.f32 %v3197_v60, %v3196_v39  ;;  %4148 = vpow2.f32 %v3821_v55 }
 0x76f   :  { %4150 = vrcp.f32 %v3193_v41  ;;  %v6868_v37 = vld [vmem:[#allocation63_spill] sm:$0xff] }
 0x770   :  { %4152 = vtanh.f32 %v6394_v43 }
 0x771   :  { %4154 = vtanh.f32 %v3293_v16 }
 0x772   :  { %4156 = vpow2.f32 %v3822_v20 }
 0x779   :  { %v4147_v8 = vpop.eup %4146 }
 0x77a   :  { %v3298_v6 = vadd.f32 1.0, %v4147_v8 }
 0x77b   :  { %v4149_v32 = vpop.eup %4148 }
 0x77c   :  { %v4151_v11 = vpop.eup %4150  ;;  %4158 = vrcp.f32 %v3298_v6  ;;  %v3304_v28 = vadd.f32 1.0, %v4149_v32  ;;  %v6869_v6 = vld [vmem:[#allocation64_spill] sm:$0xff] }
 0x77d   :  { %v4153_v48 = vpop.eup %4152 }
 0x77e   :  { %4160 = vrcp.f32 %v3304_v28  ;;  %v3200_v19 = vmul.f32 %v4153_v48, %v4151_v11  ;;  %v4155_v63 = vpop.eup %4154  ;;  %v6870_v11 = vld [vmem:[#allocation62_spill] sm:$0xff] }
 0x77f   :  { %v4157_v1 = vpop.eup %4156 }
 0x780   :  { %3823 = vst [vmem:[%s6522_s5 + $0x60] sm:$0xff] %v3200_v19  ;;  %v3332_v12 = vpack.c.bf16 %v3200_v19, %v3200_v19  ;;  %v3311_v18 = vadd.f32 1.0, %v4157_v1 }
 0x782   :  { %3366 = vmatmul.mubr.bf16.vlgmr.msra.gmra.mxu0 %v3332_v12  ;;  %3407 = vmatmul.mubr.bf16.vlgmr.msra.gmra.mxu1 %v3332_v12  ;;  %4162 = vrcp.f32 %v3311_v18  ;;  %v6872_v18 = vld [vmem:[#allocation67_spill] sm:$0xff] }
 0x783   :  { %3451 = vmatpush1.bf16.msra.mxu0 %v4296_v61  ;;  %3492 = vmatpush1.bf16.msra.mxu1 %v4297_v62 }
 0x784   :  { %3452 = vmatprep.subr.bf16.mxu0 %v4298_v46  ;;  %3493 = vmatprep.subr.bf16.mxu1 %v4299_v53 }
 0x785   :  { %3482 = vmatprep.mubr.bf16.mxu0 %v6649_v17  ;;  %3523 = vmatprep.mubr.bf16.mxu1 %v6649_v17  ;;  %v4303_v17 = vld [vmem:[%s6520_s3 + $0xac] ss:$16 sps:$4 sm:$0xff]  }
 0x787   :  { %3453 = vmatpush1.bf16.msra.mxu0 %v4300_v0  ;;  %3494 = vmatpush1.bf16.msra.mxu1 %v4301_v15  ;;  %v6871_v15 = vld [vmem:[#allocation65_spill] sm:$0xff] }
 0x788   :  { %3454 = vmatprep.subr.bf16.mxu0 %v4302_v2  ;;  %3495 = vmatprep.subr.bf16.mxu1 %v4303_v17 }
 0x789   :  { %v4159_v4 = vpop.eup %4158 }
 0x78a   :  { %v3315_v38 = vmul.f32 %v4159_v4, %v4155_v63 }
 0x78b   :  { %v4161_v42 = vpop.eup %4160  ;;  %3455 = vmatpush1.bf16.msra.mxu0 %v4304_v35  ;;  %3496 = vmatpush1.bf16.msra.mxu1 %v4305_v13 }
 0x78c   :  { %v3314_v5 = vmul.f32 %v4161_v42, %v6259_v44  ;;  %3456 = vmatprep.subr.bf16.mxu0 %v4306_v9  ;;  %3497 = vmatprep.subr.bf16.mxu1 %v4307_v57  ;;  %v4309_v44 = vld [vmem:[%s6520_s3 + $0x88] ss:$16 sps:$4 sm:$0xff]  }
 0x78e   :  { %v6441_v40 = vadd.f32 %v3315_v38, %v3314_v5 }
 0x78f   :  { %3457 = vmatpush1.bf16.msra.mxu0 %v4308_v21  ;;  %3498 = vmatpush1.bf16.msra.mxu1 %v4309_v44  ;;  %v4163_v51 = vpop.eup %4162 }
 0x790   :  { %3458 = vmatprep.subr.bf16.mxu0 %v4310_v7  ;;  %3499 = vmatprep.subr.bf16.mxu1 %v4311_v3  ;;  %4164 = vtanh.f32 %v6441_v40 }
 0x793   :  { %3459 = vmatpush1.bf16.msra.mxu0 %v4312_v59  ;;  %3500 = vmatpush1.bf16.msra.mxu1 %v4313_v31  ;;  %v6873_v31 = vld [vmem:[#allocation68_spill] sm:$0xff] }
 0x794   :  { %3460 = vmatprep.subr.bf16.mxu0 %v4314_v22  ;;  %3501 = vmatprep.subr.bf16.mxu1 %v4315_v10  ;;  %v6874_v10 = vld [vmem:[#allocation66_spill] sm:$0xff] }
 0x797   :  { %3461 = vmatpush1.bf16.msra.mxu0 %v4316_v27  ;;  %3502 = vmatpush1.bf16.msra.mxu1 %v4317_v56 }
 0x798   :  { %3462 = vmatprep.subr.bf16.mxu0 %v4318_v45  ;;  %3503 = vmatprep.subr.bf16.mxu1 %v4319_v34 }
 0x79b   :  { %3463 = vmatpush1.bf16.msra.mxu0 %v4320_v49  ;;  %3504 = vmatpush1.bf16.msra.mxu1 %v4321_v50 }
 0x79c   :  { %3464 = vmatprep.subr.bf16.mxu0 %v4322_v52  ;;  %3505 = vmatprep.subr.bf16.mxu1 %v4323_v54 }
 0x79d   :  { %v4165_v58 = vpop.eup %4164 }
 0x79e   :  { %v3318_v60 = vmul.f32 %v4165_v58, %v4163_v51 }
 0x79f   :  { %3465 = vmatpush1.bf16.msra.mxu0 %v4324_v25  ;;  %3506 = vmatpush1.bf16.msra.mxu1 %v4325_v23 }
 0x7a0   :  { %3824 = vst [vmem:[%s6522_s5 + $0x18] sm:$0xff] %v3318_v60  ;;  %v3449_v26 = vpack.c.bf16 %v3318_v60, %v3318_v60 }
 0x7a2   :  { %3483 = vmatmul.mubr.bf16.vlgmr.msra.gmra.mxu0 %v3449_v26  ;;  %3524 = vmatmul.mubr.bf16.vlgmr.msra.gmra.mxu1 %v3449_v26 }
 0x842   :  { %v3367_v24 = vpop.f32.mrf.mxu0  ;;  %v3408_v41 = vpop.f32.mrf.mxu1 }
 0x843   :  { %v3415_v29 = vadd.f32 %v3367_v24, %v6867_v36  ;;  %v3417_v28 = vadd.f32 %v3408_v41, %v6870_v11 }
 0x844   :  { %v3369_v39 = vpop.f32.mrf.mxu0  ;;  %v3410_v55 = vpop.f32.mrf.mxu1 }
 0x845   :  { %v3825_v14 = vmul.f32 -1.442695, %v3415_v29  ;;  %v3416_v33 = vadd.f32 %v3369_v39, %v6868_v37  ;;  %v3418_v32 = vadd.f32 %v3410_v55, %v6869_v6 }
 0x846   :  { %v3371_v30 = vpop.f32.mrf.mxu0  ;;  %v3412_v47 = vpop.f32.mrf.mxu1 }
 0x847   :  { %4166 = vpow2.f32 %v3825_v14  ;;  %v3826_v16 = vmul.f32 -1.442695, %v3416_v33  ;;  %v3827_v48 = vmul.f32 -1.442695, %v3418_v32 }
 0x848   :  { %v3372_v20 = vpop.f32.mrf.mxu0  ;;  %v3413_v8 = vpop.f32.mrf.mxu1 }
 0x849   :  { %4168 = vpow2.f32 %v3826_v16 }
 0x84a   :  { %4170 = vtanh.f32 %v3417_v28 }
 0x84b   :  { %4172 = vpow2.f32 %v3827_v48 }
 0x854   :  { %v4167_v19 = vpop.eup %4166 }
 0x855   :  { %v3422_v12 = vadd.f32 1.0, %v4167_v19 }
 0x856   :  { %v4169_v61 = vpop.eup %4168 }
 0x857   :  { %4174 = vrcp.f32 %v3422_v12  ;;  %v3428_v62 = vadd.f32 1.0, %v4169_v61  ;;  %v4171_v46 = vpop.eup %4170 }
 0x858   :  { %v4173_v0 = vpop.eup %4172 }
 0x859   :  { %4176 = vrcp.f32 %v3428_v62  ;;  %v3435_v5 = vadd.f32 1.0, %v4173_v0 }
 0x862   :  { %v3484_v53 = vpop.f32.mrf.mxu0  ;;  %v3525_v63 = vpop.f32.mrf.mxu1 }
 0x863   :  { %v3532_v1 = vadd.f32 %v3484_v53, %v6871_v15  ;;  %v3534_v27 = vadd.f32 %v3525_v63, %v6874_v10 }
 0x864   :  { %v4175_v2 = vpop.eup %4174  ;;  %v3486_v17 = vpop.f32.mrf.mxu0 }
 0x865   :  { %v3527_v4 = vpop.f32.mrf.mxu1  ;;  %v3439_v38 = vmul.f32 %v4175_v2, %v4171_v46  ;;  %v3828_v42 = vmul.f32 -1.442695, %v3532_v1  ;;  %v3533_v35 = vadd.f32 %v3486_v17, %v6872_v18 }
 0x866   :  { %v4177_v13 = vpop.eup %4176  ;;  %v3488_v9 = vpop.f32.mrf.mxu0  ;;  %v3535_v22 = vadd.f32 %v3527_v4, %v6873_v31 }
 0x867   :  { %v3529_v57 = vpop.f32.mrf.mxu1  ;;  %v3438_v21 = vmul.f32 %v4177_v13, %v6394_v43  ;;  %4178 = vpow2.f32 %v3828_v42  ;;  %v3829_v44 = vmul.f32 -1.442695, %v3533_v35 }
 0x868   :  { %v3489_v7 = vpop.f32.mrf.mxu0  ;;  %v3830_v56 = vmul.f32 -1.442695, %v3535_v22 }
 0x869   :  { %v3530_v3 = vpop.f32.mrf.mxu1  ;;  %v3440_v59 = vadd.f32 %v3439_v38, %v3438_v21  ;;  %4180 = vpow2.f32 %v3829_v44 }
 0x86a   :  { %4182 = vrcp.f32 %v3435_v5 }
 0x86b   :  { %4184 = vtanh.f32 %v3440_v59 }
 0x86c   :  { %4186 = vtanh.f32 %v3534_v27 }
 0x86d   :  { %4188 = vpow2.f32 %v3830_v56 }
 0x874   :  { %v4179_v45 = vpop.eup %4178 }
 0x875   :  { %v3539_v34 = vadd.f32 1.0, %v4179_v45 }
 0x876   :  { %v4181_v49 = vpop.eup %4180 }
 0x877   :  { %v4183_v50 = vpop.eup %4182  ;;  %4190 = vrcp.f32 %v3539_v34  ;;  %v3545_v43 = vadd.f32 1.0, %v4181_v49 }
 0x878   :  { %v4185_v51 = vpop.eup %4184 }
 0x879   :  { %v3442_v52 = vmul.f32 %v4185_v51, %v4183_v50  ;;  %4192 = vrcp.f32 %v3545_v43  ;;  %v4187_v54 = vpop.eup %4186 }
 0x87a   :  { %v4189_v58 = vpop.eup %4188 }
 0x87b   :  { %3831 = vst [vmem:[%s6522_s5 + $0x70] sm:$0xff] %v3442_v52  ;;  %v3552_v26 = vadd.f32 1.0, %v4189_v58 }
 0x87d   :  { %4194 = vrcp.f32 %v3552_v26 }
 0x884   :  { %v4191_v60 = vpop.eup %4190 }
 0x885   :  { %v3556_v25 = vmul.f32 %v4191_v60, %v4187_v54 }
 0x886   :  { %v4193_v23 = vpop.eup %4192 }
 0x887   :  { %v3555_v24 = vmul.f32 %v4193_v23, %v6441_v40 }
 0x889   :  { %v3557_v41 = vadd.f32 %v3556_v25, %v3555_v24 }
 0x88a   :  { %v4195_v36 = vpop.eup %4194 }
 0x88b   :  { %4196 = vtanh.f32 %v3557_v41 }
 0x898   :  { %v4197_v29 = vpop.eup %4196 }
 0x899   :  { %v3559_v39 = vmul.f32 %v4197_v29, %v4195_v36 }
 0x89b   :  { %3565 = vst [vmem:[%s6522_s5 + $0x8] sm:$0xff] %v3559_v39 }

</bundles_post_ra>
